<compile_context>
chip_gen: v7x
topology: tpu7x:2x2x1
jax: 0.10.0
libtpu: 0.0.40
codegen_flags: <defaults>
</compile_context>

<pallas_src>
import jax
import jax.numpy as jnp
import numpy as np
from jax.experimental import pallas as pl
from jax.experimental.pallas import tpu as pltpu


# ------------------------------ fused kernel ------------------------------- #

def _fused_embedder_kernel(x_ref, wm1_ref, b1_ref, wm2_ref, b2_ref,
                           wm3_ref, b3_ref, wm4_ref, b4_ref, out_ref):
    """Full LocalPixelStateEmbedder forward for one batch tile, VMEM-resident."""
    bt = x_ref.shape[0]
    f32 = jnp.float32
    bf16 = jnp.bfloat16

    # x: (bt, H=20, Wblk=21, 16) bf16, lane index = wphase*4 + c_in  (W = Wblk*4 + wphase).
    x = x_ref[...]

    # ---------- conv1: 4->32, k=8, s=4  (Ho=4, Wo=20), in-kernel im2col ----------
    # Width im2col: stride==4 matches the wphase packing, so the 8-wide window of
    # output column wo is exactly the 32 lanes of blocks (wo, wo+1): lane = kw*4+c.
    xw = jnp.concatenate([x[:, :, 0:20, :], x[:, :, 1:21, :]], axis=-1)     # (bt,20,20,32)
    # Height im2col: taps kh pull input rows 4*ho + kh into the lane dim (kh,kw,c order).
    row_blocks = []
    for ho in range(4):
        row_blocks.append(
            jnp.concatenate([xw[:, 4 * ho + kh] for kh in range(8)], axis=-1))  # (bt,20,256)
    cols1 = jnp.concatenate(row_blocks, axis=1)              # (bt, 80, 256), row = ho*20 + wo
    m1 = cols1.reshape(bt * 80, 256)
    h1 = jnp.maximum(
        jnp.dot(m1, wm1_ref[...], preferred_element_type=f32) + b1_ref[...], 0.0)
    h1 = h1.astype(bf16).reshape(bt, 4, 20, 32)              # NHWC

    # ------ ReflectionPad2d((1,1,0,0)) + conv2: 32->64, k=4, s=2 (Ho=1, Wo=10) ------
    h1p = jnp.concatenate([h1[:, :, 1:2, :], h1, h1[:, :, 18:19, :]], axis=2)   # (bt,4,22,32)
    wo_rows = []
    for wo in range(10):
        taps = [h1p[:, kh, 2 * wo + kw, :]                    # (bt, 32) each, (kh, kw, c) order
                for kh in range(4) for kw in range(4)]
        wo_rows.append(jnp.concatenate(taps, axis=-1)[:, None, :])              # (bt, 1, 512)
    cols2 = jnp.concatenate(wo_rows, axis=1)                  # (bt, 10, 512)
    m2 = cols2.reshape(bt * 10, 512)
    h2 = jnp.maximum(
        jnp.dot(m2, wm2_ref[...], preferred_element_type=f32) + b2_ref[...], 0.0)
    h2 = h2.astype(bf16).reshape(bt, 10, 64)                  # (b, wo, c); H == 1

    # ---------- conv3: 64->64, k=3, s=1, pad=(1,1)  (Ho=1, Wo=10) ----------
    # H == 1, so the kh=0 and kh=2 taps only ever see zero padding; wm3 holds just
    # the kh=1 weight slice (192, 64) — exact, not an approximation.
    z = jnp.zeros((bt, 1, 64), bf16)
    h2w = jnp.concatenate([z, h2, z], axis=1)                 # (bt, 12, 64), W zero-padded
    cols3 = jnp.concatenate(
        [h2w[:, 0:10], h2w[:, 1:11], h2w[:, 2:12]], axis=-1)  # (bt, 10, 192), (kw, c) order
    m3 = cols3.reshape(bt * 10, 192)
    h3 = jnp.maximum(
        jnp.dot(m3, wm3_ref[...], preferred_element_type=f32) + b3_ref[...], 0.0)
    h3 = h3.astype(bf16).reshape(bt, 10, 64)

    # ---------- flatten (NHWC order w*64+c, matched by column-permuted wm4) + FC ----------
    m4 = jnp.concatenate([h3[:, w, :] for w in range(10)], axis=-1)     # (bt, 640)
    out = jnp.dot(m4, wm4_ref[...], preferred_element_type=f32) + b4_ref[...]
    out_ref[...] = jnp.maximum(out, 0.0)                      # (bt, 512) f32, lane-dense


# ------------------------------- forward ----------------------------------- #

def local_pixel_state_embedder(strips, params, batch_tile=8):
    """strips: (B, 4, 20, 84) raw pixels in [0,255] -> (B, 512) f32 embedding."""
    B = strips.shape[0]
    # NCHW -> NHWC, bf16, then merge (W=84, C=4) -> (Wblk=21, 16): a free reinterpretation
    # that makes the in-kernel width-im2col a pure slice + lane-concat.
    x = jnp.transpose(strips, (0, 2, 3, 1)).astype(jnp.bfloat16).reshape(B, 20, 21, 16)

    bt = max(1, min(batch_tile, B))
    b_pad = -(-B // bt) * bt
    if b_pad != B:
        # Padded samples compute ReLU(bias) garbage and are sliced off below.
        x = jnp.pad(x, ((0, b_pad - B), (0, 0), (0, 0), (0, 0)))

    out = pl.pallas_call(
        _fused_embedder_kernel,
        out_shape=jax.ShapeDtypeStruct((b_pad, 512), jnp.float32),
        grid=(b_pad // bt,),
        in_specs=[
            pl.BlockSpec((bt, 20, 21, 16), lambda i: (i, 0, 0, 0)),
            pl.BlockSpec((256, 32), lambda i: (0, 0)),    # wm1 (VMEM-resident)
            pl.BlockSpec((1, 32), lambda i: (0, 0)),      # b1
            pl.BlockSpec((512, 64), lambda i: (0, 0)),    # wm2
            pl.BlockSpec((1, 64), lambda i: (0, 0)),      # b2
            pl.BlockSpec((192, 64), lambda i: (0, 0)),    # wm3 (kh=1 slice)
            pl.BlockSpec((1, 64), lambda i: (0, 0)),      # b3
            pl.BlockSpec((640, 512), lambda i: (0, 0)),   # wm4
            pl.BlockSpec((1, 512), lambda i: (0, 0)),     # b4
        ],
        out_specs=pl.BlockSpec((bt, 512), lambda i: (i, 0)),
        compiler_params=pltpu.CompilerParams(
            dimension_semantics=("parallel",),
        ),
    )(x, params["wm1"], params["b1"], params["wm2"], params["b2"],
      params["wm3"], params["b3"], params["wm4"], params["b4"])
    return out[:B] if b_pad != B else out


def crop_strips(frames, pixel_y):
    """frames: (B, 4, 84, 84), pixel_y: (B,) raw y in [0,210) -> (B, 4, 20, 84).

    Mirrors: y = int(pixel_y * 84/210); strip = pixel_state[:, y-10:y+10, :].
    (dynamic_slice clamps at borders; callers keep y in [10, 74] as the env does.)
    """
    # TODO(synk): AS.AbstractState / GPUVariable extraction of pixel_y from the raw
    # game-state object has no JAX equivalent; pixel_y is taken as an explicit input.
    # TODO(synk): the per-sample crop could be folded into the kernel via scalar
    # prefetch + manual DMA; kept as a single wrapper-side dynamic_slice for now.
    y = (pixel_y * (84.0 / 210.0)).astype(jnp.int32)
    return jax.vmap(
        lambda f, yy: jax.lax.dynamic_slice_in_dim(f, yy - 10, 20, axis=1)
    )(frames, y)


# --------------------------- parameter packing ----------------------------- #

def prepare_params(p):
    """One-time: PyTorch OIHW / (out,in) weights -> bf16 matmul layouts."""
    def conv_w(w):   # (C_out, C_in, kH, kW) -> (kH*kW*C_in, C_out), row = kh*kW*Cin + kw*Cin + c
        c_out, c_in, kh, kw = w.shape
        return jnp.transpose(w, (2, 3, 1, 0)).reshape(kh * kw * c_in, c_out)

    # Fold the /255 pixel normalization into the conv1 weights.
    wm1 = (conv_w(p["w1"]) / 255.0).astype(jnp.bfloat16)                 # (256, 32)
    wm2 = conv_w(p["w2"]).astype(jnp.bfloat16)                           # (512, 64)
    # conv3 input has H==1, so only the kh=1 taps ever touch real data.
    wm3 = conv_w(p["w3"])[192:384].astype(jnp.bfloat16)                  # (192, 64)
    # Torch flattens NCHW (B,64,1,10) -> col = c*10+w; the kernel flattens NHWC -> w*64+c.
    w4 = p["w4"].reshape(512, 64, 10).transpose(0, 2, 1).reshape(512, 640)
    wm4 = jnp.asarray(w4).T.astype(jnp.bfloat16)                         # (640, 512)
    return {
        "wm1": wm1, "b1": p["b1"].reshape(1, -1).astype(jnp.float32),
        "wm2": wm2, "b2": p["b2"].reshape(1, -1).astype(jnp.float32),
        "wm3": wm3, "b3": p["b3"].reshape(1, -1).astype(jnp.float32),
        "wm4": wm4, "b4": p["b4"].reshape(1, -1).astype(jnp.float32),
    }


# --------------------------- pure-JAX reference ----------------------------- #

def reference(strips, p):
    x = strips.astype(jnp.float32) / 255.0
    dn = ("NCHW", "OIHW", "NCHW")
    hp = jax.lax.Precision.HIGHEST
    h = jax.nn.relu(jax.lax.conv_general_dilated(
        x, p["w1"], (4, 4), [(0, 0), (0, 0)], dimension_numbers=dn,
        precision=hp) + p["b1"][None, :, None, None])
    h = jnp.pad(h, ((0, 0), (0, 0), (0, 0), (1, 1)), mode="reflect")
    h = jax.nn.relu(jax.lax.conv_general_dilated(
        h, p["w2"], (2, 2), [(0, 0), (0, 0)], dimension_numbers=dn,
        precision=hp) + p["b2"][None, :, None, None])
    h = jax.nn.relu(jax.lax.conv_general_dilated(
        h, p["w3"], (1, 1), [(1, 1), (1, 1)], dimension_numbers=dn,
        precision=hp) + p["b3"][None, :, None, None])
    h = h.reshape(h.shape[0], 10 * 64)                 # NCHW flatten (c,w)
    return jax.nn.relu(jnp.dot(h, p["w4"].T, precision=hp) + p["b4"])


# --------------------------------- main ------------------------------------ #

if __name__ == "__main__":
    key = jax.random.PRNGKey(0)
    keys = jax.random.split(key, 10)

    def uinit(k, shape, fan_in):
        s = 1.0 / np.sqrt(fan_in)
        return jax.random.uniform(k, shape, jnp.float32, -s, s)

    torch_params = {
        "w1": uinit(keys[0], (32, 4, 8, 8), 4 * 8 * 8),
        "b1": uinit(keys[1], (32,), 4 * 8 * 8),
        "w2": uinit(keys[2], (64, 32, 4, 4), 32 * 4 * 4),
        "b2": uinit(keys[3], (64,), 32 * 4 * 4),
        "w3": uinit(keys[4], (64, 64, 3, 3), 64 * 3 * 3),
        "b3": uinit(keys[5], (64,), 64 * 3 * 3),
        "w4": uinit(keys[6], (512, 10 * 64), 10 * 64),
        "b4": uinit(keys[7], (512,), 10 * 64),
    }
    params = prepare_params(torch_params)   # one-time: bf16, pre-transposed, /255 folded

    B = 2
    frames = jax.random.randint(keys[8], (B, 4, 84, 84), 0, 256).astype(jnp.float32)
    pixel_y = jax.random.uniform(keys[9], (B,), jnp.float32, 30.0, 180.0)

    strips = crop_strips(frames, pixel_y)                      # (B, 4, 20, 84)
    fwd = jax.jit(local_pixel_state_embedder)
    out = jax.block_until_ready(fwd(strips, params))
    ref = jax.block_until_ready(reference(strips, torch_params))

    assert out.shape == (B, 512), out.shape
    # bf16 weight/activation storage vs the f32 reference => loose tolerance.
    np.testing.assert_allclose(np.asarray(out), np.asarray(ref), rtol=3e-2, atol=3e-2)
    print("KERNEL_OK")
</pallas_src>

<mosaic_0001>
module attributes {stable_mosaic.version = 11 : i64} {
  func.func @_fused_embedder_kernel(%arg0: i32, %arg1: memref<2x20x21x16xbf16, #tpu.memory_space<vmem>>, %arg2: memref<256x32xbf16, #tpu.memory_space<vmem>>, %arg3: memref<1x32xf32, #tpu.memory_space<vmem>>, %arg4: memref<512x64xbf16, #tpu.memory_space<vmem>>, %arg5: memref<1x64xf32, #tpu.memory_space<vmem>>, %arg6: memref<192x64xbf16, #tpu.memory_space<vmem>>, %arg7: memref<1x64xf32, #tpu.memory_space<vmem>>, %arg8: memref<640x512xbf16, #tpu.memory_space<vmem>>, %arg9: memref<1x512xf32, #tpu.memory_space<vmem>>, %arg10: memref<2x512xf32, #tpu.memory_space<vmem>>) attributes {dimension_semantics = [#tpu.dimension_semantics<parallel>], iteration_bounds = array<i64: 1>, scalar_prefetch = 0 : i64, scratch_operands = 0 : i64, tpu.core_type = #tpu.core_type<tc>, window_params = [{transform_indices = @transform_0, window_bounds = array<i64: 2, 20, 21, 16>}, {pipeline_mode = #tpu.pipeline_mode<synchronous>, transform_indices = @transform_1, window_bounds = array<i64: 256, 32>}, {pipeline_mode = #tpu.pipeline_mode<synchronous>, transform_indices = @transform_2, window_bounds = array<i64: 1, 32>}, {pipeline_mode = #tpu.pipeline_mode<synchronous>, transform_indices = @transform_3, window_bounds = array<i64: 512, 64>}, {pipeline_mode = #tpu.pipeline_mode<synchronous>, transform_indices = @transform_4, window_bounds = array<i64: 1, 64>}, {pipeline_mode = #tpu.pipeline_mode<synchronous>, transform_indices = @transform_5, window_bounds = array<i64: 192, 64>}, {pipeline_mode = #tpu.pipeline_mode<synchronous>, transform_indices = @transform_6, window_bounds = array<i64: 1, 64>}, {pipeline_mode = #tpu.pipeline_mode<synchronous>, transform_indices = @transform_7, window_bounds = array<i64: 640, 512>}, {pipeline_mode = #tpu.pipeline_mode<synchronous>, transform_indices = @transform_8, window_bounds = array<i64: 1, 512>}, {transform_indices = @transform_9, window_bounds = array<i64: 2, 512>}]} {
    %c0 = arith.constant 0 : index
    %c0_0 = arith.constant 0 : index
    %c0_1 = arith.constant 0 : index
    %c0_2 = arith.constant 0 : index
    %0 = vector.load %arg1[%c0, %c0_0, %c0_1, %c0_2] : memref<2x20x21x16xbf16, #tpu.memory_space<vmem>>, vector<2x20x21x16xbf16>
    %1 = vector.extract_strided_slice %0 {offsets = [0, 0, 0, 0], sizes = [2, 20, 20, 16], strides = [1, 1, 1, 1]} : vector<2x20x21x16xbf16> to vector<2x20x20x16xbf16>
    %2 = vector.extract_strided_slice %0 {offsets = [0, 0, 1, 0], sizes = [2, 20, 20, 16], strides = [1, 1, 1, 1]} : vector<2x20x21x16xbf16> to vector<2x20x20x16xbf16>
    %3 = tpu.concatenate %1, %2 in 3 : vector<2x20x20x16xbf16>, vector<2x20x20x16xbf16> -> vector<2x20x20x32xbf16>
    %4 = vector.extract_strided_slice %3 {offsets = [0, 0, 0, 0], sizes = [2, 1, 20, 32], strides = [1, 1, 1, 1]} : vector<2x20x20x32xbf16> to vector<2x1x20x32xbf16>
    %5 = vector.shape_cast %4 : vector<2x1x20x32xbf16> to vector<2x20x32xbf16>
    %6 = vector.extract_strided_slice %3 {offsets = [0, 1, 0, 0], sizes = [2, 1, 20, 32], strides = [1, 1, 1, 1]} : vector<2x20x20x32xbf16> to vector<2x1x20x32xbf16>
    %7 = vector.shape_cast %6 : vector<2x1x20x32xbf16> to vector<2x20x32xbf16>
    %8 = vector.extract_strided_slice %3 {offsets = [0, 2, 0, 0], sizes = [2, 1, 20, 32], strides = [1, 1, 1, 1]} : vector<2x20x20x32xbf16> to vector<2x1x20x32xbf16>
    %9 = vector.shape_cast %8 : vector<2x1x20x32xbf16> to vector<2x20x32xbf16>
    %10 = vector.extract_strided_slice %3 {offsets = [0, 3, 0, 0], sizes = [2, 1, 20, 32], strides = [1, 1, 1, 1]} : vector<2x20x20x32xbf16> to vector<2x1x20x32xbf16>
    %11 = vector.shape_cast %10 : vector<2x1x20x32xbf16> to vector<2x20x32xbf16>
    %12 = vector.extract_strided_slice %3 {offsets = [0, 4, 0, 0], sizes = [2, 1, 20, 32], strides = [1, 1, 1, 1]} : vector<2x20x20x32xbf16> to vector<2x1x20x32xbf16>
    %13 = vector.shape_cast %12 : vector<2x1x20x32xbf16> to vector<2x20x32xbf16>
    %14 = vector.extract_strided_slice %3 {offsets = [0, 5, 0, 0], sizes = [2, 1, 20, 32], strides = [1, 1, 1, 1]} : vector<2x20x20x32xbf16> to vector<2x1x20x32xbf16>
    %15 = vector.shape_cast %14 : vector<2x1x20x32xbf16> to vector<2x20x32xbf16>
    %16 = vector.extract_strided_slice %3 {offsets = [0, 6, 0, 0], sizes = [2, 1, 20, 32], strides = [1, 1, 1, 1]} : vector<2x20x20x32xbf16> to vector<2x1x20x32xbf16>
    %17 = vector.shape_cast %16 : vector<2x1x20x32xbf16> to vector<2x20x32xbf16>
    %18 = vector.extract_strided_slice %3 {offsets = [0, 7, 0, 0], sizes = [2, 1, 20, 32], strides = [1, 1, 1, 1]} : vector<2x20x20x32xbf16> to vector<2x1x20x32xbf16>
    %19 = vector.shape_cast %18 : vector<2x1x20x32xbf16> to vector<2x20x32xbf16>
    %20 = tpu.concatenate %5, %7, %9, %11, %13, %15, %17, %19 in 2 : vector<2x20x32xbf16>, vector<2x20x32xbf16>, vector<2x20x32xbf16>, vector<2x20x32xbf16>, vector<2x20x32xbf16>, vector<2x20x32xbf16>, vector<2x20x32xbf16>, vector<2x20x32xbf16> -> vector<2x20x256xbf16>
    %21 = vector.extract_strided_slice %3 {offsets = [0, 4, 0, 0], sizes = [2, 1, 20, 32], strides = [1, 1, 1, 1]} : vector<2x20x20x32xbf16> to vector<2x1x20x32xbf16>
    %22 = vector.shape_cast %21 : vector<2x1x20x32xbf16> to vector<2x20x32xbf16>
    %23 = vector.extract_strided_slice %3 {offsets = [0, 5, 0, 0], sizes = [2, 1, 20, 32], strides = [1, 1, 1, 1]} : vector<2x20x20x32xbf16> to vector<2x1x20x32xbf16>
    %24 = vector.shape_cast %23 : vector<2x1x20x32xbf16> to vector<2x20x32xbf16>
    %25 = vector.extract_strided_slice %3 {offsets = [0, 6, 0, 0], sizes = [2, 1, 20, 32], strides = [1, 1, 1, 1]} : vector<2x20x20x32xbf16> to vector<2x1x20x32xbf16>
    %26 = vector.shape_cast %25 : vector<2x1x20x32xbf16> to vector<2x20x32xbf16>
    %27 = vector.extract_strided_slice %3 {offsets = [0, 7, 0, 0], sizes = [2, 1, 20, 32], strides = [1, 1, 1, 1]} : vector<2x20x20x32xbf16> to vector<2x1x20x32xbf16>
    %28 = vector.shape_cast %27 : vector<2x1x20x32xbf16> to vector<2x20x32xbf16>
    %29 = vector.extract_strided_slice %3 {offsets = [0, 8, 0, 0], sizes = [2, 1, 20, 32], strides = [1, 1, 1, 1]} : vector<2x20x20x32xbf16> to vector<2x1x20x32xbf16>
    %30 = vector.shape_cast %29 : vector<2x1x20x32xbf16> to vector<2x20x32xbf16>
    %31 = vector.extract_strided_slice %3 {offsets = [0, 9, 0, 0], sizes = [2, 1, 20, 32], strides = [1, 1, 1, 1]} : vector<2x20x20x32xbf16> to vector<2x1x20x32xbf16>
    %32 = vector.shape_cast %31 : vector<2x1x20x32xbf16> to vector<2x20x32xbf16>
    %33 = vector.extract_strided_slice %3 {offsets = [0, 10, 0, 0], sizes = [2, 1, 20, 32], strides = [1, 1, 1, 1]} : vector<2x20x20x32xbf16> to vector<2x1x20x32xbf16>
    %34 = vector.shape_cast %33 : vector<2x1x20x32xbf16> to vector<2x20x32xbf16>
    %35 = vector.extract_strided_slice %3 {offsets = [0, 11, 0, 0], sizes = [2, 1, 20, 32], strides = [1, 1, 1, 1]} : vector<2x20x20x32xbf16> to vector<2x1x20x32xbf16>
    %36 = vector.shape_cast %35 : vector<2x1x20x32xbf16> to vector<2x20x32xbf16>
    %37 = tpu.concatenate %22, %24, %26, %28, %30, %32, %34, %36 in 2 : vector<2x20x32xbf16>, vector<2x20x32xbf16>, vector<2x20x32xbf16>, vector<2x20x32xbf16>, vector<2x20x32xbf16>, vector<2x20x32xbf16>, vector<2x20x32xbf16>, vector<2x20x32xbf16> -> vector<2x20x256xbf16>
    %38 = vector.extract_strided_slice %3 {offsets = [0, 8, 0, 0], sizes = [2, 1, 20, 32], strides = [1, 1, 1, 1]} : vector<2x20x20x32xbf16> to vector<2x1x20x32xbf16>
    %39 = vector.shape_cast %38 : vector<2x1x20x32xbf16> to vector<2x20x32xbf16>
    %40 = vector.extract_strided_slice %3 {offsets = [0, 9, 0, 0], sizes = [2, 1, 20, 32], strides = [1, 1, 1, 1]} : vector<2x20x20x32xbf16> to vector<2x1x20x32xbf16>
    %41 = vector.shape_cast %40 : vector<2x1x20x32xbf16> to vector<2x20x32xbf16>
    %42 = vector.extract_strided_slice %3 {offsets = [0, 10, 0, 0], sizes = [2, 1, 20, 32], strides = [1, 1, 1, 1]} : vector<2x20x20x32xbf16> to vector<2x1x20x32xbf16>
    %43 = vector.shape_cast %42 : vector<2x1x20x32xbf16> to vector<2x20x32xbf16>
    %44 = vector.extract_strided_slice %3 {offsets = [0, 11, 0, 0], sizes = [2, 1, 20, 32], strides = [1, 1, 1, 1]} : vector<2x20x20x32xbf16> to vector<2x1x20x32xbf16>
    %45 = vector.shape_cast %44 : vector<2x1x20x32xbf16> to vector<2x20x32xbf16>
    %46 = vector.extract_strided_slice %3 {offsets = [0, 12, 0, 0], sizes = [2, 1, 20, 32], strides = [1, 1, 1, 1]} : vector<2x20x20x32xbf16> to vector<2x1x20x32xbf16>
    %47 = vector.shape_cast %46 : vector<2x1x20x32xbf16> to vector<2x20x32xbf16>
    %48 = vector.extract_strided_slice %3 {offsets = [0, 13, 0, 0], sizes = [2, 1, 20, 32], strides = [1, 1, 1, 1]} : vector<2x20x20x32xbf16> to vector<2x1x20x32xbf16>
    %49 = vector.shape_cast %48 : vector<2x1x20x32xbf16> to vector<2x20x32xbf16>
    %50 = vector.extract_strided_slice %3 {offsets = [0, 14, 0, 0], sizes = [2, 1, 20, 32], strides = [1, 1, 1, 1]} : vector<2x20x20x32xbf16> to vector<2x1x20x32xbf16>
    %51 = vector.shape_cast %50 : vector<2x1x20x32xbf16> to vector<2x20x32xbf16>
    %52 = vector.extract_strided_slice %3 {offsets = [0, 15, 0, 0], sizes = [2, 1, 20, 32], strides = [1, 1, 1, 1]} : vector<2x20x20x32xbf16> to vector<2x1x20x32xbf16>
    %53 = vector.shape_cast %52 : vector<2x1x20x32xbf16> to vector<2x20x32xbf16>
    %54 = tpu.concatenate %39, %41, %43, %45, %47, %49, %51, %53 in 2 : vector<2x20x32xbf16>, vector<2x20x32xbf16>, vector<2x20x32xbf16>, vector<2x20x32xbf16>, vector<2x20x32xbf16>, vector<2x20x32xbf16>, vector<2x20x32xbf16>, vector<2x20x32xbf16> -> vector<2x20x256xbf16>
    %55 = vector.extract_strided_slice %3 {offsets = [0, 12, 0, 0], sizes = [2, 1, 20, 32], strides = [1, 1, 1, 1]} : vector<2x20x20x32xbf16> to vector<2x1x20x32xbf16>
    %56 = vector.shape_cast %55 : vector<2x1x20x32xbf16> to vector<2x20x32xbf16>
    %57 = vector.extract_strided_slice %3 {offsets = [0, 13, 0, 0], sizes = [2, 1, 20, 32], strides = [1, 1, 1, 1]} : vector<2x20x20x32xbf16> to vector<2x1x20x32xbf16>
    %58 = vector.shape_cast %57 : vector<2x1x20x32xbf16> to vector<2x20x32xbf16>
    %59 = vector.extract_strided_slice %3 {offsets = [0, 14, 0, 0], sizes = [2, 1, 20, 32], strides = [1, 1, 1, 1]} : vector<2x20x20x32xbf16> to vector<2x1x20x32xbf16>
    %60 = vector.shape_cast %59 : vector<2x1x20x32xbf16> to vector<2x20x32xbf16>
    %61 = vector.extract_strided_slice %3 {offsets = [0, 15, 0, 0], sizes = [2, 1, 20, 32], strides = [1, 1, 1, 1]} : vector<2x20x20x32xbf16> to vector<2x1x20x32xbf16>
    %62 = vector.shape_cast %61 : vector<2x1x20x32xbf16> to vector<2x20x32xbf16>
    %63 = vector.extract_strided_slice %3 {offsets = [0, 16, 0, 0], sizes = [2, 1, 20, 32], strides = [1, 1, 1, 1]} : vector<2x20x20x32xbf16> to vector<2x1x20x32xbf16>
    %64 = vector.shape_cast %63 : vector<2x1x20x32xbf16> to vector<2x20x32xbf16>
    %65 = vector.extract_strided_slice %3 {offsets = [0, 17, 0, 0], sizes = [2, 1, 20, 32], strides = [1, 1, 1, 1]} : vector<2x20x20x32xbf16> to vector<2x1x20x32xbf16>
    %66 = vector.shape_cast %65 : vector<2x1x20x32xbf16> to vector<2x20x32xbf16>
    %67 = vector.extract_strided_slice %3 {offsets = [0, 18, 0, 0], sizes = [2, 1, 20, 32], strides = [1, 1, 1, 1]} : vector<2x20x20x32xbf16> to vector<2x1x20x32xbf16>
    %68 = vector.shape_cast %67 : vector<2x1x20x32xbf16> to vector<2x20x32xbf16>
    %69 = vector.extract_strided_slice %3 {offsets = [0, 19, 0, 0], sizes = [2, 1, 20, 32], strides = [1, 1, 1, 1]} : vector<2x20x20x32xbf16> to vector<2x1x20x32xbf16>
    %70 = vector.shape_cast %69 : vector<2x1x20x32xbf16> to vector<2x20x32xbf16>
    %71 = tpu.concatenate %56, %58, %60, %62, %64, %66, %68, %70 in 2 : vector<2x20x32xbf16>, vector<2x20x32xbf16>, vector<2x20x32xbf16>, vector<2x20x32xbf16>, vector<2x20x32xbf16>, vector<2x20x32xbf16>, vector<2x20x32xbf16>, vector<2x20x32xbf16> -> vector<2x20x256xbf16>
    %72 = tpu.concatenate %20, %37, %54, %71 in 1 : vector<2x20x256xbf16>, vector<2x20x256xbf16>, vector<2x20x256xbf16>, vector<2x20x256xbf16> -> vector<2x80x256xbf16>
    %73 = vector.shape_cast %72 : vector<2x80x256xbf16> to vector<160x256xbf16>
    %c0_3 = arith.constant 0 : index
    %c0_4 = arith.constant 0 : index
    %74 = vector.load %arg2[%c0_3, %c0_4] : memref<256x32xbf16, #tpu.memory_space<vmem>>, vector<256x32xbf16>
    %cst = arith.constant dense<0.000000e+00> : vector<160x32xf32>
    %75 = tpu.matmul %73, %74, %cst {dimension_numbers = #tpu.dot_dimension_numbers<[1], [0], [0], [1], [0, 0, 1, 1], [], []>} : vector<160x256xbf16>, vector<256x32xbf16>, vector<160x32xf32> -> vector<160x32xf32>
    %c0_5 = arith.constant 0 : index
    %c0_6 = arith.constant 0 : index
    %76 = vector.load %arg3[%c0_5, %c0_6] : memref<1x32xf32, #tpu.memory_space<vmem>>, vector<1x32xf32>
    %77 = vector.broadcast %76 : vector<1x32xf32> to vector<160x32xf32>
    %78 = arith.addf %75, %77 : vector<160x32xf32>
    %cst_7 = arith.constant 0.000000e+00 : f32
    %79 = vector.broadcast %cst_7 : f32 to vector<160x32xf32>
    %80 = arith.maximumf %78, %79 : vector<160x32xf32>
    %81 = arith.truncf %80 : vector<160x32xf32> to vector<160x32xbf16>
    %82 = vector.shape_cast %81 : vector<160x32xbf16> to vector<2x4x20x32xbf16>
    %83 = vector.extract_strided_slice %82 {offsets = [0, 0, 1, 0], sizes = [2, 4, 1, 32], strides = [1, 1, 1, 1]} : vector<2x4x20x32xbf16> to vector<2x4x1x32xbf16>
    %84 = vector.extract_strided_slice %82 {offsets = [0, 0, 18, 0], sizes = [2, 4, 1, 32], strides = [1, 1, 1, 1]} : vector<2x4x20x32xbf16> to vector<2x4x1x32xbf16>
    %85 = tpu.concatenate %83, %82, %84 in 2 : vector<2x4x1x32xbf16>, vector<2x4x20x32xbf16>, vector<2x4x1x32xbf16> -> vector<2x4x22x32xbf16>
    %86 = vector.extract_strided_slice %85 {offsets = [0, 0, 0, 0], sizes = [2, 1, 1, 32], strides = [1, 1, 1, 1]} : vector<2x4x22x32xbf16> to vector<2x1x1x32xbf16>
    %87 = vector.shape_cast %86 : vector<2x1x1x32xbf16> to vector<2x32xbf16>
    %88 = vector.extract_strided_slice %85 {offsets = [0, 0, 1, 0], sizes = [2, 1, 1, 32], strides = [1, 1, 1, 1]} : vector<2x4x22x32xbf16> to vector<2x1x1x32xbf16>
    %89 = vector.shape_cast %88 : vector<2x1x1x32xbf16> to vector<2x32xbf16>
    %90 = vector.extract_strided_slice %85 {offsets = [0, 0, 2, 0], sizes = [2, 1, 1, 32], strides = [1, 1, 1, 1]} : vector<2x4x22x32xbf16> to vector<2x1x1x32xbf16>
    %91 = vector.shape_cast %90 : vector<2x1x1x32xbf16> to vector<2x32xbf16>
    %92 = vector.extract_strided_slice %85 {offsets = [0, 0, 3, 0], sizes = [2, 1, 1, 32], strides = [1, 1, 1, 1]} : vector<2x4x22x32xbf16> to vector<2x1x1x32xbf16>
    %93 = vector.shape_cast %92 : vector<2x1x1x32xbf16> to vector<2x32xbf16>
    %94 = vector.extract_strided_slice %85 {offsets = [0, 1, 0, 0], sizes = [2, 1, 1, 32], strides = [1, 1, 1, 1]} : vector<2x4x22x32xbf16> to vector<2x1x1x32xbf16>
    %95 = vector.shape_cast %94 : vector<2x1x1x32xbf16> to vector<2x32xbf16>
    %96 = vector.extract_strided_slice %85 {offsets = [0, 1, 1, 0], sizes = [2, 1, 1, 32], strides = [1, 1, 1, 1]} : vector<2x4x22x32xbf16> to vector<2x1x1x32xbf16>
    %97 = vector.shape_cast %96 : vector<2x1x1x32xbf16> to vector<2x32xbf16>
    %98 = vector.extract_strided_slice %85 {offsets = [0, 1, 2, 0], sizes = [2, 1, 1, 32], strides = [1, 1, 1, 1]} : vector<2x4x22x32xbf16> to vector<2x1x1x32xbf16>
    %99 = vector.shape_cast %98 : vector<2x1x1x32xbf16> to vector<2x32xbf16>
    %100 = vector.extract_strided_slice %85 {offsets = [0, 1, 3, 0], sizes = [2, 1, 1, 32], strides = [1, 1, 1, 1]} : vector<2x4x22x32xbf16> to vector<2x1x1x32xbf16>
    %101 = vector.shape_cast %100 : vector<2x1x1x32xbf16> to vector<2x32xbf16>
    %102 = vector.extract_strided_slice %85 {offsets = [0, 2, 0, 0], sizes = [2, 1, 1, 32], strides = [1, 1, 1, 1]} : vector<2x4x22x32xbf16> to vector<2x1x1x32xbf16>
    %103 = vector.shape_cast %102 : vector<2x1x1x32xbf16> to vector<2x32xbf16>
    %104 = vector.extract_strided_slice %85 {offsets = [0, 2, 1, 0], sizes = [2, 1, 1, 32], strides = [1, 1, 1, 1]} : vector<2x4x22x32xbf16> to vector<2x1x1x32xbf16>
    %105 = vector.shape_cast %104 : vector<2x1x1x32xbf16> to vector<2x32xbf16>
    %106 = vector.extract_strided_slice %85 {offsets = [0, 2, 2, 0], sizes = [2, 1, 1, 32], strides = [1, 1, 1, 1]} : vector<2x4x22x32xbf16> to vector<2x1x1x32xbf16>
    %107 = vector.shape_cast %106 : vector<2x1x1x32xbf16> to vector<2x32xbf16>
    %108 = vector.extract_strided_slice %85 {offsets = [0, 2, 3, 0], sizes = [2, 1, 1, 32], strides = [1, 1, 1, 1]} : vector<2x4x22x32xbf16> to vector<2x1x1x32xbf16>
    %109 = vector.shape_cast %108 : vector<2x1x1x32xbf16> to vector<2x32xbf16>
    %110 = vector.extract_strided_slice %85 {offsets = [0, 3, 0, 0], sizes = [2, 1, 1, 32], strides = [1, 1, 1, 1]} : vector<2x4x22x32xbf16> to vector<2x1x1x32xbf16>
    %111 = vector.shape_cast %110 : vector<2x1x1x32xbf16> to vector<2x32xbf16>
    %112 = vector.extract_strided_slice %85 {offsets = [0, 3, 1, 0], sizes = [2, 1, 1, 32], strides = [1, 1, 1, 1]} : vector<2x4x22x32xbf16> to vector<2x1x1x32xbf16>
    %113 = vector.shape_cast %112 : vector<2x1x1x32xbf16> to vector<2x32xbf16>
    %114 = vector.extract_strided_slice %85 {offsets = [0, 3, 2, 0], sizes = [2, 1, 1, 32], strides = [1, 1, 1, 1]} : vector<2x4x22x32xbf16> to vector<2x1x1x32xbf16>
    %115 = vector.shape_cast %114 : vector<2x1x1x32xbf16> to vector<2x32xbf16>
    %116 = vector.extract_strided_slice %85 {offsets = [0, 3, 3, 0], sizes = [2, 1, 1, 32], strides = [1, 1, 1, 1]} : vector<2x4x22x32xbf16> to vector<2x1x1x32xbf16>
    %117 = vector.shape_cast %116 : vector<2x1x1x32xbf16> to vector<2x32xbf16>
    %118 = tpu.concatenate %87, %89, %91, %93, %95, %97, %99, %101, %103, %105, %107, %109, %111, %113, %115, %117 in 1 : vector<2x32xbf16>, vector<2x32xbf16>, vector<2x32xbf16>, vector<2x32xbf16>, vector<2x32xbf16>, vector<2x32xbf16>, vector<2x32xbf16>, vector<2x32xbf16>, vector<2x32xbf16>, vector<2x32xbf16>, vector<2x32xbf16>, vector<2x32xbf16>, vector<2x32xbf16>, vector<2x32xbf16>, vector<2x32xbf16>, vector<2x32xbf16> -> vector<2x512xbf16>
    %119 = vector.shape_cast %118 : vector<2x512xbf16> to vector<2x1x512xbf16>
    %120 = vector.extract_strided_slice %85 {offsets = [0, 0, 2, 0], sizes = [2, 1, 1, 32], strides = [1, 1, 1, 1]} : vector<2x4x22x32xbf16> to vector<2x1x1x32xbf16>
    %121 = vector.shape_cast %120 : vector<2x1x1x32xbf16> to vector<2x32xbf16>
    %122 = vector.extract_strided_slice %85 {offsets = [0, 0, 3, 0], sizes = [2, 1, 1, 32], strides = [1, 1, 1, 1]} : vector<2x4x22x32xbf16> to vector<2x1x1x32xbf16>
    %123 = vector.shape_cast %122 : vector<2x1x1x32xbf16> to vector<2x32xbf16>
    %124 = vector.extract_strided_slice %85 {offsets = [0, 0, 4, 0], sizes = [2, 1, 1, 32], strides = [1, 1, 1, 1]} : vector<2x4x22x32xbf16> to vector<2x1x1x32xbf16>
    %125 = vector.shape_cast %124 : vector<2x1x1x32xbf16> to vector<2x32xbf16>
    %126 = vector.extract_strided_slice %85 {offsets = [0, 0, 5, 0], sizes = [2, 1, 1, 32], strides = [1, 1, 1, 1]} : vector<2x4x22x32xbf16> to vector<2x1x1x32xbf16>
    %127 = vector.shape_cast %126 : vector<2x1x1x32xbf16> to vector<2x32xbf16>
    %128 = vector.extract_strided_slice %85 {offsets = [0, 1, 2, 0], sizes = [2, 1, 1, 32], strides = [1, 1, 1, 1]} : vector<2x4x22x32xbf16> to vector<2x1x1x32xbf16>
    %129 = vector.shape_cast %128 : vector<2x1x1x32xbf16> to vector<2x32xbf16>
    %130 = vector.extract_strided_slice %85 {offsets = [0, 1, 3, 0], sizes = [2, 1, 1, 32], strides = [1, 1, 1, 1]} : vector<2x4x22x32xbf16> to vector<2x1x1x32xbf16>
    %131 = vector.shape_cast %130 : vector<2x1x1x32xbf16> to vector<2x32xbf16>
    %132 = vector.extract_strided_slice %85 {offsets = [0, 1, 4, 0], sizes = [2, 1, 1, 32], strides = [1, 1, 1, 1]} : vector<2x4x22x32xbf16> to vector<2x1x1x32xbf16>
    %133 = vector.shape_cast %132 : vector<2x1x1x32xbf16> to vector<2x32xbf16>
    %134 = vector.extract_strided_slice %85 {offsets = [0, 1, 5, 0], sizes = [2, 1, 1, 32], strides = [1, 1, 1, 1]} : vector<2x4x22x32xbf16> to vector<2x1x1x32xbf16>
    %135 = vector.shape_cast %134 : vector<2x1x1x32xbf16> to vector<2x32xbf16>
    %136 = vector.extract_strided_slice %85 {offsets = [0, 2, 2, 0], sizes = [2, 1, 1, 32], strides = [1, 1, 1, 1]} : vector<2x4x22x32xbf16> to vector<2x1x1x32xbf16>
    %137 = vector.shape_cast %136 : vector<2x1x1x32xbf16> to vector<2x32xbf16>
    %138 = vector.extract_strided_slice %85 {offsets = [0, 2, 3, 0], sizes = [2, 1, 1, 32], strides = [1, 1, 1, 1]} : vector<2x4x22x32xbf16> to vector<2x1x1x32xbf16>
    %139 = vector.shape_cast %138 : vector<2x1x1x32xbf16> to vector<2x32xbf16>
    %140 = vector.extract_strided_slice %85 {offsets = [0, 2, 4, 0], sizes = [2, 1, 1, 32], strides = [1, 1, 1, 1]} : vector<2x4x22x32xbf16> to vector<2x1x1x32xbf16>
    %141 = vector.shape_cast %140 : vector<2x1x1x32xbf16> to vector<2x32xbf16>
    %142 = vector.extract_strided_slice %85 {offsets = [0, 2, 5, 0], sizes = [2, 1, 1, 32], strides = [1, 1, 1, 1]} : vector<2x4x22x32xbf16> to vector<2x1x1x32xbf16>
    %143 = vector.shape_cast %142 : vector<2x1x1x32xbf16> to vector<2x32xbf16>
    %144 = vector.extract_strided_slice %85 {offsets = [0, 3, 2, 0], sizes = [2, 1, 1, 32], strides = [1, 1, 1, 1]} : vector<2x4x22x32xbf16> to vector<2x1x1x32xbf16>
    %145 = vector.shape_cast %144 : vector<2x1x1x32xbf16> to vector<2x32xbf16>
    %146 = vector.extract_strided_slice %85 {offsets = [0, 3, 3, 0], sizes = [2, 1, 1, 32], strides = [1, 1, 1, 1]} : vector<2x4x22x32xbf16> to vector<2x1x1x32xbf16>
    %147 = vector.shape_cast %146 : vector<2x1x1x32xbf16> to vector<2x32xbf16>
    %148 = vector.extract_strided_slice %85 {offsets = [0, 3, 4, 0], sizes = [2, 1, 1, 32], strides = [1, 1, 1, 1]} : vector<2x4x22x32xbf16> to vector<2x1x1x32xbf16>
    %149 = vector.shape_cast %148 : vector<2x1x1x32xbf16> to vector<2x32xbf16>
    %150 = vector.extract_strided_slice %85 {offsets = [0, 3, 5, 0], sizes = [2, 1, 1, 32], strides = [1, 1, 1, 1]} : vector<2x4x22x32xbf16> to vector<2x1x1x32xbf16>
    %151 = vector.shape_cast %150 : vector<2x1x1x32xbf16> to vector<2x32xbf16>
    %152 = tpu.concatenate %121, %123, %125, %127, %129, %131, %133, %135, %137, %139, %141, %143, %145, %147, %149, %151 in 1 : vector<2x32xbf16>, vector<2x32xbf16>, vector<2x32xbf16>, vector<2x32xbf16>, vector<2x32xbf16>, vector<2x32xbf16>, vector<2x32xbf16>, vector<2x32xbf16>, vector<2x32xbf16>, vector<2x32xbf16>, vector<2x32xbf16>, vector<2x32xbf16>, vector<2x32xbf16>, vector<2x32xbf16>, vector<2x32xbf16>, vector<2x32xbf16> -> vector<2x512xbf16>
    %153 = vector.shape_cast %152 : vector<2x512xbf16> to vector<2x1x512xbf16>
    %154 = vector.extract_strided_slice %85 {offsets = [0, 0, 4, 0], sizes = [2, 1, 1, 32], strides = [1, 1, 1, 1]} : vector<2x4x22x32xbf16> to vector<2x1x1x32xbf16>
    %155 = vector.shape_cast %154 : vector<2x1x1x32xbf16> to vector<2x32xbf16>
    %156 = vector.extract_strided_slice %85 {offsets = [0, 0, 5, 0], sizes = [2, 1, 1, 32], strides = [1, 1, 1, 1]} : vector<2x4x22x32xbf16> to vector<2x1x1x32xbf16>
    %157 = vector.shape_cast %156 : vector<2x1x1x32xbf16> to vector<2x32xbf16>
    %158 = vector.extract_strided_slice %85 {offsets = [0, 0, 6, 0], sizes = [2, 1, 1, 32], strides = [1, 1, 1, 1]} : vector<2x4x22x32xbf16> to vector<2x1x1x32xbf16>
    %159 = vector.shape_cast %158 : vector<2x1x1x32xbf16> to vector<2x32xbf16>
    %160 = vector.extract_strided_slice %85 {offsets = [0, 0, 7, 0], sizes = [2, 1, 1, 32], strides = [1, 1, 1, 1]} : vector<2x4x22x32xbf16> to vector<2x1x1x32xbf16>
    %161 = vector.shape_cast %160 : vector<2x1x1x32xbf16> to vector<2x32xbf16>
    %162 = vector.extract_strided_slice %85 {offsets = [0, 1, 4, 0], sizes = [2, 1, 1, 32], strides = [1, 1, 1, 1]} : vector<2x4x22x32xbf16> to vector<2x1x1x32xbf16>
    %163 = vector.shape_cast %162 : vector<2x1x1x32xbf16> to vector<2x32xbf16>
    %164 = vector.extract_strided_slice %85 {offsets = [0, 1, 5, 0], sizes = [2, 1, 1, 32], strides = [1, 1, 1, 1]} : vector<2x4x22x32xbf16> to vector<2x1x1x32xbf16>
    %165 = vector.shape_cast %164 : vector<2x1x1x32xbf16> to vector<2x32xbf16>
    %166 = vector.extract_strided_slice %85 {offsets = [0, 1, 6, 0], sizes = [2, 1, 1, 32], strides = [1, 1, 1, 1]} : vector<2x4x22x32xbf16> to vector<2x1x1x32xbf16>
    %167 = vector.shape_cast %166 : vector<2x1x1x32xbf16> to vector<2x32xbf16>
    %168 = vector.extract_strided_slice %85 {offsets = [0, 1, 7, 0], sizes = [2, 1, 1, 32], strides = [1, 1, 1, 1]} : vector<2x4x22x32xbf16> to vector<2x1x1x32xbf16>
    %169 = vector.shape_cast %168 : vector<2x1x1x32xbf16> to vector<2x32xbf16>
    %170 = vector.extract_strided_slice %85 {offsets = [0, 2, 4, 0], sizes = [2, 1, 1, 32], strides = [1, 1, 1, 1]} : vector<2x4x22x32xbf16> to vector<2x1x1x32xbf16>
    %171 = vector.shape_cast %170 : vector<2x1x1x32xbf16> to vector<2x32xbf16>
    %172 = vector.extract_strided_slice %85 {offsets = [0, 2, 5, 0], sizes = [2, 1, 1, 32], strides = [1, 1, 1, 1]} : vector<2x4x22x32xbf16> to vector<2x1x1x32xbf16>
    %173 = vector.shape_cast %172 : vector<2x1x1x32xbf16> to vector<2x32xbf16>
    %174 = vector.extract_strided_slice %85 {offsets = [0, 2, 6, 0], sizes = [2, 1, 1, 32], strides = [1, 1, 1, 1]} : vector<2x4x22x32xbf16> to vector<2x1x1x32xbf16>
    %175 = vector.shape_cast %174 : vector<2x1x1x32xbf16> to vector<2x32xbf16>
    %176 = vector.extract_strided_slice %85 {offsets = [0, 2, 7, 0], sizes = [2, 1, 1, 32], strides = [1, 1, 1, 1]} : vector<2x4x22x32xbf16> to vector<2x1x1x32xbf16>
    %177 = vector.shape_cast %176 : vector<2x1x1x32xbf16> to vector<2x32xbf16>
    %178 = vector.extract_strided_slice %85 {offsets = [0, 3, 4, 0], sizes = [2, 1, 1, 32], strides = [1, 1, 1, 1]} : vector<2x4x22x32xbf16> to vector<2x1x1x32xbf16>
    %179 = vector.shape_cast %178 : vector<2x1x1x32xbf16> to vector<2x32xbf16>
    %180 = vector.extract_strided_slice %85 {offsets = [0, 3, 5, 0], sizes = [2, 1, 1, 32], strides = [1, 1, 1, 1]} : vector<2x4x22x32xbf16> to vector<2x1x1x32xbf16>
    %181 = vector.shape_cast %180 : vector<2x1x1x32xbf16> to vector<2x32xbf16>
    %182 = vector.extract_strided_slice %85 {offsets = [0, 3, 6, 0], sizes = [2, 1, 1, 32], strides = [1, 1, 1, 1]} : vector<2x4x22x32xbf16> to vector<2x1x1x32xbf16>
    %183 = vector.shape_cast %182 : vector<2x1x1x32xbf16> to vector<2x32xbf16>
    %184 = vector.extract_strided_slice %85 {offsets = [0, 3, 7, 0], sizes = [2, 1, 1, 32], strides = [1, 1, 1, 1]} : vector<2x4x22x32xbf16> to vector<2x1x1x32xbf16>
    %185 = vector.shape_cast %184 : vector<2x1x1x32xbf16> to vector<2x32xbf16>
    %186 = tpu.concatenate %155, %157, %159, %161, %163, %165, %167, %169, %171, %173, %175, %177, %179, %181, %183, %185 in 1 : vector<2x32xbf16>, vector<2x32xbf16>, vector<2x32xbf16>, vector<2x32xbf16>, vector<2x32xbf16>, vector<2x32xbf16>, vector<2x32xbf16>, vector<2x32xbf16>, vector<2x32xbf16>, vector<2x32xbf16>, vector<2x32xbf16>, vector<2x32xbf16>, vector<2x32xbf16>, vector<2x32xbf16>, vector<2x32xbf16>, vector<2x32xbf16> -> vector<2x512xbf16>
    %187 = vector.shape_cast %186 : vector<2x512xbf16> to vector<2x1x512xbf16>
    %188 = vector.extract_strided_slice %85 {offsets = [0, 0, 6, 0], sizes = [2, 1, 1, 32], strides = [1, 1, 1, 1]} : vector<2x4x22x32xbf16> to vector<2x1x1x32xbf16>
    %189 = vector.shape_cast %188 : vector<2x1x1x32xbf16> to vector<2x32xbf16>
    %190 = vector.extract_strided_slice %85 {offsets = [0, 0, 7, 0], sizes = [2, 1, 1, 32], strides = [1, 1, 1, 1]} : vector<2x4x22x32xbf16> to vector<2x1x1x32xbf16>
    %191 = vector.shape_cast %190 : vector<2x1x1x32xbf16> to vector<2x32xbf16>
    %192 = vector.extract_strided_slice %85 {offsets = [0, 0, 8, 0], sizes = [2, 1, 1, 32], strides = [1, 1, 1, 1]} : vector<2x4x22x32xbf16> to vector<2x1x1x32xbf16>
    %193 = vector.shape_cast %192 : vector<2x1x1x32xbf16> to vector<2x32xbf16>
    %194 = vector.extract_strided_slice %85 {offsets = [0, 0, 9, 0], sizes = [2, 1, 1, 32], strides = [1, 1, 1, 1]} : vector<2x4x22x32xbf16> to vector<2x1x1x32xbf16>
    %195 = vector.shape_cast %194 : vector<2x1x1x32xbf16> to vector<2x32xbf16>
    %196 = vector.extract_strided_slice %85 {offsets = [0, 1, 6, 0], sizes = [2, 1, 1, 32], strides = [1, 1, 1, 1]} : vector<2x4x22x32xbf16> to vector<2x1x1x32xbf16>
    %197 = vector.shape_cast %196 : vector<2x1x1x32xbf16> to vector<2x32xbf16>
    %198 = vector.extract_strided_slice %85 {offsets = [0, 1, 7, 0], sizes = [2, 1, 1, 32], strides = [1, 1, 1, 1]} : vector<2x4x22x32xbf16> to vector<2x1x1x32xbf16>
    %199 = vector.shape_cast %198 : vector<2x1x1x32xbf16> to vector<2x32xbf16>
    %200 = vector.extract_strided_slice %85 {offsets = [0, 1, 8, 0], sizes = [2, 1, 1, 32], strides = [1, 1, 1, 1]} : vector<2x4x22x32xbf16> to vector<2x1x1x32xbf16>
    %201 = vector.shape_cast %200 : vector<2x1x1x32xbf16> to vector<2x32xbf16>
    %202 = vector.extract_strided_slice %85 {offsets = [0, 1, 9, 0], sizes = [2, 1, 1, 32], strides = [1, 1, 1, 1]} : vector<2x4x22x32xbf16> to vector<2x1x1x32xbf16>
    %203 = vector.shape_cast %202 : vector<2x1x1x32xbf16> to vector<2x32xbf16>
    %204 = vector.extract_strided_slice %85 {offsets = [0, 2, 6, 0], sizes = [2, 1, 1, 32], strides = [1, 1, 1, 1]} : vector<2x4x22x32xbf16> to vector<2x1x1x32xbf16>
    %205 = vector.shape_cast %204 : vector<2x1x1x32xbf16> to vector<2x32xbf16>
    %206 = vector.extract_strided_slice %85 {offsets = [0, 2, 7, 0], sizes = [2, 1, 1, 32], strides = [1, 1, 1, 1]} : vector<2x4x22x32xbf16> to vector<2x1x1x32xbf16>
    %207 = vector.shape_cast %206 : vector<2x1x1x32xbf16> to vector<2x32xbf16>
    %208 = vector.extract_strided_slice %85 {offsets = [0, 2, 8, 0], sizes = [2, 1, 1, 32], strides = [1, 1, 1, 1]} : vector<2x4x22x32xbf16> to vector<2x1x1x32xbf16>
    %209 = vector.shape_cast %208 : vector<2x1x1x32xbf16> to vector<2x32xbf16>
    %210 = vector.extract_strided_slice %85 {offsets = [0, 2, 9, 0], sizes = [2, 1, 1, 32], strides = [1, 1, 1, 1]} : vector<2x4x22x32xbf16> to vector<2x1x1x32xbf16>
    %211 = vector.shape_cast %210 : vector<2x1x1x32xbf16> to vector<2x32xbf16>
    %212 = vector.extract_strided_slice %85 {offsets = [0, 3, 6, 0], sizes = [2, 1, 1, 32], strides = [1, 1, 1, 1]} : vector<2x4x22x32xbf16> to vector<2x1x1x32xbf16>
    %213 = vector.shape_cast %212 : vector<2x1x1x32xbf16> to vector<2x32xbf16>
    %214 = vector.extract_strided_slice %85 {offsets = [0, 3, 7, 0], sizes = [2, 1, 1, 32], strides = [1, 1, 1, 1]} : vector<2x4x22x32xbf16> to vector<2x1x1x32xbf16>
    %215 = vector.shape_cast %214 : vector<2x1x1x32xbf16> to vector<2x32xbf16>
    %216 = vector.extract_strided_slice %85 {offsets = [0, 3, 8, 0], sizes = [2, 1, 1, 32], strides = [1, 1, 1, 1]} : vector<2x4x22x32xbf16> to vector<2x1x1x32xbf16>
    %217 = vector.shape_cast %216 : vector<2x1x1x32xbf16> to vector<2x32xbf16>
    %218 = vector.extract_strided_slice %85 {offsets = [0, 3, 9, 0], sizes = [2, 1, 1, 32], strides = [1, 1, 1, 1]} : vector<2x4x22x32xbf16> to vector<2x1x1x32xbf16>
    %219 = vector.shape_cast %218 : vector<2x1x1x32xbf16> to vector<2x32xbf16>
    %220 = tpu.concatenate %189, %191, %193, %195, %197, %199, %201, %203, %205, %207, %209, %211, %213, %215, %217, %219 in 1 : vector<2x32xbf16>, vector<2x32xbf16>, vector<2x32xbf16>, vector<2x32xbf16>, vector<2x32xbf16>, vector<2x32xbf16>, vector<2x32xbf16>, vector<2x32xbf16>, vector<2x32xbf16>, vector<2x32xbf16>, vector<2x32xbf16>, vector<2x32xbf16>, vector<2x32xbf16>, vector<2x32xbf16>, vector<2x32xbf16>, vector<2x32xbf16> -> vector<2x512xbf16>
    %221 = vector.shape_cast %220 : vector<2x512xbf16> to vector<2x1x512xbf16>
    %222 = vector.extract_strided_slice %85 {offsets = [0, 0, 8, 0], sizes = [2, 1, 1, 32], strides = [1, 1, 1, 1]} : vector<2x4x22x32xbf16> to vector<2x1x1x32xbf16>
    %223 = vector.shape_cast %222 : vector<2x1x1x32xbf16> to vector<2x32xbf16>
    %224 = vector.extract_strided_slice %85 {offsets = [0, 0, 9, 0], sizes = [2, 1, 1, 32], strides = [1, 1, 1, 1]} : vector<2x4x22x32xbf16> to vector<2x1x1x32xbf16>
    %225 = vector.shape_cast %224 : vector<2x1x1x32xbf16> to vector<2x32xbf16>
    %226 = vector.extract_strided_slice %85 {offsets = [0, 0, 10, 0], sizes = [2, 1, 1, 32], strides = [1, 1, 1, 1]} : vector<2x4x22x32xbf16> to vector<2x1x1x32xbf16>
    %227 = vector.shape_cast %226 : vector<2x1x1x32xbf16> to vector<2x32xbf16>
    %228 = vector.extract_strided_slice %85 {offsets = [0, 0, 11, 0], sizes = [2, 1, 1, 32], strides = [1, 1, 1, 1]} : vector<2x4x22x32xbf16> to vector<2x1x1x32xbf16>
    %229 = vector.shape_cast %228 : vector<2x1x1x32xbf16> to vector<2x32xbf16>
    %230 = vector.extract_strided_slice %85 {offsets = [0, 1, 8, 0], sizes = [2, 1, 1, 32], strides = [1, 1, 1, 1]} : vector<2x4x22x32xbf16> to vector<2x1x1x32xbf16>
    %231 = vector.shape_cast %230 : vector<2x1x1x32xbf16> to vector<2x32xbf16>
    %232 = vector.extract_strided_slice %85 {offsets = [0, 1, 9, 0], sizes = [2, 1, 1, 32], strides = [1, 1, 1, 1]} : vector<2x4x22x32xbf16> to vector<2x1x1x32xbf16>
    %233 = vector.shape_cast %232 : vector<2x1x1x32xbf16> to vector<2x32xbf16>
    %234 = vector.extract_strided_slice %85 {offsets = [0, 1, 10, 0], sizes = [2, 1, 1, 32], strides = [1, 1, 1, 1]} : vector<2x4x22x32xbf16> to vector<2x1x1x32xbf16>
    %235 = vector.shape_cast %234 : vector<2x1x1x32xbf16> to vector<2x32xbf16>
    %236 = vector.extract_strided_slice %85 {offsets = [0, 1, 11, 0], sizes = [2, 1, 1, 32], strides = [1, 1, 1, 1]} : vector<2x4x22x32xbf16> to vector<2x1x1x32xbf16>
    %237 = vector.shape_cast %236 : vector<2x1x1x32xbf16> to vector<2x32xbf16>
    %238 = vector.extract_strided_slice %85 {offsets = [0, 2, 8, 0], sizes = [2, 1, 1, 32], strides = [1, 1, 1, 1]} : vector<2x4x22x32xbf16> to vector<2x1x1x32xbf16>
    %239 = vector.shape_cast %238 : vector<2x1x1x32xbf16> to vector<2x32xbf16>
    %240 = vector.extract_strided_slice %85 {offsets = [0, 2, 9, 0], sizes = [2, 1, 1, 32], strides = [1, 1, 1, 1]} : vector<2x4x22x32xbf16> to vector<2x1x1x32xbf16>
    %241 = vector.shape_cast %240 : vector<2x1x1x32xbf16> to vector<2x32xbf16>
    %242 = vector.extract_strided_slice %85 {offsets = [0, 2, 10, 0], sizes = [2, 1, 1, 32], strides = [1, 1, 1, 1]} : vector<2x4x22x32xbf16> to vector<2x1x1x32xbf16>
    %243 = vector.shape_cast %242 : vector<2x1x1x32xbf16> to vector<2x32xbf16>
    %244 = vector.extract_strided_slice %85 {offsets = [0, 2, 11, 0], sizes = [2, 1, 1, 32], strides = [1, 1, 1, 1]} : vector<2x4x22x32xbf16> to vector<2x1x1x32xbf16>
    %245 = vector.shape_cast %244 : vector<2x1x1x32xbf16> to vector<2x32xbf16>
    %246 = vector.extract_strided_slice %85 {offsets = [0, 3, 8, 0], sizes = [2, 1, 1, 32], strides = [1, 1, 1, 1]} : vector<2x4x22x32xbf16> to vector<2x1x1x32xbf16>
    %247 = vector.shape_cast %246 : vector<2x1x1x32xbf16> to vector<2x32xbf16>
    %248 = vector.extract_strided_slice %85 {offsets = [0, 3, 9, 0], sizes = [2, 1, 1, 32], strides = [1, 1, 1, 1]} : vector<2x4x22x32xbf16> to vector<2x1x1x32xbf16>
    %249 = vector.shape_cast %248 : vector<2x1x1x32xbf16> to vector<2x32xbf16>
    %250 = vector.extract_strided_slice %85 {offsets = [0, 3, 10, 0], sizes = [2, 1, 1, 32], strides = [1, 1, 1, 1]} : vector<2x4x22x32xbf16> to vector<2x1x1x32xbf16>
    %251 = vector.shape_cast %250 : vector<2x1x1x32xbf16> to vector<2x32xbf16>
    %252 = vector.extract_strided_slice %85 {offsets = [0, 3, 11, 0], sizes = [2, 1, 1, 32], strides = [1, 1, 1, 1]} : vector<2x4x22x32xbf16> to vector<2x1x1x32xbf16>
    %253 = vector.shape_cast %252 : vector<2x1x1x32xbf16> to vector<2x32xbf16>
    %254 = tpu.concatenate %223, %225, %227, %229, %231, %233, %235, %237, %239, %241, %243, %245, %247, %249, %251, %253 in 1 : vector<2x32xbf16>, vector<2x32xbf16>, vector<2x32xbf16>, vector<2x32xbf16>, vector<2x32xbf16>, vector<2x32xbf16>, vector<2x32xbf16>, vector<2x32xbf16>, vector<2x32xbf16>, vector<2x32xbf16>, vector<2x32xbf16>, vector<2x32xbf16>, vector<2x32xbf16>, vector<2x32xbf16>, vector<2x32xbf16>, vector<2x32xbf16> -> vector<2x512xbf16>
    %255 = vector.shape_cast %254 : vector<2x512xbf16> to vector<2x1x512xbf16>
    %256 = vector.extract_strided_slice %85 {offsets = [0, 0, 10, 0], sizes = [2, 1, 1, 32], strides = [1, 1, 1, 1]} : vector<2x4x22x32xbf16> to vector<2x1x1x32xbf16>
    %257 = vector.shape_cast %256 : vector<2x1x1x32xbf16> to vector<2x32xbf16>
    %258 = vector.extract_strided_slice %85 {offsets = [0, 0, 11, 0], sizes = [2, 1, 1, 32], strides = [1, 1, 1, 1]} : vector<2x4x22x32xbf16> to vector<2x1x1x32xbf16>
    %259 = vector.shape_cast %258 : vector<2x1x1x32xbf16> to vector<2x32xbf16>
    %260 = vector.extract_strided_slice %85 {offsets = [0, 0, 12, 0], sizes = [2, 1, 1, 32], strides = [1, 1, 1, 1]} : vector<2x4x22x32xbf16> to vector<2x1x1x32xbf16>
    %261 = vector.shape_cast %260 : vector<2x1x1x32xbf16> to vector<2x32xbf16>
    %262 = vector.extract_strided_slice %85 {offsets = [0, 0, 13, 0], sizes = [2, 1, 1, 32], strides = [1, 1, 1, 1]} : vector<2x4x22x32xbf16> to vector<2x1x1x32xbf16>
    %263 = vector.shape_cast %262 : vector<2x1x1x32xbf16> to vector<2x32xbf16>
    %264 = vector.extract_strided_slice %85 {offsets = [0, 1, 10, 0], sizes = [2, 1, 1, 32], strides = [1, 1, 1, 1]} : vector<2x4x22x32xbf16> to vector<2x1x1x32xbf16>
    %265 = vector.shape_cast %264 : vector<2x1x1x32xbf16> to vector<2x32xbf16>
    %266 = vector.extract_strided_slice %85 {offsets = [0, 1, 11, 0], sizes = [2, 1, 1, 32], strides = [1, 1, 1, 1]} : vector<2x4x22x32xbf16> to vector<2x1x1x32xbf16>
    %267 = vector.shape_cast %266 : vector<2x1x1x32xbf16> to vector<2x32xbf16>
    %268 = vector.extract_strided_slice %85 {offsets = [0, 1, 12, 0], sizes = [2, 1, 1, 32], strides = [1, 1, 1, 1]} : vector<2x4x22x32xbf16> to vector<2x1x1x32xbf16>
    %269 = vector.shape_cast %268 : vector<2x1x1x32xbf16> to vector<2x32xbf16>
    %270 = vector.extract_strided_slice %85 {offsets = [0, 1, 13, 0], sizes = [2, 1, 1, 32], strides = [1, 1, 1, 1]} : vector<2x4x22x32xbf16> to vector<2x1x1x32xbf16>
    %271 = vector.shape_cast %270 : vector<2x1x1x32xbf16> to vector<2x32xbf16>
    %272 = vector.extract_strided_slice %85 {offsets = [0, 2, 10, 0], sizes = [2, 1, 1, 32], strides = [1, 1, 1, 1]} : vector<2x4x22x32xbf16> to vector<2x1x1x32xbf16>
    %273 = vector.shape_cast %272 : vector<2x1x1x32xbf16> to vector<2x32xbf16>
    %274 = vector.extract_strided_slice %85 {offsets = [0, 2, 11, 0], sizes = [2, 1, 1, 32], strides = [1, 1, 1, 1]} : vector<2x4x22x32xbf16> to vector<2x1x1x32xbf16>
    %275 = vector.shape_cast %274 : vector<2x1x1x32xbf16> to vector<2x32xbf16>
    %276 = vector.extract_strided_slice %85 {offsets = [0, 2, 12, 0], sizes = [2, 1, 1, 32], strides = [1, 1, 1, 1]} : vector<2x4x22x32xbf16> to vector<2x1x1x32xbf16>
    %277 = vector.shape_cast %276 : vector<2x1x1x32xbf16> to vector<2x32xbf16>
    %278 = vector.extract_strided_slice %85 {offsets = [0, 2, 13, 0], sizes = [2, 1, 1, 32], strides = [1, 1, 1, 1]} : vector<2x4x22x32xbf16> to vector<2x1x1x32xbf16>
    %279 = vector.shape_cast %278 : vector<2x1x1x32xbf16> to vector<2x32xbf16>
    %280 = vector.extract_strided_slice %85 {offsets = [0, 3, 10, 0], sizes = [2, 1, 1, 32], strides = [1, 1, 1, 1]} : vector<2x4x22x32xbf16> to vector<2x1x1x32xbf16>
    %281 = vector.shape_cast %280 : vector<2x1x1x32xbf16> to vector<2x32xbf16>
    %282 = vector.extract_strided_slice %85 {offsets = [0, 3, 11, 0], sizes = [2, 1, 1, 32], strides = [1, 1, 1, 1]} : vector<2x4x22x32xbf16> to vector<2x1x1x32xbf16>
    %283 = vector.shape_cast %282 : vector<2x1x1x32xbf16> to vector<2x32xbf16>
    %284 = vector.extract_strided_slice %85 {offsets = [0, 3, 12, 0], sizes = [2, 1, 1, 32], strides = [1, 1, 1, 1]} : vector<2x4x22x32xbf16> to vector<2x1x1x32xbf16>
    %285 = vector.shape_cast %284 : vector<2x1x1x32xbf16> to vector<2x32xbf16>
    %286 = vector.extract_strided_slice %85 {offsets = [0, 3, 13, 0], sizes = [2, 1, 1, 32], strides = [1, 1, 1, 1]} : vector<2x4x22x32xbf16> to vector<2x1x1x32xbf16>
    %287 = vector.shape_cast %286 : vector<2x1x1x32xbf16> to vector<2x32xbf16>
    %288 = tpu.concatenate %257, %259, %261, %263, %265, %267, %269, %271, %273, %275, %277, %279, %281, %283, %285, %287 in 1 : vector<2x32xbf16>, vector<2x32xbf16>, vector<2x32xbf16>, vector<2x32xbf16>, vector<2x32xbf16>, vector<2x32xbf16>, vector<2x32xbf16>, vector<2x32xbf16>, vector<2x32xbf16>, vector<2x32xbf16>, vector<2x32xbf16>, vector<2x32xbf16>, vector<2x32xbf16>, vector<2x32xbf16>, vector<2x32xbf16>, vector<2x32xbf16> -> vector<2x512xbf16>
    %289 = vector.shape_cast %288 : vector<2x512xbf16> to vector<2x1x512xbf16>
    %290 = vector.extract_strided_slice %85 {offsets = [0, 0, 12, 0], sizes = [2, 1, 1, 32], strides = [1, 1, 1, 1]} : vector<2x4x22x32xbf16> to vector<2x1x1x32xbf16>
    %291 = vector.shape_cast %290 : vector<2x1x1x32xbf16> to vector<2x32xbf16>
    %292 = vector.extract_strided_slice %85 {offsets = [0, 0, 13, 0], sizes = [2, 1, 1, 32], strides = [1, 1, 1, 1]} : vector<2x4x22x32xbf16> to vector<2x1x1x32xbf16>
    %293 = vector.shape_cast %292 : vector<2x1x1x32xbf16> to vector<2x32xbf16>
    %294 = vector.extract_strided_slice %85 {offsets = [0, 0, 14, 0], sizes = [2, 1, 1, 32], strides = [1, 1, 1, 1]} : vector<2x4x22x32xbf16> to vector<2x1x1x32xbf16>
    %295 = vector.shape_cast %294 : vector<2x1x1x32xbf16> to vector<2x32xbf16>
    %296 = vector.extract_strided_slice %85 {offsets = [0, 0, 15, 0], sizes = [2, 1, 1, 32], strides = [1, 1, 1, 1]} : vector<2x4x22x32xbf16> to vector<2x1x1x32xbf16>
    %297 = vector.shape_cast %296 : vector<2x1x1x32xbf16> to vector<2x32xbf16>
    %298 = vector.extract_strided_slice %85 {offsets = [0, 1, 12, 0], sizes = [2, 1, 1, 32], strides = [1, 1, 1, 1]} : vector<2x4x22x32xbf16> to vector<2x1x1x32xbf16>
    %299 = vector.shape_cast %298 : vector<2x1x1x32xbf16> to vector<2x32xbf16>
    %300 = vector.extract_strided_slice %85 {offsets = [0, 1, 13, 0], sizes = [2, 1, 1, 32], strides = [1, 1, 1, 1]} : vector<2x4x22x32xbf16> to vector<2x1x1x32xbf16>
    %301 = vector.shape_cast %300 : vector<2x1x1x32xbf16> to vector<2x32xbf16>
    %302 = vector.extract_strided_slice %85 {offsets = [0, 1, 14, 0], sizes = [2, 1, 1, 32], strides = [1, 1, 1, 1]} : vector<2x4x22x32xbf16> to vector<2x1x1x32xbf16>
    %303 = vector.shape_cast %302 : vector<2x1x1x32xbf16> to vector<2x32xbf16>
    %304 = vector.extract_strided_slice %85 {offsets = [0, 1, 15, 0], sizes = [2, 1, 1, 32], strides = [1, 1, 1, 1]} : vector<2x4x22x32xbf16> to vector<2x1x1x32xbf16>
    %305 = vector.shape_cast %304 : vector<2x1x1x32xbf16> to vector<2x32xbf16>
    %306 = vector.extract_strided_slice %85 {offsets = [0, 2, 12, 0], sizes = [2, 1, 1, 32], strides = [1, 1, 1, 1]} : vector<2x4x22x32xbf16> to vector<2x1x1x32xbf16>
    %307 = vector.shape_cast %306 : vector<2x1x1x32xbf16> to vector<2x32xbf16>
    %308 = vector.extract_strided_slice %85 {offsets = [0, 2, 13, 0], sizes = [2, 1, 1, 32], strides = [1, 1, 1, 1]} : vector<2x4x22x32xbf16> to vector<2x1x1x32xbf16>
    %309 = vector.shape_cast %308 : vector<2x1x1x32xbf16> to vector<2x32xbf16>
    %310 = vector.extract_strided_slice %85 {offsets = [0, 2, 14, 0], sizes = [2, 1, 1, 32], strides = [1, 1, 1, 1]} : vector<2x4x22x32xbf16> to vector<2x1x1x32xbf16>
    %311 = vector.shape_cast %310 : vector<2x1x1x32xbf16> to vector<2x32xbf16>
    %312 = vector.extract_strided_slice %85 {offsets = [0, 2, 15, 0], sizes = [2, 1, 1, 32], strides = [1, 1, 1, 1]} : vector<2x4x22x32xbf16> to vector<2x1x1x32xbf16>
    %313 = vector.shape_cast %312 : vector<2x1x1x32xbf16> to vector<2x32xbf16>
    %314 = vector.extract_strided_slice %85 {offsets = [0, 3, 12, 0], sizes = [2, 1, 1, 32], strides = [1, 1, 1, 1]} : vector<2x4x22x32xbf16> to vector<2x1x1x32xbf16>
    %315 = vector.shape_cast %314 : vector<2x1x1x32xbf16> to vector<2x32xbf16>
    %316 = vector.extract_strided_slice %85 {offsets = [0, 3, 13, 0], sizes = [2, 1, 1, 32], strides = [1, 1, 1, 1]} : vector<2x4x22x32xbf16> to vector<2x1x1x32xbf16>
    %317 = vector.shape_cast %316 : vector<2x1x1x32xbf16> to vector<2x32xbf16>
    %318 = vector.extract_strided_slice %85 {offsets = [0, 3, 14, 0], sizes = [2, 1, 1, 32], strides = [1, 1, 1, 1]} : vector<2x4x22x32xbf16> to vector<2x1x1x32xbf16>
    %319 = vector.shape_cast %318 : vector<2x1x1x32xbf16> to vector<2x32xbf16>
    %320 = vector.extract_strided_slice %85 {offsets = [0, 3, 15, 0], sizes = [2, 1, 1, 32], strides = [1, 1, 1, 1]} : vector<2x4x22x32xbf16> to vector<2x1x1x32xbf16>
    %321 = vector.shape_cast %320 : vector<2x1x1x32xbf16> to vector<2x32xbf16>
    %322 = tpu.concatenate %291, %293, %295, %297, %299, %301, %303, %305, %307, %309, %311, %313, %315, %317, %319, %321 in 1 : vector<2x32xbf16>, vector<2x32xbf16>, vector<2x32xbf16>, vector<2x32xbf16>, vector<2x32xbf16>, vector<2x32xbf16>, vector<2x32xbf16>, vector<2x32xbf16>, vector<2x32xbf16>, vector<2x32xbf16>, vector<2x32xbf16>, vector<2x32xbf16>, vector<2x32xbf16>, vector<2x32xbf16>, vector<2x32xbf16>, vector<2x32xbf16> -> vector<2x512xbf16>
    %323 = vector.shape_cast %322 : vector<2x512xbf16> to vector<2x1x512xbf16>
    %324 = vector.extract_strided_slice %85 {offsets = [0, 0, 14, 0], sizes = [2, 1, 1, 32], strides = [1, 1, 1, 1]} : vector<2x4x22x32xbf16> to vector<2x1x1x32xbf16>
    %325 = vector.shape_cast %324 : vector<2x1x1x32xbf16> to vector<2x32xbf16>
    %326 = vector.extract_strided_slice %85 {offsets = [0, 0, 15, 0], sizes = [2, 1, 1, 32], strides = [1, 1, 1, 1]} : vector<2x4x22x32xbf16> to vector<2x1x1x32xbf16>
    %327 = vector.shape_cast %326 : vector<2x1x1x32xbf16> to vector<2x32xbf16>
    %328 = vector.extract_strided_slice %85 {offsets = [0, 0, 16, 0], sizes = [2, 1, 1, 32], strides = [1, 1, 1, 1]} : vector<2x4x22x32xbf16> to vector<2x1x1x32xbf16>
    %329 = vector.shape_cast %328 : vector<2x1x1x32xbf16> to vector<2x32xbf16>
    %330 = vector.extract_strided_slice %85 {offsets = [0, 0, 17, 0], sizes = [2, 1, 1, 32], strides = [1, 1, 1, 1]} : vector<2x4x22x32xbf16> to vector<2x1x1x32xbf16>
    %331 = vector.shape_cast %330 : vector<2x1x1x32xbf16> to vector<2x32xbf16>
    %332 = vector.extract_strided_slice %85 {offsets = [0, 1, 14, 0], sizes = [2, 1, 1, 32], strides = [1, 1, 1, 1]} : vector<2x4x22x32xbf16> to vector<2x1x1x32xbf16>
    %333 = vector.shape_cast %332 : vector<2x1x1x32xbf16> to vector<2x32xbf16>
    %334 = vector.extract_strided_slice %85 {offsets = [0, 1, 15, 0], sizes = [2, 1, 1, 32], strides = [1, 1, 1, 1]} : vector<2x4x22x32xbf16> to vector<2x1x1x32xbf16>
    %335 = vector.shape_cast %334 : vector<2x1x1x32xbf16> to vector<2x32xbf16>
    %336 = vector.extract_strided_slice %85 {offsets = [0, 1, 16, 0], sizes = [2, 1, 1, 32], strides = [1, 1, 1, 1]} : vector<2x4x22x32xbf16> to vector<2x1x1x32xbf16>
    %337 = vector.shape_cast %336 : vector<2x1x1x32xbf16> to vector<2x32xbf16>
    %338 = vector.extract_strided_slice %85 {offsets = [0, 1, 17, 0], sizes = [2, 1, 1, 32], strides = [1, 1, 1, 1]} : vector<2x4x22x32xbf16> to vector<2x1x1x32xbf16>
    %339 = vector.shape_cast %338 : vector<2x1x1x32xbf16> to vector<2x32xbf16>
    %340 = vector.extract_strided_slice %85 {offsets = [0, 2, 14, 0], sizes = [2, 1, 1, 32], strides = [1, 1, 1, 1]} : vector<2x4x22x32xbf16> to vector<2x1x1x32xbf16>
    %341 = vector.shape_cast %340 : vector<2x1x1x32xbf16> to vector<2x32xbf16>
    %342 = vector.extract_strided_slice %85 {offsets = [0, 2, 15, 0], sizes = [2, 1, 1, 32], strides = [1, 1, 1, 1]} : vector<2x4x22x32xbf16> to vector<2x1x1x32xbf16>
    %343 = vector.shape_cast %342 : vector<2x1x1x32xbf16> to vector<2x32xbf16>
    %344 = vector.extract_strided_slice %85 {offsets = [0, 2, 16, 0], sizes = [2, 1, 1, 32], strides = [1, 1, 1, 1]} : vector<2x4x22x32xbf16> to vector<2x1x1x32xbf16>
    %345 = vector.shape_cast %344 : vector<2x1x1x32xbf16> to vector<2x32xbf16>
    %346 = vector.extract_strided_slice %85 {offsets = [0, 2, 17, 0], sizes = [2, 1, 1, 32], strides = [1, 1, 1, 1]} : vector<2x4x22x32xbf16> to vector<2x1x1x32xbf16>
    %347 = vector.shape_cast %346 : vector<2x1x1x32xbf16> to vector<2x32xbf16>
    %348 = vector.extract_strided_slice %85 {offsets = [0, 3, 14, 0], sizes = [2, 1, 1, 32], strides = [1, 1, 1, 1]} : vector<2x4x22x32xbf16> to vector<2x1x1x32xbf16>
    %349 = vector.shape_cast %348 : vector<2x1x1x32xbf16> to vector<2x32xbf16>
    %350 = vector.extract_strided_slice %85 {offsets = [0, 3, 15, 0], sizes = [2, 1, 1, 32], strides = [1, 1, 1, 1]} : vector<2x4x22x32xbf16> to vector<2x1x1x32xbf16>
    %351 = vector.shape_cast %350 : vector<2x1x1x32xbf16> to vector<2x32xbf16>
    %352 = vector.extract_strided_slice %85 {offsets = [0, 3, 16, 0], sizes = [2, 1, 1, 32], strides = [1, 1, 1, 1]} : vector<2x4x22x32xbf16> to vector<2x1x1x32xbf16>
    %353 = vector.shape_cast %352 : vector<2x1x1x32xbf16> to vector<2x32xbf16>
    %354 = vector.extract_strided_slice %85 {offsets = [0, 3, 17, 0], sizes = [2, 1, 1, 32], strides = [1, 1, 1, 1]} : vector<2x4x22x32xbf16> to vector<2x1x1x32xbf16>
    %355 = vector.shape_cast %354 : vector<2x1x1x32xbf16> to vector<2x32xbf16>
    %356 = tpu.concatenate %325, %327, %329, %331, %333, %335, %337, %339, %341, %343, %345, %347, %349, %351, %353, %355 in 1 : vector<2x32xbf16>, vector<2x32xbf16>, vector<2x32xbf16>, vector<2x32xbf16>, vector<2x32xbf16>, vector<2x32xbf16>, vector<2x32xbf16>, vector<2x32xbf16>, vector<2x32xbf16>, vector<2x32xbf16>, vector<2x32xbf16>, vector<2x32xbf16>, vector<2x32xbf16>, vector<2x32xbf16>, vector<2x32xbf16>, vector<2x32xbf16> -> vector<2x512xbf16>
    %357 = vector.shape_cast %356 : vector<2x512xbf16> to vector<2x1x512xbf16>
    %358 = vector.extract_strided_slice %85 {offsets = [0, 0, 16, 0], sizes = [2, 1, 1, 32], strides = [1, 1, 1, 1]} : vector<2x4x22x32xbf16> to vector<2x1x1x32xbf16>
    %359 = vector.shape_cast %358 : vector<2x1x1x32xbf16> to vector<2x32xbf16>
    %360 = vector.extract_strided_slice %85 {offsets = [0, 0, 17, 0], sizes = [2, 1, 1, 32], strides = [1, 1, 1, 1]} : vector<2x4x22x32xbf16> to vector<2x1x1x32xbf16>
    %361 = vector.shape_cast %360 : vector<2x1x1x32xbf16> to vector<2x32xbf16>
    %362 = vector.extract_strided_slice %85 {offsets = [0, 0, 18, 0], sizes = [2, 1, 1, 32], strides = [1, 1, 1, 1]} : vector<2x4x22x32xbf16> to vector<2x1x1x32xbf16>
    %363 = vector.shape_cast %362 : vector<2x1x1x32xbf16> to vector<2x32xbf16>
    %364 = vector.extract_strided_slice %85 {offsets = [0, 0, 19, 0], sizes = [2, 1, 1, 32], strides = [1, 1, 1, 1]} : vector<2x4x22x32xbf16> to vector<2x1x1x32xbf16>
    %365 = vector.shape_cast %364 : vector<2x1x1x32xbf16> to vector<2x32xbf16>
    %366 = vector.extract_strided_slice %85 {offsets = [0, 1, 16, 0], sizes = [2, 1, 1, 32], strides = [1, 1, 1, 1]} : vector<2x4x22x32xbf16> to vector<2x1x1x32xbf16>
    %367 = vector.shape_cast %366 : vector<2x1x1x32xbf16> to vector<2x32xbf16>
    %368 = vector.extract_strided_slice %85 {offsets = [0, 1, 17, 0], sizes = [2, 1, 1, 32], strides = [1, 1, 1, 1]} : vector<2x4x22x32xbf16> to vector<2x1x1x32xbf16>
    %369 = vector.shape_cast %368 : vector<2x1x1x32xbf16> to vector<2x32xbf16>
    %370 = vector.extract_strided_slice %85 {offsets = [0, 1, 18, 0], sizes = [2, 1, 1, 32], strides = [1, 1, 1, 1]} : vector<2x4x22x32xbf16> to vector<2x1x1x32xbf16>
    %371 = vector.shape_cast %370 : vector<2x1x1x32xbf16> to vector<2x32xbf16>
    %372 = vector.extract_strided_slice %85 {offsets = [0, 1, 19, 0], sizes = [2, 1, 1, 32], strides = [1, 1, 1, 1]} : vector<2x4x22x32xbf16> to vector<2x1x1x32xbf16>
    %373 = vector.shape_cast %372 : vector<2x1x1x32xbf16> to vector<2x32xbf16>
    %374 = vector.extract_strided_slice %85 {offsets = [0, 2, 16, 0], sizes = [2, 1, 1, 32], strides = [1, 1, 1, 1]} : vector<2x4x22x32xbf16> to vector<2x1x1x32xbf16>
    %375 = vector.shape_cast %374 : vector<2x1x1x32xbf16> to vector<2x32xbf16>
    %376 = vector.extract_strided_slice %85 {offsets = [0, 2, 17, 0], sizes = [2, 1, 1, 32], strides = [1, 1, 1, 1]} : vector<2x4x22x32xbf16> to vector<2x1x1x32xbf16>
    %377 = vector.shape_cast %376 : vector<2x1x1x32xbf16> to vector<2x32xbf16>
    %378 = vector.extract_strided_slice %85 {offsets = [0, 2, 18, 0], sizes = [2, 1, 1, 32], strides = [1, 1, 1, 1]} : vector<2x4x22x32xbf16> to vector<2x1x1x32xbf16>
    %379 = vector.shape_cast %378 : vector<2x1x1x32xbf16> to vector<2x32xbf16>
    %380 = vector.extract_strided_slice %85 {offsets = [0, 2, 19, 0], sizes = [2, 1, 1, 32], strides = [1, 1, 1, 1]} : vector<2x4x22x32xbf16> to vector<2x1x1x32xbf16>
    %381 = vector.shape_cast %380 : vector<2x1x1x32xbf16> to vector<2x32xbf16>
    %382 = vector.extract_strided_slice %85 {offsets = [0, 3, 16, 0], sizes = [2, 1, 1, 32], strides = [1, 1, 1, 1]} : vector<2x4x22x32xbf16> to vector<2x1x1x32xbf16>
    %383 = vector.shape_cast %382 : vector<2x1x1x32xbf16> to vector<2x32xbf16>
    %384 = vector.extract_strided_slice %85 {offsets = [0, 3, 17, 0], sizes = [2, 1, 1, 32], strides = [1, 1, 1, 1]} : vector<2x4x22x32xbf16> to vector<2x1x1x32xbf16>
    %385 = vector.shape_cast %384 : vector<2x1x1x32xbf16> to vector<2x32xbf16>
    %386 = vector.extract_strided_slice %85 {offsets = [0, 3, 18, 0], sizes = [2, 1, 1, 32], strides = [1, 1, 1, 1]} : vector<2x4x22x32xbf16> to vector<2x1x1x32xbf16>
    %387 = vector.shape_cast %386 : vector<2x1x1x32xbf16> to vector<2x32xbf16>
    %388 = vector.extract_strided_slice %85 {offsets = [0, 3, 19, 0], sizes = [2, 1, 1, 32], strides = [1, 1, 1, 1]} : vector<2x4x22x32xbf16> to vector<2x1x1x32xbf16>
    %389 = vector.shape_cast %388 : vector<2x1x1x32xbf16> to vector<2x32xbf16>
    %390 = tpu.concatenate %359, %361, %363, %365, %367, %369, %371, %373, %375, %377, %379, %381, %383, %385, %387, %389 in 1 : vector<2x32xbf16>, vector<2x32xbf16>, vector<2x32xbf16>, vector<2x32xbf16>, vector<2x32xbf16>, vector<2x32xbf16>, vector<2x32xbf16>, vector<2x32xbf16>, vector<2x32xbf16>, vector<2x32xbf16>, vector<2x32xbf16>, vector<2x32xbf16>, vector<2x32xbf16>, vector<2x32xbf16>, vector<2x32xbf16>, vector<2x32xbf16> -> vector<2x512xbf16>
    %391 = vector.shape_cast %390 : vector<2x512xbf16> to vector<2x1x512xbf16>
    %392 = vector.extract_strided_slice %85 {offsets = [0, 0, 18, 0], sizes = [2, 1, 1, 32], strides = [1, 1, 1, 1]} : vector<2x4x22x32xbf16> to vector<2x1x1x32xbf16>
    %393 = vector.shape_cast %392 : vector<2x1x1x32xbf16> to vector<2x32xbf16>
    %394 = vector.extract_strided_slice %85 {offsets = [0, 0, 19, 0], sizes = [2, 1, 1, 32], strides = [1, 1, 1, 1]} : vector<2x4x22x32xbf16> to vector<2x1x1x32xbf16>
    %395 = vector.shape_cast %394 : vector<2x1x1x32xbf16> to vector<2x32xbf16>
    %396 = vector.extract_strided_slice %85 {offsets = [0, 0, 20, 0], sizes = [2, 1, 1, 32], strides = [1, 1, 1, 1]} : vector<2x4x22x32xbf16> to vector<2x1x1x32xbf16>
    %397 = vector.shape_cast %396 : vector<2x1x1x32xbf16> to vector<2x32xbf16>
    %398 = vector.extract_strided_slice %85 {offsets = [0, 0, 21, 0], sizes = [2, 1, 1, 32], strides = [1, 1, 1, 1]} : vector<2x4x22x32xbf16> to vector<2x1x1x32xbf16>
    %399 = vector.shape_cast %398 : vector<2x1x1x32xbf16> to vector<2x32xbf16>
    %400 = vector.extract_strided_slice %85 {offsets = [0, 1, 18, 0], sizes = [2, 1, 1, 32], strides = [1, 1, 1, 1]} : vector<2x4x22x32xbf16> to vector<2x1x1x32xbf16>
    %401 = vector.shape_cast %400 : vector<2x1x1x32xbf16> to vector<2x32xbf16>
    %402 = vector.extract_strided_slice %85 {offsets = [0, 1, 19, 0], sizes = [2, 1, 1, 32], strides = [1, 1, 1, 1]} : vector<2x4x22x32xbf16> to vector<2x1x1x32xbf16>
    %403 = vector.shape_cast %402 : vector<2x1x1x32xbf16> to vector<2x32xbf16>
    %404 = vector.extract_strided_slice %85 {offsets = [0, 1, 20, 0], sizes = [2, 1, 1, 32], strides = [1, 1, 1, 1]} : vector<2x4x22x32xbf16> to vector<2x1x1x32xbf16>
    %405 = vector.shape_cast %404 : vector<2x1x1x32xbf16> to vector<2x32xbf16>
    %406 = vector.extract_strided_slice %85 {offsets = [0, 1, 21, 0], sizes = [2, 1, 1, 32], strides = [1, 1, 1, 1]} : vector<2x4x22x32xbf16> to vector<2x1x1x32xbf16>
    %407 = vector.shape_cast %406 : vector<2x1x1x32xbf16> to vector<2x32xbf16>
    %408 = vector.extract_strided_slice %85 {offsets = [0, 2, 18, 0], sizes = [2, 1, 1, 32], strides = [1, 1, 1, 1]} : vector<2x4x22x32xbf16> to vector<2x1x1x32xbf16>
    %409 = vector.shape_cast %408 : vector<2x1x1x32xbf16> to vector<2x32xbf16>
    %410 = vector.extract_strided_slice %85 {offsets = [0, 2, 19, 0], sizes = [2, 1, 1, 32], strides = [1, 1, 1, 1]} : vector<2x4x22x32xbf16> to vector<2x1x1x32xbf16>
    %411 = vector.shape_cast %410 : vector<2x1x1x32xbf16> to vector<2x32xbf16>
    %412 = vector.extract_strided_slice %85 {offsets = [0, 2, 20, 0], sizes = [2, 1, 1, 32], strides = [1, 1, 1, 1]} : vector<2x4x22x32xbf16> to vector<2x1x1x32xbf16>
    %413 = vector.shape_cast %412 : vector<2x1x1x32xbf16> to vector<2x32xbf16>
    %414 = vector.extract_strided_slice %85 {offsets = [0, 2, 21, 0], sizes = [2, 1, 1, 32], strides = [1, 1, 1, 1]} : vector<2x4x22x32xbf16> to vector<2x1x1x32xbf16>
    %415 = vector.shape_cast %414 : vector<2x1x1x32xbf16> to vector<2x32xbf16>
    %416 = vector.extract_strided_slice %85 {offsets = [0, 3, 18, 0], sizes = [2, 1, 1, 32], strides = [1, 1, 1, 1]} : vector<2x4x22x32xbf16> to vector<2x1x1x32xbf16>
    %417 = vector.shape_cast %416 : vector<2x1x1x32xbf16> to vector<2x32xbf16>
    %418 = vector.extract_strided_slice %85 {offsets = [0, 3, 19, 0], sizes = [2, 1, 1, 32], strides = [1, 1, 1, 1]} : vector<2x4x22x32xbf16> to vector<2x1x1x32xbf16>
    %419 = vector.shape_cast %418 : vector<2x1x1x32xbf16> to vector<2x32xbf16>
    %420 = vector.extract_strided_slice %85 {offsets = [0, 3, 20, 0], sizes = [2, 1, 1, 32], strides = [1, 1, 1, 1]} : vector<2x4x22x32xbf16> to vector<2x1x1x32xbf16>
    %421 = vector.shape_cast %420 : vector<2x1x1x32xbf16> to vector<2x32xbf16>
    %422 = vector.extract_strided_slice %85 {offsets = [0, 3, 21, 0], sizes = [2, 1, 1, 32], strides = [1, 1, 1, 1]} : vector<2x4x22x32xbf16> to vector<2x1x1x32xbf16>
    %423 = vector.shape_cast %422 : vector<2x1x1x32xbf16> to vector<2x32xbf16>
    %424 = tpu.concatenate %393, %395, %397, %399, %401, %403, %405, %407, %409, %411, %413, %415, %417, %419, %421, %423 in 1 : vector<2x32xbf16>, vector<2x32xbf16>, vector<2x32xbf16>, vector<2x32xbf16>, vector<2x32xbf16>, vector<2x32xbf16>, vector<2x32xbf16>, vector<2x32xbf16>, vector<2x32xbf16>, vector<2x32xbf16>, vector<2x32xbf16>, vector<2x32xbf16>, vector<2x32xbf16>, vector<2x32xbf16>, vector<2x32xbf16>, vector<2x32xbf16> -> vector<2x512xbf16>
    %425 = vector.shape_cast %424 : vector<2x512xbf16> to vector<2x1x512xbf16>
    %426 = tpu.concatenate %119, %153, %187, %221, %255, %289, %323, %357, %391, %425 in 1 : vector<2x1x512xbf16>, vector<2x1x512xbf16>, vector<2x1x512xbf16>, vector<2x1x512xbf16>, vector<2x1x512xbf16>, vector<2x1x512xbf16>, vector<2x1x512xbf16>, vector<2x1x512xbf16>, vector<2x1x512xbf16>, vector<2x1x512xbf16> -> vector<2x10x512xbf16>
    %427 = vector.shape_cast %426 : vector<2x10x512xbf16> to vector<20x512xbf16>
    %c0_8 = arith.constant 0 : index
    %c0_9 = arith.constant 0 : index
    %428 = vector.load %arg4[%c0_8, %c0_9] : memref<512x64xbf16, #tpu.memory_space<vmem>>, vector<512x64xbf16>
    %cst_10 = arith.constant dense<0.000000e+00> : vector<20x64xf32>
    %429 = tpu.matmul %427, %428, %cst_10 {dimension_numbers = #tpu.dot_dimension_numbers<[1], [0], [0], [1], [0, 0, 1, 1], [], []>} : vector<20x512xbf16>, vector<512x64xbf16>, vector<20x64xf32> -> vector<20x64xf32>
    %c0_11 = arith.constant 0 : index
    %c0_12 = arith.constant 0 : index
    %430 = vector.load %arg5[%c0_11, %c0_12] : memref<1x64xf32, #tpu.memory_space<vmem>>, vector<1x64xf32>
    %431 = vector.broadcast %430 : vector<1x64xf32> to vector<20x64xf32>
    %432 = arith.addf %429, %431 : vector<20x64xf32>
    %cst_13 = arith.constant 0.000000e+00 : f32
    %433 = vector.broadcast %cst_13 : f32 to vector<20x64xf32>
    %434 = arith.maximumf %432, %433 : vector<20x64xf32>
    %435 = arith.truncf %434 : vector<20x64xf32> to vector<20x64xbf16>
    %436 = vector.shape_cast %435 : vector<20x64xbf16> to vector<2x10x64xbf16>
    %cst_14 = arith.constant 0.000000e+00 : bf16
    %437 = vector.broadcast %cst_14 : bf16 to vector<2x1x64xbf16>
    %438 = tpu.concatenate %437, %436, %437 in 1 : vector<2x1x64xbf16>, vector<2x10x64xbf16>, vector<2x1x64xbf16> -> vector<2x12x64xbf16>
    %439 = vector.extract_strided_slice %438 {offsets = [0, 0, 0], sizes = [2, 10, 64], strides = [1, 1, 1]} : vector<2x12x64xbf16> to vector<2x10x64xbf16>
    %440 = vector.extract_strided_slice %438 {offsets = [0, 1, 0], sizes = [2, 10, 64], strides = [1, 1, 1]} : vector<2x12x64xbf16> to vector<2x10x64xbf16>
    %441 = vector.extract_strided_slice %438 {offsets = [0, 2, 0], sizes = [2, 10, 64], strides = [1, 1, 1]} : vector<2x12x64xbf16> to vector<2x10x64xbf16>
    %442 = tpu.concatenate %439, %440, %441 in 2 : vector<2x10x64xbf16>, vector<2x10x64xbf16>, vector<2x10x64xbf16> -> vector<2x10x192xbf16>
    %443 = vector.shape_cast %442 : vector<2x10x192xbf16> to vector<20x192xbf16>
    %c0_15 = arith.constant 0 : index
    %c0_16 = arith.constant 0 : index
    %444 = vector.load %arg6[%c0_15, %c0_16] : memref<192x64xbf16, #tpu.memory_space<vmem>>, vector<192x64xbf16>
    %cst_17 = arith.constant dense<0.000000e+00> : vector<20x64xf32>
    %445 = tpu.matmul %443, %444, %cst_17 {dimension_numbers = #tpu.dot_dimension_numbers<[1], [0], [0], [1], [0, 0, 1, 1], [], []>} : vector<20x192xbf16>, vector<192x64xbf16>, vector<20x64xf32> -> vector<20x64xf32>
    %c0_18 = arith.constant 0 : index
    %c0_19 = arith.constant 0 : index
    %446 = vector.load %arg7[%c0_18, %c0_19] : memref<1x64xf32, #tpu.memory_space<vmem>>, vector<1x64xf32>
    %447 = vector.broadcast %446 : vector<1x64xf32> to vector<20x64xf32>
    %448 = arith.addf %445, %447 : vector<20x64xf32>
    %cst_20 = arith.constant 0.000000e+00 : f32
    %449 = vector.broadcast %cst_20 : f32 to vector<20x64xf32>
    %450 = arith.maximumf %448, %449 : vector<20x64xf32>
    %451 = arith.truncf %450 : vector<20x64xf32> to vector<20x64xbf16>
    %452 = vector.shape_cast %451 : vector<20x64xbf16> to vector<2x10x64xbf16>
    %453 = vector.extract_strided_slice %452 {offsets = [0, 0, 0], sizes = [2, 1, 64], strides = [1, 1, 1]} : vector<2x10x64xbf16> to vector<2x1x64xbf16>
    %454 = vector.shape_cast %453 : vector<2x1x64xbf16> to vector<2x64xbf16>
    %455 = vector.extract_strided_slice %452 {offsets = [0, 1, 0], sizes = [2, 1, 64], strides = [1, 1, 1]} : vector<2x10x64xbf16> to vector<2x1x64xbf16>
    %456 = vector.shape_cast %455 : vector<2x1x64xbf16> to vector<2x64xbf16>
    %457 = vector.extract_strided_slice %452 {offsets = [0, 2, 0], sizes = [2, 1, 64], strides = [1, 1, 1]} : vector<2x10x64xbf16> to vector<2x1x64xbf16>
    %458 = vector.shape_cast %457 : vector<2x1x64xbf16> to vector<2x64xbf16>
    %459 = vector.extract_strided_slice %452 {offsets = [0, 3, 0], sizes = [2, 1, 64], strides = [1, 1, 1]} : vector<2x10x64xbf16> to vector<2x1x64xbf16>
    %460 = vector.shape_cast %459 : vector<2x1x64xbf16> to vector<2x64xbf16>
    %461 = vector.extract_strided_slice %452 {offsets = [0, 4, 0], sizes = [2, 1, 64], strides = [1, 1, 1]} : vector<2x10x64xbf16> to vector<2x1x64xbf16>
    %462 = vector.shape_cast %461 : vector<2x1x64xbf16> to vector<2x64xbf16>
    %463 = vector.extract_strided_slice %452 {offsets = [0, 5, 0], sizes = [2, 1, 64], strides = [1, 1, 1]} : vector<2x10x64xbf16> to vector<2x1x64xbf16>
    %464 = vector.shape_cast %463 : vector<2x1x64xbf16> to vector<2x64xbf16>
    %465 = vector.extract_strided_slice %452 {offsets = [0, 6, 0], sizes = [2, 1, 64], strides = [1, 1, 1]} : vector<2x10x64xbf16> to vector<2x1x64xbf16>
    %466 = vector.shape_cast %465 : vector<2x1x64xbf16> to vector<2x64xbf16>
    %467 = vector.extract_strided_slice %452 {offsets = [0, 7, 0], sizes = [2, 1, 64], strides = [1, 1, 1]} : vector<2x10x64xbf16> to vector<2x1x64xbf16>
    %468 = vector.shape_cast %467 : vector<2x1x64xbf16> to vector<2x64xbf16>
    %469 = vector.extract_strided_slice %452 {offsets = [0, 8, 0], sizes = [2, 1, 64], strides = [1, 1, 1]} : vector<2x10x64xbf16> to vector<2x1x64xbf16>
    %470 = vector.shape_cast %469 : vector<2x1x64xbf16> to vector<2x64xbf16>
    %471 = vector.extract_strided_slice %452 {offsets = [0, 9, 0], sizes = [2, 1, 64], strides = [1, 1, 1]} : vector<2x10x64xbf16> to vector<2x1x64xbf16>
    %472 = vector.shape_cast %471 : vector<2x1x64xbf16> to vector<2x64xbf16>
    %473 = tpu.concatenate %454, %456, %458, %460, %462, %464, %466, %468, %470, %472 in 1 : vector<2x64xbf16>, vector<2x64xbf16>, vector<2x64xbf16>, vector<2x64xbf16>, vector<2x64xbf16>, vector<2x64xbf16>, vector<2x64xbf16>, vector<2x64xbf16>, vector<2x64xbf16>, vector<2x64xbf16> -> vector<2x640xbf16>
    %c0_21 = arith.constant 0 : index
    %c0_22 = arith.constant 0 : index
    %474 = vector.load %arg8[%c0_21, %c0_22] : memref<640x512xbf16, #tpu.memory_space<vmem>>, vector<640x512xbf16>
    %cst_23 = arith.constant dense<0.000000e+00> : vector<2x512xf32>
    %475 = tpu.matmul %473, %474, %cst_23 {dimension_numbers = #tpu.dot_dimension_numbers<[1], [0], [0], [1], [0, 0, 1, 1], [], []>} : vector<2x640xbf16>, vector<640x512xbf16>, vector<2x512xf32> -> vector<2x512xf32>
    %c0_24 = arith.constant 0 : index
    %c0_25 = arith.constant 0 : index
    %476 = vector.load %arg9[%c0_24, %c0_25] : memref<1x512xf32, #tpu.memory_space<vmem>>, vector<1x512xf32>
    %477 = vector.broadcast %476 : vector<1x512xf32> to vector<2x512xf32>
    %478 = arith.addf %475, %477 : vector<2x512xf32>
    %cst_26 = arith.constant 0.000000e+00 : f32
    %479 = vector.broadcast %cst_26 : f32 to vector<2x512xf32>
    %480 = arith.maximumf %478, %479 : vector<2x512xf32>
    %c0_27 = arith.constant 0 : index
    %c0_28 = arith.constant 0 : index
    %481 = vector.load %arg10[%c0_27, %c0_28] : memref<2x512xf32, #tpu.memory_space<vmem>>, vector<2x512xf32>
    tpu.vector_store %arg10[%c0_27, %c0_28], %480 {strides = array<i32>} : memref<2x512xf32, #tpu.memory_space<vmem>>, vector<2x512xf32>,
    return
  }
  func.func @transform_0(%arg0: i32) -> (i32, i32, i32, i32) {
    %c0_i32 = arith.constant 0 : i32
    %c0_i32_0 = arith.constant 0 : i32
    %c0_i32_1 = arith.constant 0 : i32
    %c0_i32_2 = arith.constant 0 : i32
    return %arg0, %c0_i32, %c0_i32_0, %c0_i32_1 : i32, i32, i32, i32
  }
  func.func @transform_1(%arg0: i32) -> (i32, i32) {
    %c0_i32 = arith.constant 0 : i32
    %c0_i32_0 = arith.constant 0 : i32
    %c0_i32_1 = arith.constant 0 : i32
    return %c0_i32, %c0_i32_0 : i32, i32
  }
  func.func @transform_2(%arg0: i32) -> (i32, i32) {
    %c0_i32 = arith.constant 0 : i32
    %c0_i32_0 = arith.constant 0 : i32
    %c0_i32_1 = arith.constant 0 : i32
    return %c0_i32, %c0_i32_0 : i32, i32
  }
  func.func @transform_3(%arg0: i32) -> (i32, i32) {
    %c0_i32 = arith.constant 0 : i32
    %c0_i32_0 = arith.constant 0 : i32
    %c0_i32_1 = arith.constant 0 : i32
    return %c0_i32, %c0_i32_0 : i32, i32
  }
  func.func @transform_4(%arg0: i32) -> (i32, i32) {
    %c0_i32 = arith.constant 0 : i32
    %c0_i32_0 = arith.constant 0 : i32
    %c0_i32_1 = arith.constant 0 : i32
    return %c0_i32, %c0_i32_0 : i32, i32
  }
  func.func @transform_5(%arg0: i32) -> (i32, i32) {
    %c0_i32 = arith.constant 0 : i32
    %c0_i32_0 = arith.constant 0 : i32
    %c0_i32_1 = arith.constant 0 : i32
    return %c0_i32, %c0_i32_0 : i32, i32
  }
  func.func @transform_6(%arg0: i32) -> (i32, i32) {
    %c0_i32 = arith.constant 0 : i32
    %c0_i32_0 = arith.constant 0 : i32
    %c0_i32_1 = arith.constant 0 : i32
    return %c0_i32, %c0_i32_0 : i32, i32
  }
  func.func @transform_7(%arg0: i32) -> (i32, i32) {
    %c0_i32 = arith.constant 0 : i32
    %c0_i32_0 = arith.constant 0 : i32
    %c0_i32_1 = arith.constant 0 : i32
    return %c0_i32, %c0_i32_0 : i32, i32
  }
  func.func @transform_8(%arg0: i32) -> (i32, i32) {
    %c0_i32 = arith.constant 0 : i32
    %c0_i32_0 = arith.constant 0 : i32
    %c0_i32_1 = arith.constant 0 : i32
    return %c0_i32, %c0_i32_0 : i32, i32
  }
  func.func @transform_9(%arg0: i32) -> (i32, i32) {
    %c0_i32 = arith.constant 0 : i32
    %c0_i32_0 = arith.constant 0 : i32
    return %arg0, %c0_i32 : i32, i32
  }
}

</mosaic_0001>

<bundles_post_ra>
// kernel: local_pixel_state_embedder.1
= control target key start
LH: loop header
LB: loop body
LE: loop exit
PB: predicated region body
PF: predicated region fallthrough
CT: control target
= control target key end

     0   :  { %vm474_vm0 = vsmask.f32 7424  ;;  %s8198_s27 = smov 16   ;;  %vm1235_vm1 = vcmask 130048   ;;  %s8199_s16 = smov 32   ;;  %s12173_s0 = inlined_call_operand.vmem [shape: bf16[2,20,21,16], index: 0, kind: input, shape index: {}]   ;;  %s12174_s1 = inlined_call_operand.vmem [shape: bf16[256,32], index: 1, kind: input, shape index: {}]   ;;  %s12175_s2 = inlined_call_operand.vmem [shape: f32[1,32], index: 2, kind: input, shape index: {}]   ;;  %s12176_s3 = inlined_call_operand.vmem [shape: bf16[512,64], index: 3, kind: input, shape index: {}]   ;;  %s12177_s4 = inlined_call_operand.vmem [shape: f32[1,64], index: 4, kind: input, shape index: {}]   ;;  %s12178_s5 = inlined_call_operand.vmem [shape: bf16[192,64], index: 5, kind: input, shape index: {}]   ;;  %s12179_s6 = inlined_call_operand.vmem [shape: f32[1,64], index: 6, kind: input, shape index: {}]   ;;  %s12180_s7 = inlined_call_operand.vmem [shape: bf16[640,512], index: 7, kind: input, shape index: {}]   ;;  %s12181_s8 = inlined_call_operand.vmem [shape: f32[1,512], index: 8, kind: input, shape index: {}]   ;;  %s12182_s9 = inlined_call_operand.hbm [shape: f32[2,512], index: 9, kind: output, shape index: {}]  }
   0x1   :  { %v7727_v0 = vld [vmem:[%s12173_s0 + $0x48] sm:$0xff]   ;;  %v8262_v1 = vld [vmem:[%s12173_s0 + $0x50] ss:$0 sps:$4 sm:$0x77]   ;;  %v7729_v2 = vld [vmem:[%s12173_s0 + $0x3c] sm:$0xff]   ;;  %s8200_s21 = smov 64  }
   0x2   :  { %v566_v3 = vshrl.u32 %v7727_v0, 16  ;;  %v568_v4 = vshll.u32 %v7727_v0, 16  ;;  %v573_v5 = vshll.u32 %v8262_v1, 16  ;;  %v7731_v6 = vld [vmem:[%s12173_s0 + $0x18] sm:$0xff]   ;;  %v551_v8 = vshrl.u32 %v7729_v2, 16  ;;  %v7733_v10 = vld [vmem:[%s12173_s0 + $0xc] sm:$0xff]  }
   0x3   :  { %v8274_v7 = vld [vmem:[%s12173_s0 + $0x44] ss:$0 sps:$4 sm:$0x77]   ;;  %v553_v9 = vshll.u32 %v7729_v2, 16  ;;  %v506_v15 = vshrl.u32 %v7731_v6, 16  ;;  %v508_v16 = vshll.u32 %v7731_v6, 16 }
   0x4   :  { %v570_v11 = vrot.slane %v568_v4, 1  ;;  %v8279_v12 = vrot.slane %v573_v5, 1  ;;  %v558_v14 = vshll.u32 %v8274_v7, 16  ;;  %v8285_v18 = vld [vmem:[%s12173_s0 + $0x20] ss:$0 sps:$4 sm:$0x77]  }
   0x5   :  { %v555_v13 = vrot.slane %v553_v9, 1  ;;  %v491_v19 = vshrl.u32 %v7733_v10, 16  ;;  %v510_v22 = vrot.slane %v508_v16, 1  ;;  %v513_v24 = vshll.u32 %v8285_v18, 16  ;;  %v7735_v27 = vld [vmem:[%s12173_s0 + $0x24] sm:$0xff]   ;;  %v7737_v40 = vld [vmem:[%s12173_s0 + $0x54] sm:$0xff]  }
   0x6   :  { %v571_v17 = vor.u32 %v570_v11, %v566_v3  ;;  %v8287_v21 = vrot.slane %v558_v14, 1  ;;  %v8295_v25 = vld [vmem:[%s12173_s0 + $0x14] ss:$0 sps:$4 sm:$0x77]   ;;  %v493_v26 = vshll.u32 %v7733_v10, 16  ;;  %v521_v34 = vshrl.u32 %v7735_v27, 16 }
   0x7   :  { %v556_v20 = vor.u32 %v555_v13, %v551_v8  ;;  %v511_v29 = vor.u32 %v510_v22, %v506_v15  ;;  %v8304_v30 = vrot.slane %v513_v24, 1  ;;  %v498_v32 = vshll.u32 %v8295_v25, 16  ;;  %v8310_v33 = vld [vmem:[%s12173_s0 + $0x2c] ss:$0 sps:$4 sm:$0x77]   ;;  %v7739_v41 = vld [vmem:[%s12173_s0 + $0x78] sm:$0xff]  }
   0x8   :  { %v576_v23 = vsel %vm474_vm0, %v571_v17, %v8279_v12  ;;  %v495_v31 = vrot.slane %v493_v26, 1  ;;  %v523_v35 = vshll.u32 %v7735_v27, 16  ;;  %v528_v39 = vshll.u32 %v8310_v33, 16  ;;  %v7738_v43 = vld [vmem:[%s12173_s0 + $0x5c] ss:$0 sps:$4 sm:$0x77]  }
   0x9   :  { %1099 = vrot.lane.b32.xlu1 %v576_v23, %s8198_s27  ;;  %v561_v28 = vsel %vm474_vm0, %v556_v20, %v8287_v21  ;;  %v516_v36 = vsel %vm474_vm0, %v511_v29, %v8304_v30  ;;  %v500_v38 = vrot.slane %v498_v32, 1  ;;  %v581_v46 = vshrl.u32 %v7737_v40, 16  ;;  %v7741_v48 = vld [vmem:[%s12173_s0 + $0x6c] sm:$0xff]   ;;  %v8335_v51 = vld [vmem:[%s12173_s0 + $0x80] ss:$0 sps:$4 sm:$0x77]  }
   0xa   :  { %1095 = vrot.lane.b32.xlu0 %v561_v28, %s8198_s27  ;;  %v496_v37 = vor.u32 %v495_v31, %v491_v19  ;;  %v525_v42 = vrot.slane %v523_v35, 1  ;;  %v8326_v45 = vrot.slane %v528_v39, 1  ;;  %v583_v47 = vshll.u32 %v7737_v40, 16  ;;  %v7742_v61 = vld [vmem:[%s12173_s0 + $0x74] ss:$0 sps:$4 sm:$0x77]  }
   0xb   :  { %v588_v50 = vshll.u32 %v7738_v43, 16  ;;  %v626_v53 = vshrl.u32 %v7739_v41, 16  ;;  %v628_v54 = vshll.u32 %v7739_v41, 16  ;;  %v611_v55 = vshrl.u32 %v7741_v48, 16  ;;  %v7743_v63 = vld [vmem:[%s12173_s0 + $0x84] sm:$0xff]   ;;  %v7745_v24 = vld [vmem:[%s12173_s0 + $0x9c] sm:$0xff]  }
   0xc   :  { %v501_v44 = vsel %vm474_vm0, %v496_v37, %v500_v38  ;;  %v526_v49 = vor.u32 %v525_v42, %v521_v34  ;;  %v585_v52 = vrot.slane %v583_v47, 1  ;;  %v633_v58 = vshll.u32 %v8335_v51, 16  ;;  %v8354_v6 = vld [vmem:[%s12173_s0 + $0x8c] ss:$0 sps:$4 sm:$0x77]   ;;  %v7747_v31 = vld [vmem:[%s12173_s0 + $0x15c] sm:$0xff]  }
   0xd   :  { %1083 = vrot.lane.b32.xlu1 %v516_v36, %s8198_s27  ;;  %v590_v57 = vrot.slane %v588_v50, 1  ;;  %v630_v60 = vrot.slane %v628_v54, 1  ;;  %v613_v62 = vshll.u32 %v7741_v48, 16  ;;  %v618_v5 = vshll.u32 %v7742_v61, 16  ;;  %v7749_v36 = vld [vmem:[%s12173_s0 + $0x12c] sm:$0xff]   ;;  %s8201_s26 = smov 96  }
   0xe   :  { %1079 = vrot.lane.b32.xlu0 %v501_v44, %s8198_s27  ;;  %v531_v56 = vsel %vm474_vm0, %v526_v49, %v8326_v45  ;;  %v586_v59 = vor.u32 %v585_v52, %v581_v46  ;;  %v8347_v0 = vrot.slane %v633_v58, 1  ;;  %v641_v8 = vshrl.u32 %v7743_v63, 16  ;;  %v8401_v41 = vld [vmem:[%s12173_s0 + $0x134] ss:$0 sps:$4 sm:$0x77]   ;;  %v7755_v54 = vld [vmem:[%s12173_s0 + $0x168] sm:$0xff]  }
   0xf   :  { %v631_v3 = vor.u32 %v630_v60, %v626_v53  ;;  %v615_v4 = vrot.slane %v613_v62, 1  ;;  %v643_v9 = vshll.u32 %v7743_v63, 16  ;;  %v562_v10 = vshrl.u32 %v8274_v7, 16  ;;  %v8413_v47 = vld [vmem:[%s12173_s0 + $0xb0] ss:$0 sps:$4 sm:$0x77]  }
  0x10   :  { %v591_v2 = vsel %vm474_vm0, %v586_v59, %v590_v57  ;;  %v620_v14 = vrot.slane %v618_v5, 1  ;;  %v648_v16 = vshll.u32 %v8354_v6, 16  ;;  %v577_v19 = vshrl.u32 %v8262_v1, 16  ;;  %v7753_v52 = vld [vmem:[%s12173_s0 + $0xb4] sm:$0xff]  }
  0x11   :  { %1087 = vrot.lane.b32.xlu1 %v531_v56, %s8198_s27  ;;  %v636_v11 = vsel %vm474_vm0, %v631_v3, %v8347_v0  ;;  %v616_v13 = vor.u32 %v615_v4, %v611_v55  ;;  %v645_v15 = vrot.slane %v643_v9, 1  ;;  %v502_v20 = vshrl.u32 %v8295_v25, 16  ;;  %v8442_v3 = vld [vmem:[%s12173_s0 + $0x170] ss:$0 sps:$4 sm:$0x77]   ;;  %v7757_v4 = vld [vmem:[%s12173_s0 + $0x138] sm:$0xff]  }
  0x12   :  { %1103 = vrot.lane.b32.xlu0 %v591_v2, %s8198_s27  ;;  %v8365_v7 = vrot.slane %v648_v16, 1  ;;  %v564_v23 = vor.u32 %v562_v10, %v8287_v21  ;;  %v579_v1 = vor.u32 %v577_v19, %v8279_v12  ;;  %v592_v27 = vshrl.u32 %v7738_v43, 16  ;;  %v8380_v21 = vld [vmem:[%s12173_s0 + $0xa4] ss:$0 sps:$4 sm:$0x77]  }
  0x13   :  { %v621_v17 = vsel %vm474_vm0, %v616_v13, %v620_v14  ;;  %v646_v22 = vor.u32 %v645_v15, %v641_v8  ;;  %v517_v25 = vshrl.u32 %v8285_v18, 16  ;;  %v504_v28 = vor.u32 %v502_v20, %v500_v38  ;;  %v8388_v12 = vld [vmem:[%s12173_s0 + $0x164] ss:$0 sps:$4 sm:$0x77]  }
  0x14   :  { %v673_v29 = vshll.u32 %v7745_v24, 16  ;;  %v594_v18 = vor.u32 %v592_v27, %v590_v57  ;;  %v622_v34 = vshrl.u32 %v7742_v61, 16  ;;  %v532_v35 = vshrl.u32 %v8310_v33, 16  ;;  %v8430_v57 = vld [vmem:[%s12173_s0 + $0xbc] ss:$0 sps:$4 sm:$0x77]  }
  0x15   :  { %1115 = vrot.lane.b32.xlu1 %v636_v11, %s8198_s27  ;;  %v651_v26 = vsel %vm474_vm0, %v646_v22, %v8365_v7  ;;  %v519_v32 = vor.u32 %v517_v25, %v8304_v30  ;;  %v671_v37 = vshrl.u32 %v7745_v24, 16  ;;  %v678_v39 = vshll.u32 %v8380_v21, 16  ;;  %v7751_v30 = vld [vmem:[%s12173_s0 + $0xa8] sm:$0xff]   ;;  %v7759_v27 = vld [vmem:[%s12173_s0 + $0x104] ss:$0 sps:$4 sm:$0x77]  }
  0x16   :  { %1111 = vrot.lane.b32.xlu0 %v621_v17, %s8198_s27  ;;  %v675_v38 = vrot.slane %v673_v29, 1  ;;  %v913_v40 = vshll.u32 %v7747_v31, 16  ;;  %v637_v33 = vshrl.u32 %v8335_v51, 16  ;;  %v918_v42 = vshll.u32 %v8388_v12, 16 }
  0x17   :  { %v624_v43 = vor.u32 %v622_v34, %v620_v14  ;;  %v534_v44 = vor.u32 %v532_v35, %v8326_v45  ;;  %v853_v46 = vshll.u32 %v7749_v36, 16  ;;  %v8416_v49 = vrot.slane %v678_v39, 1  ;;  %v7758_v14 = vld [vmem:[%s12173_s0 + $0x140] ss:$0 sps:$4 sm:$0x77]  }
  0x18   :  { %v676_v48 = vor.u32 %v675_v38, %v671_v37  ;;  %v911_v50 = vshrl.u32 %v7747_v31, 16  ;;  %v915_v51 = vrot.slane %v913_v40, 1  ;;  %v652_v53 = vshrl.u32 %v8354_v6, 16  ;;  %v7763_v40 = vld [vmem:[%s12173_s0 + $0x14c] ss:$0 sps:$4 sm:$0x77]  }
  0x19   :  { %1119 = vrot.lane.b32.xlu1 %v651_v26, %s8198_s27  ;;  %v688_v45 = vshll.u32 %v7751_v30, 16  ;;  %v639_v55 = vor.u32 %v637_v33, %v8347_v0  ;;  %v858_v56 = vshll.u32 %v8401_v41, 16  ;;  %v8433_v58 = vrot.slane %v918_v42, 1 }
  0x1a   :  { %1097 = vrot.lane.b32.xlu0 %v564_v23, %s8198_s27  ;;  %v851_v59 = vshrl.u32 %v7749_v36, 16  ;;  %v855_v60 = vrot.slane %v853_v46, 1  ;;  %v693_v61 = vshll.u32 %v8413_v47, 16  ;;  %v681_v62 = vsel %vm474_vm0, %v676_v48, %v8416_v49 }
  0x1b   :  { %v916_v63 = vor.u32 %v915_v51, %v911_v50  ;;  %v686_v0 = vshrl.u32 %v7751_v30, 16  ;;  %v703_v2 = vshll.u32 %v7753_v52, 16  ;;  %v690_v5 = vrot.slane %v688_v45, 1 }
  0x1c   :  { %v928_v6 = vshll.u32 %v7755_v54, 16  ;;  %v860_v8 = vrot.slane %v858_v56, 1  ;;  %v701_v9 = vshrl.u32 %v7753_v52, 16  ;;  %v708_v10 = vshll.u32 %v8430_v57, 16 }
  0x1d   :  { %1101 = vrot.lane.b32.xlu1 %v579_v1, %s8198_s27  ;;  %v654_v11 = vor.u32 %v652_v53, %v8365_v7  ;;  %v8450_v13 = vrot.slane %v693_v61, 1  ;;  %v921_v15 = vsel %vm474_vm0, %v916_v63, %v8433_v58  ;;  %v856_v16 = vor.u32 %v855_v60, %v851_v59  ;;  %v7760_v7 = vld [vmem:[%s12173_s0 + $0x174] sm:$0xff]   ;;  %v7764_v56 = vld [vmem:[%s12173_s0 + $0x110] ss:$0 sps:$4 sm:$0x77]  }
  0x1e   :  { %1081 = vrot.lane.b32.xlu0 %v504_v28, %s8198_s27  ;;  %v705_v17 = vrot.slane %v703_v2, 1  ;;  %v868_v19 = vshll.u32 %v7757_v4, 16  ;;  %v691_v20 = vor.u32 %v690_v5, %v686_v0  ;;  %v926_v22 = vshrl.u32 %v7755_v54, 16  ;;  %v7765_v63 = vld [vmem:[%s12173_s0 + $0x11c] ss:$0 sps:$4 sm:$0x77]  }
  0x1f   :  { %v930_v23 = vrot.slane %v928_v6, 1  ;;  %v933_v24 = vshll.u32 %v8442_v3, 16  ;;  %v8462_v26 = vrot.slane %v708_v10, 1  ;;  %v866_v1 = vshrl.u32 %v7757_v4, 16 }
  0x20   :  { %v861_v25 = vsel %vm474_vm0, %v856_v16, %v860_v8  ;;  %v706_v28 = vor.u32 %v705_v17, %v701_v9  ;;  %v870_v29 = vrot.slane %v868_v19, 1  ;;  %v873_v31 = vshll.u32 %v7758_v14, 16 }
  0x21   :  { %1105 = vrot.lane.b32.xlu1 %v594_v18, %s8198_s27  ;;  %v8473_v18 = vld [vmem:[%s12173_s0 + $0x17c] ss:$0 sps:$4 sm:$0x77]   ;;  %v696_v34 = vsel %vm474_vm0, %v691_v20, %v8450_v13  ;;  %v931_v35 = vor.u32 %v930_v23, %v926_v22  ;;  %v8480_v36 = vrot.slane %v933_v24, 1  ;;  %v943_v37 = vshll.u32 %v7760_v7, 16 }
  0x22   :  { %1085 = vrot.lane.b32.xlu0 %v519_v32, %s8198_s27  ;;  %v7762_v32 = vld [vmem:[%s12173_s0 + $0x144] sm:$0xff]   ;;  %v862_v38 = vshrl.u32 %v8401_v41, 16  ;;  %v798_v39 = vshll.u32 %v7759_v27, 16  ;;  %v711_v30 = vsel %vm474_vm0, %v706_v28, %v8462_v26  ;;  %v871_v33 = vor.u32 %v870_v29, %v866_v1  ;;  %v8524_v20 = vld [vmem:[%s12173_s0 + $0xd4] ss:$0 sps:$4 sm:$0x77]  }
  0x23   :  { %v875_v42 = vrot.slane %v873_v31, 1  ;;  %v941_v46 = vshrl.u32 %v7760_v7, 16  ;;  %v945_v41 = vrot.slane %v943_v37, 1  ;;  %v948_v48 = vshll.u32 %v8473_v18, 16 }
  0x24   :  { %v864_v50 = vor.u32 %v862_v38, %v860_v8  ;;  %v8494_v51 = vrot.slane %v798_v39, 1  ;;  %v802_v52 = vshrl.u32 %v7759_v27, 16  ;;  %v881_v45 = vshrl.u32 %v7762_v32, 16 }
  0x25   :  { %1113 = vrot.lane.b32.xlu1 %v624_v43, %s8198_s27  ;;  %v883_v43 = vshll.u32 %v7762_v32, 16  ;;  %v876_v53 = vsel %vm474_vm0, %v871_v33, %v875_v42  ;;  %v946_v59 = vor.u32 %v945_v41, %v941_v46  ;;  %v8501_v60 = vrot.slane %v948_v48, 1  ;;  %v8543_v32 = vld [vmem:[%s12173_s0 + $0x194] ss:$0 sps:$4 sm:$0x77]  }
  0x26   :  { %1089 = vrot.lane.b32.xlu0 %v534_v44, %s8198_s27  ;;  %v936_v44 = vsel %vm474_vm0, %v931_v35, %v8480_v36  ;;  %v804_v61 = vor.u32 %v802_v52, %v8494_v51  ;;  %v813_v4 = vshll.u32 %v7764_v56, 16  ;;  %v892_v8 = vshrl.u32 %v7763_v40, 16  ;;  %v8579_v41 = vld [vmem:[%s12173_s0 + $0x1a0] ss:$0 sps:$4 sm:$0x77]   ;;  %v7776_v52 = vld [vmem:[%s12173_s0 + $0x1a4] sm:$0xff]  }
  0x27   :  { %v885_v54 = vrot.slane %v883_v43, 1  ;;  %v951_v5 = vsel %vm474_vm0, %v946_v59, %v8501_v60  ;;  %v682_v16 = vshrl.u32 %v8380_v21, 16  ;;  %v832_v19 = vshrl.u32 %v7765_v63, 16  ;;  %v7768_v21 = vld [vmem:[%s12173_s0 + $0x18c] sm:$0xff]  }
  0x28   :  { %v8514_v10 = vrot.slane %v813_v4, 1  ;;  %v697_v1 = vshrl.u32 %v8413_v47, 16  ;;  %v922_v27 = vshrl.u32 %v8388_v12, 16  ;;  %v738_v28 = vshll.u32 %v8524_v20, 16  ;;  %v7770_v47 = vld [vmem:[%s12173_s0 + $0xd8] sm:$0xff]  }
  0x29   :  { %1127 = vrot.lane.b32.xlu1 %v681_v62, %s8198_s27  ;;  %v877_v62 = vshrl.u32 %v7758_v14, 16  ;;  %v886_v0 = vor.u32 %v885_v54, %v881_v45  ;;  %v828_v14 = vshll.u32 %v7765_v63, 16  ;;  %v684_v7 = vor.u32 %v682_v16, %v8416_v49  ;;  %v8551_v12 = vld [vmem:[%s12173_s0 + $0xe0] ss:$0 sps:$4 sm:$0x77]  }
  0x2a   :  { %1117 = vrot.lane.b32.xlu0 %v639_v55, %s8198_s27  ;;  %v888_v55 = vshll.u32 %v7763_v40, 16  ;;  %v973_v49 = vshll.u32 %v7768_v21, 16  ;;  %v937_v35 = vshrl.u32 %v8442_v3, 16  ;;  %v8556_v37 = vrot.slane %v738_v28, 1  ;;  %v7772_v40 = vld [vmem:[%s12173_s0 + $0xe4] sm:$0xff]   ;;  %v7774_v3 = vld [vmem:[%s12173_s0 + $0x198] sm:$0xff]  }
  0x2b   :  { %v879_v6 = vor.u32 %v877_v62, %v875_v42  ;;  %v8528_v23 = vrot.slane %v828_v14, 1  ;;  %v924_v38 = vor.u32 %v922_v27, %v8433_v58  ;;  %v978_v39 = vshll.u32 %v8543_v32, 16  ;;  %v8571_v58 = vld [vmem:[%s12173_s0 + $0xec] ss:$0 sps:$4 sm:$0x77]  }
  0x2c   :  { %v890_v2 = vrot.slane %v888_v55, 1  ;;  %v971_v33 = vshrl.u32 %v7768_v21, 16  ;;  %v975_v42 = vrot.slane %v973_v49, 1  ;;  %v748_v43 = vshll.u32 %v7770_v47, 16 }
  0x2d   :  { %1121 = vrot.lane.b32.xlu1 %v654_v11, %s8198_s27  ;;  %v817_v11 = vshrl.u32 %v7764_v56, 16  ;;  %v834_v29 = vor.u32 %v832_v19, %v8528_v23  ;;  %v753_v46 = vshll.u32 %v8551_v12, 16  ;;  %v980_v48 = vrot.slane %v978_v39, 1  ;;  %v8624_v27 = vld [vmem:[%s12173_s0 + $0x1d0] ss:$0 sps:$4 sm:$0x77]  }
  0x2e   :  { %1191 = vrot.lane.b32.xlu0 %v921_v15, %s8198_s27  ;;  %v891_v9 = vsel %vm474_vm0, %v886_v0, %v890_v2  ;;  %v7766_v15 = vld [vmem:[%s12173_s0 + $0xcc] sm:$0xff]   ;;  %v894_v17 = vor.u32 %v892_v8, %v890_v2  ;;  %v750_v45 = vrot.slane %v748_v43, 1  ;;  %v988_v54 = vshll.u32 %v7774_v3, 16 }
  0x2f   :  { %v819_v22 = vor.u32 %v817_v11, %v8514_v10  ;;  %v733_v24 = vshll.u32 %v7766_v15, 16  ;;  %v952_v56 = vshrl.u32 %v8473_v18, 16  ;;  %v8590_v59 = vrot.slane %v753_v46, 1  ;;  %v8599_v18 = vld [vmem:[%s12173_s0 + $0x1ac] ss:$0 sps:$4 sm:$0x77]  }
  0x30   :  { %v768_v62 = vshll.u32 %v8571_v58, 16  ;;  %v993_v63 = vshll.u32 %v8579_v41, 16  ;;  %v1003_v2 = vshll.u32 %v7776_v52, 16  ;;  %v1001_v16 = vshrl.u32 %v7776_v52, 16 }
  0x31   :  { %1175 = vrot.lane.b32.xlu1 %v861_v25, %s8198_s27  ;;  %v731_v25 = vshrl.u32 %v7766_v15, 16  ;;  %v735_v31 = vrot.slane %v733_v24, 1  ;;  %v954_v8 = vor.u32 %v952_v56, %v8501_v60  ;;  %v982_v15 = vshrl.u32 %v8543_v32, 16  ;;  %v8613_v60 = vld [vmem:[%s12173_s0 + $0x1c4] ss:$0 sps:$4 sm:$0x77]  }
  0x32   :  { %1131 = vrot.lane.b32.xlu0 %v696_v34, %s8198_s27  ;;  %v699_v34 = vor.u32 %v697_v1, %v8450_v13  ;;  %v712_v13 = vshrl.u32 %v8430_v57, 16  ;;  %v746_v57 = vshrl.u32 %v7770_v47, 16  ;;  %v8606_v11 = vrot.slane %v768_v62, 1  ;;  %v8639_v32 = vld [vmem:[%s12173_s0 + $0x1dc] ss:$0 sps:$4 sm:$0x77]  }
  0x33   :  { %v995_v14 = vrot.slane %v993_v63, 1  ;;  %v1005_v19 = vrot.slane %v1003_v2, 1  ;;  %v1008_v21 = vshll.u32 %v8599_v18, 16  ;;  %v742_v39 = vshrl.u32 %v8524_v20, 16  ;;  %v8658_v20 = vld [vmem:[%s12173_s0 + $0xfc] sm:$0xff]  }
  0x34   :  { %v714_v55 = vor.u32 %v712_v13, %v8462_v26  ;;  %v990_v26 = vrot.slane %v988_v54, 1  ;;  %v1012_v43 = vshrl.u32 %v8599_v18, 16  ;;  %v1068_v46 = vshll.u32 %v8639_v32, 16  ;;  %v7804_v56 = vld [vmem:[%s12174_s1 + $0x40] sm:$0xff]  }
  0x35   :  { %1135 = vrot.lane.b32.xlu1 %v711_v30, %s8198_s27  ;;  %v736_v30 = vor.u32 %v735_v31, %v731_v25  ;;  %v8629_v25 = vld [vmem:[%s12173_s0 + $0x1d4] sm:$0xff]   ;;  %v1038_v31 = vshll.u32 %v8613_v60, 16  ;;  %v1006_v47 = vor.u32 %v1005_v19, %v1001_v16  ;;  %v791_v62 = vshrl.u32 %v8658_v20, 16  ;;  %v7805_v2 = vld [vmem:[%s12174_s1] sm:$0xff]   ;;  %7551 = vmatprep.subr.bf16.mxu0 %v7804_v56 }
  0x36   :  { %1195 = vrot.lane.b32.xlu0 %v936_v44, %s8198_s27  ;;  %v939_v44 = vor.u32 %v937_v35, %v8480_v36  ;;  %v976_v36 = vor.u32 %v975_v42, %v971_v33  ;;  %v793_v63 = vshll.u32 %v8658_v20, 16  ;;  %7683 = vmatprep.subr.bf16.mxu1 %v7804_v56  ;;  %v7808_v19 = vld [vmem:[%s12174_s1 + $0x50] sm:$0xff]  }
  0x37   :  { %7552 = vmatpush3.bf16.msra.mxu0 %v7805_v2  ;;  %7691 = vmatpush3.bf16.msra.mxu1 %v7805_v2 }
  0x38   :  { %v981_v4 = vsel %vm474_vm0, %v976_v36, %v980_v48  ;;  %v1042_v36 = vshrl.u32 %v8613_v60, 16  ;;  %v8771_v60 = vld [vmem:[%s12173_s0 + $0x60] sm:$0xff]  }
  0x39   :  { %1179 = vrot.lane.b32.xlu1 %v876_v53, %s8198_s27  ;;  %v741_v53 = vsel %vm474_vm0, %v736_v30, %v8556_v37  ;;  %v1053_v30 = vshll.u32 %v8624_v27, 16 }
  0x3a   :  { %1177 = vrot.lane.b32.xlu0 %v864_v50, %s8198_s27  ;;  %v763_v50 = vshll.u32 %v7772_v40, 16 }
  0x3b   :  { %v8669_v52 = vrot.slane %v1053_v30, 1 }
  0x3c   :  { %v765_v0 = vrot.slane %v763_v50, 1  ;;  %v8667_v50 = vld [vmem:[%s12173_s0 + $0x114] sm:$0xff]  }
  0x3d   :  { %1161 = vrot.lane.b32.xlu1 %v804_v61, %s8198_s27  ;;  %v761_v61 = vshrl.u32 %v7772_v40, 16  ;;  %v757_v40 = vshrl.u32 %v8551_v12, 16 }
  0x3e   :  { %1199 = vrot.lane.b32.xlu0 %v951_v5, %s8198_s27  ;;  %v751_v5 = vor.u32 %v750_v45, %v746_v57  ;;  %v772_v57 = vshrl.u32 %v8571_v58, 16  ;;  %v8676_v45 = vld [vmem:[%s12173_s0 + $0x108] sm:$0xff]   ;;  %v744_v58 = vor.u32 %v742_v39, %v8556_v37 }
  0x3f   :  { %v808_v18 = vshll.u32 %v8676_v45, 16 }
  0x41   :  { %1183 = vrot.lane.b32.xlu1 %v891_v9, %s8198_s27  ;;  %v7778_v9 = vld [vmem:[%s12173_s0 + $0x1bc] sm:$0xff]  }
  0x42   :  { %1181 = vrot.lane.b32.xlu0 %v879_v6, %s8198_s27  ;;  %v986_v6 = vshrl.u32 %v7774_v3, 16  ;;  %v1033_v1 = vshll.u32 %v7778_v9, 16  ;;  %v1031_v33 = vshrl.u32 %v7778_v9, 16  ;;  %v1063_v3 = vshll.u32 %v8629_v25, 16 }
  0x44   :  { %v991_v24 = vor.u32 %v990_v26, %v986_v6  ;;  %v1035_v13 = vrot.slane %v1033_v1, 1  ;;  %v806_v6 = vshrl.u32 %v8676_v45, 16  ;;  %v759_v26 = vor.u32 %v757_v40, %v8590_v59  ;;  %v7809_v1 = vld [vmem:[%s12174_s1 + $0x10] sm:$0xff]   ;;  %v7812_v40 = vld [vmem:[%s12174_s1 + $0x60] sm:$0xff]  }
  0x45   :  { %1185 = vrot.lane.b32.xlu1 %v894_v17, %s8198_s27  ;;  %v766_v17 = vor.u32 %v765_v0, %v761_v61  ;;  %v8684_v61 = vrot.slane %v1068_v46, 1  ;;  %v1072_v0 = vshrl.u32 %v8639_v32, 16 }
  0x46   :  { %1165 = vrot.lane.b32.xlu0 %v819_v22, %s8198_s27  ;;  %v756_v22 = vsel %vm474_vm0, %v751_v5, %v8590_v59  ;;  %v996_v49 = vsel %vm474_vm0, %v991_v24, %v995_v14  ;;  %v1036_v37 = vor.u32 %v1035_v13, %v1031_v33  ;;  %v823_v5 = vshll.u32 %v8667_v50, 16  ;;  %v8710_v59 = vld [vmem:[%s12173_s0 + $0x30] sm:$0xff]  }
  0x47   :  { %v771_v28 = vsel %vm474_vm0, %v766_v17, %v8606_v11 }
  0x48   :  { %v825_v17 = vrot.slane %v823_v5, 1 }
  0x49   :  { %1129 = vrot.lane.b32.xlu1 %v684_v7, %s8198_s27  ;;  %v7780_v7 = vld [vmem:[%s12173_s0 + $0x1c8] sm:$0xff]  }
  0x4a   :  { %1169 = vrot.lane.b32.xlu0 %v834_v29, %s8198_s27  ;;  %v984_v29 = vor.u32 %v982_v15, %v980_v48  ;;  %v1048_v35 = vshll.u32 %v7780_v7, 16  ;;  %v1046_v42 = vshrl.u32 %v7780_v7, 16  ;;  %v1061_v48 = vshrl.u32 %v8629_v25, 16  ;;  %v7807_v15 = vld [vmem:[%s12174_s1 + $0x8] sm:$0xff]  }
  0x4b   :  { %v810_v7 = vrot.slane %v808_v18, 1  ;;  %v8726_v25 = vld [vmem:[%s12173_s0 + $0x38] ss:$0 sps:$4 sm:$0x77]   ;;  %v8107_v18 = vld [vmem:[%s12173_s0 + $0xc] sm:$0xff]  }
  0x4c   :  { %v543_v39 = vshll.u32 %v8726_v25, 16 }
  0x4d   :  { %1133 = vrot.lane.b32.xlu1 %v699_v34, %s8198_s27  ;;  %v8642_v34 = vrot.slane %v1008_v21, 1 }
  0x4e   :  { %1193 = vrot.lane.b32.xlu0 %v924_v38, %s8198_s27  ;;  %v997_v38 = vshrl.u32 %v8579_v41, 16  ;;  %v1050_v41 = vrot.slane %v1048_v35, 1  ;;  %v7811_v35 = vld [vmem:[%s12174_s1 + $0x18] sm:$0xff]  }
  0x4f   :  { %v1011_v12 = vsel %vm474_vm0, %v1006_v47, %v8642_v34  ;;  %v1014_v24 = vor.u32 %v1012_v43, %v8642_v34  ;;  %v774_v47 = vor.u32 %v772_v57, %v8606_v11  ;;  %v538_v34 = vshll.u32 %v8710_v59, 16  ;;  %v7813_v43 = vld [vmem:[%s12174_s1 + $0x20] sm:$0xff]  }
  0x50   :  { %v999_v54 = vor.u32 %v997_v38, %v995_v14  ;;  %v1051_v9 = vor.u32 %v1050_v41, %v1046_v42  ;;  %v795_v14 = vrot.slane %v793_v63, 1  ;;  %v8747_v38 = vld [vmem:[%s12173_s0 + $0x8] ss:$0 sps:$4 sm:$0x77]   ;;  %v8787_v57 = vrot.slane %v543_v39, 1  ;;  %v8113_v39 = vld [vmem:[%s12173_s0 + $0x6c] sm:$0xff]  }
  0x51   :  { %1197 = vrot.lane.b32.xlu1 %v939_v44, %s8198_s27  ;;  %v8652_v44 = vrot.slane %v1038_v31, 1  ;;  %v7810_v31 = vld [vmem:[%s12174_s1 + $0x58] sm:$0xff]   ;;  %v7815_v41 = vld [vmem:[%s12174_s1 + $0x28] sm:$0xff]  }
  0x52   :  { %1143 = vrot.lane.b32.xlu0 %v741_v53, %s8198_s27  ;;  %v1057_v53 = vshrl.u32 %v8624_v27, 16  ;;  %v796_v33 = vor.u32 %v795_v14, %v791_v62  ;;  %v1074_v27 = vor.u32 %v1072_v0, %v8684_v61  ;;  %v7820_v0 = vld [vmem:[%s12174_s1 + $0x78] sm:$0xff]  }
  0x53   :  { %v1041_v16 = vsel %vm474_vm0, %v1036_v37, %v8652_v44  ;;  %v1044_v30 = vor.u32 %v1042_v36, %v8652_v44  ;;  %v7814_v44 = vld [vmem:[%s12174_s1 + $0x68] sm:$0xff]   ;;  %v7816_v36 = vld [vmem:[%s12174_s1 + $0x70] sm:$0xff]   ;;  %v8108_v14 = vld [vmem:[%s12173_s0 + $0x3c] sm:$0xff]  }
  0x54   :  { %v1059_v11 = vor.u32 %v1057_v53, %v8669_v52  ;;  %v801_v46 = vsel %vm474_vm0, %v796_v33, %v8494_v51  ;;  %v598_v53 = vshll.u32 %v8771_v60, 16 }
  0x55   :  { %1137 = vrot.lane.b32.xlu1 %v714_v55, %s8198_s27  ;;  %v1065_v55 = vrot.slane %v1063_v3, 1  ;;  %v540_v3 = vrot.slane %v538_v34, 1 }
  0x56   :  { %1207 = vrot.lane.b32.xlu0 %v981_v4, %s8198_s27  ;;  %v821_v4 = vshrl.u32 %v8667_v50, 16  ;;  %v600_v37 = vrot.slane %v598_v53, 1 }
  0x57   :  { %v1066_v21 = vor.u32 %v1065_v55, %v1061_v48  ;;  %v811_v48 = vor.u32 %v810_v7, %v806_v6  ;;  %v7817_v55 = vld [vmem:[%s12174_s1 + $0x30] sm:$0xff]  }
  0x58   :  { %v826_v32 = vor.u32 %v825_v17, %v821_v4  ;;  %v7821_v4 = vld [vmem:[%s12174_s1 + $0x38] sm:$0xff]  }
  0x59   :  { %1201 = vrot.lane.b32.xlu1 %v954_v8, %s8198_s27  ;;  %v7806_v8 = vld [vmem:[%s12174_s1 + $0x48] sm:$0xff]   ;;  %v816_v56 = vsel %vm474_vm0, %v811_v48, %v8514_v10  ;;  %v8109_v17 = vld [vmem:[%s12173_s0 + $0x18] sm:$0xff]  }
  0x5a   :  { %1147 = vrot.lane.b32.xlu0 %v756_v22, %s8198_s27  ;;  %7553 = vmatprep.subr.bf16.mxu0 %v7806_v8  ;;  %v1056_v22 = vsel %vm474_vm0, %v1051_v9, %v8669_v52  ;;  %v8792_v52 = vld [vmem:[%s12173_s0 + $0x68] ss:$0 sps:$4 sm:$0x77]   ;;  %v831_v45 = vsel %vm474_vm0, %v826_v32, %v8528_v23  ;;  %v596_v23 = vshrl.u32 %v8771_v60, 16 }
  0x5b   :  { %7684 = vmatprep.subr.bf16.mxu1 %v7806_v8  ;;  %7554 = vmatpush3.bf16.msra.mxu0 %v7807_v15  ;;  %v603_v62 = vshll.u32 %v8792_v52, 16  ;;  %v8889_v32 = vld [vmem:[%s12173_s0 + $0x98] ss:$0 sps:$4 sm:$0x77]  }
  0x5c   :  { %7692 = vmatpush3.bf16.msra.mxu1 %v7807_v15  ;;  %7555 = vmatprep.subr.bf16.mxu0 %v7808_v19  ;;  %v601_v7 = vor.u32 %v600_v37, %v596_v23  ;;  %v607_v37 = vshrl.u32 %v8792_v52, 16  ;;  %v8121_v52 = vld [vmem:[%s12173_s0 + $0x5c] ss:$0 sps:$4 sm:$0x77]  }
  0x5d   :  { %1151 = vrot.lane.b32.xlu1 %v771_v28, %s8198_s27  ;;  %7685 = vmatprep.subr.bf16.mxu1 %v7808_v19  ;;  %v7789_v28 = vld [vmem:[%s12173_s0] sm:$0xff]   ;;  %v8823_v6 = vrot.slane %v603_v62, 1 }
  0x5e   :  { %1211 = vrot.lane.b32.xlu0 %v996_v49, %s8198_s27  ;;  %v1071_v49 = vsel %vm474_vm0, %v1066_v21, %v8684_v61  ;;  %v478_v42 = vshll.u32 %v7789_v28, 16  ;;  %v476_v13 = vshrl.u32 %v7789_v28, 16  ;;  %v8111_v28 = vld [vmem:[%s12173_s0 + $0x24] sm:$0xff]  }
  0x5f   :  { %7556 = vmatpush3.bf16.msra.mxu0 %v7809_v1 }
  0x60   :  { %7693 = vmatpush3.bf16.msra.mxu1 %v7809_v1  ;;  %7557 = vmatprep.subr.bf16.mxu0 %v7810_v31  ;;  %v480_v20 = vrot.slane %v478_v42, 1 }
  0x61   :  { %1209 = vrot.lane.b32.xlu1 %v984_v29, %s8198_s27  ;;  %v536_v29 = vshrl.u32 %v8710_v59, 16  ;;  %7686 = vmatprep.subr.bf16.mxu1 %v7810_v31  ;;  %v8112_v31 = vld [vmem:[%s12173_s0 + $0x54] sm:$0xff]  }
  0x62   :  { %1215 = vrot.lane.b32.xlu0 %v1011_v12, %s8198_s27  ;;  %v483_v12 = vshll.u32 %v8747_v38, 16 }
  0x63   :  { %7558 = vmatpush3.bf16.msra.mxu0 %v7811_v35  ;;  %v541_v61 = vor.u32 %v540_v3, %v536_v29  ;;  %v8875_v3 = vld [vmem:[%s12173_s0 + $0x90] sm:$0xff]  }
  0x64   :  { %7694 = vmatpush3.bf16.msra.mxu1 %v7811_v35  ;;  %7559 = vmatprep.subr.bf16.mxu0 %v7812_v40  ;;  %v606_v35 = vsel %vm474_vm0, %v601_v7, %v8823_v6 }
  0x65   :  { %1213 = vrot.lane.b32.xlu1 %v999_v54, %s8198_s27  ;;  %7687 = vmatprep.subr.bf16.mxu1 %v7812_v40  ;;  %v481_v54 = vor.u32 %v480_v20, %v476_v13  ;;  %v546_v5 = vsel %vm474_vm0, %v541_v61, %v8787_v57  ;;  %v8895_v20 = vld [vmem:[%s12173_s0 + $0x150] sm:$0xff]  }
  0x66   :  { %1145 = vrot.lane.b32.xlu0 %v744_v58, %s8198_s27  ;;  %v8802_v58 = vrot.slane %v483_v12, 1  ;;  %v658_v12 = vshll.u32 %v8875_v3, 16  ;;  %v898_v61 = vshll.u32 %v8895_v20, 16 }
  0x67   :  { %7560 = vmatpush3.bf16.msra.mxu0 %v7813_v43 }
  0x68   :  { %7695 = vmatpush3.bf16.msra.mxu1 %v7813_v43  ;;  %7561 = vmatprep.subr.bf16.mxu0 %v7814_v44  ;;  %v486_v10 = vsel %vm474_vm0, %v481_v54, %v8802_v58  ;;  %v8114_v43 = vld [vmem:[%s12173_s0 + $0x78] sm:$0xff]   ;;  %v656_v54 = vshrl.u32 %v8875_v3, 16 }
  0x69   :  { %1149 = vrot.lane.b32.xlu1 %v759_v26, %s8198_s27  ;;  %7688 = vmatprep.subr.bf16.mxu1 %v7814_v44  ;;  %v8115_v44 = vld [vmem:[%s12173_s0 + $0x44] ss:$0 sps:$4 sm:$0x77]  }
  0x6a   :  { %1223 = vrot.lane.b32.xlu0 %v1041_v16, %s8198_s27 }
  0x6b   :  { %7562 = vmatpush3.bf16.msra.mxu0 %v7815_v41 }
  0x6c   :  { %7696 = vmatpush3.bf16.msra.mxu1 %v7815_v41  ;;  %7563 = vmatprep.subr.bf16.mxu0 %v7816_v36 }
  0x6d   :  { %1227 = vrot.lane.b32.xlu1 %v1056_v22, %s8198_s27  ;;  %7689 = vmatprep.subr.bf16.mxu1 %v7816_v36  ;;  %v8110_v22 = vld [vmem:[%s12173_s0 + $0x48] sm:$0xff]   ;;  %v8915_v36 = vld [vmem:[%s12173_s0 + $0x158] ss:$0 sps:$4 sm:$0x77]  }
  0x6e   :  { %1217 = vrot.lane.b32.xlu0 %v1014_v24, %s8198_s27 }
  0x6f   :  { %7564 = vmatpush3.bf16.msra.mxu0 %v7817_v55 }
  0x70   :  { %7697 = vmatpush3.bf16.msra.mxu1 %v7817_v55  ;;  %7565 = vmatprep.subr.bf16.mxu0 %v7820_v0  ;;  %v663_v55 = vshll.u32 %v8889_v32, 16 }
  0x71   :  { %1231 = vrot.lane.b32.xlu1 %v1071_v49, %s8198_s27  ;;  %7690 = vmatprep.subr.bf16.mxu1 %v7820_v0  ;;  %v8119_v0 = vld [vmem:[%s12173_s0 + $0x50] ss:$0 sps:$4 sm:$0x77]  }
  0x72   :  { %1153 = vrot.lane.b32.xlu0 %v774_v47, %s8198_s27  ;;  %v547_v47 = vshrl.u32 %v8726_v25, 16 }
  0x73   :  { %7566 = vmatpush3.bf16.msra.mxu0 %v7821_v4 }
  0x74   :  { %7698 = vmatpush3.bf16.msra.mxu1 %v7821_v4  ;;  %v549_v33 = vor.u32 %v547_v47, %v8787_v57  ;;  %v8116_v57 = vld [vmem:[%s12173_s0 + $0x14] ss:$0 sps:$4 sm:$0x77]  }
  0x75   :  { %1229 = vrot.lane.b32.xlu1 %v1059_v11, %s8198_s27 }
  0x76   :  { %1225 = vrot.lane.b32.xlu0 %v1044_v30, %s8198_s27  ;;  %v487_v30 = vshrl.u32 %v8747_v38, 16 }
  0x78   :  { %v489_v38 = vor.u32 %v487_v30, %v8802_v58  ;;  %v660_v58 = vrot.slane %v658_v12, 1 }
  0x79   :  { %1159 = vrot.lane.b32.xlu1 %v801_v46, %s8198_s27 }
  0x7a   :  { %1233 = vrot.lane.b32.xlu0 %v1074_v27, %s8198_s27  ;;  %v661_v4 = vor.u32 %v660_v58, %v656_v54 }
  0x7b   :  { %v1100_v51 = vpop.permute.xlu1 %1099 }
  0x7c   :  { %v1096_v50 = vpop.permute.xlu0 %1095  ;;  %v1261_v24 = vsel %vm1235_vm1, %v8110_v22, %v1100_v51 }
  0x7d   :  { %1167 = vrot.lane.b32.xlu1 %v831_v45, %s8198_s27  ;;  %v1257_v15 = vsel %vm1235_vm1, %v8108_v14, %v1096_v50  ;;  %v8117_v50 = vld [vmem:[%s12173_s0 + $0x84] sm:$0xff]  }
  0x7e   :  { %1163 = vrot.lane.b32.xlu0 %v816_v56, %s8198_s27  ;;  %v8920_v45 = vld [vmem:[%s12173_s0 + $0x120] sm:$0xff]  }
  0x7f   :  { %v1084_v63 = vpop.permute.xlu1 %1083  ;;  %v838_v14 = vshll.u32 %v8920_v45, 16 }
  0x80   :  { %v1080_v2 = vpop.permute.xlu0 %1079  ;;  %v1245_v19 = vsel %vm1235_vm1, %v8109_v17, %v1084_v63  ;;  %v8118_v63 = vld [vmem:[%s12173_s0 + $0x20] ss:$0 sps:$4 sm:$0x77]  }
  0x81   :  { %1075 = vrot.lane.b32.xlu1 %v486_v10, %s8198_s27  ;;  %v1241_v8 = vsel %vm1235_vm1, %v8107_v18, %v1080_v2  ;;  %v8940_v10 = vld [vmem:[%s12173_s0 + $0x128] ss:$0 sps:$4 sm:$0x77]  }
  0x82   :  { %1091 = vrot.lane.b32.xlu0 %v546_v5, %s8198_s27  ;;  %v8944_v5 = vrot.slane %v663_v55, 1 }
  0x83   :  { %v1088_v26 = vpop.permute.xlu1 %1087 }
  0x84   :  { %v1104_v9 = vpop.permute.xlu0 %1103  ;;  %v1249_v29 = vsel %vm1235_vm1, %v8111_v28, %v1088_v26  ;;  %v896_v26 = vshrl.u32 %v8895_v20, 16  ;;  %v666_v22 = vsel %vm474_vm0, %v661_v4, %v8944_v5  ;;  %v840_v28 = vrot.slane %v838_v14, 1 }
  0x85   :  { %1400 = vrot.lane.b32.xlu1 %v1241_v8, %s8199_s16  ;;  %v1265_v49 = vsel %vm1235_vm1, %v8112_v31, %v1104_v9  ;;  %v900_v8 = vrot.slane %v898_v61, 1  ;;  %v903_v9 = vshll.u32 %v8915_v36, 16 }
  0x86   :  { %1436 = vrot.lane.b32.xlu0 %v1257_v15, %s8199_s16 }
  0x87   :  { %v1116_v16 = vpop.permute.xlu1 %1115  ;;  %v901_v7 = vor.u32 %v900_v8, %v896_v26 }
  0x88   :  { %v1112_v59 = vpop.permute.xlu0 %1111  ;;  %v1277_v27 = vsel %vm1235_vm1, %v8114_v43, %v1116_v16  ;;  %v8120_v16 = vld [vmem:[%s12173_s0 + $0x2c] ss:$0 sps:$4 sm:$0x77]  }
  0x89   :  { %1412 = vrot.lane.b32.xlu1 %v1245_v19, %s8200_s21  ;;  %v1273_v40 = vsel %vm1235_vm1, %v8113_v39, %v1112_v59  ;;  %v609_v19 = vor.u32 %v607_v37, %v8823_v6 }
  0x8a   :  { %1448 = vrot.lane.b32.xlu0 %v1261_v24, %s8200_s21  ;;  %v836_v24 = vshrl.u32 %v8920_v45, 16 }
  0x8b   :  { %v1120_v21 = vpop.permute.xlu1 %1119 }
  0x8c   :  { %v1098_v1 = vpop.permute.xlu0 %1097  ;;  %v1281_v53 = vsel %vm1235_vm1, %v8117_v50, %v1120_v21  ;;  %v841_v47 = vor.u32 %v840_v28, %v836_v24 }
  0x8d   :  { %1424 = vrot.lane.b32.xlu1 %v1249_v29, %s8201_s26  ;;  %v1259_v46 = vsel %vm1235_vm1, %v8115_v44, %v1098_v1  ;;  %v8967_v1 = vrot.slane %v903_v9, 1  ;;  %v843_v29 = vshll.u32 %v8940_v10, 16  ;;  %v8130_v9 = vld [vmem:[%s12173_s0 + $0x138] sm:$0xff]  }
  0x8e   :  { %1460 = vrot.lane.b32.xlu0 %v1265_v49, %s8201_s26 }
  0x8f   :  { %v1102_v34 = vpop.permute.xlu1 %1101  ;;  %v906_v6 = vsel %vm474_vm0, %v901_v7, %v8967_v1 }
  0x90   :  { %v1082_v11 = vpop.permute.xlu0 %1081  ;;  %v1263_v2 = vsel %vm1235_vm1, %v8119_v0, %v1102_v34  ;;  %v845_v34 = vrot.slane %v843_v29, 1 }
  0x91   :  { %1527 = vrot.lane.b32.xlu1 %v1273_v40, %s8199_s16  ;;  %v1243_v51 = vsel %vm1235_vm1, %v8116_v57, %v1082_v11  ;;  %v8122_v11 = vld [vmem:[%s12173_s0 + $0x74] ss:$0 sps:$4 sm:$0x77]  }
  0x92   :  { %1107 = vrot.lane.b32.xlu0 %v606_v35, %s8198_s27  ;;  %v846_v30 = vsel %vm474_vm0, %v841_v47, %v845_v34 }
  0x93   :  { %v1106_v25 = vpop.permute.xlu1 %1105 }
  0x94   :  { %v1086_v42 = vpop.permute.xlu0 %1085  ;;  %v1267_v17 = vsel %vm1235_vm1, %v8121_v52, %v1106_v25 }
  0x95   :  { %1539 = vrot.lane.b32.xlu1 %v1277_v27, %s8200_s21  ;;  %v1247_v23 = vsel %vm1235_vm1, %v8118_v63, %v1086_v42  ;;  %v8123_v42 = vld [vmem:[%s12173_s0 + $0x15c] sm:$0xff]   ;;  %v847_v27 = vshrl.u32 %v8940_v10, 16 }
  0x96   :  { %1093 = vrot.lane.b32.xlu0 %v549_v33, %s8198_s27  ;;  %v8987_v33 = vld [vmem:[%s12173_s0 + $0xf8] ss:$0 sps:$4 sm:$0x77]  }
  0x97   :  { %v8880_v13 = vpop.permute.xlu1 %1113  ;;  %v783_v57 = vshll.u32 %v8987_v33, 16 }
  0x98   :  { %v1090_v60 = vpop.permute.xlu0 %1089  ;;  %v1275_v39 = vsel %vm1235_vm1, %v8122_v11, %v8880_v13 }
  0x99   :  { %1438 = vrot.lane.b32.xlu1 %v1259_v46, %s8199_s16  ;;  %v1251_v59 = vsel %vm1235_vm1, %v8120_v16, %v1090_v60  ;;  %v8124_v60 = vld [vmem:[%s12173_s0 + $0x9c] sm:$0xff]   ;;  %v9018_v58 = vrot.slane %v783_v57, 1  ;;  %v8131_v16 = vld [vmem:[%s12173_s0 + $0x134] ss:$0 sps:$4 sm:$0x77]  }
  0x9a   :  { %1077 = vrot.lane.b32.xlu0 %v489_v38, %s8198_s27  ;;  %v8125_v46 = vld [vmem:[%s12173_s0 + $0x80] ss:$0 sps:$4 sm:$0x77]  }
  0x9b   :  { %v8899_v41 = vpop.permute.xlu1 %1127 }
  0x9c   :  { %v8901_v48 = vpop.permute.xlu0 %1117  ;;  %v1289_v44 = vsel %vm1235_vm1, %v8124_v60, %v8899_v41  ;;  %v8126_v41 = vld [vmem:[%s12173_s0 + $0x12c] sm:$0xff]  }
  0x9d   :  { %1402 = vrot.lane.b32.xlu1 %v1243_v51, %s8199_s16  ;;  %v1279_v12 = vsel %vm1235_vm1, %v8125_v46, %v8901_v48  ;;  %v849_v51 = vor.u32 %v847_v27, %v845_v34  ;;  %v787_v48 = vshrl.u32 %v8987_v33, 16 }
  0x9e   :  { %1551 = vrot.lane.b32.xlu0 %v1281_v53, %s8201_s26 }
  0x9f   :  { %v8925_v56 = vpop.permute.xlu1 %1121 }
  0xa0   :  { %v1192_v62 = vpop.permute.xlu0 %1191 }
  0xa1   :  { %1414 = vrot.lane.b32.xlu1 %v1247_v23, %s8200_s21  ;;  %v1353_v43 = vsel %vm1235_vm1, %v8123_v42, %v1192_v62  ;;  %v8127_v62 = vld [vmem:[%s12173_s0 + $0x8c] ss:$0 sps:$4 sm:$0x77]  }
  0xa2   :  { %1450 = vrot.lane.b32.xlu0 %v1263_v2, %s8200_s21  ;;  %v1283_v63 = vsel %vm1235_vm1, %v8127_v62, %v8925_v56  ;;  %v8128_v23 = vld [vmem:[%s12173_s0 + $0x168] sm:$0xff]   ;;  %v789_v2 = vor.u32 %v787_v48, %v9018_v58 }
  0xa3   :  { %v1176_v18 = vpop.permute.xlu1 %1175  ;;  %v8129_v56 = vld [vmem:[%s12173_s0 + $0xa8] sm:$0xff]  }
  0xa4   :  { %v8949_v15 = vpop.permute.xlu0 %1131  ;;  %v1337_v54 = vsel %vm1235_vm1, %v8126_v41, %v1176_v18 }
  0xa5   :  { %1426 = vrot.lane.b32.xlu1 %v1251_v59, %s8201_s26  ;;  %v1293_v26 = vsel %vm1235_vm1, %v8129_v56, %v8949_v15 }
  0xa6   :  { %1462 = vrot.lane.b32.xlu0 %v1267_v17, %s8201_s26  ;;  %v8132_v17 = vld [vmem:[%s12173_s0 + $0xb4] sm:$0xff]  }
  0xa7   :  { %v8965_v21 = vpop.permute.xlu1 %1135 }
  0xa8   :  { %v1196_v31 = vpop.permute.xlu0 %1195 }
  0xa9   :  { %1123 = vrot.lane.b32.xlu1 %v666_v22, %s8198_s27  ;;  %v1357_v0 = vsel %vm1235_vm1, %v8128_v23, %v1196_v31  ;;  %v8133_v22 = vld [vmem:[%s12173_s0 + $0x174] sm:$0xff]  }
  0xaa   :  { %1109 = vrot.lane.b32.xlu0 %v609_v19, %s8198_s27  ;;  %v1297_v19 = vsel %vm1235_vm1, %v8132_v17, %v8965_v21 }
  0xab   :  { %v1180_v49 = vpop.permute.xlu1 %1179 }
  0xac   :  { %v1178_v35 = vpop.permute.xlu0 %1177  ;;  %v1341_v14 = vsel %vm1235_vm1, %v8130_v9, %v1180_v49 }
  0xad   :  { %1529 = vrot.lane.b32.xlu1 %v1275_v39, %s8199_s16  ;;  %v1339_v15 = vsel %vm1235_vm1, %v8131_v16, %v1178_v35 }
  0xae   :  { %1187 = vrot.lane.b32.xlu0 %v906_v6, %s8198_s27 }
  0xaf   :  { %v8981_v40 = vpop.permute.xlu1 %1161 }
  0xb0   :  { %v1200_v25 = vpop.permute.xlu0 %1199 }
  0xb1   :  { %1531 = vrot.lane.b32.xlu1 %v1353_v43, %s8199_s16  ;;  %v1361_v24 = vsel %vm1235_vm1, %v8133_v22, %v1200_v25 }
  0xb2   :  { %1171 = vrot.lane.b32.xlu0 %v846_v30, %s8198_s27 }
  0xb3   :  { %v8996_v38 = vpop.permute.xlu1 %1183 }
  0xb4   :  { %v1182_v13 = vpop.permute.xlu0 %1181 }
  0xb5   :  { %1587 = vrot.lane.b32.xlu1 %v1289_v44, %s8199_s16 }
  0xb6   :  { %1541 = vrot.lane.b32.xlu0 %v1279_v12, %s8200_s21 }
  0xb7   :  { %v9011_v50 = vpop.permute.xlu1 %1185 }
  0xb8   :  { %v1166_v53 = vpop.permute.xlu0 %1165 }
  0xb9   :  { %1440 = vrot.lane.b32.xlu1 %v1337_v54, %s8199_s16 }
  0xba   :  { %1173 = vrot.lane.b32.xlu0 %v849_v51, %s8198_s27 }
  0xbb   :  { %v9022_v55 = vpop.permute.xlu1 %1129 }
  0xbc   :  { %v9024_v61 = vpop.permute.xlu0 %1169 }
  0xbd   :  { %1553 = vrot.lane.b32.xlu1 %v1283_v63, %s8201_s26 }
  0xbe   :  { %1543 = vrot.lane.b32.xlu0 %v1357_v0, %s8200_s21 }
  0xbf   :  { %v9038_v37 = vpop.permute.xlu1 %1133 }
  0xc0   :  { %v9040_v4 = vpop.permute.xlu0 %1193 }
  0xc1   :  { %1157 = vrot.lane.b32.xlu1 %v789_v2, %s8198_s27 }
  0xc2   :  { %1599 = vrot.lane.b32.xlu0 %v1293_v26, %s8200_s21 }
  0xc3   :  { %v9049_v18 = vpop.permute.xlu1 %1197 }
  0xc4   :  { %v9051_v8 = vpop.permute.xlu0 %1143 }
  0xc5   :  { %1452 = vrot.lane.b32.xlu1 %v1341_v14, %s8200_s21 }
  0xc6   :  { %1442 = vrot.lane.b32.xlu0 %v1339_v15, %s8199_s16 }
  0xc7   :  { %v9063_v59 = vpop.permute.xlu1 %1137 }
  0xc8   :  { %v9065_v52 = vpop.permute.xlu0 %1207 }
  0xc9   :  { %1611 = vrot.lane.b32.xlu1 %v1297_v19, %s8201_s26 }
  0xca   :  { %14 = vsyncpa [#allocation3], 0  ;;  %1555 = vrot.lane.b32.xlu0 %v1361_v24, %s8201_s26  ;;  %v9081_v7 = vld [vmem:[%s12173_s0 + $0x180] sm:$0xff]   ;;  %v9106_v34 = vld [vmem:[%s12173_s0 + $0x188] ss:$0 sps:$4 sm:$0x77]  }
  0xcb   :  { %v9083_v28 = vpop.permute.xlu1 %1201  ;;  %v9088_v21 = vld [vmem:[%s12173_s0 + $0xc0] sm:$0xff]   ;;  %v958_v35 = vshll.u32 %v9081_v7, 16  ;;  %v9114_v39 = vld [vmem:[%s12173_s0 + $0xc8] ss:$0 sps:$4 sm:$0x77]   ;;  %v667_v60 = vshrl.u32 %v8889_v32, 16 }
  0xcc   :  { %v8134_v29 = vld [vmem:[%s12173_s0 + $0x140] ss:$0 sps:$4 sm:$0x77]   ;;  %v9094_v49 = vpop.permute.xlu0 %1147  ;;  %v8135_v6 = vld [vmem:[%s12173_s0 + $0x104] ss:$0 sps:$4 sm:$0x77]  }
  0xcd   :  { %v1343_v31 = vsel %vm1235_vm1, %v8134_v29, %v1182_v13  ;;  %v1323_v47 = vsel %vm1235_vm1, %v8135_v6, %v8981_v40  ;;  %v718_v40 = vshll.u32 %v9088_v21, 16  ;;  %v8136_v30 = vld [vmem:[%s12173_s0 + $0x110] ss:$0 sps:$4 sm:$0x77]   ;;  %v8137_v43 = vld [vmem:[%s12173_s0 + $0x144] sm:$0xff]   ;;  %v907_v13 = vshrl.u32 %v8915_v36, 16 }
  0xce   :  { %1454 = vrot.lane.b32.xlu1 %v1343_v31, %s8200_s21  ;;  %1406 = vrot.lane.b32.xlu0 %v1323_v47, %s8199_s16  ;;  %v1327_v25 = vsel %vm1235_vm1, %v8136_v30, %v1166_v53  ;;  %v1345_v27 = vsel %vm1235_vm1, %v8137_v43, %v8996_v38  ;;  %v956_v44 = vshrl.u32 %v9081_v7, 16  ;;  %v960_v46 = vrot.slane %v958_v35, 1  ;;  %v8138_v41 = vld [vmem:[%s12173_s0 + $0x11c] ss:$0 sps:$4 sm:$0x77]   ;;  %v8142_v31 = vld [vmem:[%s12173_s0 + $0x18c] sm:$0xff]  }
  0xcf   :  { %v9109_v11 = vpop.permute.xlu1 %1151  ;;  %v963_v12 = vshll.u32 %v9106_v34, 16  ;;  %v716_v51 = vshrl.u32 %v9088_v21, 16  ;;  %v720_v53 = vrot.slane %v718_v40, 1  ;;  %v723_v38 = vshll.u32 %v9114_v39, 16  ;;  %v8144_v40 = vld [vmem:[%s12173_s0 + $0xcc] sm:$0xff]  }
  0xd0   :  { %v9121_v42 = vpop.permute.xlu0 %1211  ;;  %v1331_v54 = vsel %vm1235_vm1, %v8138_v41, %v9024_v61  ;;  %v8139_v48 = vld [vmem:[%s12173_s0 + $0x14c] ss:$0 sps:$4 sm:$0x77]   ;;  %v909_v63 = vor.u32 %v907_v13, %v8967_v1  ;;  %v669_v23 = vor.u32 %v667_v60, %v8944_v5  ;;  %v961_v0 = vor.u32 %v960_v46, %v956_v44  ;;  %v8140_v15 = vld [vmem:[%s12173_s0 + $0xa4] ss:$0 sps:$4 sm:$0x77]  }
  0xd1   :  { %v1347_v62 = vsel %vm1235_vm1, %v8139_v48, %v9011_v50  ;;  %v9154_v2 = vrot.slane %v963_v12, 1  ;;  %v721_v56 = vor.u32 %v720_v53, %v716_v51  ;;  %v9158_v26 = vrot.slane %v723_v38, 1  ;;  %v8141_v22 = vld [vmem:[%s12173_s0 + $0x164] ss:$0 sps:$4 sm:$0x77]   ;;  %v8148_v51 = vld [vmem:[%s12173_s0 + $0xd8] sm:$0xff]  }
  0xd2   :  { %1418 = vrot.lane.b32.xlu1 %v1327_v25, %s8200_s21  ;;  %1464 = vrot.lane.b32.xlu0 %v1345_v27, %s8201_s26  ;;  %v1291_v17 = vsel %vm1235_vm1, %v8140_v15, %v9022_v55  ;;  %v1355_v24 = vsel %vm1235_vm1, %v8141_v22, %v9040_v4  ;;  %v1369_v55 = vsel %vm1235_vm1, %v8142_v31, %v9065_v52  ;;  %v8143_v47 = vld [vmem:[%s12173_s0 + $0x170] ss:$0 sps:$4 sm:$0x77]   ;;  %v9248_v12 = vld [vmem:[%s12173_s0 + $0x1b8] ss:$0 sps:$4 sm:$0x77]  }
  0xd3   :  { %v9134_v57 = vpop.permute.xlu1 %1209  ;;  %v966_v1 = vsel %vm474_vm0, %v961_v0, %v9154_v2  ;;  %v726_v5 = vsel %vm474_vm0, %v721_v56, %v9158_v26  ;;  %v1359_v4 = vsel %vm1235_vm1, %v8143_v47, %v9049_v18  ;;  %v1305_v52 = vsel %vm1235_vm1, %v8144_v40, %v9051_v8  ;;  %v8145_v25 = vld [vmem:[%s12173_s0 + $0xb0] ss:$0 sps:$4 sm:$0x77]   ;;  %v8146_v8 = vld [vmem:[%s12173_s0 + $0x198] sm:$0xff]   ;;  %v8150_v0 = vld [vmem:[%s12173_s0 + $0xe4] sm:$0xff]  }
  0xd4   :  { %v9143_v32 = vpop.permute.xlu0 %1215  ;;  %v1295_v18 = vsel %vm1235_vm1, %v8145_v25, %v9038_v37  ;;  %v9227_v27 = vld [vmem:[%s12173_s0 + $0x1b0] sm:$0xff]   ;;  %v1373_v13 = vsel %vm1235_vm1, %v8146_v8, %v9121_v42  ;;  %v8147_v37 = vld [vmem:[%s12173_s0 + $0x17c] ss:$0 sps:$4 sm:$0x77]   ;;  %v967_v48 = vshrl.u32 %v9106_v34, 16  ;;  %vm1468_vm2 = vcmask 261120  }
  0xd5   :  { %v1363_v44 = vsel %vm1235_vm1, %v8147_v37, %v9083_v28  ;;  %v1018_v42 = vshll.u32 %v9227_v27, 16  ;;  %v1309_v28 = vsel %vm1235_vm1, %v8148_v51, %v9094_v49  ;;  %v8149_v38 = vld [vmem:[%s12173_s0 + $0xbc] ss:$0 sps:$4 sm:$0x77]   ;;  %v1016_v49 = vshrl.u32 %v9227_v27, 16 }
  0xd6   :  { %1430 = vrot.lane.b32.xlu1 %v1331_v54, %s8201_s26  ;;  %1466 = vrot.lane.b32.xlu0 %v1347_v62, %s8201_s26  ;;  %v1299_v41 = vsel %vm1235_vm1, %v8149_v38, %v9063_v59  ;;  %v727_v54 = vshrl.u32 %v9114_v39, 16  ;;  %v1313_v59 = vsel %vm1235_vm1, %v8150_v0, %v9109_v11  ;;  %vm1477_vm3 = vcmask 523264   ;;  %v8155_v37 = vld [vmem:[%s12173_s0 + $0xd4] ss:$0 sps:$4 sm:$0x77]  }
  0xd7   :  { %v9156_v61 = vpop.permute.xlu1 %1213  ;;  %vm1486_vm4 = vcmask 785408   ;;  %v8156_v38 = vld [vmem:[%s12173_s0 + $0x1a0] ss:$0 sps:$4 sm:$0x77]   ;;  %v9337_v0 = vld [vmem:[%s12173_s0 + $0xf0] sm:$0xff]   ;;  %vm1711_vm5 = vcmask 1041408  }
  0xd8   :  { %v9160_v9 = vpop.permute.xlu0 %1145  ;;  %v729_v15 = vor.u32 %v727_v54, %v9158_v26  ;;  %v8152_v26 = vld [vmem:[%s12173_s0 + $0x194] ss:$0 sps:$4 sm:$0x77]   ;;  %vm1728_vm6 = vcmask 1043456   ;;  %vm1745_vm7 = vcmask 1045504   ;;  %vm2700_vm9 = vcmask 1040384  }
  0xd9   :  { %v1371_v47 = vsel %vm1235_vm1, %v8152_v26, %v9134_v57  ;;  %v776_v26 = vshrl.u32 %v9337_v0, 16  ;;  %vm2547_vm8 = vsmask.f32 256  ;;  %vm2710_vm11 = vcmask 1042432  }
  0xda   :  { %1189 = vrot.lane.b32.xlu1 %v909_v63, %s8198_s27  ;;  %1125 = vrot.lane.b32.xlu0 %v669_v23, %s8198_s27  ;;  %v1020_v63 = vrot.slane %v1018_v42, 1  ;;  %v1023_v23 = vshll.u32 %v9248_v12, 16  ;;  %vm9590_vm10 = vmand %vm2700_vm9, %vm2547_vm8  ;;  %vm2711_vm12 = vsmask.f32 2304  ;;  %vm3107_vm14 = vcmask 1047559  }
  0xdb   :  { %v9166_v50 = vpop.permute.xlu1 %1149  ;;  %vm9604_vm13 = vmand %vm2710_vm11, %vm2711_vm12  ;;  %vm2726_vm15 = vcmask 1041409  }
  0xdc   :  { %v9170_v14 = vpop.permute.xlu0 %1223  ;;  %v1025_v31 = vrot.slane %v1023_v23, 1 }
  0xde   :  { %1203 = vrot.lane.b32.xlu1 %v966_v1, %s8198_s27  ;;  %1139 = vrot.lane.b32.xlu0 %v726_v5, %s8198_s27  ;;  %v8151_v1 = vld [vmem:[%s12173_s0 + $0x1a4] sm:$0xff]  }
  0xdf   :  { %v9174_v16 = vpop.permute.xlu1 %1227  ;;  %v1377_v5 = vsel %vm1235_vm1, %v8151_v1, %v9143_v32 }
  0xe0   :  { %v9181_v19 = vpop.permute.xlu0 %1217 }
  0xe2   :  { %1589 = vrot.lane.b32.xlu1 %v1291_v17, %s8199_s16  ;;  %1533 = vrot.lane.b32.xlu0 %v1355_v24, %s8199_s16  ;;  %v969_v17 = vor.u32 %v967_v48, %v9154_v2  ;;  %v1021_v24 = vor.u32 %v1020_v63, %v1016_v49  ;;  %v8153_v2 = vld [vmem:[%s12173_s0 + $0x30] sm:$0xff]   ;;  %v8157_v48 = vld [vmem:[%s12173_s0 + $0x1ac] ss:$0 sps:$4 sm:$0x77]  }
  0xe3   :  { %v9190_v29 = vpop.permute.xlu1 %1231 }
  0xe4   :  { %v9197_v6 = vpop.permute.xlu0 %1153  ;;  %v1026_v32 = vsel %vm474_vm0, %v1021_v24, %v1025_v31 }
  0xe6   :  { %1591 = vrot.lane.b32.xlu1 %v1369_v55, %s8199_s16  ;;  %1545 = vrot.lane.b32.xlu0 %v1359_v4, %s8200_s21 }
  0xe7   :  { %v9206_v35 = vpop.permute.xlu1 %1229 }
  0xe8   :  { %v9213_v30 = vpop.permute.xlu0 %1225 }
  0xea   :  { %1647 = vrot.lane.b32.xlu1 %v1305_v52, %s8199_s16  ;;  %1601 = vrot.lane.b32.xlu0 %v1295_v18, %s8200_s21  ;;  %v8154_v52 = vld [vmem:[%s12173_s0] sm:$0xff]  }
  0xeb   :  { %v9222_v43 = vpop.permute.xlu1 %1159 }
  0xec   :  { %v9234_v60 = vpop.permute.xlu0 %1233 }
  0xee   :  { %1603 = vrot.lane.b32.xlu1 %v1373_v13, %s8200_s21  ;;  %1557 = vrot.lane.b32.xlu0 %v1363_v44, %s8201_s26  ;;  %v1307_v44 = vsel %vm1235_vm1, %v8155_v37, %v9160_v9 }
  0xef   :  { %v9243_v46 = vpop.permute.xlu1 %1167 }
  0xf0   :  { %v9256_v53 = vpop.permute.xlu0 %1163 }
  0xf2   :  { %1659 = vrot.lane.b32.xlu1 %v1309_v28, %s8200_s21  ;;  %1613 = vrot.lane.b32.xlu0 %v1299_v41, %s8201_s26  ;;  %v1375_v41 = vsel %vm1235_vm1, %v8156_v38, %v9156_v61  ;;  %v8158_v61 = vld [vmem:[%s12173_s0 + $0x1bc] sm:$0xff]  }
  0xf3   :  { %v1076_v62 = vpop.permute.xlu1 %1075  ;;  %v1385_v63 = vsel %vm1235_vm1, %v8158_v61, %v9170_v14  ;;  %v8160_v14 = vld [vmem:[%s12173_s0 + $0xe0] ss:$0 sps:$4 sm:$0x77]  }
  0xf4   :  { %v1092_v56 = vpop.permute.xlu0 %1091  ;;  %v1237_v25 = vsel %vm1235_vm1, %v8154_v52, %v1076_v62  ;;  %v1379_v62 = vsel %vm1235_vm1, %v8157_v48, %v9181_v19  ;;  %v8159_v19 = vld [vmem:[%s12173_s0 + $0x1c8] sm:$0xff]   ;;  %v1311_v1 = vsel %vm1235_vm1, %v8160_v14, %v9166_v50 }
  0xf5   :  { %v1253_v4 = vsel %vm1235_vm1, %v8153_v2, %v1092_v56  ;;  %v8162_v50 = vld [vmem:[%s12173_s0 + $0xec] ss:$0 sps:$4 sm:$0x77]   ;;  %v8165_v52 = vld [vmem:[%s12173_s0 + $0x8] ss:$0 sps:$4 sm:$0x77]  }
  0xf6   :  { %1671 = vrot.lane.b32.xlu1 %v1313_v59, %s8201_s26  ;;  %1615 = vrot.lane.b32.xlu0 %v1377_v5, %s8201_s26  ;;  %v1389_v59 = vsel %vm1235_vm1, %v8159_v19, %v9174_v16  ;;  %v1027_v5 = vshrl.u32 %v9248_v12, 16  ;;  %v8161_v16 = vld [vmem:[%s12173_s0 + $0x1d4] sm:$0xff]  }
  0xf7   :  { %v1401_v22 = vpop.permute.xlu1 %1400 }
  0xf8   :  { %v1437_v11 = vpop.permute.xlu0 %1436  ;;  %v1470_v18 = vsel %vm1468_vm2, %v1237_v25, %v1401_v22  ;;  %v1393_v22 = vsel %vm1235_vm1, %v8161_v16, %v9190_v29  ;;  %v8163_v29 = vld [vmem:[%s12173_s0 + $0x1c4] ss:$0 sps:$4 sm:$0x77]  }
  0xf9   :  { %v1498_v57 = vsel %vm1468_vm2, %v1253_v4, %v1437_v11  ;;  %v1315_v11 = vsel %vm1235_vm1, %v8162_v50, %v9197_v6  ;;  %v1387_v2 = vsel %vm1235_vm1, %v8163_v29, %v9213_v30  ;;  %v8164_v6 = vld [vmem:[%s12173_s0 + $0x60] sm:$0xff]   ;;  %v8172_v29 = vld [vmem:[%s12173_s0 + $0x68] ss:$0 sps:$4 sm:$0x77]  }
  0xfa   :  { %1141 = vrot.lane.b32.xlu1 %v729_v15, %s8198_s27  ;;  %1205 = vrot.lane.b32.xlu0 %v969_v17, %s8198_s27  ;;  %v778_v17 = vshll.u32 %v9337_v0, 16 }
  0xfb   :  { %v1413_v55 = vpop.permute.xlu1 %1412 }
  0xfc   :  { %v1449_v40 = vpop.permute.xlu0 %1448  ;;  %v1479_v8 = vsel %vm1477_vm3, %v1470_v18, %v1413_v55  ;;  %v1029_v55 = vor.u32 %v1027_v5, %v1025_v31 }
  0xfd   :  { %v1506_v42 = vsel %vm1477_vm3, %v1498_v57, %v1449_v40  ;;  %v8166_v57 = vld [vmem:[%s12173_s0 + $0x1dc] ss:$0 sps:$4 sm:$0x77]  }
  0xfe   :  { %1593 = vrot.lane.b32.xlu1 %v1371_v47, %s8199_s16  ;;  %1219 = vrot.lane.b32.xlu0 %v1026_v32, %s8198_s27  ;;  %v780_v47 = vrot.slane %v778_v17, 1 }
  0xff   :  { %v1425_v13 = vpop.permute.xlu1 %1424 }
 0x100   :  { %v1461_v51 = vpop.permute.xlu0 %1460  ;;  %v1488_v28 = vsel %vm1486_vm4, %v1479_v8, %v1425_v13  ;;  %v781_v18 = vor.u32 %v780_v47, %v776_v26  ;;  %v1395_v8 = vsel %vm1235_vm1, %v8166_v57, %v9234_v60  ;;  %v8167_v13 = vld [vmem:[%s12173_s0 + $0x38] ss:$0 sps:$4 sm:$0x77]  }
 0x101   :  { %v9317_v54 = vsel %vm1486_vm4, %v1506_v42, %v1461_v51  ;;  %v8168_v51 = vld [vmem:[%s12173_s0 + $0x1d0] ss:$0 sps:$4 sm:$0x77]  }
 0x102   :  { %1649 = vrot.lane.b32.xlu1 %v1307_v44, %s8199_s16  ;;  %1976 = vmatprep.mubr.bf16.mxu0 %v9317_v54 }
 0x103   :  { %1605 = vrot.lane.b32.xlu0 %v1375_v41, %s8200_s21  ;;  %1977 = vmatmul.mubr.bf16.vlgmr.msra.gmra.mrb[0].mxu0 %v1488_v28  ;;  %v1528_v9 = vpop.permute.xlu1 %1527  ;;  %v1391_v28 = vsel %vm1235_vm1, %v8168_v51, %v9206_v35  ;;  %v1712_v41 = vrot.slane %v9317_v54, 6  ;;  %v786_v35 = vsel %vm474_vm0, %v781_v18, %v9018_v58  ;;  %vm2876_vm0 = vcmask 1043459  }
 0x104   :  { %v1108_v49 = vpop.permute.xlu0 %1107 }
 0x105   :  { %v1269_v4 = vsel %vm1235_vm1, %v8164_v6, %v1108_v49  ;;  %v8169_v49 = vld [vmem:[%s12173_s0 + $0xfc] sm:$0xff]  }
 0x106   :  { %1617 = vrot.lane.b32.xlu1 %v1379_v62, %s8201_s26  ;;  %v1560_v31 = vsel %vm1468_vm2, %v1269_v4, %v1528_v9  ;;  %v1321_v61 = vsel %vm1235_vm1, %v8169_v49, %v9222_v43  ;;  %v8170_v43 = vld [vmem:[%s12173_s0 + $0x114] sm:$0xff]  }
 0x107   :  { %1651 = vrot.lane.b32.xlu0 %v1385_v63, %s8199_s16  ;;  %v1540_v23 = vpop.permute.xlu1 %1539 }
 0x108   :  { %v1094_v56 = vpop.permute.xlu0 %1093  ;;  %v1568_v44 = vsel %vm1477_vm3, %v1560_v31, %v1540_v23 }
 0x109   :  { %v1255_v37 = vsel %vm1235_vm1, %v8167_v13, %v1094_v56 }
 0x10a   :  { %1663 = vrot.lane.b32.xlu1 %v1389_v59, %s8200_s21 }
 0x10b   :  { %1661 = vrot.lane.b32.xlu0 %v1311_v1, %s8200_s21  ;;  %v1439_v15 = vpop.permute.xlu1 %1438  ;;  %v1329_v1 = vsel %vm1235_vm1, %v8170_v43, %v9243_v46 }
 0x10c   :  { %v1078_v24 = vpop.permute.xlu0 %1077  ;;  %v1500_v9 = vsel %vm1468_vm2, %v1255_v37, %v1439_v15  ;;  %v8171_v15 = vld [vmem:[%s12173_s0 + $0x108] sm:$0xff]  }
 0x10d   :  { %v1239_v25 = vsel %vm1235_vm1, %v8165_v52, %v1078_v24  ;;  %v1325_v17 = vsel %vm1235_vm1, %v8171_v15, %v9256_v53 }
 0x10e   :  { %1675 = vrot.lane.b32.xlu1 %v1393_v22, %s8201_s26 }
 0x10f   :  { %1673 = vrot.lane.b32.xlu0 %v1315_v11, %s8201_s26  ;;  %v1403_v32 = vpop.permute.xlu1 %1402 }
 0x110   :  { %v1552_v40 = vpop.permute.xlu0 %1551  ;;  %v1472_v60 = vsel %vm1468_vm2, %v1239_v25, %v1403_v32 }
 0x111   :  { %v9398_v38 = vsel %vm1486_vm4, %v1568_v44, %v1552_v40 }
 0x112   :  { %1653 = vrot.lane.b32.xlu1 %v1387_v2, %s8199_s16  ;;  %v1713_v63 = vrot.slane %v9398_v38, 6 }
 0x113   :  { %1221 = vrot.lane.b32.xlu0 %v1029_v55, %s8198_s27  ;;  %v1415_v30 = vpop.permute.xlu1 %1414 }
 0x114   :  { %v1451_v42 = vpop.permute.xlu0 %1450  ;;  %v1481_v48 = vsel %vm1477_vm3, %v1472_v60, %v1415_v30  ;;  %v1729_v60 = vrot.slane %v9398_v38, 4 }
 0x115   :  { %v1508_v23 = vsel %vm1477_vm3, %v1500_v9, %v1451_v42 }
 0x116   :  { %1677 = vrot.lane.b32.xlu1 %v1395_v8, %s8201_s26 }
 0x117   :  { %1665 = vrot.lane.b32.xlu0 %v1391_v28, %s8200_s21  ;;  %v1427_v62 = vpop.permute.xlu1 %1426 }
 0x118   :  { %v1463_v54 = vpop.permute.xlu0 %1462  ;;  %v1491_v19 = vsel %vm1486_vm4, %v1481_v48, %v1427_v62 }
 0x119   :  { %v1517_v59 = vsel %vm1486_vm4, %v1508_v23, %v1463_v54  ;;  %v1764_v58 = vsel %vm1711_vm5, %v1491_v19, %v1712_v41 }
 0x11a   :  { %1404 = vrot.lane.b32.xlu1 %v1321_v61, %s8199_s16  ;;  %v1767_v56 = vsel %vm1711_vm5, %v1517_v59, %v1713_v63  ;;  %v1714_v30 = vrot.slane %v1517_v59, 6 }
 0x11b   :  { %1155 = vrot.lane.b32.xlu0 %v786_v35, %s8198_s27  ;;  %1984 = vmatprep.mubr.bf16.mxu0 %v1767_v56  ;;  %v1124_v14 = vpop.permute.xlu1 %1123 }
 0x11c   :  { %v1110_v5 = vpop.permute.xlu0 %1109  ;;  %1985 = vmatmul.mubr.bf16.gmra.mrb[4].mxu0 %v1764_v58  ;;  %v1285_v18 = vsel %vm1235_vm1, %v8875_v3, %v1124_v14  ;;  %v1715_v28 = vsel %vm1711_vm5, %v1712_v41, %v1714_v30 }
 0x11d   :  { %v1271_v53 = vsel %vm1235_vm1, %v8172_v29, %v1110_v5  ;;  %v1778_v41 = vsel %vm1728_vm6, %v1715_v28, %v1729_v60 }
 0x11e   :  { %1428 = vrot.lane.b32.xlu1 %v1329_v1, %s8201_s26 }
 0x11f   :  { %1416 = vrot.lane.b32.xlu0 %v1325_v17, %s8200_s21  ;;  %v1530_v16 = vpop.permute.xlu1 %1529 }
 0x120   :  { %v1188_v22 = vpop.permute.xlu0 %1187  ;;  %v1562_v4 = vsel %vm1468_vm2, %v1271_v53, %v1530_v16 }
 0x121   :  { %v1349_v62 = vsel %vm1235_vm1, %v8895_v20, %v1188_v22 }
 0x123   :  { %v1532_v24 = vpop.permute.xlu1 %1531 }
 0x124   :  { %v1172_v50 = vpop.permute.xlu0 %1171  ;;  %v1564_v61 = vsel %vm1468_vm2, %v1349_v62, %v1532_v24 }
 0x125   :  { %v1333_v35 = vsel %vm1235_vm1, %v8920_v45, %v1172_v50 }
 0x127   :  { %v1588_v11 = vpop.permute.xlu1 %1587 }
 0x128   :  { %v1542_v55 = vpop.permute.xlu0 %1541  ;;  %v1620_v57 = vsel %vm1468_vm2, %v1285_v18, %v1588_v11 }
 0x129   :  { %v1570_v40 = vsel %vm1477_vm3, %v1562_v4, %v1542_v55 }
 0x12b   :  { %v1441_v46 = vpop.permute.xlu1 %1440 }
 0x12c   :  { %v1174_v32 = vpop.permute.xlu0 %1173 }
 0x12d   :  { %v1335_v56 = vsel %vm1235_vm1, %v8940_v10, %v1174_v32 }
 0x12f   :  { %v1554_v26 = vpop.permute.xlu1 %1553 }
 0x130   :  { %v1544_v47 = vpop.permute.xlu0 %1543  ;;  %v9440_v31 = vsel %vm1486_vm4, %v1570_v40, %v1554_v26  ;;  %v8173_v40 = vld [vmem:[%s12173_s0 + $0x98] ss:$0 sps:$4 sm:$0x77]  }
 0x131   :  { %v1716_v8 = vrot.slane %v9440_v31, 6  ;;  %v1572_v54 = vsel %vm1477_vm3, %v1564_v61, %v1544_v47 }
 0x133   :  { %v1158_v2 = vpop.permute.xlu1 %1157  ;;  %v1717_v3 = vsel %vm1711_vm5, %v1713_v63, %v1716_v8  ;;  %v1502_v63 = vsel %vm1468_vm2, %v1333_v35, %v1441_v46 }
 0x134   :  { %v1600_v6 = vpop.permute.xlu0 %1599  ;;  %v1319_v45 = vsel %vm1235_vm1, %v8987_v33, %v1158_v2 }
 0x135   :  { %v1628_v13 = vsel %vm1477_vm3, %v1620_v57, %v1600_v6 }
 0x137   :  { %v1453_v52 = vpop.permute.xlu1 %1452 }
 0x138   :  { %v1443_v25 = vpop.permute.xlu0 %1442  ;;  %v1510_v19 = vsel %vm1477_vm3, %v1502_v63, %v1453_v52 }
 0x139   :  { %v1504_v43 = vsel %vm1468_vm2, %v1335_v56, %v1443_v25 }
 0x13b   :  { %v1612_v37 = vpop.permute.xlu1 %1611 }
 0x13c   :  { %v1556_v44 = vpop.permute.xlu0 %1555  ;;  %v9448_v42 = vsel %vm1486_vm4, %v1628_v13, %v1612_v37 }
 0x13d   :  { %v1730_v51 = vrot.slane %v9448_v42, 4  ;;  %v9471_v59 = vsel %vm1486_vm4, %v1572_v54, %v1556_v44 }
 0x13e   :  { %v1719_v33 = vrot.slane %v9471_v59, 6 }
 0x13f   :  { %v1782_v48 = vsel %vm1728_vm6, %v1717_v3, %v1730_v51 }
 0x140   :  { %v1455_v9 = vpop.permute.xlu1 %1454  ;;  %v1407_v49 = vpop.permute.xlu0 %1406  ;;  %1992 = vmatprep.mubr.bf16.mxu0 %v1782_v48 }
 0x141   :  { %1993 = vmatmul.mubr.bf16.gmra.mrb[8].mxu0 %v1778_v41  ;;  %v1476_v14 = vsel %vm1468_vm2, %v1319_v45, %v1407_v49  ;;  %v1512_v17 = vsel %vm1477_vm3, %v1504_v43, %v1455_v9  ;;  %v1731_v49 = vrot.slane %v9440_v31, 4  ;;  %v1735_v43 = vrot.slane %v9471_v59, 4 }
 0x144   :  { %v1419_v23 = vpop.permute.xlu1 %1418  ;;  %v1465_v20 = vpop.permute.xlu0 %1464 }
 0x145   :  { %v9474_v58 = vsel %vm1486_vm4, %v1510_v19, %v1465_v20  ;;  %v1485_v5 = vsel %vm1477_vm3, %v1476_v14, %v1419_v23  ;;  %v1746_v23 = vrot.slane %v9448_v42, 2 }
 0x146   :  { %v1718_v1 = vrot.slane %v9474_v58, 6 }
 0x148   :  { %v1431_v15 = vpop.permute.xlu1 %1430  ;;  %v1467_v16 = vpop.permute.xlu0 %1466 }
 0x149   :  { %v1496_v22 = vsel %vm1486_vm4, %v1485_v5, %v1431_v15  ;;  %v1522_v24 = vsel %vm1486_vm4, %v1512_v17, %v1467_v16  ;;  %v1732_v16 = vsel %vm1728_vm6, %v1729_v60, %v1731_v49 }
 0x14a   :  { %v1770_v10 = vsel %vm1711_vm5, %v1496_v22, %v1718_v1  ;;  %v1773_v50 = vsel %vm1711_vm5, %v1522_v24, %v1719_v33  ;;  %v1795_v42 = vsel %vm1745_vm7, %v1732_v16, %v1746_v23 }
 0x14b   :  { %2024 = vmatprep.mubr.bf16.mxu1 %v1773_v50 }
 0x14c   :  { %v1190_v11 = vpop.permute.xlu1 %1189  ;;  %v1126_v55 = vpop.permute.xlu0 %1125  ;;  %2025 = vmatmul.mubr.bf16.vlgmr.msra.gmra.mrb[0].mxu1 %v1770_v10 }
 0x14d   :  { %v1287_v52 = vsel %vm1235_vm1, %v8173_v40, %v1126_v55  ;;  %v1351_v30 = vsel %vm1235_vm1, %v8915_v36, %v1190_v11  ;;  %v1720_v36 = vrot.slane %v1522_v24, 6 }
 0x14f   :  { %v1721_v14 = vsel %vm1711_vm5, %v1718_v1, %v1720_v36 }
 0x150   :  { %v1204_v46 = vpop.permute.xlu1 %1203  ;;  %v1140_v32 = vpop.permute.xlu0 %1139 }
 0x151   :  { %v1301_v3 = vsel %vm1235_vm1, %v9088_v21, %v1140_v32  ;;  %v1365_v48 = vsel %vm1235_vm1, %v9081_v7, %v1204_v46 }
 0x154   :  { %v1590_v26 = vpop.permute.xlu1 %1589  ;;  %v1534_v47 = vpop.permute.xlu0 %1533 }
 0x155   :  { %v1566_v18 = vsel %vm1468_vm2, %v1351_v30, %v1534_v47  ;;  %v1622_v57 = vsel %vm1468_vm2, %v1287_v52, %v1590_v26 }
 0x158   :  { %v1592_v29 = vpop.permute.xlu1 %1591  ;;  %v1546_v53 = vpop.permute.xlu0 %1545 }
 0x159   :  { %v1574_v8 = vsel %vm1477_vm3, %v1566_v18, %v1546_v53  ;;  %v1624_v41 = vsel %vm1468_vm2, %v1365_v48, %v1592_v29 }
 0x15c   :  { %v1648_v2 = vpop.permute.xlu1 %1647  ;;  %v1602_v6 = vpop.permute.xlu0 %1601 }
 0x15d   :  { %v1630_v37 = vsel %vm1477_vm3, %v1622_v57, %v1602_v6  ;;  %v1680_v62 = vsel %vm1468_vm2, %v1301_v3, %v1648_v2 }
 0x160   :  { %v1604_v4 = vpop.permute.xlu1 %1603  ;;  %v1558_v25 = vpop.permute.xlu0 %1557 }
 0x161   :  { %v9499_v44 = vsel %vm1486_vm4, %v1574_v8, %v1558_v25  ;;  %v1632_v54 = vsel %vm1477_vm3, %v1624_v41, %v1604_v4 }
 0x162   :  { %v1722_v61 = vrot.slane %v9499_v44, 6 }
 0x164   :  { %v1660_v13 = vpop.permute.xlu1 %1659  ;;  %v1614_v28 = vpop.permute.xlu0 %1613  ;;  %v1723_v17 = vsel %vm1711_vm5, %v1719_v33, %v1722_v61 }
 0x165   :  { %v9504_v9 = vsel %vm1486_vm4, %v1630_v37, %v1614_v28  ;;  %v1688_v63 = vsel %vm1477_vm3, %v1680_v62, %v1660_v13 }
 0x166   :  { %v1733_v35 = vrot.slane %v9504_v9, 4  ;;  %v1748_v18 = vrot.slane %v9504_v9, 2 }
 0x168   :  { %v1672_v21 = vpop.permute.xlu1 %1671  ;;  %v1616_v19 = vpop.permute.xlu0 %1615  ;;  %v1734_v56 = vsel %vm1728_vm6, %v1730_v51, %v1733_v35  ;;  %v1786_v51 = vsel %vm1728_vm6, %v1721_v14, %v1735_v43  ;;  %v1749_v62 = vsel %vm1745_vm7, %v1746_v23, %v1748_v18 }
 0x169   :  { %v1696_v7 = vsel %vm1486_vm4, %v1688_v63, %v1672_v21  ;;  %v9518_v20 = vsel %vm1486_vm4, %v1632_v54, %v1616_v19 }
 0x16a   :  { %v1747_v45 = vrot.slane %v1696_v7, 2  ;;  %v1736_v31 = vrot.slane %v9518_v20, 4  ;;  %v1752_v52 = vrot.slane %v9518_v20, 2 }
 0x16c   :  { %v1142_v5 = vpop.permute.xlu1 %1141  ;;  %v1799_v15 = vsel %vm1745_vm7, %v1734_v56, %v1747_v45  ;;  %v1206_v22 = vpop.permute.xlu0 %1205  ;;  %v1790_v24 = vsel %vm1728_vm6, %v1723_v17, %v1736_v31  ;;  %v2101_v17 = vlaneseq }
 0x16d   :  { %2000 = vmatprep.mubr.bf16.mxu0 %v1799_v15  ;;  %2032 = vmatprep.mubr.bf16.mxu1 %v1790_v24  ;;  %v1367_v38 = vsel %vm1235_vm1, %v9106_v34, %v1206_v22  ;;  %v1303_v29 = vsel %vm1235_vm1, %v9114_v39, %v1142_v5  ;;  %v1737_v34 = vrot.slane %v9499_v44, 4  ;;  %v8202_v5 = vmov 1983009808  }
 0x16e   :  { %2001 = vmatmul.mubr.bf16.gmra.mrb[12].mxu0 %v1795_v42  ;;  %2033 = vmatmul.mubr.bf16.gmra.mrb[4].mxu1 %v1786_v51  ;;  %v2099_v15 = vunpack.c.l.s4 %v8202_v5 }
 0x16f   :  { %v1738_v28 = vsel %vm1728_vm6, %v1735_v43, %v1737_v34 }
 0x170   :  { %v1594_v59 = vpop.permute.xlu1 %1593  ;;  %v1220_v1 = vpop.permute.xlu0 %1219  ;;  %v1803_v48 = vsel %vm1745_vm7, %v1738_v28, %v1752_v52 }
 0x171   :  { %v1626_v11 = vsel %vm1468_vm2, %v1367_v38, %v1594_v59  ;;  %v1381_v46 = vsel %vm1235_vm1, %v9227_v27, %v1220_v1  ;;  %v2100_v1 = vunpack.c.0.s8 %v2099_v15 }
 0x174   :  { %v1650_v10 = vpop.permute.xlu1 %1649 }
 0x175   :  { %v1606_v50 = vpop.permute.xlu0 %1605  ;;  %v1682_v6 = vsel %vm1468_vm2, %v1303_v29, %v1650_v10  ;;  %v9577_v10 = vshrl.u32 %v2101_v17, 7 }
 0x176   :  { %v1634_v55 = vsel %vm1477_vm3, %v1626_v11, %v1606_v50 }
 0x177   :  { %12205 = vst [vmem:[#allocation5_spill] sm:$0xff] %v9577_v10 }
 0x178   :  { %v1618_v33 = vpop.permute.xlu1 %1617 }
 0x179   :  { %v1652_v60 = vpop.permute.xlu0 %1651  ;;  %v1642_v32 = vsel %vm1486_vm4, %v1634_v55, %v1618_v33 }
 0x17a   :  { %v1684_v53 = vsel %vm1468_vm2, %v1381_v46, %v1652_v60  ;;  %v1739_v2 = vrot.slane %v1642_v32, 4  ;;  %v1754_v63 = vrot.slane %v1642_v32, 2  ;;  %v9581_v60 = vsub.s32 %v2100_v1, %v9577_v10 }
 0x17c   :  { %v1664_v26 = vpop.permute.xlu1 %1663  ;;  %v1740_v13 = vsel %vm1728_vm6, %v1736_v31, %v1739_v2  ;;  %12206 = vst [vmem:[#allocation6_spill] sm:$0xff] %v9581_v60 }
 0x17d   :  { %v1662_v47 = vpop.permute.xlu0 %1661  ;;  %v1692_v4 = vsel %vm1477_vm3, %v1684_v53, %v1664_v26 }
 0x17e   :  { %v1690_v27 = vsel %vm1477_vm3, %v1682_v6, %v1662_v47 }
 0x180   :  { %v1676_v40 = vpop.permute.xlu1 %1675 }
 0x181   :  { %v1674_v25 = vpop.permute.xlu0 %1673  ;;  %v1700_v30 = vsel %vm1486_vm4, %v1692_v4, %v1676_v40 }
 0x182   :  { %v1698_v39 = vsel %vm1486_vm4, %v1690_v27, %v1674_v25  ;;  %v1753_v57 = vrot.slane %v1700_v30, 2  ;;  %v12207_v25 = vmov 0 }
 0x183   :  { %v1750_v8 = vrot.slane %v1698_v39, 2  ;;  %v12208_v25 = vsel %vm9590_vm10, 4294967295, %v12207_v25 }
 0x184   :  { %v1654_v37 = vpop.permute.xlu1 %1653  ;;  %v1807_v44 = vsel %vm1745_vm7, %v1740_v13, %v1753_v57  ;;  %12209 = vst [vmem:[#allocation7_spill] sm:$0xff] %v12208_v25 }
 0x185   :  { %v1222_v3 = vpop.permute.xlu0 %1221  ;;  %v1751_v36 = vsel %vm1745_vm7, %v1747_v45, %v1750_v8  ;;  %2040 = vmatprep.mubr.bf16.mxu1 %v1807_v44 }
 0x186   :  { %v1383_v9 = vsel %vm1235_vm1, %v9248_v12, %v1222_v3  ;;  %2008 = vmatprep.mubr.bf16.mxu0 %v1751_v36  ;;  %2041 = vmatmul.mubr.bf16.gmra.mrb[8].mxu1 %v1803_v48 }
 0x187   :  { %2009 = vmatmul.mubr.bf16.gmra.mrb[16].mxu0 %v1749_v62  ;;  %v1686_v49 = vsel %vm1468_vm2, %v1383_v9, %v1654_v37 }
 0x188   :  { %2016 = vmatprep.mubr.bf16.mxu0 %v9474_v58  ;;  %v1678_v35 = vpop.permute.xlu1 %1677  ;;  %v1755_v58 = vsel %vm1745_vm7, %v1752_v52, %v1754_v63 }
 0x189   :  { %v1666_v41 = vpop.permute.xlu0 %1665 }
 0x18a   :  { %v1694_v61 = vsel %vm1477_vm3, %v1686_v49, %v1666_v41 }
 0x18b   :  { %v1702_v21 = vsel %vm1486_vm4, %v1694_v61, %v1678_v35 }
 0x18c   :  { %v1756_v54 = vrot.slane %v1702_v21, 2  ;;  %v1405_v19 = vpop.permute.xlu1 %1404 }
 0x18d   :  { %v1156_v7 = vpop.permute.xlu0 %1155 }
 0x18e   :  { %v1317_v12 = vsel %vm1235_vm1, %v9337_v0, %v1156_v7  ;;  %v1757_v23 = vsel %vm1745_vm7, %v1753_v57, %v1756_v54  ;;  %v9574_v0 = vld [vmem:[%s12175_s2] ss:$0 sm:$0xff]  ;;  %vm2991_vm1 = vcmask 1045509  }
 0x18f   :  { %2048 = vmatprep.mubr.bf16.mxu1 %v1757_v23  ;;  %v1474_v45 = vsel %vm1468_vm2, %v1317_v12, %v1405_v19  ;;  %v12210_v23 = vmov 0 }
 0x190   :  { %2049 = vmatmul.mubr.bf16.gmra.mrb[12].mxu1 %v1755_v58  ;;  %v1429_v20 = vpop.permute.xlu1 %1428  ;;  %v12211_v23 = vsel %vm9604_vm13, 4294967295, %v12210_v23 }
 0x191   :  { %v1417_v31 = vpop.permute.xlu0 %1416  ;;  %12212 = vst [vmem:[#allocation8_spill] sm:$0xff] %v12211_v23 }
 0x192   :  { %v1483_v56 = vsel %vm1477_vm3, %v1474_v45, %v1417_v31 }
 0x193   :  { %v1493_v14 = vsel %vm1486_vm4, %v1483_v56, %v1429_v20 }
 0x194   :  { %2017 = vmatmul.mubr.bf16.gmra.mrb[20].mxu0 %v1493_v14 }
 0x1d6   :  { %v7567_v43 = vpop.f32.mrb[0].mxu0 }
 0x1d7   :  { %v7568_v16 = vpop.f32.mrb[1].mxu0 }
 0x1d8   :  { %v7569_v22 = vadd.f32 %v7568_v16, %v7567_v43  ;;  %v7570_v24 = vpop.f32.mrb[2].mxu0 }
 0x1d9   :  { %v7571_v42 = vpop.f32.mrb[3].mxu0 }
 0x1da   :  { %v1979_v51 = vadd.f32 %v7569_v22, %v9574_v0  ;;  %v7572_v59 = vadd.f32 %v7571_v42, %v7570_v24 }
 0x1dc   :  { %v1982_v50 = vadd.f32 %v7572_v59, %v9574_v0  ;;  %v2057_v38 = vmax.f32 %v1979_v51, 0.0 }
 0x1de   :  { %v2058_v33 = vmax.f32 %v1982_v50, 0.0 }
 0x1e0   :  { %v2077_v11 = vpack.c.bf16 %v2058_v33, %v2057_v38  ;;  %v7318_v55 = vpack.c.bf16 %v2058_v33, %v2058_v33 }
 0x1e2   :  { %v2104_v46 = vrot.slane %v2077_v11, %v9581_v60  ;;  %v2111_v32 = vrot.slane %v7318_v55, %v9581_v60 }
 0x1e4   :  { %v2112_v26 = vcombine.high %v2104_v46, %v2104_v46  ;;  %v2113_v47 = vcombine.high %v2111_v32, %v2111_v32  ;;  %v2273_v4 = vrot.slane %v2104_v46, %v9581_v60 }
 0x1e6   :  { %v2355_v29 = vcombine.low %v2104_v46, %v2112_v26  ;;  %v2356_v53 = vcombine.low %v2111_v32, %v2113_v47  ;;  %v2324_v18 = vshrl.u32 %v2273_v4, 16 }
 0x1e8   :  { %v2363_v2 = vrot.slane %v2355_v29, %v9581_v60  ;;  %v2370_v34 = vrot.slane %v2356_v53, %v9581_v60 }
 0x1ea   :  { %v2371_v6 = vcombine.low %v2363_v2, %v2370_v34 }
 0x1ec   :  { %v2549_v40 = vshrl.u32 %v2371_v6, 16  ;;  %v2552_v27 = vshll.u32 %v2371_v6, 16 }
 0x1ee   :  { %v2551_v52 = vrot.slane %v2549_v40, 7 }
 0x1ef   :  { %v7573_v30 = vpop.f32.mrb[4].mxu0 }
 0x1f0   :  { %v2554_v39 = vor.u32 %v2552_v27, %v2551_v52  ;;  %v7574_v57 = vpop.f32.mrb[5].mxu0 }
 0x1f1   :  { %v7575_v8 = vadd.f32 %v7574_v57, %v7573_v30  ;;  %v7576_v13 = vpop.f32.mrb[6].mxu0 }
 0x1f2   :  { %v9596_v37 = vsel %vm9590_vm10, %v2324_v18, %v2554_v39  ;;  %v7577_v44 = vpop.f32.mrb[7].mxu0 }
 0x1f3   :  { %v1987_v28 = vadd.f32 %v7575_v8, %v9574_v0  ;;  %v7578_v3 = vadd.f32 %v7577_v44, %v7576_v13 }
 0x1f5   :  { %v1990_v36 = vadd.f32 %v7578_v3, %v9574_v0  ;;  %v2059_v48 = vmax.f32 %v1987_v28, 0.0 }
 0x1f7   :  { %v2060_v9 = vmax.f32 %v1990_v36, 0.0 }
 0x1f9   :  { %v2078_v62 = vpack.c.bf16 %v2060_v9, %v2059_v48  ;;  %v7319_v35 = vpack.c.bf16 %v2060_v9, %v2060_v9 }
 0x1fb   :  { %v2121_v49 = vrot.slane %v2078_v62, %v9581_v60  ;;  %v2128_v41 = vrot.slane %v7319_v35, %v9581_v60 }
 0x1fd   :  { %v2129_v61 = vcombine.high %v2121_v49, %v2121_v49  ;;  %v2378_v63 = vrot.slane %v2121_v49, %v9581_v60  ;;  %v2130_v59 = vcombine.high %v2128_v41, %v2128_v41 }
 0x1ff   :  { %v2379_v21 = vcombine.low %v2129_v61, %v2128_v41  ;;  %v2556_v54 = vshrl.u32 %v2378_v63, 16  ;;  %v2559_v19 = vshll.u32 %v2378_v63, 16  ;;  %v2280_v27 = vrot.slane %v2129_v61, %v9581_v60 }
 0x201   :  { %v2558_v7 = vrot.slane %v2556_v54, 7  ;;  %v9608_v58 = vrot.slane %v2559_v19, 7  ;;  %v2387_v47 = vrot.slane %v2379_v21, %v9581_v60  ;;  %v2327_v36 = vshrl.u32 %v2280_v27, 16 }
 0x203   :  { %v2561_v12 = vor.u32 %v2559_v19, %v2558_v7 }
 0x205   :  { %v9611_v20 = vsel %vm2547_vm8, %v2551_v52, %v2561_v12 }
 0x214   :  { %v7579_v31 = vpop.f32.mrb[8].mxu0 }
 0x215   :  { %v7580_v56 = vpop.f32.mrb[9].mxu0 }
 0x216   :  { %v7581_v14 = vadd.f32 %v7580_v56, %v7579_v31  ;;  %v7582_v43 = vpop.f32.mrb[10].mxu0 }
 0x217   :  { %v7583_v5 = vpop.f32.mrb[11].mxu0 }
 0x218   :  { %v1995_v15 = vadd.f32 %v7581_v14, %v9574_v0  ;;  %v7584_v17 = vadd.f32 %v7583_v5, %v7582_v43 }
 0x21a   :  { %v1998_v16 = vadd.f32 %v7584_v17, %v9574_v0  ;;  %v2061_v22 = vmax.f32 %v1995_v15, 0.0 }
 0x21c   :  { %v2062_v24 = vmax.f32 %v1998_v16, 0.0 }
 0x21e   :  { %v2079_v42 = vpack.c.bf16 %v2062_v24, %v2061_v22  ;;  %v7320_v19 = vpack.c.bf16 %v2062_v24, %v2062_v24 }
 0x21f   :  { %v7603_v51 = vpop.f32.mrb[0].mxu1 }
 0x220   :  { %v2138_v1 = vrot.slane %v2079_v42, %v9581_v60  ;;  %v7604_v50 = vpop.f32.mrb[1].mxu1  ;;  %v2145_v42 = vrot.slane %v7320_v19, %v9581_v60 }
 0x221   :  { %v7605_v38 = vadd.f32 %v7604_v50, %v7603_v51  ;;  %v7606_v33 = vpop.f32.mrb[2].mxu1 }
 0x222   :  { %v2146_v11 = vcombine.high %v2138_v1, %v2138_v1  ;;  %v2380_v55 = vcombine.low %v2130_v59, %v2138_v1  ;;  %v7607_v46 = vpop.f32.mrb[3].mxu1 }
 0x223   :  { %v2027_v32 = vadd.f32 %v7605_v38, %v9574_v0  ;;  %v7608_v26 = vadd.f32 %v7607_v46, %v7606_v33  ;;  %v2147_v33 = vcombine.high %v2145_v42, %v2145_v42 }
 0x224   :  { %v2394_v29 = vrot.slane %v2380_v55, %v9581_v60  ;;  %v2402_v53 = vrot.slane %v2146_v11, %v9581_v60 }
 0x225   :  { %v2030_v2 = vadd.f32 %v7608_v26, %v9574_v0  ;;  %v2069_v40 = vmax.f32 %v2027_v32, 0.0 }
 0x226   :  { %v2395_v34 = vcombine.low %v2387_v47, %v2394_v29  ;;  %v2571_v6 = vshrl.u32 %v2402_v53, 16  ;;  %v2574_v4 = vshll.u32 %v2402_v53, 16  ;;  %v2403_v53 = vcombine.low %v2145_v42, %v2147_v33 }
 0x227   :  { %v2070_v52 = vmax.f32 %v2030_v2, 0.0 }
 0x228   :  { %v2564_v30 = vshrl.u32 %v2395_v34, 16  ;;  %v2573_v18 = vrot.slane %v2571_v6, 7  ;;  %v2567_v13 = vshll.u32 %v2395_v34, 16  ;;  %v9626_v28 = vrot.slane %v2574_v4, 7 }
 0x229   :  { %v2083_v39 = vpack.c.bf16 %v2070_v52, %v2069_v40  ;;  %v7324_v57 = vpack.c.bf16 %v2070_v52, %v2070_v52 }
 0x22a   :  { %v2566_v8 = vrot.slane %v2564_v30, 7  ;;  %v2576_v44 = vor.u32 %v2574_v4, %v2573_v18 }
 0x22b   :  { %v9629_v3 = vrot.slane %v2083_v39, %v9581_v60  ;;  %v2213_v35 = vrot.slane %v7324_v57, %v9581_v60  ;;  %v2287_v57 = vrot.slane %v2145_v42, %v9581_v60 }
 0x22c   :  { %v2569_v48 = vor.u32 %v2567_v13, %v2566_v8  ;;  %v2577_v9 = vsel %vm2547_vm8, %v2566_v8, %v2576_v44  ;;  %v2411_v8 = vrot.slane %v2403_v53, %v9581_v60 }
 0x22d   :  { %v2714_v62 = vsel %vm9604_vm13, %v2577_v9, %v9626_v28  ;;  %v2214_v49 = vcombine.high %v9629_v3, %v9629_v3  ;;  %v2215_v47 = vcombine.high %v2213_v35, %v2213_v35  ;;  %v2330_v19 = vshrl.u32 %v2287_v57, 16 }
 0x22e   :  { %v9640_v41 = vsel %vm9590_vm10, %v2327_v36, %v2569_v48  ;;  %v9699_v57 = vrot.slane %v9629_v3, %v9581_v60 }
 0x22f   :  { %v2475_v61 = vcombine.low %v2214_v49, %v2213_v35  ;;  %v2308_v13 = vrot.slane %v2214_v49, %v9581_v60 }
 0x231   :  { %v2483_v27 = vrot.slane %v2475_v61, %v9581_v60 }
 0x241   :  { %v7585_v63 = vpop.f32.mrb[12].mxu0  ;;  %v7609_v21 = vpop.f32.mrb[4].mxu1 }
 0x242   :  { %v7586_v54 = vpop.f32.mrb[13].mxu0  ;;  %v7610_v12 = vpop.f32.mrb[5].mxu1 }
 0x243   :  { %v7587_v7 = vadd.f32 %v7586_v54, %v7585_v63  ;;  %v7588_v31 = vpop.f32.mrb[14].mxu0  ;;  %v7611_v56 = vadd.f32 %v7610_v12, %v7609_v21  ;;  %v7612_v14 = vpop.f32.mrb[6].mxu1  ;;  %v2339_v12 = vshrl.u32 %v2308_v13, 16 }
 0x244   :  { %v7589_v43 = vpop.f32.mrb[15].mxu0  ;;  %v7613_v17 = vpop.f32.mrb[7].mxu1 }
 0x245   :  { %v2003_v5 = vadd.f32 %v7587_v7, %v9574_v0  ;;  %v7590_v15 = vadd.f32 %v7589_v43, %v7588_v31  ;;  %v2035_v16 = vadd.f32 %v7611_v56, %v9574_v0  ;;  %v7614_v22 = vadd.f32 %v7613_v17, %v7612_v14 }
 0x246   :  { %v9661_v7 = vunpack.c.l.b16 %v2714_v62 }
 0x247   :  { %v2006_v51 = vadd.f32 %v7590_v15, %v9574_v0  ;;  %v2038_v59 = vadd.f32 %v7614_v22, %v9574_v0  ;;  %v2063_v24 = vmax.f32 %v2003_v5, 0.0  ;;  %v2071_v50 = vmax.f32 %v2035_v16, 0.0 }
 0x248   :  { %12213 = vst [vmem:[#allocation9_spill] sm:$0xff] %v9661_v7  ;;  %v9714_v3 = vrot.slane %v9661_v7, 3 }
 0x249   :  { %v2064_v1 = vmax.f32 %v2006_v51, 0.0  ;;  %v2072_v38 = vmax.f32 %v2038_v59, 0.0 }
 0x24b   :  { %v2080_v11 = vpack.c.bf16 %v2064_v1, %v2063_v24  ;;  %v7321_v55 = vpack.c.bf16 %v2064_v1, %v2064_v1  ;;  %v2084_v46 = vpack.c.bf16 %v2072_v38, %v2071_v50  ;;  %v7325_v30 = vpack.c.bf16 %v2072_v38, %v2072_v38 }
 0x24d   :  { %v2155_v32 = vrot.slane %v2080_v11, %v9581_v60  ;;  %v2162_v26 = vrot.slane %v7321_v55, %v9581_v60  ;;  %v2223_v29 = vrot.slane %v2084_v46, %v9581_v60  ;;  %v9659_v61 = vrot.slane %v7325_v30, %v9581_v60 }
 0x24f   :  { %v2163_v2 = vcombine.high %v2155_v32, %v2155_v32  ;;  %v2426_v34 = vrot.slane %v2162_v26, %v9581_v60  ;;  %v2231_v6 = vcombine.high %v2223_v29, %v2223_v29  ;;  %v2476_v4 = vcombine.low %v2215_v47, %v2223_v29 }
 0x250   :  { %v9663_v56 = vcombine.high %v2162_v26, %v2162_v26  ;;  %v2232_v51 = vcombine.high %v9659_v61, %v9659_v61  ;;  %v2315_v13 = vrot.slane %v9659_v61, %v9581_v60 }
 0x251   :  { %v2404_v40 = vcombine.low %v2155_v32, %v2163_v2  ;;  %v2586_v52 = vshrl.u32 %v2426_v34, 16  ;;  %v2490_v18 = vrot.slane %v2476_v4, %v9581_v60  ;;  %v2498_v39 = vrot.slane %v2231_v6, %v9581_v60 }
 0x252   :  { %v2589_v63 = vshll.u32 %v2426_v34, 16 }
 0x253   :  { %v2418_v44 = vrot.slane %v2404_v40, %v9581_v60  ;;  %v2491_v28 = vcombine.low %v2483_v27, %v2490_v18  ;;  %v2631_v36 = vshrl.u32 %v2498_v39, 16  ;;  %v2588_v9 = vrot.slane %v2586_v52, 7 }
 0x254   :  { %v2634_v35 = vshll.u32 %v2498_v39, 16  ;;  %v9665_v42 = vrot.slane %v2589_v63, 7  ;;  %v9689_v52 = vrot.slane %v9661_v7, 2 }
 0x255   :  { %v2419_v48 = vcombine.low %v2411_v8, %v2418_v44  ;;  %v2624_v21 = vshrl.u32 %v2491_v28, 16  ;;  %v2633_v54 = vrot.slane %v2631_v36, 7  ;;  %v2627_v14 = vshll.u32 %v2491_v28, 16 }
 0x256   :  { %v2591_v17 = vor.u32 %v2589_v63, %v2588_v9  ;;  %v2689_v16 = vrot.slane %v2634_v35, 7  ;;  %v2294_v8 = vrot.slane %v9663_v56, %v9581_v60  ;;  %v9706_v44 = vcombine.low %v9659_v61, %v2232_v51 }
 0x257   :  { %v2579_v31 = vshrl.u32 %v2419_v48, 16  ;;  %v2626_v49 = vrot.slane %v2624_v21, 7  ;;  %v2636_v43 = vor.u32 %v2634_v35, %v2633_v54  ;;  %v2582_v15 = vshll.u32 %v2419_v48, 16 }
 0x258   :  { %v9717_v9 = vunpack.c.l.b16 %v9640_v41  ;;  %v3764_v21 = vrot.slane %v9661_v7, 1 }
 0x259   :  { %v2581_v5 = vrot.slane %v2579_v31, 7  ;;  %v7615_v22 = vpop.f32.mrb[8].mxu1  ;;  %v2629_v59 = vor.u32 %v2627_v14, %v2626_v49  ;;  %v2637_v62 = vsel %vm2547_vm8, %v2626_v49, %v2636_v43  ;;  %v9723_v49 = vshrl.u32 %v2294_v8, 16 }
 0x25a   :  { %v7591_v24 = vpop.f32.mrb[16].mxu0  ;;  %v7616_v1 = vpop.f32.mrb[9].mxu1  ;;  %v2718_v33 = vsel %vm9604_vm13, %v2637_v62, %v2689_v16  ;;  %12215 = vst [vmem:[#allocation11_spill] sm:$0xff] %v9717_v9  ;;  %v9725_v14 = vshrl.u32 %v2315_v13, 16  ;;  %v2507_v43 = vrot.slane %v9706_v44, %v9581_v60 }
 0x25b   :  { %v2584_v50 = vor.u32 %v2582_v15, %v2581_v5  ;;  %v2592_v38 = vsel %vm2547_vm8, %v2581_v5, %v2591_v17  ;;  %v7592_v11 = vpop.f32.mrb[17].mxu0  ;;  %v7617_v55 = vadd.f32 %v7616_v1, %v7615_v22  ;;  %v7618_v46 = vpop.f32.mrb[10].mxu1  ;;  %v9678_v26 = vsel %vm9590_vm10, %v2339_v12, %v2629_v59 }
 0x25c   :  { %v2715_v32 = vsel %vm9604_vm13, %v2592_v38, %v9665_v42  ;;  %v9680_v47 = vunpack.c.l.b16 %v2718_v33  ;;  %v7593_v29 = vadd.f32 %v7592_v11, %v7591_v24  ;;  %v7594_v53 = vpop.f32.mrb[18].mxu0  ;;  %v7619_v2 = vpop.f32.mrb[11].mxu1 }
 0x25d   :  { %v9684_v34 = vsel %vm9590_vm10, %v2330_v19, %v2584_v50  ;;  %v7595_v6 = vpop.f32.mrb[19].mxu0  ;;  %v2043_v40 = vadd.f32 %v7617_v55, %v9574_v0  ;;  %v7620_v30 = vadd.f32 %v7619_v2, %v7618_v46 }
 0x25e   :  { %12214 = vst [vmem:[#allocation10_spill] sm:$0xff] %v9680_v47  ;;  %v2011_v4 = vadd.f32 %v7593_v29, %v9574_v0  ;;  %v7596_v27 = vadd.f32 %v7595_v6, %v7594_v53  ;;  %v9692_v18 = vrot.slane %v9680_v47, 1  ;;  %v9695_v39 = vrot.slane %v9680_v47, 2 }
 0x25f   :  { %v2046_v36 = vadd.f32 %v7620_v30, %v9574_v0  ;;  %v2073_v61 = vmax.f32 %v2043_v40, 0.0  ;;  %v3765_v15 = vsel %vm2726_vm15, %v9680_v47, %v3764_v21  ;;  %v9737_v50 = vsel %vm2876_vm0, %v9680_v47, %v3764_v21 }
 0x260   :  { %v2014_v28 = vadd.f32 %v7596_v27, %v9574_v0  ;;  %v3632_v48 = vsel %vm3107_vm14, %v9692_v18, %v9689_v52  ;;  %v2065_v35 = vmax.f32 %v2011_v4, 0.0  ;;  %v3638_v31 = vsel %vm3107_vm14, %v9695_v39, %v9714_v3 }
 0x261   :  { %v3633_v63 = vpack.c.b16 %v3632_v48, %v3632_v48  ;;  %v2074_v19 = vmax.f32 %v2046_v36, 0.0  ;;  %v3639_v24 = vpack.c.b16 %v3638_v31, %v3638_v31  ;;  %v3769_v1 = vsel %vm2726_vm15, %v9692_v18, %v9689_v52 }
 0x262   :  { %v2066_v54 = vmax.f32 %v2014_v28, 0.0  ;;  %v9743_v29 = vunpack.c.l.b16 %v2715_v32  ;;  %v3766_v4 = vpack.c.b16 %v3765_v15, %v3765_v15  ;;  %v3770_v32 = vpack.c.b16 %v3769_v1, %v3769_v1 }
 0x263   :  { %v7621_v12 = vpop.f32.mrb[12].mxu1  ;;  %3634 = vrot.lane.b32.xlu1 %v3633_v63, %s8200_s21  ;;  %v2085_v22 = vpack.c.bf16 %v2074_v19, %v2073_v61  ;;  %v7326_v42 = vpack.c.bf16 %v2074_v19, %v2074_v19  ;;  %v3884_v48 = vpack.c.b16 %v9737_v50, %v9737_v50  ;;  %v3773_v61 = vsel %vm2726_vm15, %v9695_v39, %v9714_v3 }
 0x264   :  { %v7622_v5 = vpop.f32.mrb[13].mxu1  ;;  %v2081_v17 = vpack.c.bf16 %v2066_v54, %v2065_v35  ;;  %v7322_v16 = vpack.c.bf16 %v2066_v54, %v2066_v54  ;;  %12216 = vst [vmem:[#allocation12_spill] sm:$0xff] %v9743_v29 }
 0x265   :  { %v7624_v51 = vpop.f32.mrb[14].mxu1  ;;  %v7623_v59 = vadd.f32 %v7622_v5, %v7621_v12  ;;  %v2240_v11 = vrot.slane %v2085_v22, %v9581_v60  ;;  %v2247_v55 = vrot.slane %v7326_v42, %v9581_v60  ;;  %v9760_v12 = vsel %vm2876_vm0, %v9692_v18, %v9689_v52 }
 0x266   :  { %v7625_v62 = vpop.f32.mrb[15].mxu1  ;;  %v2172_v38 = vrot.slane %v2081_v17, %v9581_v60  ;;  %v2179_v33 = vrot.slane %v7322_v16, %v9581_v60 }
 0x267   :  { %v7597_v46 = vpop.f32.mrb[20].mxu0  ;;  %v2051_v53 = vadd.f32 %v7623_v59, %v9574_v0  ;;  %v7626_v2 = vadd.f32 %v7625_v62, %v7624_v51  ;;  %3640 = vrot.lane.b32.xlu1 %v3639_v24, %s8201_s26  ;;  %v2248_v8 = vcombine.high %v2240_v11, %v2240_v11  ;;  %v2522_v44 = vrot.slane %v2247_v55, %v9581_v60 }
 0x268   :  { %v7598_v6 = vpop.f32.mrb[21].mxu0  ;;  %v2180_v40 = vcombine.high %v2172_v38, %v2172_v38  ;;  %v2181_v27 = vcombine.high %v2179_v33, %v2179_v33  ;;  %v2427_v30 = vcombine.low %v9663_v56, %v2172_v38  ;;  %v9765_v16 = vcombine.high %v2247_v55, %v2247_v55 }
 0x269   :  { %v7600_v13 = vpop.f32.mrb[22].mxu0  ;;  %v2054_v28 = vadd.f32 %v7626_v2, %v9574_v0  ;;  %v2500_v21 = vcombine.low %v2240_v11, %v2248_v8  ;;  %v2646_v56 = vshrl.u32 %v2522_v44, 16  ;;  %v2075_v54 = vmax.f32 %v2051_v53, 0.0 }
 0x26a   :  { %v7601_v36 = vpop.f32.mrb[23].mxu0  ;;  %v2428_v35 = vcombine.low %v2180_v40, %v2179_v33  ;;  %v2450_v63 = vrot.slane %v2181_v27, %v9581_v60  ;;  %v2435_v31 = vrot.slane %v2427_v30, %v9581_v60  ;;  %v3774_v51 = vpack.c.b16 %v3773_v61, %v3773_v61 }
 0x26b   :  { %v2076_v19 = vmax.f32 %v2054_v28, 0.0  ;;  %3767 = vrot.lane.b32.xlu1 %v3766_v4, %s8199_s16  ;;  %v2514_v17 = vrot.slane %v2500_v21, %v9581_v60  ;;  %v2648_v22 = vrot.slane %v2646_v56, 7  ;;  %v2649_v1 = vshll.u32 %v2522_v44, 16 }
 0x26c   :  { %v2442_v5 = vrot.slane %v2428_v35, %v9581_v60  ;;  %v2601_v15 = vshrl.u32 %v2450_v63, 16  ;;  %v2604_v50 = vshll.u32 %v2450_v63, 16  ;;  %v7599_v18 = vadd.f32 %v7598_v6, %v7597_v46 }
 0x26d   :  { %v2086_v42 = vpack.c.bf16 %v2076_v19, %v2075_v54  ;;  %v2515_v24 = vcombine.low %v2507_v43, %v2514_v17  ;;  %v7327_v38 = vpack.c.bf16 %v2076_v19, %v2076_v19  ;;  %v2651_v2 = vor.u32 %v2649_v1, %v2648_v22 }
 0x26e   :  { %v2443_v59 = vcombine.low %v2435_v31, %v2442_v5  ;;  %v2603_v62 = vrot.slane %v2601_v15, 7  ;;  %v7602_v44 = vadd.f32 %v7601_v36, %v7600_v13  ;;  %v9771_v28 = vrot.slane %v2604_v50, 7 }
 0x26f   :  { %v2257_v52 = vrot.slane %v2086_v42, %v9581_v60  ;;  %3771 = vrot.lane.b32.xlu1 %v3770_v32, %s8200_s21  ;;  %v2639_v53 = vshrl.u32 %v2515_v24, 16  ;;  %v2264_v4 = vrot.slane %v7327_v38, %v9581_v60  ;;  %v2642_v8 = vshll.u32 %v2515_v24, 16 }
 0x270   :  { %v2594_v33 = vshrl.u32 %v2443_v59, 16  ;;  %v2597_v11 = vshll.u32 %v2443_v59, 16  ;;  %v2606_v55 = vor.u32 %v2604_v50, %v2603_v62  ;;  %v2690_v35 = vrot.slane %v2649_v1, 7 }
 0x271   :  { %v2265_v40 = vcombine.high %v2257_v52, %v2257_v52  ;;  %v2523_v27 = vcombine.low %v9765_v16, %v2257_v52  ;;  %v2641_v43 = vrot.slane %v2639_v53, 7  ;;  %v2266_v46 = vcombine.high %v2264_v4, %v2264_v4 }
 0x272   :  { %v2596_v30 = vrot.slane %v2594_v33, 7  ;;  %v9800_v15 = vunpack.c.l.b16 %v9678_v26  ;;  %v2019_v17 = vadd.f32 %v7599_v18, %v9574_v0  ;;  %v9808_v22 = vrot.slane %v9717_v9, 1 }
 0x273   :  { %v2524_v6 = vcombine.low %v2265_v40, %v2264_v4  ;;  %3885 = vrot.lane.b32.xlu1 %v3884_v48, %s8199_s16  ;;  %v2644_v21 = vor.u32 %v2642_v8, %v2641_v43  ;;  %v2652_v61 = vsel %vm2547_vm8, %v2641_v43, %v2651_v2  ;;  %v2546_v48 = vrot.slane %v2266_v46, %v9581_v60 }
 0x274   :  { %v2599_v32 = vor.u32 %v2597_v11, %v2596_v30  ;;  %v9775_v63 = vsel %vm2547_vm8, %v2596_v30, %v2606_v55  ;;  %v2719_v36 = vsel %vm9604_vm13, %v2652_v61, %v2690_v35  ;;  %v2531_v5 = vrot.slane %v2523_v27, %v9581_v60 }
 0x275   :  { %v2716_v13 = vsel %vm9604_vm13, %v9775_v63, %v9771_v28  ;;  %v2538_v56 = vrot.slane %v2524_v6, %v9581_v60  ;;  %v9794_v19 = vsel %vm9590_vm10, %v9725_v14, %v2644_v21  ;;  %v9796_v31 = vunpack.c.l.b16 %v2719_v36 }
 0x276   :  { %v9789_v54 = vsel %vm9590_vm10, %v9723_v49, %v2599_v32  ;;  %v3891_v49 = vsel %vm2876_vm0, %v9695_v39, %v9714_v3  ;;  %v2661_v42 = vshrl.u32 %v2546_v48, 16  ;;  %v3888_v59 = vpack.c.b16 %v9760_v12, %v9760_v12 }
 0x277   :  { %12217 = vst [vmem:[#allocation13_spill] sm:$0xff] %v9796_v31  ;;  %3775 = vrot.lane.b32.xlu1 %v3774_v51, %s8201_s26  ;;  %v2539_v14 = vcombine.low %v2531_v5, %v2538_v56  ;;  %v9813_v62 = vrot.slane %v9743_v29, 2  ;;  %v2664_v24 = vshll.u32 %v2546_v48, 16  ;;  %v2022_v1 = vadd.f32 %v7602_v44, %v9574_v0 }
 0x278   :  { %v9817_v51 = vrot.slane %v9796_v31, 1  ;;  %v9820_v50 = vrot.slane %v9796_v31, 2  ;;  %v2322_v39 = vrot.slane %v9765_v16, %v9581_v60  ;;  %v2663_v38 = vrot.slane %v2661_v42, 7 }
 0x279   :  { %v2654_v3 = vshrl.u32 %v2539_v14, 16  ;;  %v3892_v52 = vpack.c.b16 %v3891_v49, %v3891_v49  ;;  %v2067_v18 = vmax.f32 %v2019_v17, 0.0  ;;  %v2068_v12 = vmax.f32 %v2022_v1, 0.0 }
 0x27a   :  { %12218 = vst [vmem:[#allocation14_spill] sm:$0xff] %v9820_v50  ;;  %v3654_v0 = vsel %vm3107_vm14, %v9817_v51, %v9813_v62  ;;  %v9829_v33 = vrot.slane %v9743_v29, 3  ;;  %v2657_v53 = vshll.u32 %v2539_v14, 16  ;;  %v2666_v2 = vor.u32 %v2664_v24, %v2663_v38 }
 0x27b   :  { %3889 = vrot.lane.b32.xlu1 %v3888_v59, %s8200_s21  ;;  %v2656_v11 = vrot.slane %v2654_v3, 7  ;;  %v3655_v55 = vpack.c.b16 %v3654_v0, %v3654_v0  ;;  %v9831_v4 = vrot.slane %v2664_v24, 7  ;;  %v2082_v16 = vpack.c.bf16 %v2068_v12, %v2067_v18 }
 0x27c   :  { %12219 = vst [vmem:[#allocation15_spill] sm:$0xff] %v9829_v33  ;;  %v7323_v40 = vpack.c.bf16 %v2068_v12, %v2068_v12  ;;  %v3660_v27 = vsel %vm3107_vm14, %v9820_v50, %v9829_v33  ;;  %v2345_v30 = vshrl.u32 %v2322_v39, 16  ;;  %v3008_v44 = vsel %vm2991_vm1, %v9800_v15, %v9808_v22 }
 0x27d   :  { %v2659_v43 = vor.u32 %v2657_v53, %v2656_v11  ;;  %v9837_v8 = vsel %vm2547_vm8, %v2656_v11, %v2666_v2  ;;  %3656 = vrot.lane.b32.xlu0 %v3655_v55, %s8200_s21  ;;  %v2189_v46 = vrot.slane %v2082_v16, %v9581_v60  ;;  %v3780_v32 = vrot.slane %v9743_v29, 1 }
 0x27e   :  { %v2720_v35 = vsel %vm9604_vm13, %v9837_v8, %v9831_v4  ;;  %v2196_v6 = vrot.slane %v7323_v40, %v9581_v60  ;;  %v3661_v61 = vpack.c.b16 %v3660_v27, %v3660_v27  ;;  %v3009_v48 = vpack.c.b16 %v3008_v44, %v3008_v44 }
 0x27f   :  { %3893 = vrot.lane.b32.xlu1 %v3892_v52, %s8201_s26  ;;  %v9853_v21 = vsel %vm9590_vm10, %v2345_v30, %v2659_v43  ;;  %v2197_v36 = vcombine.high %v2189_v46, %v2189_v46  ;;  %v3781_v5 = vsel %vm2726_vm15, %v9796_v31, %v3780_v32  ;;  %v2616_v17 = vshrl.u32 %v9699_v57, 16 }
 0x280   :  { %v2198_v56 = vcombine.high %v2196_v6, %v2196_v6  ;;  %v9859_v49 = vunpack.c.l.b16 %v9684_v34  ;;  %v2754_v14 = vsel %vm2726_vm15, %v9800_v15, %v9808_v22  ;;  %v9867_v24 = vunpack.c.l.b16 %v9794_v19 }
 0x281   :  { %3662 = vrot.lane.b32.xlu0 %v3661_v61, %s8201_s26  ;;  %v2451_v42 = vcombine.low %v2189_v46, %v2197_v36  ;;  %v3782_v1 = vpack.c.b16 %v3781_v5, %v3781_v5  ;;  %v3785_v39 = vsel %vm2726_vm15, %v9817_v51, %v9813_v62  ;;  %v2755_v52 = vpack.c.b16 %v2754_v14, %v2754_v14 }
 0x282   :  { %v2452_v59 = vcombine.low %v2196_v6, %v2198_v56  ;;  %v2618_v18 = vrot.slane %v2616_v17, 7  ;;  %v2893_v12 = vsel %vm2876_vm0, %v9800_v15, %v9808_v22  ;;  %v2759_v0 = vrot.slane %v9800_v15, 1 }
 0x283   :  { %3010 = vrot.lane.b32.xlu1 %v3009_v48, %s8199_s16  ;;  %v2459_v3 = vrot.slane %v2451_v42, %v9581_v60  ;;  %v2777_v11 = vrot.slane %v9859_v49, 1  ;;  %v12183_v53 = vshll.u32 %v9699_v57, 16  ;;  %v3786_v55 = vpack.c.b16 %v3785_v39, %v3785_v39 }
 0x284   :  { %v2466_v38 = vrot.slane %v2452_v59, %v9581_v60  ;;  %v2758_v16 = vrot.slane %v9717_v9, 2  ;;  %v2301_v40 = vrot.slane %v2189_v46, %v9581_v60  ;;  %v2894_v6 = vpack.c.b16 %v2893_v12, %v2893_v12 }
 0x285   :  { %3783 = vrot.lane.b32.xlu0 %v3782_v1, %s8199_s16  ;;  %v9886_v27 = vsel %vm2991_vm1, %v9867_v24, %v2777_v11  ;;  %v9890_v30 = vsel %vm2726_vm15, %v9867_v24, %v2777_v11  ;;  %v9894_v43 = vsel %vm2876_vm0, %v9867_v24, %v2777_v11  ;;  %v3897_v61 = vsel %vm2876_vm0, %v9796_v31, %v3780_v32 }
 0x286   :  { %v2467_v2 = vcombine.low %v2459_v3, %v2466_v38  ;;  %v2621_v46 = vor.u32 %v12183_v53, %v2618_v18  ;;  %v3012_v36 = vsel %vm2991_vm1, %v2759_v0, %v2758_v16  ;;  %v2782_v5 = vrot.slane %v9859_v49, 2 }
 0x287   :  { %2756 = vrot.lane.b32.xlu1 %v2755_v52, %s8199_s16  ;;  %v2783_v17 = vrot.slane %v9867_v24, 1  ;;  %v2336_v14 = vshrl.u32 %v2301_v40, 16  ;;  %v3898_v42 = vpack.c.b16 %v3897_v61, %v3897_v61  ;;  %v3789_v32 = vsel %vm2726_vm15, %v9820_v50, %v9829_v33 }
 0x288   :  { %v2609_v44 = vshrl.u32 %v2467_v2, 16  ;;  %v2612_v48 = vshll.u32 %v2467_v2, 16  ;;  %v9910_v59 = vsel %vm3107_vm14, %v9867_v24, %v2777_v11  ;;  %v3013_v3 = vpack.c.b16 %v3012_v36, %v3012_v36 }
 0x289   :  { %3787 = vrot.lane.b32.xlu0 %v3786_v55, %s8200_s21  ;;  %v9916_v38 = vsel %vm2991_vm1, %v2783_v17, %v2782_v5  ;;  %v9919_v52 = vunpack.c.h.b16 %v9684_v34  ;;  %v9922_v18 = vunpack.c.h.b16 %v9794_v19  ;;  %v3130_v12 = vsel %vm3107_vm14, %v9800_v15, %v9808_v22 }
 0x28a   :  { %v2611_v56 = vrot.slane %v2609_v44, 7  ;;  %v9929_v11 = vsel %vm2726_vm15, %v2783_v17, %v2782_v5  ;;  %v9937_v34 = vsel %vm2876_vm0, %v2783_v17, %v2782_v5  ;;  %v3790_v19 = vpack.c.b16 %v3789_v32, %v3789_v32 }
 0x28b   :  { %2895 = vrot.lane.b32.xlu1 %v2894_v6, %s8199_s16  ;;  %v3131_v55 = vpack.c.b16 %v3130_v12, %v3130_v12  ;;  %v3901_v40 = vsel %vm2876_vm0, %v9817_v51, %v9813_v62  ;;  %v2788_v22 = vrot.slane %v9859_v49, 3  ;;  %v2789_v44 = vrot.slane %v9867_v24, 2 }
 0x28c   :  { %v2614_v1 = vor.u32 %v2612_v48, %v2611_v56  ;;  %v9913_v39 = vsel %vm2547_vm8, %v2611_v56, %v2621_v46  ;;  %v2760_v6 = vsel %vm2726_vm15, %v2759_v0, %v2758_v16  ;;  %v3156_v61 = vrot.slane %v9919_v52, 2 }
 0x28d   :  { %3899 = vrot.lane.b32.xlu0 %v3898_v42, %s8199_s16  ;;  %v3157_v46 = vrot.slane %v9922_v18, 1  ;;  %v9950_v36 = vsel %vm2991_vm1, %v2789_v44, %v2788_v22  ;;  %v9953_v56 = vsel %vm2726_vm15, %v2789_v44, %v2788_v22  ;;  %v9956_v62 = vunpack.c.h.b16 %v9678_v26 }
 0x28e   :  { %v9933_v2 = vsel %vm9590_vm10, %v2336_v14, %v2614_v1  ;;  %v3902_v51 = vpack.c.b16 %v3901_v40, %v3901_v40  ;;  %v9962_v5 = vunpack.c.h.b16 %v9640_v41  ;;  %v2761_v17 = vpack.c.b16 %v2760_v6, %v2760_v6 }
 0x28f   :  { %3014 = vrot.lane.b32.xlu1 %v3013_v3, %s8200_s21  ;;  %v9959_v48 = vsel %vm3107_vm14, %v3157_v46, %v3156_v61  ;;  %v9965_v14 = vsel %vm2876_vm0, %v2789_v44, %v2788_v22  ;;  %v2897_v42 = vsel %vm2876_vm0, %v2759_v0, %v2758_v16  ;;  %v2765_v32 = vrot.slane %v9800_v15, 2 }
 0x290   :  { %12220 = vst [vmem:[#allocation16_spill] sm:$0xff] %v9962_v5  ;;  %v3162_v26 = vrot.slane %v9919_v52, 3  ;;  %v3163_v1 = vrot.slane %v9922_v18, 2  ;;  %v9977_v41 = vunpack.c.l.b16 %v2716_v13  ;;  %v2764_v3 = vrot.slane %v9717_v9, 3 }
 0x291   :  { %3791 = vrot.lane.b32.xlu0 %v3790_v19, %s8201_s26  ;;  %v3282_v12 = vrot.slane %v9919_v52, 1  ;;  %v9987_v0 = vunpack.c.l.b16 %v2720_v35  ;;  %v3023_v16 = vpack.c.b16 %v9886_v27, %v9886_v27  ;;  %v9992_v28 = vrot.slane %v9956_v62, 1 }
 0x292   :  { %v9995_v63 = vsel %vm3107_vm14, %v3163_v1, %v3162_v26  ;;  %v2898_v13 = vpack.c.b16 %v2897_v42, %v2897_v42  ;;  %v10006_v4 = vsel %vm2726_vm15, %v3157_v46, %v3156_v61  ;;  %v3016_v8 = vsel %vm2991_vm1, %v2765_v32, %v2764_v3 }
 0x293   :  { %3132 = vrot.lane.b32.xlu1 %v3131_v55, %s8199_s16  ;;  %v9999_v19 = vsel %vm2726_vm15, %v9922_v18, %v3282_v12  ;;  %v10003_v55 = vsel %vm2991_vm1, %v9922_v18, %v3282_v12  ;;  %v10011_v35 = vrot.slane %v9962_v5, 2  ;;  %v10016_v27 = vsel %vm2876_vm0, %v9922_v18, %v3282_v12 }
 0x294   :  { %v10019_v40 = vsel %vm2991_vm1, %v3157_v46, %v3156_v61  ;;  %v2779_v22 = vpack.c.b16 %v9890_v30, %v9890_v30  ;;  %v3017_v6 = vpack.c.b16 %v3016_v8, %v3016_v8  ;;  %v10030_v42 = vsel %vm3107_vm14, %v9922_v18, %v3282_v12 }
 0x295   :  { %3903 = vrot.lane.b32.xlu0 %v3902_v51, %s8200_s21  ;;  %v3138_v44 = vsel %vm3107_vm14, %v9992_v28, %v10011_v35  ;;  %v3674_v51 = vrot.slane %v9977_v41, 2  ;;  %v10037_v30 = vrot.slane %v9987_v0, 2  ;;  %v3796_v8 = vrot.slane %v9977_v41, 1 }
 0x296   :  { %v10048_v12 = vsel %vm2876_vm0, %v3157_v46, %v3156_v61  ;;  %v3139_v10 = vpack.c.b16 %v3138_v44, %v3138_v44  ;;  %v2766_v61 = vsel %vm2726_vm15, %v2765_v32, %v2764_v3  ;;  %v10071_v46 = vsel %vm2991_vm1, %v3163_v1, %v3162_v26 }
 0x297   :  { %2762 = vrot.lane.b32.xlu1 %v2761_v17, %s8200_s21  ;;  %v3675_v17 = vrot.slane %v9987_v0, 1  ;;  %v10059_v60 = vsel %vm2726_vm15, %v9987_v0, %v3796_v8  ;;  %v10075_v7 = vsel %vm2876_vm0, %v9987_v0, %v3796_v8  ;;  %v10078_v47 = vunpack.c.l.b16 %v9789_v54 }
 0x298   :  { %v3027_v44 = vpack.c.b16 %v9916_v38, %v9916_v38  ;;  %v2901_v38 = vsel %vm2876_vm0, %v2765_v32, %v2764_v3  ;;  %v3151_v8 = vpack.c.b16 %v9910_v59, %v9910_v59  ;;  %v10143_v31 = vunpack.c.h.b16 %v9789_v54 }
 0x299   :  { %3024 = vrot.lane.b32.xlu0 %v3023_v16, %s8199_s16  ;;  %v10034_v16 = vrot.slane %v9977_v41, 3  ;;  %v10045_v45 = vsel %vm3107_vm14, %v3675_v17, %v3674_v51  ;;  %v2801_v50 = vrot.slane %v10078_v47, 1  ;;  %v2806_v33 = vrot.slane %v10078_v47, 2 }
 0x29b   :  { %2899 = vrot.lane.b32.xlu1 %v2898_v13, %s8200_s21  ;;  %v10040_v13 = vsel %vm2726_vm15, %v3163_v1, %v3162_v26  ;;  %v10055_v53 = vsel %vm3107_vm14, %v10037_v30, %v10034_v16 }
 0x29d   :  { %2780 = vrot.lane.b32.xlu0 %v2779_v22, %s8199_s16  ;;  %v2908_v22 = vpack.c.b16 %v9894_v43, %v9894_v43  ;;  %v10068_v43 = vsel %vm2726_vm15, %v3675_v17, %v3674_v51 }
 0x29f   :  { %3018 = vrot.lane.b32.xlu1 %v3017_v6, %s8201_s26  ;;  %v12221_v6 = vshll.u32 %v9699_v57, 16  ;;  %v10082_v57 = vsel %vm2876_vm0, %v3163_v1, %v3162_v26  ;;  %v2767_v26 = vpack.c.b16 %v2766_v61, %v2766_v61  ;;  %v10104_v1 = vrot.slane %v9956_v62, 2 }
 0x2a1   :  { %v10063_v25 = vrot.slane %v12221_v6, 7  ;;  %2909 = vrot.lane.b32.xlu0 %v2908_v22, %s8199_s16  ;;  %v10089_v22 = vsel %vm2726_vm15, %v10037_v30, %v10034_v16  ;;  %v10096_v6 = vsel %vm2876_vm0, %v3675_v17, %v3674_v51  ;;  %v10111_v51 = vrot.slane %v9962_v5, 3 }
 0x2a2   :  { %v2902_v17 = vpack.c.b16 %v2901_v38, %v2901_v38 }
 0x2a3   :  { %3140 = vrot.lane.b32.xlu1 %v3139_v10, %s8200_s21  ;;  %v10099_v10 = vunpack.c.l.b16 %v9853_v21  ;;  %v3144_v3 = vsel %vm3107_vm14, %v10104_v1, %v10111_v51 }
 0x2a4   :  { %v3145_v38 = vpack.c.b16 %v3144_v3, %v3144_v3  ;;  %v2774_v3 = vrot.slane %v9867_v24, 7 }
 0x2a5   :  { %3028 = vrot.lane.b32.xlu0 %v3027_v44, %s8200_s21  ;;  %v10115_v61 = vsel %vm2991_vm1, %v10099_v10, %v2801_v50  ;;  %v10119_v32 = vsel %vm2726_vm15, %v10099_v10, %v2801_v50  ;;  %v10128_v59 = vsel %vm2876_vm0, %v10099_v10, %v2801_v50  ;;  %v2785_v44 = vpack.c.b16 %v9929_v11, %v9929_v11 }
 0x2a6   :  { %v10167_v24 = vsel %vm2726_vm15, %v2774_v3, %v9859_v49 }
 0x2a7   :  { %2768 = vrot.lane.b32.xlu1 %v2767_v26, %s8201_s26  ;;  %v3266_v26 = vrot.slane %v9962_v5, 1  ;;  %v10151_v5 = vunpack.c.h.b16 %v9853_v21  ;;  %12225 = vst [vmem:[#allocation20_spill] sm:$0xff] %v10167_v24 }
 0x2a9   :  { %3152 = vrot.lane.b32.xlu0 %v3151_v8, %s8199_s16  ;;  %v2807_v8 = vrot.slane %v10099_v10, 1  ;;  %v3267_v29 = vsel %vm2726_vm15, %v9956_v62, %v3266_v26  ;;  %v3499_v21 = vsel %vm2991_vm1, %v9956_v62, %v3266_v26 }
 0x2aa   :  { %v3268_v54 = vpack.c.b16 %v3267_v29, %v3267_v29  ;;  %v2812_v29 = vrot.slane %v10078_v47, 3  ;;  %v3500_v24 = vpack.c.b16 %v3499_v21, %v3499_v21  ;;  %v3159_v21 = vpack.c.b16 %v9959_v48, %v9959_v48 }
 0x2ab   :  { %2903 = vrot.lane.b32.xlu1 %v2902_v17, %s8201_s26  ;;  %v10140_v17 = vsel %vm3107_vm14, %v10099_v10, %v2801_v50  ;;  %v10147_v11 = vsel %vm2991_vm1, %v2807_v8, %v2806_v33  ;;  %v10156_v9 = vsel %vm2726_vm15, %v2807_v8, %v2806_v33  ;;  %v10159_v50 = vsel %vm2876_vm0, %v2807_v8, %v2806_v33 }
 0x2ac   :  { %12222 = vst [vmem:[#allocation17_spill] sm:$0xff] %v10156_v9  ;;  %12223 = vst [vmem:[#allocation18_spill] sm:$0xff] %v10159_v50  ;;  %v10175_v33 = vsel %vm2876_vm0, %v2774_v3, %v9859_v49  ;;  %v3031_v8 = vpack.c.b16 %v9950_v36, %v9950_v36  ;;  %v2791_v48 = vpack.c.b16 %v9953_v56, %v9953_v56 }
 0x2ad   :  { %2786 = vrot.lane.b32.xlu0 %v2785_v44, %s8200_s21  ;;  %v2912_v44 = vpack.c.b16 %v9937_v34, %v9937_v34  ;;  %12226 = vst [vmem:[#allocation21_spill] sm:$0xff] %v10175_v33  ;;  %v2813_v34 = vrot.slane %v10099_v10, 2  ;;  %v3271_v33 = vsel %vm2726_vm15, %v9992_v28, %v10011_v35 }
 0x2af   :  { %3146 = vrot.lane.b32.xlu1 %v3145_v38, %s8201_s26  ;;  %v10163_v38 = vsel %vm2991_vm1, %v2774_v3, %v9859_v49  ;;  %v10184_v50 = vsel %vm2991_vm1, %v2813_v34, %v2812_v29  ;;  %v10198_v9 = vsel %vm2726_vm15, %v2813_v34, %v2812_v29 }
 0x2b0   :  { %12224 = vst [vmem:[#allocation19_spill] sm:$0xff] %v10163_v38  ;;  %v3176_v38 = vrot.slane %v10143_v31, 2  ;;  %12229 = vst [vmem:[#allocation24_spill] sm:$0xff] %v10198_v9  ;;  %v3298_v9 = vrot.slane %v10143_v31, 1 }
 0x2b1   :  { %2913 = vrot.lane.b32.xlu0 %v2912_v44, %s8200_s21  ;;  %v3177_v44 = vrot.slane %v10151_v5, 1 }
 0x2b2   :  { %v10236_v56 = vsel %vm2876_vm0, %v10151_v5, %v3298_v9 }
 0x2b3   :  { %3269 = vrot.lane.b32.xlu1 %v3268_v54, %s8199_s16  ;;  %v10188_v54 = vsel %vm3107_vm14, %v2774_v3, %v9859_v49  ;;  %v10195_v36 = vsel %vm3107_vm14, %v3177_v44, %v3176_v38  ;;  %v10204_v49 = vsel %vm2876_vm0, %v2813_v34, %v2812_v29  ;;  %v3272_v3 = vpack.c.b16 %v3271_v33, %v3271_v33 }
 0x2b4   :  { %12227 = vst [vmem:[#allocation22_spill] sm:$0xff] %v10188_v54  ;;  %12228 = vst [vmem:[#allocation23_spill] sm:$0xff] %v10195_v36  ;;  %v3183_v54 = vrot.slane %v10151_v5, 2  ;;  %v3385_v36 = vsel %vm2876_vm0, %v9956_v62, %v3266_v26  ;;  %v10220_v33 = vsel %vm2726_vm15, %v10151_v5, %v3298_v9  ;;  %v10224_v34 = vsel %vm2991_vm1, %v10151_v5, %v3298_v9 }
 0x2b5   :  { %3032 = vrot.lane.b32.xlu0 %v3031_v8, %s8201_s26  ;;  %v3182_v8 = vrot.slane %v10143_v31, 3  ;;  %12230 = vst [vmem:[#allocation25_spill] sm:$0xff] %v10220_v33  ;;  %v3386_v29 = vpack.c.b16 %v3385_v36, %v3385_v36  ;;  %12231 = vst [vmem:[#allocation26_spill] sm:$0xff] %v10224_v34  ;;  %v2916_v36 = vpack.c.b16 %v9965_v14, %v9965_v14 }
 0x2b6   :  { %12233 = vst [vmem:[#allocation28_spill] sm:$0xff] %v10236_v56  ;;  %v10241_v34 = vsel %vm2991_vm1, %v3177_v44, %v3176_v38  ;;  %v3622_v33 = vsel %vm3107_vm14, %v9956_v62, %v3266_v26  ;;  %v3165_v14 = vpack.c.b16 %v9995_v63, %v9995_v63 }
 0x2b7   :  { %3501 = vrot.lane.b32.xlu1 %v3500_v24, %s8199_s16  ;;  %v10214_v24 = vsel %vm3107_vm14, %v3183_v54, %v3182_v8  ;;  %v10253_v56 = vsel %vm2726_vm15, %v3183_v54, %v3182_v8 }
 0x2b9   :  { %3160 = vrot.lane.b32.xlu0 %v3159_v21, %s8200_s21  ;;  %v3503_v21 = vsel %vm2991_vm1, %v9992_v28, %v10011_v35 }
 0x2bb   :  { %3273 = vrot.lane.b32.xlu1 %v3272_v3, %s8200_s21  ;;  %v10231_v3 = vsel %vm2726_vm15, %v3177_v44, %v3176_v38 }
 0x2bc   :  { %12232 = vst [vmem:[#allocation27_spill] sm:$0xff] %v10231_v3  ;;  %v10250_v3 = vsel %vm3107_vm14, %v10151_v5, %v3298_v9  ;;  %v3275_v9 = vsel %vm2726_vm15, %v10104_v1, %v10111_v51 }
 0x2bd   :  { %2792 = vrot.lane.b32.xlu0 %v2791_v48, %s8201_s26  ;;  %v3504_v48 = vpack.c.b16 %v3503_v21, %v3503_v21  ;;  %v10258_v21 = vsel %vm2876_vm0, %v3177_v44, %v3176_v38  ;;  %v10278_v38 = vsel %vm2991_vm1, %v3183_v54, %v3182_v8  ;;  %v3284_v44 = vpack.c.b16 %v9999_v19, %v9999_v19 }
 0x2be   :  { %v3514_v19 = vpack.c.b16 %v10003_v55, %v10003_v55 }
 0x2bf   :  { %3387 = vrot.lane.b32.xlu1 %v3386_v29, %s8199_s16  ;;  %v3279_v29 = vrot.slane %v9922_v18, 7 }
 0x2c1   :  { %2917 = vrot.lane.b32.xlu0 %v2916_v36, %s8201_s26  ;;  %v3623_v36 = vpack.c.b16 %v3622_v33, %v3622_v33  ;;  %v10262_v26 = vsel %vm2726_vm15, %v3279_v29, %v9919_v52  ;;  %v10266_v18 = vsel %vm2991_vm1, %v3279_v29, %v9919_v52  ;;  %v10275_v63 = vsel %vm2876_vm0, %v3279_v29, %v9919_v52 }
 0x2c2   :  { %12234 = vst [vmem:[#allocation29_spill] sm:$0xff] %v10275_v63  ;;  %v3276_v33 = vpack.c.b16 %v3275_v9, %v3275_v9  ;;  %v10296_v63 = vsel %vm2876_vm0, %v10037_v30, %v10034_v16  ;;  %v2798_v16 = vrot.slane %v10099_v10, 7  ;;  %v3393_v30 = vsel %vm2876_vm0, %v10104_v1, %v10111_v51 }
 0x2c3   :  { %3505 = vrot.lane.b32.xlu1 %v3504_v48, %s8200_s21  ;;  %v10283_v48 = vsel %vm2876_vm0, %v3183_v54, %v3182_v8  ;;  %v3793_v54 = vrot.slane %v9987_v0, 7  ;;  %v3507_v8 = vsel %vm2991_vm1, %v10104_v1, %v10111_v51  ;;  %v3288_v0 = vpack.c.b16 %v10006_v4, %v10006_v4 }
 0x2c4   :  { %v3508_v55 = vpack.c.b16 %v3507_v8, %v3507_v8  ;;  %v3400_v4 = vpack.c.b16 %v10016_v27, %v10016_v27  ;;  %v3394_v9 = vpack.c.b16 %v3393_v30, %v3393_v30  ;;  %v10341_v1 = vsel %vm3107_vm14, %v2798_v16, %v10078_v47 }
 0x2c5   :  { %3166 = vrot.lane.b32.xlu0 %v3165_v14, %s8201_s26  ;;  %v10287_v14 = vsel %vm3107_vm14, %v3279_v29, %v9919_v52  ;;  %v10329_v29 = vsel %vm2726_vm15, %v2798_v16, %v10078_v47  ;;  %v3295_v51 = vrot.slane %v10151_v5, 7  ;;  %v3518_v27 = vpack.c.b16 %v10019_v40, %v10019_v40 }
 0x2c6   :  { %v3912_v30 = vpack.c.b16 %v10075_v7, %v10075_v7  ;;  %v3806_v7 = vpack.c.b16 %v10089_v22, %v10089_v22  ;;  %v3916_v22 = vpack.c.b16 %v10096_v6, %v10096_v6 }
 0x2c7   :  { %3624 = vrot.lane.b32.xlu1 %v3623_v36, %s8199_s16  ;;  %v3389_v36 = vsel %vm2876_vm0, %v9992_v28, %v10011_v35  ;;  %v10308_v28 = vsel %vm2726_vm15, %v3793_v54, %v9977_v41  ;;  %v10312_v35 = vsel %vm2876_vm0, %v3793_v54, %v9977_v41  ;;  %v10325_v41 = vsel %vm2991_vm1, %v2798_v16, %v10078_v47 }
 0x2c8   :  { %v3390_v52 = vpack.c.b16 %v3389_v36, %v3389_v36  ;;  %v10362_v5 = vsel %vm2876_vm0, %v3295_v51, %v10143_v31  ;;  %v10366_v40 = vsel %vm3107_vm14, %v3295_v51, %v10143_v31 }
 0x2c9   :  { %3285 = vrot.lane.b32.xlu0 %v3284_v44, %s8199_s16  ;;  %v10337_v44 = vsel %vm2876_vm0, %v2798_v16, %v10078_v47  ;;  %v10358_v47 = vsel %vm2991_vm1, %v3295_v51, %v10143_v31  ;;  %12237 = vst [vmem:[#allocation32_spill] sm:$0xff] %v10362_v5  ;;  %v3522_v16 = vpack.c.b16 %v10071_v46, %v10071_v46 }
 0x2ca   :  { %12236 = vst [vmem:[#allocation31_spill] sm:$0xff] %v10358_v47 }
 0x2cb   :  { %3277 = vrot.lane.b32.xlu1 %v3276_v33, %s8201_s26  ;;  %v3677_v33 = vpack.c.b16 %v10045_v45, %v10045_v45  ;;  %v3645_v45 = vpack.c.b16 %v10030_v42, %v10030_v42  ;;  %v3404_v42 = vpack.c.b16 %v10048_v12, %v10048_v12 }
 0x2cd   :  { %3515 = vrot.lane.b32.xlu0 %v3514_v19, %s8199_s16  ;;  %v10354_v19 = vsel %vm2726_vm15, %v3295_v51, %v10143_v31  ;;  %v3292_v31 = vpack.c.b16 %v10040_v13, %v10040_v13  ;;  %v12238_v13 = vsel %vm9604_vm13, %v9611_v20, %v9608_v58  ;;  %v3408_v20 = vpack.c.b16 %v10082_v57, %v10082_v57 }
 0x2ce   :  { %12235 = vst [vmem:[#allocation30_spill] sm:$0xff] %v10354_v19  ;;  %v10433_v57 = vunpack.c.l.b16 %v9933_v2  ;;  %v12258_v19 = vld [vmem:[#allocation27_spill] sm:$0xff] }
 0x2cf   :  { %3391 = vrot.lane.b32.xlu1 %v3390_v52, %s8200_s21  ;;  %v3683_v52 = vpack.c.b16 %v10055_v53, %v10055_v53 }
 0x2d1   :  { %3289 = vrot.lane.b32.xlu0 %v3288_v0, %s8200_s21  ;;  %v3798_v0 = vpack.c.b16 %v10059_v60, %v10059_v60  ;;  %v10398_v60 = vunpack.c.l.b16 %v12238_v13 }
 0x2d3   :  { %3509 = vrot.lane.b32.xlu1 %v3508_v55, %s8201_s26  ;;  %v3802_v55 = vpack.c.b16 %v10068_v43, %v10068_v43  ;;  %v12239_v43 = vsel %vm9604_vm13, %v9913_v39, %v10063_v25  ;;  %v3748_v58 = vrot.slane %v10398_v60, 1  ;;  %v10427_v25 = vunpack.c.l.b16 %v9596_v37 }
 0x2d5   :  { %v10333_v10 = vpop.permute.xlu1 %3634  ;;  %3401 = vrot.lane.b32.xlu0 %v3400_v4, %s8199_s16  ;;  %v10412_v4 = vunpack.c.l.b16 %v12239_v43 }
 0x2d7   :  { %3395 = vrot.lane.b32.xlu1 %v3394_v9, %s8201_s26  ;;  %v3749_v9 = vsel %vm2726_vm15, %v10412_v4, %v3748_v58 }
 0x2d8   :  { %v3750_v51 = vpack.c.b16 %v3749_v9, %v3749_v9 }
 0x2d9   :  { %v10350_v36 = vpop.permute.xlu1 %3640  ;;  %3519 = vrot.lane.b32.xlu0 %v3518_v27, %s8200_s21 }
 0x2db   :  { %3678 = vrot.lane.b32.xlu1 %v3677_v33, %s8200_s21  ;;  %v3869_v33 = vsel %vm2876_vm0, %v10412_v4, %v3748_v58 }
 0x2dd   :  { %v10372_v54 = vpop.permute.xlu1 %3767  ;;  %3646 = vrot.lane.b32.xlu0 %v3645_v45, %s8199_s16  ;;  %v2729_v45 = vrot.slane %v10427_v25, 1 }
 0x2df   :  { %3684 = vrot.lane.b32.xlu1 %v3683_v52, %s8201_s26  ;;  %v2730_v43 = vsel %vm2726_vm15, %v10433_v57, %v2729_v45  ;;  %v2879_v9 = vsel %vm2876_vm0, %v10433_v57, %v2729_v45 }
 0x2e0   :  { %v2731_v58 = vpack.c.b16 %v2730_v43, %v2730_v43  ;;  %v3171_v43 = vpack.c.b16 %v10140_v17, %v10140_v17 }
 0x2e1   :  { %v10380_v8 = vpop.permute.xlu1 %3771  ;;  %3293 = vrot.lane.b32.xlu0 %v3292_v31, %s8201_s26  ;;  %v3870_v31 = vpack.c.b16 %v3869_v33, %v3869_v33  ;;  %v10476_v33 = vunpack.c.h.b16 %v9933_v2 }
 0x2e3   :  { %3799 = vrot.lane.b32.xlu1 %v3798_v0, %s8199_s16 }
 0x2e5   :  { %v10388_v53 = vpop.permute.xlu1 %3885  ;;  %3405 = vrot.lane.b32.xlu0 %v3404_v42, %s8200_s21  ;;  %v3037_v42 = vpack.c.b16 %v10115_v61, %v10115_v61 }
 0x2e7   :  { %3803 = vrot.lane.b32.xlu1 %v3802_v55, %s8200_s21  ;;  %v2994_v55 = vsel %vm2991_vm1, %v10433_v57, %v2729_v45 }
 0x2e8   :  { %v2995_v13 = vpack.c.b16 %v2994_v55, %v2994_v55  ;;  %v2750_v55 = vrot.slane %v9800_v15, 7 }
 0x2e9   :  { %v10403_v12 = vpop.permute.xlu1 %3775  ;;  %3523 = vrot.lane.b32.xlu0 %v3522_v16, %s8201_s26 }
 0x2eb   :  { %3913 = vrot.lane.b32.xlu1 %v3912_v30, %s8199_s16  ;;  %v2803_v30 = vpack.c.b16 %v10119_v32, %v10119_v32  ;;  %v10470_v32 = vunpack.c.h.b16 %v9596_v37 }
 0x2ed   :  { %v10419_v46 = vpop.permute.xlu1 %3889  ;;  %3409 = vrot.lane.b32.xlu0 %v3408_v20, %s8201_s26  ;;  %v3250_v37 = vrot.slane %v10470_v32, 1 }
 0x2ef   :  { %3807 = vrot.lane.b32.xlu1 %v3806_v7, %s8201_s26  ;;  %v10430_v39 = vpop.permute.xlu0 %3656  ;;  %v2922_v7 = vpack.c.b16 %v10128_v59, %v10128_v59  ;;  %v3041_v59 = vpack.c.b16 %v10147_v11, %v10147_v11  ;;  %v3251_v11 = vsel %vm2726_vm15, %v10476_v33, %v3250_v37  ;;  %v3485_v17 = vsel %vm2991_vm1, %v10476_v33, %v3250_v37 }
 0x2f0   :  { %12240 = vst [vmem:[#allocation33_spill] sm:$0xff] %v10430_v39  ;;  %v3252_v15 = vpack.c.b16 %v3251_v11, %v3251_v11  ;;  %v3486_v23 = vpack.c.b16 %v3485_v17, %v3485_v17  ;;  %v3371_v5 = vsel %vm2876_vm0, %v10476_v33, %v3250_v37 }
 0x2f1   :  { %v10435_v27 = vpop.permute.xlu1 %3893  ;;  %3751 = vrot.lane.b32.xlu0 %v3750_v51, %s8199_s16  ;;  %v3372_v17 = vpack.c.b16 %v3371_v5, %v3371_v5 }
 0x2f3   :  { %3917 = vrot.lane.b32.xlu1 %v3916_v22, %s8200_s21  ;;  %v10444_v52 = vpop.permute.xlu0 %3662  ;;  %v2880_v22 = vpack.c.b16 %v2879_v9, %v2879_v9 }
 0x2f4   :  { %12241 = vst [vmem:[#allocation34_spill] sm:$0xff] %v10444_v52 }
 0x2f5   :  { %v3011_v0 = vpop.permute.xlu1 %3010  ;;  %3871 = vrot.lane.b32.xlu0 %v3870_v31, %s8199_s16 }
 0x2f7   :  { %3038 = vrot.lane.b32.xlu1 %v3037_v42, %s8199_s16  ;;  %v10452_v6 = vpop.permute.xlu0 %3783  ;;  %v3110_v42 = vsel %vm3107_vm14, %v10433_v57, %v2729_v45  ;;  %v12243_v45 = vld [vmem:[#allocation11_spill] sm:$0xff] }
 0x2f9   :  { %v10454_v16 = vpop.permute.xlu1 %2756  ;;  %2996 = vrot.lane.b32.xlu0 %v2995_v13, %s8199_s16 }
 0x2fb   :  { %2804 = vrot.lane.b32.xlu1 %v2803_v30, %s8199_s16  ;;  %v10462_v61 = vpop.permute.xlu0 %3787  ;;  %v3111_v30 = vpack.c.b16 %v3110_v42, %v3110_v42  ;;  %v3006_v42 = vsel %vm2991_vm1, %v2750_v55, %v12243_v45 }
 0x2fc   :  { %v3007_v47 = vpack.c.b16 %v3006_v42, %v3006_v42  ;;  %v3045_v42 = vpack.c.b16 %v10184_v50, %v10184_v50 }
 0x2fd   :  { %v2896_v20 = vpop.permute.xlu1 %2895  ;;  %2732 = vrot.lane.b32.xlu0 %v2731_v58, %s8199_s16  ;;  %v2891_v58 = vsel %vm2876_vm0, %v2750_v55, %v12243_v45 }
 0x2ff   :  { %2923 = vrot.lane.b32.xlu1 %v2922_v7, %s8199_s16  ;;  %v10473_v51 = vpop.permute.xlu0 %3899 }
 0x300   :  { %12242 = vst [vmem:[#allocation35_spill] sm:$0xff] %v10473_v51  ;;  %v12246_v51 = vld [vmem:[#allocation18_spill] sm:$0xff] }
 0x301   :  { %v3015_v31 = vpop.permute.xlu1 %3014  ;;  %2881 = vrot.lane.b32.xlu0 %v2880_v22, %s8199_s16  ;;  %v12245_v22 = vld [vmem:[#allocation17_spill] sm:$0xff] }
 0x303   :  { %3042 = vrot.lane.b32.xlu1 %v3041_v59, %s8200_s21  ;;  %v10486_v13 = vpop.permute.xlu0 %3791  ;;  %v2809_v59 = vpack.c.b16 %v12245_v22, %v12245_v22  ;;  %v2926_v22 = vpack.c.b16 %v12246_v51, %v12246_v51 }
 0x305   :  { %v3133_v2 = vpop.permute.xlu1 %3132  ;;  %3112 = vrot.lane.b32.xlu0 %v3111_v30, %s8199_s16  ;;  %v2892_v30 = vpack.c.b16 %v2891_v58, %v2891_v58  ;;  %v3057_v58 = vsel %vm1468_vm2, %v3007_v47, %v3011_v0  ;;  %v2751_v0 = vsel %vm2726_vm15, %v2750_v55, %v12243_v45 }
 0x306   :  { %v3059_v51 = vsel %vm1477_vm3, %v3057_v58, %v3015_v31  ;;  %v3608_v31 = vrot.slane %v10398_v60, 2  ;;  %v12248_v58 = vld [vmem:[#allocation23_spill] sm:$0xff] }
 0x307   :  { %3172 = vrot.lane.b32.xlu1 %v3171_v43, %s8199_s16  ;;  %v10496_v7 = vpop.permute.xlu0 %3903  ;;  %v2942_v11 = vsel %vm1468_vm2, %v2892_v30, %v2896_v20 }
 0x308   :  { %12244 = vst [vmem:[#allocation11_spill] sm:$0xff] %v10496_v7 }
 0x309   :  { %v2763_v9 = vpop.permute.xlu1 %2762  ;;  %3253 = vrot.lane.b32.xlu0 %v3252_v15, %s8199_s16 }
 0x30b   :  { %2810 = vrot.lane.b32.xlu1 %v2809_v59, %s8200_s21  ;;  %v10506_v43 = vpop.permute.xlu0 %3024  ;;  %v3128_v59 = vsel %vm3107_vm14, %v2750_v55, %v12243_v45  ;;  %v3614_v45 = vrot.slane %v10398_v60, 3 }
 0x30c   :  { %v3129_v5 = vpack.c.b16 %v3128_v59, %v3128_v59 }
 0x30d   :  { %v2900_v7 = vpop.permute.xlu1 %2899  ;;  %3487 = vrot.lane.b32.xlu0 %v3486_v23, %s8199_s16  ;;  %v3600_v23 = vsel %vm3107_vm14, %v10476_v33, %v3250_v37 }
 0x30e   :  { %v2944_v15 = vsel %vm1477_vm3, %v2942_v11, %v2900_v7  ;;  %v3609_v7 = vrot.slane %v10412_v4, 1  ;;  %v3601_v50 = vpack.c.b16 %v3600_v23, %v3600_v23  ;;  %v3197_v37 = vsel %vm1468_vm2, %v3129_v5, %v3133_v2 }
 0x30f   :  { %2927 = vrot.lane.b32.xlu1 %v2926_v22, %s8200_s21  ;;  %v10519_v20 = vpop.permute.xlu0 %2780 }
 0x311   :  { %v3019_v30 = vpop.permute.xlu1 %3018  ;;  %3373 = vrot.lane.b32.xlu0 %v3372_v17, %s8199_s16  ;;  %v3179_v17 = vpack.c.b16 %v12248_v58, %v12248_v58  ;;  %v12249_v58 = vld [vmem:[#allocation24_spill] sm:$0xff] }
 0x312   :  { %v10529_v47 = vsel %vm1486_vm4, %v3059_v51, %v3019_v30  ;;  %v3610_v51 = vsel %vm3107_vm14, %v3609_v7, %v3608_v31  ;;  %v3615_v30 = vrot.slane %v10412_v4, 2 }
 0x313   :  { %12247 = vst [vmem:[#allocation17_spill] sm:$0xff] %v10529_v47  ;;  %3046 = vrot.lane.b32.xlu1 %v3045_v42, %s8201_s26  ;;  %v10535_v11 = vpop.permute.xlu0 %2909  ;;  %v2752_v47 = vpack.c.b16 %v2751_v0, %v2751_v0  ;;  %v3611_v42 = vpack.c.b16 %v3610_v51, %v3610_v51  ;;  %v2815_v0 = vpack.c.b16 %v12249_v58, %v12249_v58  ;;  %v10563_v51 = vrot.slane %v9956_v62, 7 }
 0x314   :  { %v3185_v58 = vpack.c.b16 %v10214_v24, %v10214_v24 }
 0x315   :  { %v3141_v22 = vpop.permute.xlu1 %3140  ;;  %3602 = vrot.lane.b32.xlu0 %v3601_v50, %s8199_s16  ;;  %v2827_v2 = vsel %vm1468_vm2, %v2752_v47, %v10454_v16  ;;  %v3616_v50 = vsel %vm3107_vm14, %v3615_v30, %v3614_v45 }
 0x316   :  { %v3199_v55 = vsel %vm1477_vm3, %v3197_v37, %v3141_v22  ;;  %v2829_v23 = vsel %vm1477_vm3, %v2827_v2, %v2763_v9  ;;  %v3617_v16 = vpack.c.b16 %v3616_v50, %v3616_v50  ;;  %v3753_v9 = vsel %vm2726_vm15, %v3609_v7, %v3608_v31 }
 0x317   :  { %3180 = vrot.lane.b32.xlu1 %v3179_v17, %s8200_s21  ;;  %v10548_v59 = vpop.permute.xlu0 %3028  ;;  %v2930_v17 = vpack.c.b16 %v10204_v49, %v10204_v49  ;;  %v3757_v49 = vsel %vm2726_vm15, %v3615_v30, %v3614_v45 }
 0x319   :  { %v2769_v5 = vpop.permute.xlu1 %2768  ;;  %3612 = vrot.lane.b32.xlu0 %v3611_v42, %s8200_s21 }
 0x31a   :  { %v10556_v37 = vsel %vm1486_vm4, %v2829_v23, %v2769_v5  ;;  %v3754_v23 = vpack.c.b16 %v3753_v9, %v3753_v9  ;;  %v12254_v9 = vld [vmem:[#allocation25_spill] sm:$0xff] }
 0x31b   :  { %12250 = vst [vmem:[#allocation18_spill] sm:$0xff] %v10556_v37  ;;  %2816 = vrot.lane.b32.xlu1 %v2815_v0, %s8201_s26  ;;  %v3153_v22 = vpop.permute.xlu0 %3152  ;;  %v12252_v0 = vld [vmem:[#allocation16_spill] sm:$0xff]  ;;  %v3300_v24 = vpack.c.b16 %v12254_v9, %v12254_v9 }
 0x31c   :  { %v3264_v62 = vsel %vm2726_vm15, %v10563_v51, %v12252_v0  ;;  %v3497_v37 = vsel %vm2991_vm1, %v10563_v51, %v12252_v0 }
 0x31d   :  { %v2904_v47 = vpop.permute.xlu1 %2903  ;;  %3618 = vrot.lane.b32.xlu0 %v3617_v16, %s8201_s26  ;;  %v3758_v16 = vpack.c.b16 %v3757_v49, %v3757_v49 }
 0x31e   :  { %v10567_v2 = vsel %vm1486_vm4, %v2944_v15, %v2904_v47  ;;  %v3265_v47 = vpack.c.b16 %v3264_v62, %v3264_v62  ;;  %v12255_v62 = vld [vmem:[#allocation26_spill] sm:$0xff] }
 0x31f   :  { %12251 = vst [vmem:[#allocation23_spill] sm:$0xff] %v10567_v2  ;;  %2931 = vrot.lane.b32.xlu1 %v2930_v17, %s8201_s26  ;;  %v2787_v42 = vpop.permute.xlu0 %2786  ;;  %v3873_v2 = vsel %vm2876_vm0, %v3609_v7, %v3608_v31  ;;  %v3528_v9 = vpack.c.b16 %v12255_v62, %v12255_v62  ;;  %v3877_v7 = vsel %vm2876_vm0, %v3615_v30, %v3614_v45  ;;  %v2735_v31 = vrot.slane %v10433_v57, 1 }
 0x320   :  { %v3878_v30 = vpack.c.b16 %v3877_v7, %v3877_v7 }
 0x321   :  { %v3147_v5 = vpop.permute.xlu1 %3146  ;;  %3755 = vrot.lane.b32.xlu0 %v3754_v23, %s8200_s21 }
 0x322   :  { %v10578_v50 = vsel %vm1486_vm4, %v3199_v55, %v3147_v5  ;;  %v3874_v5 = vpack.c.b16 %v3873_v2, %v3873_v2  ;;  %v2734_v2 = vrot.slane %v10427_v25, 2 }
 0x323   :  { %12253 = vst [vmem:[#allocation24_spill] sm:$0xff] %v10578_v50  ;;  %3186 = vrot.lane.b32.xlu1 %v3185_v58, %s8201_s26  ;;  %v2914_v15 = vpop.permute.xlu0 %2913  ;;  %v3498_v58 = vpack.c.b16 %v3497_v37, %v3497_v37  ;;  %v12256_v50 = vld [vmem:[#allocation22_spill] sm:$0xff]  ;;  %v12257_v37 = vld [vmem:[#allocation20_spill] sm:$0xff] }
 0x324   :  { %v3149_v52 = vpack.c.b16 %v12256_v50, %v12256_v50  ;;  %v3304_v50 = vpack.c.b16 %v12258_v19, %v12258_v19 }
 0x325   :  { %v3270_v17 = vpop.permute.xlu1 %3269  ;;  %3759 = vrot.lane.b32.xlu0 %v3758_v16, %s8201_s26 }
 0x326   :  { %v3320_v55 = vsel %vm1468_vm2, %v3265_v47, %v3270_v17  ;;  %v2776_v47 = vpack.c.b16 %v12257_v37, %v12257_v37  ;;  %v3204_v17 = vsel %vm1468_vm2, %v3149_v52, %v3153_v22  ;;  %v12259_v37 = vld [vmem:[#allocation21_spill] sm:$0xff] }
 0x327   :  { %3301 = vrot.lane.b32.xlu1 %v3300_v24, %s8199_s16  ;;  %v10590_v23 = vpop.permute.xlu0 %3032 }
 0x328   :  { %v2834_v52 = vsel %vm1468_vm2, %v2776_v47, %v10519_v20 }
 0x329   :  { %v3502_v49 = vpop.permute.xlu1 %3501  ;;  %3875 = vrot.lane.b32.xlu0 %v3874_v5, %s8200_s21  ;;  %v2998_v5 = vsel %vm2991_vm1, %v2735_v31, %v2734_v2  ;;  %v2836_v22 = vsel %vm1477_vm3, %v2834_v52, %v2787_v42 }
 0x32a   :  { %v3548_v16 = vsel %vm1468_vm2, %v3498_v58, %v3502_v49  ;;  %v3383_v58 = vsel %vm2876_vm0, %v10563_v51, %v12252_v0  ;;  %v2999_v7 = vpack.c.b16 %v2998_v5, %v2998_v5 }
 0x32b   :  { %3529 = vrot.lane.b32.xlu1 %v3528_v9, %s8199_s16  ;;  %v3161_v24 = vpop.permute.xlu0 %3160  ;;  %v3384_v19 = vpack.c.b16 %v3383_v58, %v3383_v58  ;;  %v3620_v58 = vsel %vm3107_vm14, %v10563_v51, %v12252_v0 }
 0x32c   :  { %v3206_v45 = vsel %vm1477_vm3, %v3204_v17, %v3161_v24  ;;  %v2906_v17 = vpack.c.b16 %v12259_v37, %v12259_v37 }
 0x32d   :  { %v3274_v62 = vpop.permute.xlu1 %3273  ;;  %3879 = vrot.lane.b32.xlu0 %v3878_v30, %s8201_s26  ;;  %v12260_v30 = vld [vmem:[#allocation28_spill] sm:$0xff] }
 0x32e   :  { %v3322_v49 = vsel %vm1477_vm3, %v3320_v55, %v3274_v62  ;;  %v3414_v55 = vpack.c.b16 %v12260_v30, %v12260_v30  ;;  %v2736_v62 = vsel %vm2726_vm15, %v2735_v31, %v2734_v2  ;;  %v2949_v42 = vsel %vm1468_vm2, %v2906_v17, %v10535_v11 }
 0x32f   :  { %3305 = vrot.lane.b32.xlu1 %v3304_v50, %s8200_s21  ;;  %v2793_v9 = vpop.permute.xlu0 %2792  ;;  %v2951_v47 = vsel %vm1477_vm3, %v2949_v42, %v2914_v15  ;;  %v2737_v5 = vpack.c.b16 %v2736_v62, %v2736_v62  ;;  %v2741_v11 = vrot.slane %v10433_v57, 2  ;;  %v3281_v30 = vpack.c.b16 %v10262_v26, %v10262_v26 }
 0x330   :  { %v10621_v24 = vsel %vm1486_vm4, %v2836_v22, %v2793_v9  ;;  %v2883_v9 = vsel %vm2876_vm0, %v2735_v31, %v2734_v2  ;;  %v10653_v2 = vrot.slane %v10476_v33, 1 }
 0x331   :  { %v3388_v39 = vpop.permute.xlu1 %3387  ;;  %3000 = vrot.lane.b32.xlu0 %v2999_v7, %s8200_s21  ;;  %v2740_v7 = vrot.slane %v10427_v25, 3  ;;  %v2884_v0 = vpack.c.b16 %v2883_v9, %v2883_v9 }
 0x332   :  { %v3434_v20 = vsel %vm1468_vm2, %v3384_v19, %v3388_v39  ;;  %v3532_v39 = vpack.c.b16 %v10241_v34, %v10241_v34  ;;  %v3621_v19 = vpack.c.b16 %v3620_v58, %v3620_v58  ;;  %v3667_v34 = vpack.c.b16 %v10250_v3, %v10250_v3 }
 0x333   :  { %3415 = vrot.lane.b32.xlu1 %v3414_v55, %s8199_s16  ;;  %v2918_v50 = vpop.permute.xlu0 %2917  ;;  %v3002_v31 = vsel %vm2991_vm1, %v2741_v11, %v2740_v7 }
 0x334   :  { %v10636_v52 = vsel %vm1486_vm4, %v2951_v47, %v2918_v50  ;;  %v3003_v3 = vpack.c.b16 %v3002_v31, %v3002_v31  ;;  %v3308_v47 = vpack.c.b16 %v10253_v56, %v10253_v56  ;;  %v3418_v56 = vpack.c.b16 %v10258_v21, %v10258_v21 }
 0x335   :  { %v3506_v22 = vpop.permute.xlu1 %3505  ;;  %2738 = vrot.lane.b32.xlu0 %v2737_v5, %s8200_s21  ;;  %v3512_v5 = vpack.c.b16 %v10266_v18, %v10266_v18  ;;  %v2887_v31 = vsel %vm2876_vm0, %v2741_v11, %v2740_v7  ;;  %v10690_v21 = vrot.slane %v10476_v33, 2 }
 0x336   :  { %v3550_v15 = vsel %vm1477_vm3, %v3548_v16, %v3506_v22 }
 0x337   :  { %3533 = vrot.lane.b32.xlu1 %v3532_v39, %s8200_s21  ;;  %v3167_v51 = vpop.permute.xlu0 %3166 }
 0x338   :  { %v10647_v37 = vsel %vm1486_vm4, %v3206_v45, %v3167_v51  ;;  %v10663_v45 = vrot.slane %v10470_v32, 2  ;;  %v2742_v51 = vsel %vm2726_vm15, %v2741_v11, %v2740_v7  ;;  %v3422_v7 = vpack.c.b16 %v10283_v48, %v10283_v48 }
 0x339   :  { %v3625_v17 = vpop.permute.xlu1 %3624  ;;  %2885 = vrot.lane.b32.xlu0 %v2884_v0, %s8200_s21  ;;  %v2743_v18 = vpack.c.b16 %v2742_v51, %v2742_v51 }
 0x33a   :  { %v10657_v16 = vsel %vm1468_vm2, %v3621_v19, %v3625_v17  ;;  %v3118_v50 = vsel %vm3107_vm14, %v10653_v2, %v10663_v45  ;;  %v3255_v48 = vsel %vm2726_vm15, %v10653_v2, %v10663_v45 }
 0x33b   :  { %3668 = vrot.lane.b32.xlu1 %v3667_v34, %s8199_s16  ;;  %v3286_v55 = vpop.permute.xlu0 %3285  ;;  %v3119_v22 = vpack.c.b16 %v3118_v50, %v3118_v50  ;;  %v3536_v34 = vpack.c.b16 %v10278_v38, %v10278_v38 }
 0x33c   :  { %v3327_v62 = vsel %vm1468_vm2, %v3281_v30, %v3286_v55 }
 0x33d   :  { %v3278_v42 = vpop.permute.xlu1 %3277  ;;  %3004 = vrot.lane.b32.xlu0 %v3003_v3, %s8201_s26  ;;  %v3122_v3 = vrot.slane %v10470_v32, 3 }
 0x33e   :  { %v10673_v26 = vsel %vm1486_vm4, %v3322_v49, %v3278_v42  ;;  %v2888_v42 = vpack.c.b16 %v2887_v31, %v2887_v31 }
 0x33f   :  { %3309 = vrot.lane.b32.xlu1 %v3308_v47, %s8201_s26  ;;  %v3516_v58 = vpop.permute.xlu0 %3515  ;;  %v3124_v47 = vsel %vm3107_vm14, %v10690_v21, %v3122_v3 }
 0x340   :  { %v3555_v39 = vsel %vm1468_vm2, %v3512_v5, %v3516_v58  ;;  %v3125_v5 = vpack.c.b16 %v3124_v47, %v3124_v47 }
 0x341   :  { %v3392_v9 = vpop.permute.xlu1 %3391  ;;  %3120 = vrot.lane.b32.xlu0 %v3119_v22, %s8200_s21 }
 0x342   :  { %v3436_v49 = vsel %vm1477_vm3, %v3434_v20, %v3392_v9  ;;  %v12261_v20 = vld [vmem:[#allocation29_spill] sm:$0xff]  ;;  %v3920_v9 = vpack.c.b16 %v10296_v63, %v10296_v63  ;;  %v3489_v63 = vsel %vm2991_vm1, %v10653_v2, %v10663_v45 }
 0x343   :  { %3419 = vrot.lane.b32.xlu1 %v3418_v56, %s8200_s21  ;;  %v3290_v0 = vpop.permute.xlu0 %3289  ;;  %v3398_v55 = vpack.c.b16 %v12261_v20, %v12261_v20  ;;  %v3643_v56 = vpack.c.b16 %v10287_v14, %v10287_v14  ;;  %v3795_v14 = vpack.c.b16 %v10308_v28, %v10308_v28  ;;  %v3259_v20 = vsel %vm2726_vm15, %v10690_v21, %v3122_v3 }
 0x344   :  { %v3329_v19 = vsel %vm1477_vm3, %v3327_v62, %v3290_v0  ;;  %v3375_v28 = vsel %vm2876_vm0, %v10653_v2, %v10663_v45  ;;  %v3493_v45 = vsel %vm2991_vm1, %v10690_v21, %v3122_v3 }
 0x345   :  { %v3510_v17 = vpop.permute.xlu1 %3509  ;;  %2744 = vrot.lane.b32.xlu0 %v2743_v18, %s8201_s26 }
 0x346   :  { %v10694_v30 = vsel %vm1486_vm4, %v3550_v15, %v3510_v17  ;;  %v3490_v17 = vpack.c.b16 %v3489_v63, %v3489_v63 }
 0x347   :  { %3537 = vrot.lane.b32.xlu1 %v3536_v34, %s8201_s26  ;;  %v3402_v62 = vpop.permute.xlu0 %3401 }
 0x348   :  { %v3441_v38 = vsel %vm1468_vm2, %v3398_v55, %v3402_v62  ;;  %v12262_v62 = vld [vmem:[#allocation13_spill] sm:$0xff] }
 0x349   :  { %v3396_v11 = vpop.permute.xlu1 %3395  ;;  %2889 = vrot.lane.b32.xlu0 %v2888_v42, %s8201_s26  ;;  %v3777_v42 = vrot.slane %v12262_v62, 7 }
 0x34a   :  { %v10707_v15 = vsel %vm1486_vm4, %v3436_v49, %v3396_v11  ;;  %v3256_v49 = vpack.c.b16 %v3255_v48, %v3255_v48 }
 0x34b   :  { %3423 = vrot.lane.b32.xlu1 %v3422_v7, %s8201_s26  ;;  %v3520_v50 = vpop.permute.xlu0 %3519  ;;  %v3260_v7 = vpack.c.b16 %v3259_v20, %v3259_v20 }
 0x34c   :  { %v3557_v58 = vsel %vm1477_vm3, %v3555_v39, %v3520_v50 }
 0x34d   :  { %v10711_v22 = vpop.permute.xlu1 %3678  ;;  %3126 = vrot.lane.b32.xlu0 %v3125_v5, %s8201_s26  ;;  %v12263_v5 = vld [vmem:[#allocation12_spill] sm:$0xff] }
 0x34f   :  { %3921 = vrot.lane.b32.xlu1 %v3920_v9, %s8201_s26  ;;  %v3647_v51 = vpop.permute.xlu0 %3646  ;;  %v3778_v9 = vsel %vm2726_vm15, %v3777_v42, %v12263_v5 }
 0x350   :  { %v10723_v39 = vsel %vm1468_vm2, %v3643_v56, %v3647_v51  ;;  %v3376_v56 = vpack.c.b16 %v3375_v28, %v3375_v28  ;;  %v3910_v51 = vpack.c.b16 %v10312_v35, %v10312_v35  ;;  %v3779_v63 = vpack.c.b16 %v3778_v9, %v3778_v9  ;;  %v12264_v9 = vld [vmem:[#allocation15_spill] sm:$0xff] }
 0x351   :  { %v10725_v0 = vpop.permute.xlu1 %3684  ;;  %3257 = vrot.lane.b32.xlu0 %v3256_v49, %s8200_s21 }
 0x353   :  { %v3294_v18 = vpop.permute.xlu0 %3293 }
 0x354   :  { %v10734_v34 = vsel %vm1486_vm4, %v3329_v19, %v3294_v18 }
 0x355   :  { %v3800_v31 = vpop.permute.xlu1 %3799  ;;  %3491 = vrot.lane.b32.xlu0 %v3490_v17, %s8200_s21  ;;  %v3825_v17 = vsel %vm1468_vm2, %v3779_v63, %v10452_v6 }
 0x356   :  { %v3832_v55 = vsel %vm1468_vm2, %v3795_v14, %v3800_v31  ;;  %v3494_v31 = vpack.c.b16 %v3493_v45, %v3493_v45 }
 0x357   :  { %v3406_v11 = vpop.permute.xlu0 %3405 }
 0x358   :  { %v3443_v47 = vsel %vm1477_vm3, %v3441_v38, %v3406_v11  ;;  %v3745_v38 = vrot.slane %v10412_v4, 7  ;;  %v3827_v4 = vsel %vm1477_vm3, %v3825_v17, %v10462_v61 }
 0x359   :  { %v3804_v50 = vpop.permute.xlu1 %3803  ;;  %3261 = vrot.lane.b32.xlu0 %v3260_v7, %s8201_s26  ;;  %v10774_v11 = vsel %vm1486_vm4, %v3827_v4, %v10486_v13 }
 0x35a   :  { %v3834_v19 = vsel %vm1477_vm3, %v3832_v55, %v3804_v50  ;;  %v3746_v35 = vsel %vm2726_vm15, %v3745_v38, %v10398_v60  ;;  %v3379_v55 = vsel %vm2876_vm0, %v10690_v21, %v3122_v3  ;;  %v3867_v28 = vsel %vm2876_vm0, %v3745_v38, %v10398_v60 }
 0x35b   :  { %v3524_v48 = vpop.permute.xlu0 %3523  ;;  %v3747_v61 = vpack.c.b16 %v3746_v35, %v3746_v35  ;;  %v2725_v21 = vrot.slane %v10433_v57, 7  ;;  %v3035_v60 = vpack.c.b16 %v10325_v41, %v10325_v41 }
 0x35c   :  { %v10755_v49 = vsel %vm1486_vm4, %v3557_v58, %v3524_v48  ;;  %v12265_v48 = vld [vmem:[#allocation14_spill] sm:$0xff] }
 0x35d   :  { %v3914_v2 = vpop.permute.xlu1 %3913  ;;  %3377 = vrot.lane.b32.xlu0 %v3376_v56, %s8200_s21  ;;  %v2992_v57 = vsel %vm2991_vm1, %v2725_v21, %v10427_v25  ;;  %v2727_v35 = vsel %vm2726_vm15, %v2725_v21, %v10427_v25 }
 0x35e   :  { %v3946_v18 = vsel %vm1468_vm2, %v3910_v51, %v3914_v2  ;;  %v3868_v51 = vpack.c.b16 %v3867_v28, %v3867_v28 }
 0x35f   :  { %v3410_v14 = vpop.permute.xlu0 %3409 }
 0x360   :  { %v10768_v58 = vsel %vm1486_vm4, %v3443_v47, %v3410_v14  ;;  %v3380_v47 = vpack.c.b16 %v3379_v55, %v3379_v55  ;;  %v2993_v14 = vpack.c.b16 %v2992_v57, %v2992_v57  ;;  %v2728_v55 = vpack.c.b16 %v2727_v35, %v2727_v35 }
 0x361   :  { %v3808_v20 = vpop.permute.xlu1 %3807  ;;  %3495 = vrot.lane.b32.xlu0 %v3494_v31, %s8201_s26  ;;  %v2800_v31 = vpack.c.b16 %v10329_v29, %v10329_v29 }
 0x362   :  { %v10778_v6 = vsel %vm1486_vm4, %v3834_v19, %v3808_v20  ;;  %v3905_v19 = vsel %vm2876_vm0, %v12265_v48, %v12264_v9 }
 0x363   :  { %v3842_v7 = vcombine.low %v10774_v11, %v10778_v6  ;;  %v3752_v50 = vpop.permute.xlu0 %3751  ;;  %v3906_v45 = vpack.c.b16 %v3905_v19, %v3905_v19  ;;  %v3108_v19 = vsel %vm3107_vm14, %v2725_v21, %v10427_v25 }
 0x364   :  { %v10786_v3 = vsel %vm1468_vm2, %v3747_v61, %v3752_v50  ;;  %v2920_v50 = vpack.c.b16 %v10337_v44, %v10337_v44  ;;  %v7823_v44 = vld [vmem:[%s12176_s3 + $0x40] sm:$0xff]  }
 0x365   :  { %v3918_v13 = vpop.permute.xlu1 %3917  ;;  %3381 = vrot.lane.b32.xlu0 %v3380_v47, %s8201_s26  ;;  %v2877_v47 = vsel %vm2876_vm0, %v2725_v21, %v10427_v25  ;;  %7627 = vmatprep.subr.bf16.mxu1 %v7823_v44  ;;  %v7826_v21 = vld [vmem:[%s12176_s3 + $0x8] sm:$0xff]  }
 0x366   :  { %v10793_v56 = vsel %vm1477_vm3, %v3946_v18, %v3918_v13  ;;  %v2878_v9 = vpack.c.b16 %v2877_v47, %v2877_v47 }
 0x367   :  { %v3872_v2 = vpop.permute.xlu0 %3871 }
 0x368   :  { %v10800_v38 = vsel %vm1468_vm2, %v3868_v51, %v3872_v2  ;;  %v3247_v51 = vrot.slane %v10476_v33, 7  ;;  %v7824_v2 = vld [vmem:[%s12176_s3] sm:$0xff]   ;;  %v3109_v33 = vpack.c.b16 %v3108_v19, %v3108_v19 }
 0x369   :  { %v3039_v63 = vpop.permute.xlu1 %3038  ;;  %3907 = vrot.lane.b32.xlu0 %v3906_v45, %s8201_s26  ;;  %v7825_v45 = vld [vmem:[%s12176_s3 + $0x48] sm:$0xff]   ;;  %7628 = vmatpush3.bf16.msra.mxu1 %v7824_v2  ;;  %v7831_v2 = vld [vmem:[%s12176_s3 + $0x60] sm:$0xff]  }
 0x36a   :  { %v3071_v17 = vsel %vm1468_vm2, %v3035_v60, %v3039_v63  ;;  %7629 = vmatprep.subr.bf16.mxu1 %v7825_v45  ;;  %v3369_v44 = vsel %vm2876_vm0, %v3247_v51, %v10470_v32 }
 0x36b   :  { %v2997_v18 = vpop.permute.xlu0 %2996 }
 0x36c   :  { %v10809_v41 = vsel %vm1468_vm2, %v2993_v14, %v2997_v18  ;;  %v3248_v14 = vsel %vm2726_vm15, %v3247_v51, %v10470_v32  ;;  %v7827_v18 = vld [vmem:[%s12176_s3 + $0x50] sm:$0xff]  }
 0x36d   :  { %v2805_v4 = vpop.permute.xlu1 %2804  ;;  %v3249_v35 = vpack.c.b16 %v3248_v14, %v3248_v14  ;;  %7630 = vmatpush3.bf16.msra.mxu1 %v7826_v21  ;;  %v7832_v14 = vld [vmem:[%s12176_s3 + $0x20] sm:$0xff]  }
 0x36e   :  { %v10812_v20 = vsel %vm1468_vm2, %v2800_v31, %v2805_v4  ;;  %v7828_v4 = vld [vmem:[%s12176_s3 + $0x10] sm:$0xff]   ;;  %7631 = vmatprep.subr.bf16.mxu1 %v7827_v18 }
 0x36f   :  { %v2733_v61 = vpop.permute.xlu0 %2732 }
 0x370   :  { %v10819_v29 = vsel %vm1468_vm2, %v2728_v55, %v2733_v61  ;;  %v3483_v61 = vsel %vm2991_vm1, %v3247_v51, %v10470_v32 }
 0x371   :  { %v2924_v28 = vpop.permute.xlu1 %2923  ;;  %7632 = vmatpush3.bf16.msra.mxu1 %v7828_v4  ;;  %v3598_v4 = vsel %vm3107_vm14, %v3247_v51, %v10470_v32 }
 0x372   :  { %v10822_v13 = vsel %vm1468_vm2, %v2920_v50, %v2924_v28  ;;  %v7829_v50 = vld [vmem:[%s12176_s3 + $0x58] sm:$0xff]   ;;  %v3599_v51 = vpack.c.b16 %v3598_v4, %v3598_v4 }
 0x373   :  { %v2882_v48 = vpop.permute.xlu0 %2881  ;;  %7633 = vmatprep.subr.bf16.mxu1 %v7829_v50 }
 0x374   :  { %v10837_v60 = vsel %vm1468_vm2, %v2878_v9, %v2882_v48  ;;  %v3484_v9 = vpack.c.b16 %v3483_v61, %v3483_v61  ;;  %v7830_v48 = vld [vmem:[%s12176_s3 + $0x18] sm:$0xff]  }
 0x375   :  { %v3043_v57 = vpop.permute.xlu1 %3042  ;;  %7634 = vmatpush3.bf16.msra.mxu1 %v7830_v48 }
 0x376   :  { %v3073_v25 = vsel %vm1477_vm3, %v3071_v17, %v3043_v57  ;;  %7635 = vmatprep.subr.bf16.mxu1 %v7831_v2 }
 0x377   :  { %v3113_v63 = vpop.permute.xlu0 %3112 }
 0x378   :  { %v10849_v31 = vsel %vm1468_vm2, %v3109_v33, %v3113_v63  ;;  %v12266_v33 = vld [vmem:[#allocation19_spill] sm:$0xff]  ;;  %v3370_v63 = vpack.c.b16 %v3369_v44, %v3369_v44  ;;  %v7835_v44 = vld [vmem:[%s12176_s3 + $0x70] sm:$0xff]  }
 0x379   :  { %v10851_v17 = vpop.permute.xlu1 %3172  ;;  %v3021_v21 = vpack.c.b16 %v12266_v33, %v12266_v33  ;;  %7636 = vmatpush3.bf16.msra.mxu1 %v7832_v14 }
 0x37b   :  { %v3254_v55 = vpop.permute.xlu0 %3253  ;;  %v3064_v18 = vsel %vm1468_vm2, %v3021_v21, %v10506_v43  ;;  %v7837_v21 = vld [vmem:[%s12176_s3 + $0x78] sm:$0xff]  }
 0x37c   :  { %v10862_v47 = vsel %vm1468_vm2, %v3249_v35, %v3254_v55  ;;  %v7833_v55 = vld [vmem:[%s12176_s3 + $0x68] sm:$0xff]   ;;  %v3066_v61 = vsel %vm1477_vm3, %v3064_v18, %v10548_v59 }
 0x37d   :  { %v2811_v28 = vpop.permute.xlu1 %2810  ;;  %v10894_v48 = vsel %vm1486_vm4, %v3066_v61, %v10590_v23  ;;  %v7834_v59 = vld [vmem:[%s12176_s3 + $0x28] sm:$0xff]   ;;  %7637 = vmatprep.subr.bf16.mxu1 %v7833_v55  ;;  %v3697_v55 = vsel %vm1477_vm3, %v10657_v16, %v10333_v10 }
 0x37e   :  { %7638 = vmatpush3.bf16.msra.mxu1 %v7834_v59 }
 0x37f   :  { %v3488_v19 = vpop.permute.xlu0 %3487  ;;  %7639 = vmatprep.subr.bf16.mxu1 %v7835_v44  ;;  %v10939_v44 = vsel %vm1486_vm4, %v3697_v55, %v10350_v36 }
 0x380   :  { %v10873_v45 = vsel %vm1468_vm2, %v3484_v9, %v3488_v19 }
 0x381   :  { %v2928_v57 = vpop.permute.xlu1 %2927 }
 0x382   :  { %v2958_v10 = vsel %vm1477_vm3, %v10822_v13, %v2928_v57 }
 0x383   :  { %v3374_v35 = vpop.permute.xlu0 %3373 }
 0x384   :  { %v10890_v50 = vsel %vm1468_vm2, %v3370_v63, %v3374_v35  ;;  %v2843_v63 = vsel %vm1477_vm3, %v10812_v20, %v2811_v28  ;;  %v12267_v35 = vld [vmem:[#allocation10_spill] sm:$0xff]  ;;  %v7838_v20 = vld [vmem:[%s12176_s3 + $0x38] sm:$0xff]   ;;  %v8203_v28 = vmov 1966171168  }
 0x385   :  { %v3047_v9 = vpop.permute.xlu1 %3046  ;;  %v3761_v4 = vrot.slane %v12267_v35, 7 }
 0x386   :  { %v10897_v43 = vsel %vm1486_vm4, %v3073_v25, %v3047_v9  ;;  %v7836_v25 = vld [vmem:[%s12176_s3 + $0x30] sm:$0xff]  }
 0x387   :  { %v3081_v32 = vcombine.low %v10894_v48, %v10897_v43  ;;  %v3603_v19 = vpop.permute.xlu0 %3602  ;;  %7640 = vmatpush3.bf16.msra.mxu1 %v7836_v25  ;;  %v12268_v25 = vld [vmem:[#allocation9_spill] sm:$0xff] }
 0x388   :  { %v3688_v23 = vsel %vm1468_vm2, %v3599_v51, %v3603_v19  ;;  %v2853_v51 = vunpack.c.l.s4 %v8203_v28  ;;  %7641 = vmatprep.subr.bf16.mxu1 %v7837_v21  ;;  %v7839_v19 = vld [vmem:[%s12176_s3 + $0xc0] sm:$0xff]   ;;  %v3169_v21 = vpack.c.b16 %v10341_v1, %v10341_v1 }
 0x389   :  { %v3181_v2 = vpop.permute.xlu1 %3180 }
 0x38a   :  { %v2854_v57 = vunpack.c.0.s8 %v2853_v51  ;;  %v3211_v36 = vsel %vm1468_vm2, %v3169_v21, %v10851_v17  ;;  %v12269_v51 = vld [vmem:[#allocation5_spill] sm:$0xff] }
 0x38b   :  { %v3613_v33 = vpop.permute.xlu0 %3612  ;;  %7642 = vmatpush3.bf16.msra.mxu1 %v7838_v20  ;;  %v3213_v55 = vsel %vm1477_vm3, %v3211_v36, %v3181_v2 }
 0x38c   :  { %v3690_v14 = vsel %vm1477_vm3, %v3688_v23, %v3613_v33  ;;  %v3762_v33 = vsel %vm2726_vm15, %v3761_v4, %v12268_v25  ;;  %7655 = vmatprep.subr.bf16.mxu1 %v7839_v19  ;;  %v10965_v17 = vsub.s32 %v2854_v57, %v12269_v51 }
 0x38d   :  { %v2817_v18 = vpop.permute.xlu1 %2816  ;;  %v3763_v35 = vpack.c.b16 %v3762_v33, %v3762_v33 }
 0x38e   :  { %v10922_v61 = vsel %vm1486_vm4, %v2843_v63, %v2817_v18  ;;  %v3856_v33 = vrot.slane %v3842_v7, %v10965_v17 }
 0x38f   :  { %v2851_v9 = vcombine.low %v10621_v24, %v10922_v61  ;;  %v3619_v59 = vpop.permute.xlu0 %3618 }
 0x390   :  { %v10935_v16 = vsel %vm1486_vm4, %v3690_v14, %v3619_v59 }
 0x391   :  { %v2932_v23 = vpop.permute.xlu1 %2931  ;;  %v3718_v63 = vcombine.high %v10935_v16, %v10939_v44 }
 0x392   :  { %v10948_v18 = vsel %vm1486_vm4, %v2958_v10, %v2932_v23  ;;  %v3818_v10 = vsel %vm1468_vm2, %v3763_v35, %v10372_v54  ;;  %v3881_v23 = vsel %vm2876_vm0, %v3761_v4, %v12268_v25 }
 0x393   :  { %v2966_v13 = vcombine.low %v10636_v52, %v10948_v18  ;;  %v3756_v14 = vpop.permute.xlu0 %3755  ;;  %v3820_v19 = vsel %vm1477_vm3, %v3818_v10, %v10380_v8  ;;  %v3882_v8 = vpack.c.b16 %v3881_v23, %v3881_v23 }
 0x394   :  { %v3813_v1 = vsel %vm1477_vm3, %v10786_v3, %v3756_v14  ;;  %v3822_v3 = vsel %vm1486_vm4, %v3820_v19, %v10403_v12  ;;  %v12270_v19 = vld [vmem:[#allocation33_spill] sm:$0xff] }
 0x395   :  { %v3187_v28 = vpop.permute.xlu1 %3186  ;;  %v3932_v12 = vsel %vm1468_vm2, %v3882_v8, %v10388_v53 }
 0x396   :  { %v10958_v59 = vsel %vm1486_vm4, %v3213_v55, %v3187_v28  ;;  %v3934_v35 = vsel %vm1477_vm3, %v3932_v12, %v10419_v46 }
 0x397   :  { %v3221_v20 = vcombine.low %v10647_v37, %v10958_v59  ;;  %v3760_v2 = vpop.permute.xlu0 %3759  ;;  %v10987_v11 = vsel %vm1486_vm4, %v3934_v35, %v10435_v27  ;;  %v3704_v27 = vsel %vm1477_vm3, %v10723_v39, %v12270_v19 }
 0x398   :  { %v3815_v16 = vsel %vm1486_vm4, %v3813_v1, %v3760_v2 }
 0x399   :  { %v3302_v44 = vpop.permute.xlu1 %3301  ;;  %v3841_v54 = vcombine.low %v3815_v16, %v3822_v3  ;;  %v12271_v3 = vld [vmem:[#allocation30_spill] sm:$0xff] }
 0x39a   :  { %v3297_v16 = vpack.c.b16 %v12271_v3, %v12271_v3 }
 0x39b   :  { %v3849_v21 = vrot.slane %v3841_v54, %v10965_v17  ;;  %v3876_v57 = vpop.permute.xlu0 %3875 }
 0x39c   :  { %v3927_v4 = vsel %vm1477_vm3, %v10800_v38, %v3876_v57  ;;  %v3665_v38 = vpack.c.b16 %v10366_v40, %v10366_v40  ;;  %v3334_v57 = vsel %vm1468_vm2, %v3297_v16, %v3302_v44  ;;  %v3726_v44 = vrot.slane %v3718_v63, %v10965_v17  ;;  %v12274_v16 = vld [vmem:[#allocation31_spill] sm:$0xff] }
 0x39d   :  { %v3530_v36 = vpop.permute.xlu1 %3529  ;;  %v3857_v14 = vcombine.low %v3849_v21, %v3856_v33  ;;  %v12272_v33 = vld [vmem:[#allocation34_spill] sm:$0xff] }
 0x39e   :  { %v3706_v21 = vsel %vm1486_vm4, %v3704_v27, %v12272_v33  ;;  %v3895_v33 = vsel %vm2876_vm0, %v3777_v42, %v12263_v5 }
 0x39f   :  { %v3880_v25 = vpop.permute.xlu0 %3879  ;;  %v3864_v63 = vrot.slane %v3857_v14, %v10965_v17  ;;  %v3896_v62 = vpack.c.b16 %v3895_v33, %v3895_v33 }
 0x3a0   :  { %v10990_v6 = vsel %vm1486_vm4, %v3927_v4, %v3880_v25 }
 0x3a1   :  { %v3306_v7 = vpop.permute.xlu1 %3305  ;;  %v3955_v55 = vcombine.low %v10990_v6, %v10987_v11  ;;  %v3866_v42 = vunpack.i.h.s16 %v3864_v63 }
 0x3a2   :  { %v3336_v12 = vsel %vm1477_vm3, %v3334_v57, %v3306_v7 }
 0x3a3   :  { %v3001_v1 = vpop.permute.xlu0 %3000  ;;  %v11083_v33 = vpack.i.b16 %v3866_v42, %v3866_v42 }
 0x3a4   :  { %v3052_v40 = vsel %vm1477_vm3, %v10809_v41, %v3001_v1 }
 0x3a5   :  { %v10994_v53 = vpop.permute.xlu1 %3415 }
 0x3a7   :  { %v2739_v28 = vpop.permute.xlu0 %2738 }
 0x3a8   :  { %v2822_v48 = vsel %vm1477_vm3, %v10819_v29, %v2739_v28  ;;  %v11048_v29 = vsub.s32 0, %v12269_v51  ;;  %v12276_v28 = vld [vmem:[#allocation32_spill] sm:$0xff] }
 0x3a9   :  { %v3534_v46 = vpop.permute.xlu1 %3533 }
 0x3ab   :  { %v2886_v10 = vpop.permute.xlu0 %2885 }
 0x3ac   :  { %v2937_v61 = vsel %vm1477_vm3, %v10837_v60, %v2886_v10  ;;  %v12279_v10 = vld [vmem:[#allocation23_spill] sm:$0xff] }
 0x3ad   :  { %v3669_v2 = vpop.permute.xlu1 %3668 }
 0x3ae   :  { %v3709_v23 = vsel %vm1468_vm2, %v3665_v38, %v3669_v2  ;;  %v12273_v38 = vld [vmem:[#allocation17_spill] sm:$0xff] }
 0x3af   :  { %v3711_v54 = vsel %vm1477_vm3, %v3709_v23, %v10711_v22  ;;  %v3005_v8 = vpop.permute.xlu0 %3004  ;;  %v3526_v23 = vpack.c.b16 %v12274_v16, %v12274_v16  ;;  %v11066_v16 = vsub.s32 2, %v12269_v51 }
 0x3b0   :  { %v3713_v39 = vsel %vm1486_vm4, %v3711_v54, %v10725_v0  ;;  %v3054_v4 = vsel %vm1486_vm4, %v3052_v40, %v3005_v8  ;;  %v3095_v0 = vrot.slane %v3081_v32, %v10965_v17  ;;  %v12275_v8 = vld [vmem:[#allocation18_spill] sm:$0xff] }
 0x3b1   :  { %v3719_v35 = vcombine.high %v3706_v21, %v3713_v39  ;;  %v3310_v25 = vpop.permute.xlu1 %3309  ;;  %v3080_v22 = vcombine.low %v3054_v4, %v12273_v38  ;;  %v3562_v21 = vsel %vm1468_vm2, %v3526_v23, %v3530_v36  ;;  %v11050_v36 = vpack.i.b16 %v3864_v63, %v3864_v63  ;;  %v12277_v4 = vld [vmem:[#allocation35_spill] sm:$0xff] }
 0x3b2   :  { %v11017_v19 = vsel %vm1486_vm4, %v3336_v12, %v3310_v25  ;;  %v3564_v32 = vsel %vm1477_vm3, %v3562_v21, %v3534_v46  ;;  %v3412_v46 = vpack.c.b16 %v12276_v28, %v12276_v28  ;;  %v3939_v25 = vsel %vm1468_vm2, %v3896_v62, %v12277_v4 }
 0x3b3   :  { %v3733_v27 = vrot.slane %v3719_v35, %v10965_v17  ;;  %v3344_v41 = vcombine.high %v10734_v34, %v11017_v19  ;;  %v3088_v7 = vrot.slane %v3080_v22, %v10965_v17  ;;  %v3121_v1 = vpop.permute.xlu0 %3120  ;;  %v11069_v23 = vsub.s32 3, %v12269_v51 }
 0x3b4   :  { %v3235_v63 = vrot.slane %v3221_v20, %v10965_v17  ;;  %v3448_v24 = vsel %vm1468_vm2, %v3412_v46, %v10994_v53  ;;  %v3192_v52 = vsel %vm1477_vm3, %v10849_v31, %v3121_v1  ;;  %vm4410_vm2 = vsmask.f32 1280 }
 0x3b5   :  { %v3734_v2 = vcombine.high %v3726_v44, %v3733_v27  ;;  %v3420_v3 = vpop.permute.xlu1 %3419  ;;  %v3096_v54 = vcombine.low %v3088_v7, %v3095_v0  ;;  %v12278_v27 = vld [vmem:[#allocation11_spill] sm:$0xff]  ;;  %v11063_v7 = vsub.s32 1, %v12269_v51  ;;  %v4298_v51 = vrot.slane %v11050_v36, %v11048_v29  ;;  %vm11203_vm8 = vmand %vm1711_vm5, %vm4410_vm2 }
 0x3b6   :  { %v11060_v0 = vsel %vm1477_vm3, %v3939_v25, %v12278_v27  ;;  %v11130_v4 = vrot.slane %v3344_v41, %v10965_v17 }
 0x3b7   :  { %v2745_v43 = vpop.permute.xlu0 %2744  ;;  %v3103_v57 = vrot.slane %v3096_v54, %v10965_v17  ;;  %v3741_v38 = vrot.slane %v3734_v2, %v10965_v17  ;;  %v2865_v2 = vrot.slane %v2851_v9, %v10965_v17  ;;  %v2980_v54 = vrot.slane %v2966_v13, %v10965_v17 }
 0x3b8   :  { %v2824_v40 = vsel %vm1486_vm4, %v2822_v48, %v2745_v43  ;;  %v3450_v13 = vsel %vm1477_vm3, %v3448_v24, %v3420_v3  ;;  %v4302_v3 = vrot.slane %v11050_v36, %v11063_v7 }
 0x3b9   :  { %v3538_v39 = vpop.permute.xlu1 %3537  ;;  %v2850_v14 = vcombine.low %v2824_v40, %v12275_v8  ;;  %v3104_v22 = vcombine.high %v3103_v57, %v3103_v57  ;;  %v11093_v18 = vcombine.high %v3741_v38, %v3741_v38  ;;  %v4306_v40 = vrot.slane %v11050_v36, %v11066_v16 }
 0x3ba   :  { %v11043_v12 = vsel %vm1486_vm4, %v3564_v32, %v3538_v39  ;;  %v12280_v32 = vld [vmem:[#allocation24_spill] sm:$0xff]  ;;  %v4310_v39 = vrot.slane %v11050_v36, %v11069_v23  ;;  %v11118_v8 = vrot.slane %v3955_v55, %v10965_v17 }
 0x3bb   :  { %v3572_v5 = vcombine.high %v10755_v49, %v11043_v12  ;;  %v2890_v35 = vpop.permute.xlu0 %2889  ;;  %v2858_v44 = vrot.slane %v2850_v14, %v10965_v17  ;;  %v3106_v37 = vunpack.i.h.s16 %v3104_v22  ;;  %v11096_v20 = vpack.i.b16 %v3104_v22, %v3104_v22 }
 0x3bc   :  { %v2939_v48 = vsel %vm1486_vm4, %v2937_v61, %v2890_v35  ;;  %v3744_v35 = vunpack.i.h.s16 %v11093_v18  ;;  %v11135_v55 = vpack.i.b16 %v11093_v18, %v11093_v18 }
 0x3bd   :  { %v3424_v21 = vpop.permute.xlu1 %3423  ;;  %v2866_v59 = vcombine.low %v2858_v44, %v2865_v2  ;;  %v2965_v31 = vcombine.low %v2939_v48, %v12279_v10  ;;  %v11122_v42 = vpack.i.b16 %v3106_v37, %v3106_v37  ;;  %v4070_v25 = vrot.slane %v11096_v20, %v11048_v29 }
 0x3be   :  { %v11100_v43 = vsel %vm1486_vm4, %v3450_v13, %v3424_v21  ;;  %v4074_v38 = vrot.slane %v11096_v20, %v11063_v7  ;;  %v4078_v44 = vrot.slane %v11096_v20, %v11066_v16  ;;  %v4082_v34 = vrot.slane %v11096_v20, %v11069_v23 }
 0x3bf   :  { %v3127_v9 = vpop.permute.xlu0 %3126  ;;  %v2873_v60 = vrot.slane %v2866_v59, %v10965_v17  ;;  %v3458_v1 = vcombine.high %v10768_v58, %v11100_v43  ;;  %v2973_v46 = vrot.slane %v2965_v31, %v10965_v17  ;;  %v4086_v2 = vrot.slane %v11122_v42, %v11048_v29 }
 0x3c0   :  { %v3194_v53 = vsel %vm1486_vm4, %v3192_v52, %v3127_v9  ;;  %v4090_v21 = vrot.slane %v11122_v42, %v11063_v7  ;;  %v4094_v24 = vrot.slane %v11122_v42, %v11066_v16  ;;  %v4098_v61 = vrot.slane %v11122_v42, %v11069_v23 }
 0x3c1   :  { %v3220_v57 = vcombine.low %v3194_v53, %v12280_v32  ;;  %v2875_v28 = vunpack.i.h.s16 %v2873_v60  ;;  %v7328_v11 = vpack.i.b16 %v2873_v60, %v2873_v60  ;;  %v2981_v19 = vcombine.high %v2973_v46, %v2980_v54 }
 0x3c2   :  { %v3472_v18 = vrot.slane %v3458_v1, %v10965_v17  ;;  %v4268_v58 = vrot.slane %v11135_v55, %v11069_v23 }
 0x3c3   :  { %v3258_v14 = vpop.permute.xlu0 %3257  ;;  %v3228_v6 = vrot.slane %v3220_v57, %v10965_v17  ;;  %v3982_v22 = vpack.i.b16 %v2875_v28, %v2875_v28  ;;  %v3986_v52 = vrot.slane %v7328_v11, %v11048_v29  ;;  %v2988_v9 = vrot.slane %v2981_v19, %v10965_v17 }
 0x3c4   :  { %v3990_v37 = vrot.slane %v7328_v11, %v11063_v7  ;;  %v3994_v13 = vrot.slane %v7328_v11, %v11066_v16  ;;  %v3998_v59 = vrot.slane %v7328_v11, %v11069_v23 }
 0x3c5   :  { %v3236_v41 = vcombine.high %v3228_v6, %v3235_v63  ;;  %v3315_v63 = vsel %vm1477_vm3, %v10862_v47, %v3258_v14  ;;  %v4002_v20 = vrot.slane %v3982_v22, %v11048_v29  ;;  %v4006_v48 = vrot.slane %v3982_v22, %v11063_v7 }
 0x3c6   :  { %v2990_v53 = vunpack.i.h.s16 %v2988_v9  ;;  %v7329_v60 = vpack.i.b16 %v2988_v9, %v2988_v9  ;;  %v4010_v32 = vrot.slane %v3982_v22, %v11066_v16  ;;  %v4014_v57 = vrot.slane %v3982_v22, %v11069_v23 }
 0x3c7   :  { %v3492_v27 = vpop.permute.xlu0 %3491  ;;  %v3243_v54 = vrot.slane %v3236_v41, %v10965_v17 }
 0x3c8   :  { %v3543_v47 = vsel %vm1477_vm3, %v10873_v45, %v3492_v27  ;;  %v4024_v42 = vpack.i.b16 %v2990_v53, %v2990_v53  ;;  %v4028_v28 = vrot.slane %v7329_v60, %v11048_v29  ;;  %v4032_v46 = vrot.slane %v7329_v60, %v11063_v7  ;;  %v7862_v53 = vld [vmem:[%s12178_s5 + $0x38] sm:$0xff]  }
 0x3c9   :  { %v3244_v10 = vcombine.high %v3243_v54, %v3243_v54  ;;  %v4036_v11 = vrot.slane %v7329_v60, %v11066_v16  ;;  %v4040_v6 = vrot.slane %v7329_v60, %v11069_v23 }
 0x3ca   :  { %v4044_v22 = vrot.slane %v4024_v42, %v11048_v29  ;;  %v4048_v54 = vrot.slane %v4024_v42, %v11063_v7  ;;  %v4052_v45 = vrot.slane %v4024_v42, %v11066_v16  ;;  %v4056_v27 = vrot.slane %v4024_v42, %v11069_v23 }
 0x3cb   :  { %v3262_v31 = vpop.permute.xlu0 %3261  ;;  %v3246_v19 = vunpack.i.h.s16 %v3244_v10  ;;  %v7331_v41 = vpack.i.b16 %v3244_v10, %v3244_v10  ;;  %v4370_v62 = vsel %vm9590_vm10, %v3990_v37, %v4032_v46  ;;  %v4371_v60 = vsel %vm9590_vm10, %v3994_v13, %v4036_v11 }
 0x3cc   :  { %v3317_v14 = vsel %vm1486_vm4, %v3315_v63, %v3262_v31  ;;  %v4369_v31 = vsel %vm9590_vm10, %v3986_v52, %v4028_v28  ;;  %v4373_v10 = vsel %vm9590_vm10, %v4002_v20, %v4044_v22  ;;  %v4375_v42 = vsel %vm9590_vm10, %v4010_v32, %v4052_v45 }
 0x3cd   :  { %v3343_v9 = vcombine.high %v3317_v14, %v10673_v26  ;;  %v4372_v26 = vsel %vm9590_vm10, %v3998_v59, %v4040_v6  ;;  %v4374_v14 = vsel %vm9590_vm10, %v4006_v48, %v4048_v54  ;;  %v4376_v52 = vsel %vm9590_vm10, %v4014_v57, %v4056_v27 }
 0x3ce   :  { %v4380_v37 = vsel %vm2700_vm9, %v4369_v31, %v4070_v25  ;;  %v4384_v28 = vsel %vm2700_vm9, %v4370_v62, %v4074_v38  ;;  %v4388_v13 = vsel %vm2700_vm9, %v4371_v60, %v4078_v44  ;;  %v4392_v59 = vsel %vm2700_vm9, %v4372_v26, %v4082_v34  ;;  %v3922_v26 = vpop.permute.xlu1 %3921 }
 0x3cf   :  { %v3378_v63 = vpop.permute.xlu0 %3377  ;;  %v4396_v46 = vsel %vm2700_vm9, %v4373_v10, %v4086_v2  ;;  %v4400_v20 = vsel %vm2700_vm9, %v4374_v14, %v4090_v21  ;;  %v4404_v48 = vsel %vm2700_vm9, %v4375_v42, %v4094_v24  ;;  %v4408_v11 = vsel %vm2700_vm9, %v4376_v52, %v4098_v61 }
 0x3d0   :  { %v4100_v62 = vpack.i.b16 %v3246_v19, %v3246_v19  ;;  %v4104_v25 = vrot.slane %v7331_v41, %v11048_v29  ;;  %v4108_v38 = vrot.slane %v7331_v41, %v11063_v7  ;;  %v4112_v44 = vrot.slane %v7331_v41, %v11066_v16 }
 0x3d1   :  { %v4116_v34 = vrot.slane %v7331_v41, %v11069_v23  ;;  %v3351_v2 = vrot.slane %v3343_v9, %v10965_v17  ;;  %v3429_v21 = vsel %vm1477_vm3, %v10890_v50, %v3378_v63  ;;  %v4318_v60 = vrot.slane %v11083_v33, %v11063_v7 }
 0x3d2   :  { %v4120_v61 = vrot.slane %v4100_v62, %v11048_v29  ;;  %v4124_v6 = vrot.slane %v4100_v62, %v11063_v7  ;;  %v4128_v19 = vrot.slane %v4100_v62, %v11066_v16  ;;  %v4132_v22 = vrot.slane %v4100_v62, %v11069_v23 }
 0x3d3   :  { %v3496_v32 = vpop.permute.xlu0 %3495  ;;  %v4412_v54 = vsel %vm11203_vm8, %v4380_v37, %v4104_v25  ;;  %v4413_v41 = vsel %vm11203_vm8, %v4384_v28, %v4108_v38  ;;  %v4414_v9 = vsel %vm11203_vm8, %v4388_v13, %v4112_v44  ;;  %v4415_v50 = vsel %vm11203_vm8, %v4392_v59, %v4116_v34 }
 0x3d4   :  { %v3545_v24 = vsel %vm1486_vm4, %v3543_v47, %v3496_v32  ;;  %v4416_v45 = vsel %vm11203_vm8, %v4396_v46, %v4120_v61  ;;  %v4417_v27 = vsel %vm11203_vm8, %v4400_v20, %v4124_v6  ;;  %v4418_v63 = vsel %vm11203_vm8, %v4404_v48, %v4128_v19 }
 0x3d5   :  { %v4419_v31 = vsel %vm11203_vm8, %v4408_v11, %v4132_v22  ;;  %v3359_v10 = vcombine.low %v3351_v2, %v11130_v4  ;;  %v3571_v14 = vcombine.high %v3545_v24, %v10694_v30  ;;  %v4322_v52 = vrot.slane %v11083_v33, %v11066_v16 }
 0x3d6   :  { %v4326_v37 = vrot.slane %v11083_v33, %v11069_v23  ;;  %v11247_v28 = vpack.i.b16 %v3744_v35, %v3744_v35  ;;  %v4256_v4 = vrot.slane %v11135_v55, %v11048_v29  ;;  %v3586_v30 = vrot.slane %v3572_v5, %v10965_v17 }
 0x3d7   :  { %v3382_v47 = vpop.permute.xlu0 %3381  ;;  %v3366_v59 = vrot.slane %v3359_v10, %v10965_v17  ;;  %v3579_v46 = vrot.slane %v3571_v14, %v10965_v17  ;;  %v4260_v32 = vrot.slane %v11135_v55, %v11063_v7  ;;  %v4264_v57 = vrot.slane %v11135_v55, %v11066_v16 }
 0x3d8   :  { %v3431_v42 = vsel %vm1486_vm4, %v3429_v21, %v3382_v47  ;;  %vm4536_vm9 = vsmask.f32 4352 }
 0x3d9   :  { %v3457_v13 = vcombine.high %v3431_v42, %v10707_v15  ;;  %v3950_v15 = vsel %vm1486_vm4, %v10793_v56, %v3922_v26  ;;  %v3368_v49 = vunpack.i.h.s16 %v3366_v59  ;;  %v7332_v12 = vpack.i.b16 %v3366_v59, %v3366_v59 }
 0x3da   :  { %v3587_v5 = vcombine.low %v3579_v46, %v3586_v30 }
 0x3db   :  { %v3908_v20 = vpop.permute.xlu0 %3907  ;;  %v3465_v35 = vrot.slane %v3457_v13, %v10965_v17  ;;  %v4142_v56 = vpack.i.b16 %v3368_v49, %v3368_v49  ;;  %v4146_v1 = vrot.slane %v7332_v12, %v11048_v29  ;;  %v4150_v62 = vrot.slane %v7332_v12, %v11063_v7 }
 0x3dc   :  { %v3943_v48 = vsel %vm1486_vm4, %v11060_v0, %v3908_v20  ;;  %v4154_v0 = vrot.slane %v7332_v12, %v11066_v16  ;;  %v4158_v25 = vrot.slane %v7332_v12, %v11069_v23  ;;  %v3594_v38 = vrot.slane %v3587_v5, %v10965_v17 }
 0x3dd   :  { %v3956_v11 = vcombine.low %v3943_v48, %v3950_v15  ;;  %v3473_v43 = vcombine.high %v3465_v35, %v3472_v18  ;;  %v4162_v2 = vrot.slane %v4142_v56, %v11048_v29  ;;  %v4166_v21 = vrot.slane %v4142_v56, %v11063_v7 }
 0x3de   :  { %v4170_v24 = vrot.slane %v4142_v56, %v11066_v16  ;;  %v4174_v61 = vrot.slane %v4142_v56, %v11069_v23  ;;  %vm4493_vm4 = vsmask.f32 3328  ;;  %v4422_v6 = vsel %vm1711_vm5, %v4412_v54, %v4146_v1 }
 0x3df   :  { %v3480_v44 = vrot.slane %v3473_v43, %v10965_v17  ;;  %v3970_v34 = vrot.slane %v3956_v11, %v10965_v17  ;;  %v4426_v19 = vsel %vm1711_vm5, %v4413_v41, %v4150_v62  ;;  %v4430_v22 = vsel %vm1711_vm5, %v4414_v9, %v4154_v0  ;;  %vm11334_vm12 = vmand %vm1728_vm6, %vm4493_vm4 }
 0x3e0   :  { %v4434_v47 = vsel %vm1711_vm5, %v4415_v50, %v4158_v25  ;;  %v4438_v26 = vsel %vm1711_vm5, %v4416_v45, %v4162_v2  ;;  %v4442_v10 = vsel %vm1711_vm5, %v4417_v27, %v4166_v21  ;;  %v4446_v14 = vsel %vm1711_vm5, %v4418_v63, %v4170_v24 }
 0x3e1   :  { %v4450_v42 = vsel %vm1711_vm5, %v4419_v31, %v4174_v61  ;;  %v3595_v13 = vcombine.high %v3594_v38, %v3594_v38  ;;  %v3482_v30 = vunpack.i.h.s16 %v3480_v44  ;;  %v7333_v59 = vpack.i.b16 %v3480_v44, %v3480_v44 }
 0x3e2   :  { %v3971_v46 = vcombine.high %v11118_v8, %v3970_v34  ;;  %v4272_v54 = vrot.slane %v11247_v28, %v11048_v29  ;;  %v4276_v41 = vrot.slane %v11247_v28, %v11063_v7  ;;  %v4280_v9 = vrot.slane %v11247_v28, %v11066_v16 }
 0x3e3   :  { %v4284_v50 = vrot.slane %v11247_v28, %v11069_v23  ;;  %v3597_v45 = vunpack.i.h.s16 %v3595_v13  ;;  %v7334_v27 = vpack.i.b16 %v3595_v13, %v3595_v13  ;;  %v4176_v63 = vpack.i.b16 %v3482_v30, %v3482_v30 }
 0x3e4   :  { %v4180_v31 = vrot.slane %v7333_v59, %v11048_v29  ;;  %v4184_v20 = vrot.slane %v7333_v59, %v11063_v7  ;;  %v4188_v8 = vrot.slane %v7333_v59, %v11066_v16  ;;  %v4192_v18 = vrot.slane %v7333_v59, %v11069_v23 }
 0x3e5   :  { %v3978_v15 = vrot.slane %v3971_v46, %v10965_v17  ;;  %v4218_v35 = vpack.i.b16 %v3597_v45, %v3597_v45  ;;  %v4222_v48 = vrot.slane %v7334_v27, %v11048_v29  ;;  %v4226_v49 = vrot.slane %v7334_v27, %v11063_v7 }
 0x3e6   :  { %v4230_v28 = vrot.slane %v7334_v27, %v11066_v16  ;;  %vm4535_vm5 = vcmask 1044480   ;;  %v4234_v12 = vrot.slane %v7334_v27, %v11069_v23  ;;  %v4196_v5 = vrot.slane %v4176_v63, %v11048_v29 }
 0x3e7   :  { %v4200_v11 = vrot.slane %v4176_v63, %v11063_v7  ;;  %v4204_v43 = vrot.slane %v4176_v63, %v11066_v16  ;;  %v4238_v56 = vrot.slane %v4218_v35, %v11048_v29  ;;  %v4242_v1 = vrot.slane %v4218_v35, %v11063_v7 }
 0x3e8   :  { %v4246_v62 = vrot.slane %v4218_v35, %v11066_v16  ;;  %v4250_v0 = vrot.slane %v4218_v35, %v11069_v23  ;;  %v4208_v25 = vrot.slane %v4176_v63, %v11069_v23  ;;  %v4452_v44 = vsel %vm9604_vm13, %v4422_v6, %v4180_v31 }
 0x3e9   :  { %v4453_v34 = vsel %vm9604_vm13, %v4426_v19, %v4184_v20  ;;  %v4454_v2 = vsel %vm9604_vm13, %v4430_v22, %v4188_v8  ;;  %v4455_v21 = vsel %vm9604_vm13, %v4434_v47, %v4192_v18  ;;  %v4456_v24 = vsel %vm9604_vm13, %v4438_v26, %v4196_v5 }
 0x3ea   :  { %v4457_v61 = vsel %vm9604_vm13, %v4442_v10, %v4200_v11  ;;  %v4458_v13 = vsel %vm9604_vm13, %v4446_v14, %v4204_v43  ;;  %v4459_v19 = vsel %vm9604_vm13, %v4450_v42, %v4208_v25  ;;  %v4463_v22 = vsel %vm2710_vm11, %v4452_v44, %v4222_v48 }
 0x3eb   :  { %v4467_v47 = vsel %vm2710_vm11, %v4453_v34, %v4226_v49  ;;  %v4471_v26 = vsel %vm2710_vm11, %v4454_v2, %v4230_v28  ;;  %v4475_v10 = vsel %vm2710_vm11, %v4455_v21, %v4234_v12  ;;  %v4479_v30 = vsel %vm2710_vm11, %v4456_v24, %v4238_v56 }
 0x3ec   :  { %v4483_v14 = vsel %vm2710_vm11, %v4457_v61, %v4242_v1  ;;  %v4487_v59 = vsel %vm2710_vm11, %v4458_v13, %v4246_v62  ;;  %v4491_v46 = vsel %vm2710_vm11, %v4459_v19, %v4250_v0  ;;  %v3980_v45 = vunpack.i.h.s16 %v3978_v15  ;;  %vm11386_vm11 = vmand %vm4535_vm5, %vm4536_vm9 }
 0x3ed   :  { %v7337_v27 = vpack.i.b16 %v3978_v15, %v3978_v15  ;;  %v4495_v42 = vsel %vm11334_vm12, %v4463_v22, %v4256_v4  ;;  %v4496_v63 = vsel %vm11334_vm12, %v4467_v47, %v4260_v32  ;;  %v4497_v31 = vsel %vm11334_vm12, %v4471_v26, %v4264_v57 }
 0x3ee   :  { %v4498_v20 = vsel %vm11334_vm12, %v4475_v10, %v4268_v58  ;;  %v4499_v4 = vsel %vm11334_vm12, %v4479_v30, %v4272_v54  ;;  %v4328_v8 = vpack.i.b16 %v3980_v45, %v3980_v45  ;;  %v4500_v57 = vsel %vm11334_vm12, %v4483_v14, %v4276_v41 }
 0x3ef   :  { %v4332_v18 = vrot.slane %v7337_v27, %v11048_v29  ;;  %v4336_v32 = vrot.slane %v7337_v27, %v11063_v7  ;;  %v4340_v15 = vrot.slane %v7337_v27, %v11066_v16  ;;  %v4344_v35 = vrot.slane %v7337_v27, %v11069_v23 }
 0x3f0   :  { %v4501_v55 = vsel %vm11334_vm12, %v4487_v59, %v4280_v9  ;;  %v4502_v58 = vsel %vm11334_vm12, %v4491_v46, %v4284_v50  ;;  %v4348_v54 = vrot.slane %v4328_v8, %v11048_v29  ;;  %v4352_v48 = vrot.slane %v4328_v8, %v11063_v7 }
 0x3f1   :  { %v4356_v49 = vrot.slane %v4328_v8, %v11066_v16  ;;  %v4360_v28 = vrot.slane %v4328_v8, %v11069_v23  ;;  %v4505_v41 = vsel %vm1728_vm6, %v4495_v42, %v4298_v51  ;;  %v4509_v9 = vsel %vm1728_vm6, %v4496_v63, %v4302_v3 }
 0x3f2   :  { %v4513_v50 = vsel %vm1728_vm6, %v4497_v31, %v4306_v40  ;;  %v4517_v5 = vsel %vm1728_vm6, %v4498_v20, %v4310_v39  ;;  %v12289_v11 = vrot.slane %v11083_v33, %v11048_v29  ;;  %v4525_v3 = vsel %vm1728_vm6, %v4500_v57, %v4318_v60 }
 0x3f3   :  { %v4529_v40 = vsel %vm1728_vm6, %v4501_v55, %v4322_v52  ;;  %v4533_v36 = vsel %vm1728_vm6, %v4502_v58, %v4326_v37  ;;  %v4538_v39 = vsel %vm11386_vm11, %v4505_v41, %v4332_v18  ;;  %v4539_v43 = vsel %vm11386_vm11, %v4509_v9, %v4336_v32 }
 0x3f4   :  { %v4521_v51 = vsel %vm1728_vm6, %v4499_v4, %v12289_v11  ;;  %v4540_v56 = vsel %vm11386_vm11, %v4513_v50, %v4340_v15  ;;  %v4541_v60 = vsel %vm11386_vm11, %v4517_v5, %v4344_v35  ;;  %v4543_v33 = vsel %vm11386_vm11, %v4525_v3, %v4352_v48 }
 0x3f5   :  { %v4542_v52 = vsel %vm11386_vm11, %v4521_v51, %v4348_v54  ;;  %v4544_v37 = vsel %vm11386_vm11, %v4529_v40, %v4356_v49  ;;  %v4545_v1 = vsel %vm11386_vm11, %v4533_v36, %v4360_v28  ;;  %v4554_v62 = vcombine.low %v4538_v39, %v4539_v43 }
 0x3f6   :  { %v4555_v0 = vcombine.high %v4538_v39, %v4539_v43  ;;  %v4556_v25 = vcombine.low %v4540_v56, %v4541_v60  ;;  %v4557_v38 = vcombine.high %v4540_v56, %v4541_v60  ;;  %v4612_v44 = vcombine.low %v4542_v52, %v4543_v33  ;;  %v7840_v43 = vld [vmem:[%s12176_s3 + $0x80] sm:$0xff]  }
 0x3f7   :  { %v4614_v34 = vcombine.low %v4544_v37, %v4545_v1  ;;  %v4613_v2 = vcombine.high %v4542_v52, %v4543_v33  ;;  %v4615_v21 = vcombine.high %v4544_v37, %v4545_v1  ;;  %v4564_v24 = vrot.slane %v4554_v62, %v10965_v17  ;;  %v7841_v52 = vld [vmem:[%s12176_s3 + $0xc8] sm:$0xff]   ;;  %v7843_v1 = vld [vmem:[%s12176_s3 + $0xd0] sm:$0xff]  }
 0x3f8   :  { %v4571_v61 = vrot.slane %v4555_v0, %v10965_v17  ;;  %v4578_v13 = vrot.slane %v4556_v25, %v10965_v17  ;;  %v4585_v6 = vrot.slane %v4557_v38, %v10965_v17  ;;  %v4622_v19 = vrot.slane %v4612_v44, %v10965_v17  ;;  %v7842_v37 = vld [vmem:[%s12176_s3 + $0x88] sm:$0xff]   ;;  %v7844_v62 = vld [vmem:[%s12176_s3 + $0x90] sm:$0xff]   ;;  %v7845_v25 = vld [vmem:[%s12176_s3 + $0xd8] sm:$0xff]  }
 0x3f9   :  { %v4636_v22 = vrot.slane %v4614_v34, %v10965_v17  ;;  %v4629_v47 = vrot.slane %v4613_v2, %v10965_v17  ;;  %v4643_v26 = vrot.slane %v4615_v21, %v10965_v17  ;;  %v7846_v38 = vld [vmem:[%s12176_s3 + $0x98] sm:$0xff]   ;;  %v7847_v44 = vld [vmem:[%s12176_s3 + $0xe0] sm:$0xff]   ;;  %v7849_v2 = vld [vmem:[%s12176_s3 + $0xe8] sm:$0xff]   ;;  %vm5304_vm6 = vsmask.f32 5376 }
 0x3fa   :  { %v4586_v10 = vcombine.low %v4564_v24, %v4578_v13  ;;  %v4587_v30 = vcombine.high %v4564_v24, %v4578_v13  ;;  %v4588_v14 = vcombine.low %v4571_v61, %v4585_v6  ;;  %v7848_v34 = vld [vmem:[%s12176_s3 + $0xa0] sm:$0xff]   ;;  %v7850_v21 = vld [vmem:[%s12176_s3 + $0xa8] sm:$0xff]   ;;  %v7851_v24 = vld [vmem:[%s12176_s3 + $0xf0] sm:$0xff]  }
 0x3fb   :  { %v4644_v59 = vcombine.low %v4622_v19, %v4636_v22  ;;  %v4645_v46 = vcombine.high %v4622_v19, %v4636_v22  ;;  %v4646_v45 = vcombine.low %v4629_v47, %v4643_v26  ;;  %v7852_v61 = vld [vmem:[%s12176_s3 + $0xb0] sm:$0xff]   ;;  %v7853_v13 = vld [vmem:[%s12176_s3 + $0xf8] sm:$0xff]   ;;  %v7855_v47 = vld [vmem:[%s12178_s5] sm:$0xff]   ;;  %v8204_v26 = vmov 0  }
 0x3fc   :  { %v4595_v27 = vrot.slane %v4586_v10, %v10965_v17  ;;  %v4609_v42 = vrot.slane %v4587_v30, %v10965_v17  ;;  %v4602_v63 = vrot.slane %v4588_v14, %v10965_v17  ;;  %v7854_v6 = vld [vmem:[%s12176_s3 + $0xb8] sm:$0xff]   ;;  %5616 = vmatprep.subr.bf16.mxu0 %v8204_v26  ;;  %v7856_v10 = vld [vmem:[%s12178_s5 + $0x8] sm:$0xff]   ;;  %v7857_v30 = vld [vmem:[%s12178_s5 + $0x10] sm:$0xff]  }
 0x3fd   :  { %v4653_v31 = vrot.slane %v4644_v59, %v10965_v17  ;;  %v4667_v20 = vrot.slane %v4645_v46, %v10965_v17  ;;  %v4660_v15 = vrot.slane %v4646_v45, %v10965_v17  ;;  %5617 = vmatpush1.bf16.msra.mxu0 %v7855_v47  ;;  %v7858_v14 = vld [vmem:[%s12178_s5 + $0x18] sm:$0xff]   ;;  %v7859_v59 = vld [vmem:[%s12178_s5 + $0x20] sm:$0xff]   ;;  %v7860_v46 = vld [vmem:[%s12178_s5 + $0x28] sm:$0xff]  }
 0x3fe   :  { %v4741_v4 = vcombine.low %v4595_v27, %v4609_v42  ;;  %v7339_v8 = vcombine.high %v4595_v27, %v4609_v42  ;;  %5618 = vmatprep.subr.bf16.mxu0 %v8204_v26  ;;  %vm5305_vm13 = vmand %vm1745_vm7, %vm5304_vm6 }
 0x3ff   :  { %v4668_v18 = vcombine.high %v4653_v31, %v4653_v31  ;;  %v4743_v32 = vcombine.low %v4602_v63, %v4653_v31  ;;  %v4669_v35 = vcombine.high %v4667_v20, %v4667_v20 }
 0x400   :  { %v4751_v57 = vrot.slane %v4741_v4, %v10965_v17  ;;  %v4758_v55 = vrot.slane %v7339_v8, %v10965_v17 }
 0x401   :  { %v4744_v58 = vcombine.low %v4667_v20, %v4668_v18  ;;  %v4809_v54 = vcombine.low %v4669_v35, %v4660_v15  ;;  %v4765_v28 = vrot.slane %v4743_v32, %v10965_v17  ;;  %5619 = vmatpush1.bf16.msra.mxu0 %v7856_v10  ;;  %v7338_v35 = vld [vmem:[%s12177_s4] ss:$0 sm:$0xff] }
 0x402   :  { %v4773_v48 = vcombine.low %v4751_v57, %v4758_v55  ;;  %v4774_v49 = vcombine.high %v4751_v57, %v4758_v55  ;;  %5620 = vmatprep.subr.bf16.mxu0 %v8204_v26 }
 0x403   :  { %v4772_v12 = vrot.slane %v4744_v58, %v10965_v17  ;;  %v4816_v41 = vrot.slane %v4809_v54, %v10965_v17 }
 0x404   :  { %v4790_v5 = vrot.slane %v4774_v49, %v10965_v17  ;;  %v4783_v51 = vrot.slane %v4773_v48, %v10965_v17 }
 0x405   :  { %v4775_v9 = vcombine.low %v4765_v28, %v4772_v12  ;;  %v4776_v50 = vcombine.high %v4765_v28, %v4772_v12  ;;  %v4817_v40 = vcombine.high %v4816_v41, %v4816_v41  ;;  %v4824_v0 = vrot.slane %v4816_v41, %v10965_v17  ;;  %5621 = vmatpush1.bf16.msra.mxu0 %v7857_v30 }
 0x406   :  { %5622 = vmatprep.subr.bf16.mxu0 %v8204_v26 }
 0x407   :  { %v4804_v11 = vrot.slane %v4776_v50, %v10965_v17  ;;  %v4797_v3 = vrot.slane %v4775_v9, %v10965_v17  ;;  %v4831_v33 = vrot.slane %v4817_v40, %v10965_v17  ;;  %v4832_v22 = vcombine.high %v4824_v0, %v4824_v0 }
 0x409   :  { %v4807_v36 = vcombine.low %v4790_v5, %v4804_v11  ;;  %v4805_v39 = vcombine.low %v4783_v51, %v4797_v3  ;;  %v4808_v56 = vcombine.high %v4790_v5, %v4804_v11  ;;  %v4806_v60 = vcombine.high %v4783_v51, %v4797_v3  ;;  %5623 = vmatpush1.bf16.msra.mxu0 %v7858_v14 }
 0x40a   :  { %v4833_v19 = vcombine.high %v4831_v33, %v4831_v33  ;;  %5624 = vmatprep.subr.bf16.mxu0 %v8204_v26 }
 0x40b   :  { %5066 = vmatprep.mubr.bf16.mxu1 %v4807_v36 }
 0x40c   :  { %5067 = vmatmul.mubr.bf16.vlgmr.msra.gmra.mrb[16].mxu1 %v4805_v39 }
 0x40d   :  { %7656 = vmatpush3.bf16.msra.mxu1 %v7840_v43  ;;  %5074 = vmatprep.mubr.bf16.mxu1 %v4831_v33 }
 0x40e   :  { %7657 = vmatprep.subr.bf16.mxu1 %v7841_v52  ;;  %5625 = vmatpush1.bf16.msra.mxu0 %v7859_v59 }
 0x40f   :  { %5626 = vmatprep.subr.bf16.mxu0 %v8204_v26 }
 0x411   :  { %7658 = vmatpush3.bf16.msra.mxu1 %v7842_v37 }
 0x412   :  { %7659 = vmatprep.subr.bf16.mxu1 %v7843_v1  ;;  %5627 = vmatpush1.bf16.msra.mxu0 %v7860_v46 }
 0x413   :  { %5628 = vmatprep.subr.bf16.mxu0 %v8204_v26 }
 0x414   :  { %5075 = vmatmul.mubr.bf16.gmra.mrb[20].mxu1 %v4824_v0 }
 0x415   :  { %7660 = vmatpush3.bf16.msra.mxu1 %v7844_v62  ;;  %5114 = vmatprep.mubr.bf16.mxu1 %v4808_v56 }
 0x416   :  { %7661 = vmatprep.subr.bf16.mxu1 %v7845_v25 }
 0x419   :  { %7662 = vmatpush3.bf16.msra.mxu1 %v7846_v38 }
 0x41a   :  { %7663 = vmatprep.subr.bf16.mxu1 %v7847_v44 }
 0x41d   :  { %7664 = vmatpush3.bf16.msra.mxu1 %v7848_v34 }
 0x41e   :  { %7665 = vmatprep.subr.bf16.mxu1 %v7849_v2 }
 0x421   :  { %7666 = vmatpush3.bf16.msra.mxu1 %v7850_v21 }
 0x422   :  { %7667 = vmatprep.subr.bf16.mxu1 %v7851_v24 }
 0x425   :  { %7668 = vmatpush3.bf16.msra.mxu1 %v7852_v61 }
 0x426   :  { %7669 = vmatprep.subr.bf16.mxu1 %v7853_v13 }
 0x429   :  { %7670 = vmatpush3.bf16.msra.mxu1 %v7854_v6 }
 0x42c   :  { %5115 = vmatmul.mubr.bf16.vlgmr.msra.gmra.mrb[24].mxu1 %v4806_v60 }
 0x42d   :  { %5122 = vmatprep.mubr.bf16.mxu1 %v4833_v19 }
 0x434   :  { %5123 = vmatmul.mubr.bf16.gmra.mrb[28].mxu1 %v4832_v22 }
 0x4df   :  { %v7643_v45 = vpop.f32.mrb[16].mxu1 }
 0x4e0   :  { %v7644_v27 = vpop.f32.mrb[17].mxu1 }
 0x4e1   :  { %v7645_v42 = vadd.f32 %v7644_v27, %v7643_v45  ;;  %v7646_v63 = vpop.f32.mrb[18].mxu1 }
 0x4e2   :  { %v7647_v31 = vpop.f32.mrb[19].mxu1 }
 0x4e3   :  { %v7648_v20 = vadd.f32 %v7647_v31, %v7646_v63  ;;  %v5069_v58 = vadd.f32 %v7645_v42, %v7338_v35 }
 0x4e5   :  { %v5072_v28 = vadd.f32 %v7648_v20, %v7338_v35 }
 0x4e7   :  { %v7649_v4 = vpop.f32.mrb[20].mxu1 }
 0x4e8   :  { %v7650_v8 = vpop.f32.mrb[21].mxu1 }
 0x4e9   :  { %v7651_v18 = vadd.f32 %v7650_v8, %v7649_v4  ;;  %v7652_v32 = vpop.f32.mrb[22].mxu1 }
 0x4ea   :  { %v7653_v15 = vpop.f32.mrb[23].mxu1 }
 0x4eb   :  { %v5077_v3 = vadd.f32 %v7651_v18, %v7338_v35 }
 0x4ff   :  { %v7671_v57 = vpop.f32.mrb[24].mxu1 }
 0x500   :  { %v7672_v55 = vpop.f32.mrb[25].mxu1 }
 0x501   :  { %v7673_v54 = vadd.f32 %v7672_v55, %v7671_v57  ;;  %v7674_v48 = vpop.f32.mrb[26].mxu1 }
 0x502   :  { %v7675_v49 = vpop.f32.mrb[27].mxu1 }
 0x503   :  { %v5117_v12 = vadd.f32 %v7673_v54, %v5069_v58  ;;  %v7676_v41 = vadd.f32 %v7675_v49, %v7674_v48 }
 0x505   :  { %v5120_v9 = vadd.f32 %v7676_v41, %v5072_v28  ;;  %v5130_v50 = vmax.f32 %v5117_v12, 0.0 }
 0x507   :  { %v5131_v5 = vmax.f32 %v5120_v9, 0.0  ;;  %v7677_v11 = vpop.f32.mrb[28].mxu1 }
 0x508   :  { %v7678_v51 = vpop.f32.mrb[29].mxu1 }
 0x509   :  { %v5133_v40 = vpack.c.bf16 %v5131_v5, %v5130_v50  ;;  %v7372_v36 = vpack.c.bf16 %v5131_v5, %v5131_v5  ;;  %v7679_v39 = vadd.f32 %v7678_v51, %v7677_v11  ;;  %v7680_v43 = vpop.f32.mrb[30].mxu1 }
 0x50a   :  { %v7681_v56 = vpop.f32.mrb[31].mxu1 }
 0x50b   :  { %v5144_v60 = vrot.slane %v5133_v40, %v10965_v17  ;;  %v5151_v52 = vrot.slane %v7372_v36, %v10965_v17  ;;  %v5125_v33 = vadd.f32 %v7679_v39, %v5077_v3  ;;  %v7861_v40 = vld [vmem:[%s12178_s5 + $0x30] sm:$0xff]   ;;  %v7863_v56 = vld [vmem:[%s12178_s5 + $0x40] sm:$0xff]  }
 0x50c   :  { %5629 = vmatpush1.bf16.msra.mxu0 %v7861_v40  ;;  %v7870_v40 = vld [vmem:[%s12180_s7 + $0x8] ss:$16 sps:$4 sm:$0xff]  }
 0x50d   :  { %v5152_v37 = vcombine.high %v5144_v60, %v5144_v60  ;;  %v5153_v1 = vcombine.high %v5151_v52, %v5151_v52  ;;  %v5167_v62 = vrot.slane %v5151_v52, %v10965_v17  ;;  %v5132_v0 = vmax.f32 %v5125_v33, 0.0  ;;  %5630 = vmatprep.subr.bf16.mxu0 %v8204_v26  ;;  %v7865_v52 = vld [vmem:[%s12178_s5 + $0x50] sm:$0xff]   ;;  %v7866_v33 = vld [vmem:[%s12178_s5 + $0x58] sm:$0xff]  }
 0x50e   :  { %v5160_v25 = vrot.slane %v5144_v60, %v10965_v17  ;;  %v7864_v60 = vld [vmem:[%s12178_s5 + $0x48] sm:$0xff]  }
 0x50f   :  { %v5174_v38 = vrot.slane %v5152_v37, %v10965_v17  ;;  %v5181_v44 = vrot.slane %v5153_v1, %v10965_v17  ;;  %v5183_v34 = vcombine.high %v5167_v62, %v5167_v62  ;;  %v5134_v2 = vpack.c.bf16 %v5132_v0, %v5132_v0 }
 0x510   :  { %v5230_v19 = vrot.slane %v5167_v62, %v10965_v17  ;;  %5631 = vmatpush1.bf16.msra.mxu0 %v7862_v53  ;;  %v7873_v53 = vld [vmem:[%s12180_s7 + $0x20] ss:$16 sps:$4 sm:$0xff]  }
 0x511   :  { %v5208_v21 = vcombine.low %v5160_v25, %v5174_v38  ;;  %v7373_v24 = vcombine.high %v5160_v25, %v5174_v38  ;;  %v5192_v61 = vrot.slane %v5134_v2, %v10965_v17  ;;  %v5247_v22 = vcombine.low %v5181_v44, %v5183_v34  ;;  %5632 = vmatprep.subr.bf16.mxu0 %v8204_v26 }
 0x512   :  { %v5185_v47 = vcombine.high %v5181_v44, %v5181_v44  ;;  %v5245_v27 = vrot.slane %v5230_v19, %v10965_v17 }
 0x513   :  { %v5216_v13 = vrot.slane %v5208_v21, %v10965_v17  ;;  %v5223_v6 = vrot.slane %v7373_v24, %v10965_v17  ;;  %v5193_v10 = vcombine.high %v5192_v61, %v5192_v61  ;;  %v5200_v30 = vrot.slane %v5192_v61, %v10965_v17 }
 0x514   :  { %v5255_v42 = vrot.slane %v5247_v22, %v10965_v17  ;;  %5633 = vmatpush1.bf16.msra.mxu0 %v7863_v56  ;;  %v7876_v56 = vld [vmem:[%s12180_s7 + $0x28] ss:$16 sps:$4 sm:$0xff]  }
 0x515   :  { %v5231_v14 = vcombine.low %v5216_v13, %v5223_v6  ;;  %v5207_v59 = vrot.slane %v5193_v10, %v10965_v17  ;;  %v5248_v46 = vcombine.low %v5185_v47, %v5200_v30  ;;  %5634 = vmatprep.subr.bf16.mxu0 %v8204_v26 }
 0x517   :  { %v5238_v45 = vrot.slane %v5231_v14, %v10965_v17  ;;  %v5262_v63 = vrot.slane %v5248_v46, %v10965_v17  ;;  %v5269_v31 = vrot.slane %v5207_v59, %v10965_v17 }
 0x518   :  { %5635 = vmatpush1.bf16.msra.mxu0 %v7864_v60  ;;  %v7881_v60 = vld [vmem:[%s12180_s7 + $0x44] ss:$16 sps:$4 sm:$0xff]  }
 0x519   :  { %v5246_v20 = vcombine.low %v5238_v45, %v5245_v27  ;;  %v5270_v4 = vcombine.low %v5255_v42, %v5262_v63  ;;  %v5284_v32 = vrot.slane %v5269_v31, %v10965_v17  ;;  %5636 = vmatprep.subr.bf16.mxu0 %v8204_v26 }
 0x51b   :  { %v5287_v8 = vshrl.u32 %v5246_v20, 16  ;;  %v5277_v18 = vrot.slane %v5270_v4, %v10965_v17  ;;  %v5290_v35 = vshll.u32 %v5246_v20, 16 }
 0x51c   :  { %5637 = vmatpush1.bf16.msra.mxu0 %v7865_v52  ;;  %v7884_v52 = vld [vmem:[%s12180_s7 + $0x4c] ss:$16 sps:$4 sm:$0xff]  }
 0x51d   :  { %v5289_v15 = vrot.slane %v5287_v8, 7  ;;  %v5285_v57 = vcombine.low %v5277_v18, %v5284_v32  ;;  %5638 = vmatprep.subr.bf16.mxu0 %v8204_v26 }
 0x51f   :  { %v5292_v55 = vor.u32 %v5290_v35, %v5289_v15  ;;  %v5294_v58 = vshrl.u32 %v5285_v57, 16  ;;  %v5297_v49 = vshll.u32 %v5285_v57, 16 }
 0x520   :  { %5639 = vmatpush1.bf16.msra.mxu0 %v7866_v33  ;;  %v7879_v33 = vld [vmem:[%s12180_s7 + $0x40] ss:$16 sps:$4 sm:$0xff]  }
 0x521   :  { %v5302_v54 = vsel %vm9590_vm10, 0, %v5292_v55  ;;  %v5296_v48 = vrot.slane %v5294_v58, 7 }
 0x522   :  { %v5306_v28 = vsel %vm5305_vm13, %v5302_v54, 0 }
 0x523   :  { %v5311_v12 = vshll.u32 %v5306_v28, 16  ;;  %v5299_v41 = vor.u32 %v5297_v49, %v5296_v48  ;;  %v5309_v9 = vshrl.u32 %v5306_v28, 16  ;;  %v5328_v37 = vrot.slane %v5306_v28, 1 }
 0x525   :  { %v5313_v50 = vrot.slane %v5311_v12, 1  ;;  %v5303_v5 = vsel %vm9590_vm10, 0, %v5299_v41 }
 0x526   :  { %v5307_v51 = vsel %vm5305_vm13, %v5303_v5, 0 }
 0x527   :  { %v5314_v11 = vor.u32 %v5313_v50, %v5309_v9  ;;  %v5318_v3 = vshll.u32 %v5307_v51, 16  ;;  %v5316_v36 = vshrl.u32 %v5307_v51, 16  ;;  %v5329_v44 = vrot.slane %v5307_v51, 1 }
 0x529   :  { %5322 = vrot.lane.b32.xlu0 %v5314_v11, %s8200_s21  ;;  %v5320_v39 = vrot.slane %v5318_v3, 1  ;;  %v7869_v3 = vld [vmem:[%s12180_s7 + $0x4] ss:$16 sps:$4 sm:$0xff]  }
 0x52a   :  { %6934 = vmatprep.subr.bf16.mxu1 %v7869_v3  ;;  %v7954_v3 = vld [vmem:[%s12180_s7 + $0x1c8] ss:$16 sps:$4 sm:$0xff]  }
 0x52b   :  { %v5321_v43 = vor.u32 %v5320_v39, %v5316_v36  ;;  %v7872_v36 = vld [vmem:[%s12180_s7 + $0xc] ss:$16 sps:$4 sm:$0xff]   ;;  %v7875_v39 = vld [vmem:[%s12180_s7 + $0x24] ss:$16 sps:$4 sm:$0xff]  }
 0x52c   :  { %7057 = vmatprep.subr.bf16.mxu0 %v7872_v36  ;;  %v7962_v36 = vld [vmem:[%s12180_s7 + $0x1ec] ss:$16 sps:$4 sm:$0xff]  }
 0x52d   :  { %5324 = vrot.lane.b32.xlu1 %v5321_v43, %s8200_s21  ;;  %v7878_v43 = vld [vmem:[%s12180_s7 + $0x2c] ss:$16 sps:$4 sm:$0xff]  }
 0x59b   :  { %v5323_v1 = vpop.permute.xlu0 %5322 }
 0x59c   :  { %v5331_v62 = vsel %vm1477_vm3, %v5306_v28, %v5323_v1  ;;  %v7887_v1 = vld [vmem:[%s12180_s7 + $0x64] ss:$16 sps:$4 sm:$0xff]  }
 0x59d   :  { %v5336_v0 = vcombine.low %v5331_v62, %v5328_v37  ;;  %v5337_v25 = vcombine.high %v5331_v62, %v5328_v37  ;;  %v7882_v37 = vld [vmem:[%s12180_s7 + $0x48] ss:$16 sps:$4 sm:$0xff]   ;;  %v7890_v62 = vld [vmem:[%s12180_s7 + $0x6c] ss:$16 sps:$4 sm:$0xff]  }
 0x59f   :  { %v5344_v38 = vrot.slane %v5336_v0, %v10965_v17  ;;  %v5325_v34 = vpop.permute.xlu1 %5324  ;;  %v5351_v24 = vrot.slane %v5337_v25, %v10965_v17  ;;  %v7885_v0 = vld [vmem:[%s12180_s7 + $0x60] ss:$16 sps:$4 sm:$0xff]   ;;  %v7888_v25 = vld [vmem:[%s12180_s7 + $0x68] ss:$16 sps:$4 sm:$0xff]  }
 0x5a0   :  { %v5333_v21 = vsel %vm1477_vm3, %v5307_v51, %v5325_v34  ;;  %v7867_v51 = vld [vmem:[%s12180_s7] ss:$16 sps:$4 sm:$0xff]  }
 0x5a1   :  { %v5352_v2 = vcombine.high %v5344_v38, %v5344_v38  ;;  %v5376_v61 = vcombine.low %v5333_v21, %v5329_v44  ;;  %v5377_v13 = vcombine.high %v5333_v21, %v5329_v44  ;;  %v5359_v6 = vrot.slane %v5344_v38, %v10965_v17  ;;  %6935 = vmatpush1.bf16.msra.mxu1 %v7867_v51  ;;  %v7893_v38 = vld [vmem:[%s12180_s7 + $0x84] ss:$16 sps:$4 sm:$0xff]   ;;  %v7896_v44 = vld [vmem:[%s12180_s7 + $0x8c] ss:$16 sps:$4 sm:$0xff]   ;;  %v7891_v34 = vld [vmem:[%s12180_s7 + $0x80] ss:$16 sps:$4 sm:$0xff]  }
 0x5a2   :  { %v5366_v30 = vrot.slane %v5351_v24, %v10965_v17  ;;  %6936 = vmatprep.subr.bf16.mxu1 %v7875_v39  ;;  %v7899_v21 = vld [vmem:[%s12180_s7 + $0xa4] ss:$16 sps:$4 sm:$0xff]   ;;  %v7902_v24 = vld [vmem:[%s12180_s7 + $0xac] ss:$16 sps:$4 sm:$0xff]   ;;  %v7951_v51 = vld [vmem:[%s12180_s7 + $0x1c0] ss:$16 sps:$4 sm:$0xff]  }
 0x5a3   :  { %v5373_v19 = vrot.slane %v5352_v2, %v10965_v17  ;;  %v5384_v22 = vrot.slane %v5376_v61, %v10965_v17  ;;  %v5391_v14 = vrot.slane %v5377_v13, %v10965_v17  ;;  %v7894_v2 = vld [vmem:[%s12180_s7 + $0x88] ss:$16 sps:$4 sm:$0xff]   ;;  %v7897_v61 = vld [vmem:[%s12180_s7 + $0xa0] ss:$16 sps:$4 sm:$0xff]  }
 0x5a4   :  { %v7900_v13 = vld [vmem:[%s12180_s7 + $0xa8] ss:$16 sps:$4 sm:$0xff]   ;;  %v7957_v39 = vld [vmem:[%s12180_s7 + $0x1e0] ss:$16 sps:$4 sm:$0xff]  }
 0x5a5   :  { %v5447_v47 = vcombine.low %v5359_v6, %v5373_v19  ;;  %v7375_v10 = vcombine.high %v5359_v6, %v5373_v19  ;;  %v5392_v59 = vcombine.high %v5384_v22, %v5384_v22  ;;  %v5399_v46 = vrot.slane %v5384_v22, %v10965_v17  ;;  %6937 = vmatpush1.bf16.msra.mxu1 %v7873_v53  ;;  %v7905_v6 = vld [vmem:[%s12180_s7 + $0xc4] ss:$16 sps:$4 sm:$0xff]   ;;  %v7908_v19 = vld [vmem:[%s12180_s7 + $0xcc] ss:$16 sps:$4 sm:$0xff]   ;;  %v7903_v22 = vld [vmem:[%s12180_s7 + $0xc0] ss:$16 sps:$4 sm:$0xff]  }
 0x5a6   :  { %v5406_v20 = vrot.slane %v5391_v14, %v10965_v17  ;;  %6938 = vmatprep.subr.bf16.mxu1 %v7881_v60  ;;  %v7909_v14 = vld [vmem:[%s12180_s7 + $0xe0] ss:$16 sps:$4 sm:$0xff]  }
 0x5a7   :  { %v5457_v45 = vrot.slane %v5447_v47, %v10965_v17  ;;  %v5464_v27 = vrot.slane %v7375_v10, %v10965_v17  ;;  %v5413_v42 = vrot.slane %v5392_v59, %v10965_v17  ;;  %v5414_v63 = vcombine.high %v5399_v46, %v5399_v46  ;;  %v7906_v47 = vld [vmem:[%s12180_s7 + $0xc8] ss:$16 sps:$4 sm:$0xff]   ;;  %v7911_v10 = vld [vmem:[%s12180_s7 + $0xe4] ss:$16 sps:$4 sm:$0xff]   ;;  %v7374_v53 = vld [vmem:[%s12179_s6] ss:$0 sm:$0xff] }
 0x5a8   :  { %v5449_v31 = vcombine.low %v5366_v30, %v5399_v46  ;;  %v7914_v30 = vld [vmem:[%s12180_s7 + $0xec] ss:$16 sps:$4 sm:$0xff]   ;;  %v7912_v59 = vld [vmem:[%s12180_s7 + $0xe8] ss:$16 sps:$4 sm:$0xff]   ;;  %v7917_v46 = vld [vmem:[%s12180_s7 + $0x104] ss:$16 sps:$4 sm:$0xff]  }
 0x5a9   :  { %v5415_v4 = vcombine.high %v5413_v42, %v5413_v42  ;;  %v5450_v8 = vcombine.low %v5413_v42, %v5414_v63  ;;  %v5480_v18 = vcombine.high %v5457_v45, %v5464_v27  ;;  %v5479_v32 = vcombine.low %v5457_v45, %v5464_v27  ;;  %6939 = vmatpush1.bf16.msra.mxu1 %v7879_v33  ;;  %v7920_v45 = vld [vmem:[%s12180_s7 + $0x10c] ss:$16 sps:$4 sm:$0xff]   ;;  %v7915_v27 = vld [vmem:[%s12180_s7 + $0x100] ss:$16 sps:$4 sm:$0xff]   ;;  %v7918_v42 = vld [vmem:[%s12180_s7 + $0x108] ss:$16 sps:$4 sm:$0xff]  }
 0x5aa   :  { %v5471_v15 = vrot.slane %v5449_v31, %v10965_v17  ;;  %6940 = vmatprep.subr.bf16.mxu1 %v7887_v1  ;;  %v7923_v63 = vld [vmem:[%s12180_s7 + $0x124] ss:$16 sps:$4 sm:$0xff]   ;;  %v7926_v31 = vld [vmem:[%s12180_s7 + $0x12c] ss:$16 sps:$4 sm:$0xff]  }
 0x5ab   :  { %v5478_v35 = vrot.slane %v5450_v8, %v10965_v17  ;;  %v5513_v57 = vcombine.low %v5415_v4, %v5406_v20  ;;  %v5496_v48 = vrot.slane %v5480_v18, %v10965_v17  ;;  %v5489_v28 = vrot.slane %v5479_v32, %v10965_v17  ;;  %v7921_v20 = vld [vmem:[%s12180_s7 + $0x120] ss:$16 sps:$4 sm:$0xff]   ;;  %v7924_v4 = vld [vmem:[%s12180_s7 + $0x128] ss:$16 sps:$4 sm:$0xff]   ;;  %v7929_v8 = vld [vmem:[%s12180_s7 + $0x144] ss:$16 sps:$4 sm:$0xff]  }
 0x5ac   :  { %v7932_v18 = vld [vmem:[%s12180_s7 + $0x14c] ss:$16 sps:$4 sm:$0xff]   ;;  %v7927_v32 = vld [vmem:[%s12180_s7 + $0x140] ss:$16 sps:$4 sm:$0xff]  }
 0x5ad   :  { %v5481_v55 = vcombine.low %v5471_v15, %v5478_v35  ;;  %v5520_v58 = vrot.slane %v5513_v57, %v10965_v17  ;;  %v5482_v54 = vcombine.high %v5471_v15, %v5478_v35  ;;  %6941 = vmatpush1.bf16.msra.mxu1 %v7885_v0  ;;  %v7930_v15 = vld [vmem:[%s12180_s7 + $0x148] ss:$16 sps:$4 sm:$0xff]   ;;  %v7935_v35 = vld [vmem:[%s12180_s7 + $0x164] ss:$16 sps:$4 sm:$0xff]   ;;  %v7938_v57 = vld [vmem:[%s12180_s7 + $0x16c] ss:$16 sps:$4 sm:$0xff]  }
 0x5ae   :  { %6942 = vmatprep.subr.bf16.mxu1 %v7893_v38 }
 0x5af   :  { %v5510_v49 = vrot.slane %v5482_v54, %v10965_v17  ;;  %v5503_v12 = vrot.slane %v5481_v55, %v10965_v17  ;;  %v5521_v41 = vcombine.high %v5520_v58, %v5520_v58  ;;  %v5528_v11 = vrot.slane %v5520_v58, %v10965_v17  ;;  %v7933_v55 = vld [vmem:[%s12180_s7 + $0x160] ss:$16 sps:$4 sm:$0xff]   ;;  %v7936_v58 = vld [vmem:[%s12180_s7 + $0x168] ss:$16 sps:$4 sm:$0xff]   ;;  %v7941_v54 = vld [vmem:[%s12180_s7 + $0x184] ss:$16 sps:$4 sm:$0xff]  }
 0x5b1   :  { %v5512_v9 = vcombine.low %v5496_v48, %v5510_v49  ;;  %v5511_v50 = vcombine.low %v5489_v28, %v5503_v12  ;;  %v5535_v5 = vrot.slane %v5521_v41, %v10965_v17  ;;  %6943 = vmatpush1.bf16.msra.mxu1 %v7891_v34  ;;  %v7944_v48 = vld [vmem:[%s12180_s7 + $0x18c] ss:$16 sps:$4 sm:$0xff]   ;;  %v7939_v49 = vld [vmem:[%s12180_s7 + $0x180] ss:$16 sps:$4 sm:$0xff]   ;;  %v7942_v28 = vld [vmem:[%s12180_s7 + $0x188] ss:$16 sps:$4 sm:$0xff]  }
 0x5b2   :  { %6944 = vmatprep.subr.bf16.mxu1 %v7899_v21  ;;  %v7947_v12 = vld [vmem:[%s12180_s7 + $0x1a4] ss:$16 sps:$4 sm:$0xff]   ;;  %v7950_v41 = vld [vmem:[%s12180_s7 + $0x1ac] ss:$16 sps:$4 sm:$0xff]  }
 0x5b3   :  { %7388 = vmatprep.mubr.msk.bf16.mxu0 %vm1477_vm3, %v5512_v9  ;;  %v7945_v9 = vld [vmem:[%s12180_s7 + $0x1a0] ss:$16 sps:$4 sm:$0xff]  }
 0x5b4   :  { %5649 = vmatmul.mubr.bf16.vlgmr.msra.gmra.mrb[24].mxu0 %v5511_v50  ;;  %v7948_v50 = vld [vmem:[%s12180_s7 + $0x1a8] ss:$16 sps:$4 sm:$0xff]  }
 0x5b5   :  { %7389 = vmatprep.mubr.msk.bf16.mxu0 %vm1477_vm3, %v5535_v5  ;;  %7058 = vmatpush1.bf16.msra.mxu0 %v7870_v40  ;;  %v7953_v5 = vld [vmem:[%s12180_s7 + $0x1c4] ss:$16 sps:$4 sm:$0xff]  }
 0x5b6   :  { %7059 = vmatprep.subr.bf16.mxu0 %v7878_v43  ;;  %6945 = vmatpush1.bf16.msra.mxu1 %v7897_v61  ;;  %v7959_v40 = vld [vmem:[%s12180_s7 + $0x1e4] ss:$16 sps:$4 sm:$0xff]   ;;  %v7960_v43 = vld [vmem:[%s12180_s7 + $0x1e8] ss:$16 sps:$4 sm:$0xff]  }
 0x5b7   :  { %6946 = vmatprep.subr.bf16.mxu1 %v7905_v6 }
 0x5b9   :  { %7060 = vmatpush1.bf16.msra.mxu0 %v7876_v56 }
 0x5ba   :  { %7061 = vmatprep.subr.bf16.mxu0 %v7884_v52  ;;  %6947 = vmatpush1.bf16.msra.mxu1 %v7903_v22 }
 0x5bb   :  { %6948 = vmatprep.subr.bf16.mxu1 %v7911_v10 }
 0x5bc   :  { %5657 = vmatmul.mubr.bf16.gmra.mrb[28].mxu0 %v5528_v11  ;;  %v7956_v11 = vld [vmem:[%s12180_s7 + $0x1cc] ss:$16 sps:$4 sm:$0xff]  }
 0x5bd   :  { %7062 = vmatpush1.bf16.msra.mxu0 %v7882_v37 }
 0x5be   :  { %7063 = vmatprep.subr.bf16.mxu0 %v7890_v62  ;;  %6949 = vmatpush1.bf16.msra.mxu1 %v7909_v14 }
 0x5bf   :  { %6950 = vmatprep.subr.bf16.mxu1 %v7917_v46 }
 0x5c1   :  { %7064 = vmatpush1.bf16.msra.mxu0 %v7888_v25 }
 0x5c2   :  { %7065 = vmatprep.subr.bf16.mxu0 %v7896_v44  ;;  %6951 = vmatpush1.bf16.msra.mxu1 %v7915_v27  ;;  %v7968_v27 = vld [vmem:[%s12180_s7 + $0x20c] ss:$16 sps:$4 sm:$0xff]  }
 0x5c3   :  { %6952 = vmatprep.subr.bf16.mxu1 %v7923_v63 }
 0x5c5   :  { %7066 = vmatpush1.bf16.msra.mxu0 %v7894_v2 }
 0x5c6   :  { %7067 = vmatprep.subr.bf16.mxu0 %v7902_v24  ;;  %6953 = vmatpush1.bf16.msra.mxu1 %v7921_v20 }
 0x5c7   :  { %6954 = vmatprep.subr.bf16.mxu1 %v7929_v8 }
 0x5c9   :  { %7068 = vmatpush1.bf16.msra.mxu0 %v7900_v13 }
 0x5ca   :  { %7069 = vmatprep.subr.bf16.mxu0 %v7908_v19  ;;  %6955 = vmatpush1.bf16.msra.mxu1 %v7927_v32 }
 0x5cb   :  { %6956 = vmatprep.subr.bf16.mxu1 %v7935_v35 }
 0x5cd   :  { %7070 = vmatpush1.bf16.msra.mxu0 %v7906_v47 }
 0x5ce   :  { %7071 = vmatprep.subr.bf16.mxu0 %v7914_v30  ;;  %6957 = vmatpush1.bf16.msra.mxu1 %v7933_v55  ;;  %v7965_v30 = vld [vmem:[%s12180_s7 + $0x204] ss:$16 sps:$4 sm:$0xff]  }
 0x5cf   :  { %6958 = vmatprep.subr.bf16.mxu1 %v7941_v54 }
 0x5d1   :  { %7072 = vmatpush1.bf16.msra.mxu0 %v7912_v59 }
 0x5d2   :  { %7073 = vmatprep.subr.bf16.mxu0 %v7920_v45  ;;  %6959 = vmatpush1.bf16.msra.mxu1 %v7939_v49 }
 0x5d3   :  { %6960 = vmatprep.subr.bf16.mxu1 %v7947_v12 }
 0x5d5   :  { %7074 = vmatpush1.bf16.msra.mxu0 %v7918_v42 }
 0x5d6   :  { %7075 = vmatprep.subr.bf16.mxu0 %v7926_v31  ;;  %6961 = vmatpush1.bf16.msra.mxu1 %v7945_v9 }
 0x5d7   :  { %6962 = vmatprep.subr.bf16.mxu1 %v7953_v5 }
 0x5d9   :  { %7076 = vmatpush1.bf16.msra.mxu0 %v7924_v4 }
 0x5da   :  { %7077 = vmatprep.subr.bf16.mxu0 %v7932_v18  ;;  %6963 = vmatpush1.bf16.msra.mxu1 %v7951_v51 }
 0x5db   :  { %6964 = vmatprep.subr.bf16.mxu1 %v7959_v40 }
 0x5dd   :  { %7078 = vmatpush1.bf16.msra.mxu0 %v7930_v15 }
 0x5de   :  { %7079 = vmatprep.subr.bf16.mxu0 %v7938_v57  ;;  %6965 = vmatpush1.bf16.msra.mxu1 %v7957_v39 }
 0x5df   :  { %6975 = vmatprep.subr.bf16.mxu1 %v7965_v30 }
 0x5e1   :  { %7080 = vmatpush1.bf16.msra.mxu0 %v7936_v58 }
 0x5e2   :  { %7081 = vmatprep.subr.bf16.mxu0 %v7944_v48 }
 0x5e5   :  { %7082 = vmatpush1.bf16.msra.mxu0 %v7942_v28 }
 0x5e6   :  { %7083 = vmatprep.subr.bf16.mxu0 %v7950_v41 }
 0x5e9   :  { %7084 = vmatpush1.bf16.msra.mxu0 %v7948_v50 }
 0x5ea   :  { %7085 = vmatprep.subr.bf16.mxu0 %v7956_v11 }
 0x5ed   :  { %7086 = vmatpush1.bf16.msra.mxu0 %v7954_v3 }
 0x5ee   :  { %7087 = vmatprep.subr.bf16.mxu0 %v7962_v36 }
 0x5f1   :  { %7088 = vmatpush1.bf16.msra.mxu0 %v7960_v43 }
 0x5f2   :  { %7098 = vmatprep.subr.bf16.mxu0 %v7968_v27 }
 0x687   :  { %v5650_v56 = vpop.f32.mrb[24].mxu0 }
 0x688   :  { %v5651_v60 = vadd.f32 %v7374_v53, %v5650_v56  ;;  %v5652_v52 = vpop.f32.mrb[25].mxu0 }
 0x689   :  { %v5653_v33 = vpop.f32.mrb[26].mxu0 }
 0x68a   :  { %v5654_v37 = vadd.f32 %v7374_v53, %v5653_v33  ;;  %v5655_v1 = vpop.f32.mrb[27].mxu0  ;;  %v5664_v62 = vmax.f32 %v5651_v60, 0.0 }
 0x68c   :  { %v5665_v0 = vmax.f32 %v5654_v37, 0.0 }
 0x68e   :  { %v5667_v25 = vpack.c.bf16 %v5665_v0, %v5664_v62  ;;  %v7390_v38 = vpack.c.bf16 %v5665_v0, %v5665_v0 }
 0x68f   :  { %v5658_v44 = vpop.f32.mrb[28].mxu0 }
 0x690   :  { %v5678_v34 = vrot.slane %v5667_v25, %v10965_v17  ;;  %v5685_v2 = vrot.slane %v7390_v38, %v10965_v17  ;;  %v5659_v21 = vadd.f32 %v7374_v53, %v5658_v44  ;;  %v5660_v24 = vpop.f32.mrb[29].mxu0 }
 0x691   :  { %v5661_v61 = vpop.f32.mrb[30].mxu0 }
 0x692   :  { %v5686_v13 = vcombine.high %v5678_v34, %v5678_v34  ;;  %v5687_v6 = vcombine.high %v5685_v2, %v5685_v2  ;;  %v5694_v19 = vrot.slane %v5678_v34, %v10965_v17  ;;  %v5701_v22 = vrot.slane %v5685_v2, %v10965_v17  ;;  %v5662_v47 = vpop.f32.mrb[31].mxu0 }
 0x693   :  { %v5666_v10 = vmax.f32 %v5659_v21, 0.0 }
 0x694   :  { %v5708_v14 = vrot.slane %v5686_v13, %v10965_v17  ;;  %v5715_v59 = vrot.slane %v5687_v6, %v10965_v17  ;;  %v5716_v46 = vcombine.high %v5694_v19, %v5694_v19  ;;  %v5717_v45 = vcombine.high %v5701_v22, %v5701_v22 }
 0x695   :  { %v5748_v42 = vrot.slane %v5694_v19, %v10965_v17  ;;  %v5900_v63 = vrot.slane %v5701_v22, %v10965_v17  ;;  %v5668_v31 = vpack.c.bf16 %v5666_v10, %v5666_v10 }
 0x696   :  { %v5718_v20 = vcombine.high %v5708_v14, %v5708_v14  ;;  %v5719_v4 = vcombine.high %v5715_v59, %v5715_v59  ;;  %v5762_v8 = vrot.slane %v5715_v59, %v10965_v17  ;;  %v5786_v18 = vrot.slane %v5708_v14, %v10965_v17 }
 0x697   :  { %v5755_v32 = vrot.slane %v5748_v42, %v10965_v17  ;;  %v5800_v15 = vrot.slane %v5717_v45, %v10965_v17  ;;  %v5824_v35 = vrot.slane %v5716_v46, %v10965_v17  ;;  %v5907_v57 = vrot.slane %v5900_v63, %v10965_v17 }
 0x698   :  { %v5793_v55 = vrot.slane %v5786_v18, %v10965_v17  ;;  %v5838_v58 = vrot.slane %v5719_v4, %v10965_v17  ;;  %v5862_v54 = vrot.slane %v5718_v20, %v10965_v17  ;;  %v5726_v48 = vrot.slane %v5668_v31, %v10965_v17 }
 0x699   :  { %v5770_v49 = vunpack.c.l.b16 %v5755_v32  ;;  %v5831_v28 = vrot.slane %v5824_v35, %v10965_v17  ;;  %v5922_v12 = vunpack.c.l.b16 %v5907_v57  ;;  %v5769_v41 = vrot.slane %v5762_v8, %v10965_v17  ;;  %v7963_v32 = vld [vmem:[%s12180_s7 + $0x200] ss:$16 sps:$4 sm:$0xff]   ;;  %v7971_v57 = vld [vmem:[%s12180_s7 + $0x224] ss:$16 sps:$4 sm:$0xff]  }
 0x69a   :  { %v5808_v9 = vunpack.c.l.b16 %v5793_v55  ;;  %v5727_v50 = vcombine.high %v5726_v48, %v5726_v48  ;;  %v5734_v5 = vrot.slane %v5726_v48, %v10965_v17  ;;  %v5807_v11 = vrot.slane %v5800_v15, %v10965_v17  ;;  %v7966_v15 = vld [vmem:[%s12180_s7 + $0x208] ss:$16 sps:$4 sm:$0xff]   ;;  %v7974_v55 = vld [vmem:[%s12180_s7 + $0x22c] ss:$16 sps:$4 sm:$0xff]  }
 0x69b   :  { %v5846_v51 = vunpack.c.l.b16 %v5831_v28  ;;  %v5771_v3 = vunpack.c.l.b16 %v5769_v41  ;;  %v5775_v40 = vrot.slane %v5770_v49, 1  ;;  %v5845_v36 = vrot.slane %v5838_v58, %v10965_v17  ;;  %v7980_v41 = vld [vmem:[%s12180_s7 + $0x24c] ss:$16 sps:$4 sm:$0xff]  }
 0x69c   :  { %v5741_v39 = vrot.slane %v5727_v50, %v10965_v17  ;;  %v5876_v43 = vrot.slane %v5734_v5, %v10965_v17  ;;  %v5809_v53 = vunpack.c.l.b16 %v5807_v11  ;;  %v5813_v56 = vrot.slane %v5808_v9, 1  ;;  %v7975_v50 = vld [vmem:[%s12180_s7 + $0x240] ss:$16 sps:$4 sm:$0xff]   ;;  %v7978_v5 = vld [vmem:[%s12180_s7 + $0x248] ss:$16 sps:$4 sm:$0xff]  }
 0x69d   :  { %v5776_v60 = vsel %vm2726_vm15, %v5771_v3, %v5775_v40  ;;  %v5847_v52 = vunpack.c.l.b16 %v5845_v36  ;;  %v5851_v33 = vrot.slane %v5846_v51, 1  ;;  %v5869_v37 = vrot.slane %v5862_v54, %v10965_v17  ;;  %v7969_v54 = vld [vmem:[%s12180_s7 + $0x220] ss:$16 sps:$4 sm:$0xff]   ;;  %v7983_v11 = vld [vmem:[%s12180_s7 + $0x264] ss:$16 sps:$4 sm:$0xff]  }
 0x69e   :  { %v5883_v1 = vrot.slane %v5876_v43, %v10965_v17  ;;  %v5914_v62 = vrot.slane %v5741_v39, %v10965_v17  ;;  %v5777_v0 = vpack.c.b16 %v5776_v60, %v5776_v60  ;;  %v5814_v25 = vsel %vm2726_vm15, %v5809_v53, %v5813_v56  ;;  %v7984_v40 = vld [vmem:[%s12180_s7 + $0x268] ss:$16 sps:$4 sm:$0xff]   ;;  %v7989_v36 = vld [vmem:[%s12180_s7 + $0x284] ss:$16 sps:$4 sm:$0xff]   ;;  %v7992_v39 = vld [vmem:[%s12180_s7 + $0x28c] ss:$16 sps:$4 sm:$0xff]  }
 0x69f   :  { %v5815_v38 = vpack.c.b16 %v5814_v25, %v5814_v25  ;;  %v5852_v44 = vsel %vm2726_vm15, %v5847_v52, %v5851_v33  ;;  %v5884_v34 = vunpack.c.l.b16 %v5869_v37  ;;  %v5772_v24 = vrot.slane %v5771_v3, 7  ;;  %v7981_v3 = vld [vmem:[%s12180_s7 + $0x260] ss:$16 sps:$4 sm:$0xff]   ;;  %v7995_v56 = vld [vmem:[%s12180_s7 + $0x2a4] ss:$16 sps:$4 sm:$0xff]  }
 0x6a0   :  { %v5885_v2 = vunpack.c.l.b16 %v5883_v1  ;;  %v5921_v21 = vrot.slane %v5914_v62, %v10965_v17  ;;  %5778 = vrot.lane.b32.xlu1 %v5777_v0, %s8200_s21  ;;  %v5927_v13 = vrot.slane %v5922_v12, 1  ;;  %v5848_v6 = vrot.slane %v5847_v52, 7  ;;  %v7987_v43 = vld [vmem:[%s12180_s7 + $0x280] ss:$16 sps:$4 sm:$0xff]   ;;  %v7998_v60 = vld [vmem:[%s12180_s7 + $0x2ac] ss:$16 sps:$4 sm:$0xff]  }
 0x6a1   :  { %5816 = vrot.lane.b32.xlu0 %v5815_v38, %s8200_s21  ;;  %v5889_v61 = vrot.slane %v5884_v34, 1  ;;  %v5810_v19 = vrot.slane %v5809_v53, 7  ;;  %v5853_v47 = vpack.c.b16 %v5852_v44, %v5852_v44  ;;  %v5773_v10 = vsel %vm2726_vm15, %v5772_v24, %v5770_v49  ;;  %v7972_v49 = vld [vmem:[%s12180_s7 + $0x228] ss:$16 sps:$4 sm:$0xff]   ;;  %v7993_v52 = vld [vmem:[%s12180_s7 + $0x2a0] ss:$16 sps:$4 sm:$0xff]  }
 0x6a2   :  { %v5923_v22 = vunpack.c.l.b16 %v5921_v21  ;;  %v5886_v30 = vrot.slane %v5885_v2, 7  ;;  %v11848_v59 = vsel %vm2726_vm15, %v5848_v6, %v5846_v51  ;;  %v5774_v8 = vpack.c.b16 %v5773_v10, %v5773_v10  ;;  %v7986_v51 = vld [vmem:[%s12180_s7 + $0x26c] ss:$16 sps:$4 sm:$0xff]   ;;  %v7990_v53 = vld [vmem:[%s12180_s7 + $0x288] ss:$16 sps:$4 sm:$0xff]  }
 0x6a3   :  { %v5890_v14 = vsel %vm2726_vm15, %v5885_v2, %v5889_v61  ;;  %v5811_v17 = vsel %vm2726_vm15, %v5810_v19, %v5808_v9  ;;  %v7996_v33 = vld [vmem:[%s12180_s7 + $0x2a8] ss:$16 sps:$4 sm:$0xff]   ;;  %v8001_v37 = vld [vmem:[%s12180_s7 + $0x2c4] ss:$16 sps:$4 sm:$0xff]   ;;  %v8004_v1 = vld [vmem:[%s12180_s7 + $0x2cc] ss:$16 sps:$4 sm:$0xff]  }
 0x6a4   :  { %5854 = vrot.lane.b32.xlu1 %v5853_v47, %s8200_s21  ;;  %v5891_v46 = vpack.c.b16 %v5890_v14, %v5890_v14  ;;  %v5928_v45 = vsel %vm2726_vm15, %v5923_v22, %v5927_v13  ;;  %v5887_v27 = vsel %vm2726_vm15, %v5886_v30, %v5884_v34  ;;  %v5924_v42 = vrot.slane %v5923_v22, 7  ;;  %v7999_v62 = vld [vmem:[%s12180_s7 + $0x2c0] ss:$16 sps:$4 sm:$0xff]   ;;  %v8002_v0 = vld [vmem:[%s12180_s7 + $0x2c8] ss:$16 sps:$4 sm:$0xff]  }
 0x6a5   :  { %v5929_v31 = vpack.c.b16 %v5928_v45, %v5928_v45  ;;  %v5812_v4 = vpack.c.b16 %v5811_v17, %v5811_v17  ;;  %v5888_v48 = vpack.c.b16 %v5887_v27, %v5887_v27  ;;  %v8007_v25 = vld [vmem:[%s12180_s7 + $0x2e4] ss:$16 sps:$4 sm:$0xff]   ;;  %v8010_v38 = vld [vmem:[%s12180_s7 + $0x2ec] ss:$16 sps:$4 sm:$0xff]   ;;  %v8005_v44 = vld [vmem:[%s12180_s7 + $0x2e0] ss:$16 sps:$4 sm:$0xff]  }
 0x6a6   :  { %5892 = vrot.lane.b32.xlu0 %v5891_v46, %s8200_s21  ;;  %v11856_v63 = vsel %vm2726_vm15, %v5924_v42, %v5922_v12  ;;  %v7977_v12 = vld [vmem:[%s12180_s7 + $0x244] ss:$16 sps:$4 sm:$0xff]   ;;  %v8008_v34 = vld [vmem:[%s12180_s7 + $0x2e8] ss:$16 sps:$4 sm:$0xff]   ;;  %v8016_v21 = vld [vmem:[%s12180_s7 + $0x30c] ss:$16 sps:$4 sm:$0xff]  }
 0x6a7   :  { %v8013_v2 = vld [vmem:[%s12180_s7 + $0x304] ss:$16 sps:$4 sm:$0xff]   ;;  %v8011_v24 = vld [vmem:[%s12180_s7 + $0x300] ss:$16 sps:$4 sm:$0xff]   ;;  %v8014_v61 = vld [vmem:[%s12180_s7 + $0x308] ss:$16 sps:$4 sm:$0xff]  }
 0x6a8   :  { %v8019_v13 = vld [vmem:[%s12180_s7 + $0x324] ss:$16 sps:$4 sm:$0xff]   ;;  %v8022_v6 = vld [vmem:[%s12180_s7 + $0x32c] ss:$16 sps:$4 sm:$0xff]   ;;  %v8017_v19 = vld [vmem:[%s12180_s7 + $0x320] ss:$16 sps:$4 sm:$0xff]  }
 0x6a9   :  { %v8020_v22 = vld [vmem:[%s12180_s7 + $0x328] ss:$16 sps:$4 sm:$0xff]   ;;  %v8025_v47 = vld [vmem:[%s12180_s7 + $0x344] ss:$16 sps:$4 sm:$0xff]   ;;  %v8028_v10 = vld [vmem:[%s12180_s7 + $0x34c] ss:$16 sps:$4 sm:$0xff]  }
 0x6aa   :  { %5930 = vrot.lane.b32.xlu0 %v5929_v31, %s8200_s21  ;;  %v8023_v30 = vld [vmem:[%s12180_s7 + $0x340] ss:$16 sps:$4 sm:$0xff]   ;;  %v8026_v14 = vld [vmem:[%s12180_s7 + $0x348] ss:$16 sps:$4 sm:$0xff]   ;;  %v8031_v17 = vld [vmem:[%s12180_s7 + $0x364] ss:$16 sps:$4 sm:$0xff]  }
 0x6ab   :  { %v8034_v46 = vld [vmem:[%s12180_s7 + $0x36c] ss:$16 sps:$4 sm:$0xff]   ;;  %v8029_v45 = vld [vmem:[%s12180_s7 + $0x360] ss:$16 sps:$4 sm:$0xff]   ;;  %v8032_v27 = vld [vmem:[%s12180_s7 + $0x368] ss:$16 sps:$4 sm:$0xff]  }
 0x6ac   :  { %v8037_v42 = vld [vmem:[%s12180_s7 + $0x384] ss:$16 sps:$4 sm:$0xff]   ;;  %v8040_v31 = vld [vmem:[%s12180_s7 + $0x38c] ss:$16 sps:$4 sm:$0xff]  }
 0x712   :  { %v5779_v20 = vpop.permute.xlu1 %5778 }
 0x713   :  { %v5817_v18 = vpop.permute.xlu0 %5816  ;;  %v5934_v58 = vsel %vm1477_vm3, %v5774_v8, %v5779_v20  ;;  %v8035_v20 = vld [vmem:[%s12180_s7 + $0x380] ss:$16 sps:$4 sm:$0xff]   ;;  %v8043_v8 = vld [vmem:[%s12180_s7 + $0x3a4] ss:$16 sps:$4 sm:$0xff]  }
 0x714   :  { %v5938_v35 = vsel %vm1477_vm3, %v5812_v4, %v5817_v18  ;;  %v8038_v4 = vld [vmem:[%s12180_s7 + $0x388] ss:$16 sps:$4 sm:$0xff]   ;;  %v8046_v18 = vld [vmem:[%s12180_s7 + $0x3ac] ss:$16 sps:$4 sm:$0xff]  }
 0x715   :  { %6966 = vmatprep.mubr.bf16.mxu1 %v5938_v35  ;;  %7089 = vmatprep.mubr.bf16.mxu0 %v5938_v35  ;;  %v8049_v35 = vld [vmem:[%s12180_s7 + $0x3c4] ss:$16 sps:$4 sm:$0xff]  }
 0x716   :  { %6967 = vmatmul.mubr.bf16.vlgmr.msra.gmra.mrb[32].mxu1 %v5934_v58  ;;  %7090 = vmatmul.mubr.bf16.vlgmr.msra.gmra.mrb[32].mxu0 %v5934_v58  ;;  %v8050_v58 = vld [vmem:[%s12180_s7 + $0x3c8] ss:$16 sps:$4 sm:$0xff]  }
 0x717   :  { %6976 = vmatpush1.bf16.msra.mxu1 %v7963_v32  ;;  %7099 = vmatpush1.bf16.msra.mxu0 %v7966_v15  ;;  %v8041_v32 = vld [vmem:[%s12180_s7 + $0x3a0] ss:$16 sps:$4 sm:$0xff]   ;;  %v8044_v15 = vld [vmem:[%s12180_s7 + $0x3a8] ss:$16 sps:$4 sm:$0xff]  }
 0x718   :  { %v5893_v28 = vpop.permute.xlu0 %5892  ;;  %6977 = vmatprep.subr.bf16.mxu1 %v7971_v57  ;;  %7100 = vmatprep.subr.bf16.mxu0 %v7974_v55  ;;  %v8052_v57 = vld [vmem:[%s12180_s7 + $0x3cc] ss:$16 sps:$4 sm:$0xff]   ;;  %v8047_v55 = vld [vmem:[%s12180_s7 + $0x3c0] ss:$16 sps:$4 sm:$0xff]  }
 0x719   :  { %v5946_v9 = vsel %vm1477_vm3, %v5888_v48, %v5893_v28  ;;  %v8058_v48 = vld [vmem:[%s12180_s7 + $0x3ec] ss:$16 sps:$4 sm:$0xff]   ;;  %v8056_v28 = vld [vmem:[%s12180_s7 + $0x3e8] ss:$16 sps:$4 sm:$0xff]  }
 0x71a   :  { %7007 = vmatprep.mubr.bf16.mxu1 %v5946_v9  ;;  %7130 = vmatprep.mubr.bf16.mxu0 %v5946_v9  ;;  %v5855_v9 = vpop.permute.xlu1 %5854 }
 0x71b   :  { %6978 = vmatpush1.bf16.msra.mxu1 %v7969_v54  ;;  %7101 = vmatpush1.bf16.msra.mxu0 %v7972_v49  ;;  %v8055_v54 = vld [vmem:[%s12180_s7 + $0x3e4] ss:$16 sps:$4 sm:$0xff]   ;;  %v8053_v49 = vld [vmem:[%s12180_s7 + $0x3e0] ss:$16 sps:$4 sm:$0xff]  }
 0x71c   :  { %6979 = vmatprep.subr.bf16.mxu1 %v7977_v12  ;;  %7102 = vmatprep.subr.bf16.mxu0 %v7980_v41  ;;  %v8061_v12 = vld [vmem:[%s12180_s7 + $0x404] ss:$16 sps:$4 sm:$0xff]   ;;  %v8064_v41 = vld [vmem:[%s12180_s7 + $0x40c] ss:$16 sps:$4 sm:$0xff]  }
 0x71f   :  { %6980 = vmatpush1.bf16.msra.mxu1 %v7975_v50  ;;  %7103 = vmatpush1.bf16.msra.mxu0 %v7978_v5  ;;  %v5850_v50 = vpack.c.b16 %v11848_v59, %v11848_v59  ;;  %v8059_v5 = vld [vmem:[%s12180_s7 + $0x400] ss:$16 sps:$4 sm:$0xff]   ;;  %v8070_v59 = vld [vmem:[%s12180_s7 + $0x42c] ss:$16 sps:$4 sm:$0xff]  }
 0x720   :  { %6981 = vmatprep.subr.bf16.mxu1 %v7983_v11  ;;  %7104 = vmatprep.subr.bf16.mxu0 %v7986_v51  ;;  %v8062_v11 = vld [vmem:[%s12180_s7 + $0x408] ss:$16 sps:$4 sm:$0xff]   ;;  %v8067_v51 = vld [vmem:[%s12180_s7 + $0x424] ss:$16 sps:$4 sm:$0xff]  }
 0x723   :  { %6982 = vmatpush1.bf16.msra.mxu1 %v7981_v3  ;;  %7105 = vmatpush1.bf16.msra.mxu0 %v7984_v40  ;;  %v5942_v3 = vsel %vm1477_vm3, %v5850_v50, %v5855_v9  ;;  %v8065_v40 = vld [vmem:[%s12180_s7 + $0x420] ss:$16 sps:$4 sm:$0xff]  }
 0x724   :  { %6983 = vmatprep.subr.bf16.mxu1 %v7989_v36  ;;  %7106 = vmatprep.subr.bf16.mxu0 %v7992_v39  ;;  %v8068_v36 = vld [vmem:[%s12180_s7 + $0x428] ss:$16 sps:$4 sm:$0xff]   ;;  %v8073_v39 = vld [vmem:[%s12180_s7 + $0x444] ss:$16 sps:$4 sm:$0xff]  }
 0x727   :  { %6984 = vmatpush1.bf16.msra.mxu1 %v7987_v43  ;;  %7107 = vmatpush1.bf16.msra.mxu0 %v7990_v53  ;;  %v8076_v43 = vld [vmem:[%s12180_s7 + $0x44c] ss:$16 sps:$4 sm:$0xff]   ;;  %v8071_v53 = vld [vmem:[%s12180_s7 + $0x440] ss:$16 sps:$4 sm:$0xff]  }
 0x728   :  { %6985 = vmatprep.subr.bf16.mxu1 %v7995_v56  ;;  %7108 = vmatprep.subr.bf16.mxu0 %v7998_v60  ;;  %v8074_v56 = vld [vmem:[%s12180_s7 + $0x448] ss:$16 sps:$4 sm:$0xff]   ;;  %v8079_v60 = vld [vmem:[%s12180_s7 + $0x464] ss:$16 sps:$4 sm:$0xff]  }
 0x72b   :  { %6986 = vmatpush1.bf16.msra.mxu1 %v7993_v52  ;;  %7109 = vmatpush1.bf16.msra.mxu0 %v7996_v33  ;;  %v8077_v52 = vld [vmem:[%s12180_s7 + $0x460] ss:$16 sps:$4 sm:$0xff]   ;;  %v8080_v33 = vld [vmem:[%s12180_s7 + $0x468] ss:$16 sps:$4 sm:$0xff]  }
 0x72c   :  { %6987 = vmatprep.subr.bf16.mxu1 %v8001_v37  ;;  %7110 = vmatprep.subr.bf16.mxu0 %v8004_v1  ;;  %v8085_v37 = vld [vmem:[%s12180_s7 + $0x484] ss:$16 sps:$4 sm:$0xff]   ;;  %v8088_v1 = vld [vmem:[%s12180_s7 + $0x48c] ss:$16 sps:$4 sm:$0xff]  }
 0x72f   :  { %6988 = vmatpush1.bf16.msra.mxu1 %v7999_v62  ;;  %7111 = vmatpush1.bf16.msra.mxu0 %v8002_v0  ;;  %v8083_v62 = vld [vmem:[%s12180_s7 + $0x480] ss:$16 sps:$4 sm:$0xff]   ;;  %v8086_v0 = vld [vmem:[%s12180_s7 + $0x488] ss:$16 sps:$4 sm:$0xff]  }
 0x730   :  { %6989 = vmatprep.subr.bf16.mxu1 %v8007_v25  ;;  %7112 = vmatprep.subr.bf16.mxu0 %v8010_v38  ;;  %v8091_v25 = vld [vmem:[%s12180_s7 + $0x4a4] ss:$16 sps:$4 sm:$0xff]   ;;  %v8094_v38 = vld [vmem:[%s12180_s7 + $0x4ac] ss:$16 sps:$4 sm:$0xff]  }
 0x733   :  { %6990 = vmatpush1.bf16.msra.mxu1 %v8005_v44  ;;  %7113 = vmatpush1.bf16.msra.mxu0 %v8008_v34  ;;  %v8089_v44 = vld [vmem:[%s12180_s7 + $0x4a0] ss:$16 sps:$4 sm:$0xff]   ;;  %v8092_v34 = vld [vmem:[%s12180_s7 + $0x4a8] ss:$16 sps:$4 sm:$0xff]  }
 0x734   :  { %6991 = vmatprep.subr.bf16.mxu1 %v8013_v2  ;;  %7114 = vmatprep.subr.bf16.mxu0 %v8016_v21  ;;  %v8097_v2 = vld [vmem:[%s12180_s7 + $0x4c4] ss:$16 sps:$4 sm:$0xff]   ;;  %v8100_v21 = vld [vmem:[%s12180_s7 + $0x4cc] ss:$16 sps:$4 sm:$0xff]  }
 0x737   :  { %6992 = vmatpush1.bf16.msra.mxu1 %v8011_v24  ;;  %7115 = vmatpush1.bf16.msra.mxu0 %v8014_v61  ;;  %v8095_v24 = vld [vmem:[%s12180_s7 + $0x4c0] ss:$16 sps:$4 sm:$0xff]   ;;  %v8098_v61 = vld [vmem:[%s12180_s7 + $0x4c8] ss:$16 sps:$4 sm:$0xff]  }
 0x738   :  { %6993 = vmatprep.subr.bf16.mxu1 %v8019_v13  ;;  %7116 = vmatprep.subr.bf16.mxu0 %v8022_v6  ;;  %v8103_v13 = vld [vmem:[%s12180_s7 + $0x4e4] ss:$16 sps:$4 sm:$0xff]   ;;  %v8106_v6 = vld [vmem:[%s12180_s7 + $0x4ec] ss:$16 sps:$4 sm:$0xff]  }
 0x73b   :  { %6994 = vmatpush1.bf16.msra.mxu1 %v8017_v19  ;;  %7117 = vmatpush1.bf16.msra.mxu0 %v8020_v22  ;;  %v8101_v19 = vld [vmem:[%s12180_s7 + $0x4e0] ss:$16 sps:$4 sm:$0xff]   ;;  %v8104_v22 = vld [vmem:[%s12180_s7 + $0x4e8] ss:$16 sps:$4 sm:$0xff]  }
 0x73c   :  { %6995 = vmatprep.subr.bf16.mxu1 %v8025_v47  ;;  %7118 = vmatprep.subr.bf16.mxu0 %v8028_v10  ;;  %v5931_v47 = vpop.permute.xlu0 %5930  ;;  %v5926_v10 = vpack.c.b16 %v11856_v63, %v11856_v63 }
 0x73f   :  { %6996 = vmatpush1.bf16.msra.mxu1 %v8023_v30  ;;  %7119 = vmatpush1.bf16.msra.mxu0 %v8026_v14  ;;  %v5950_v30 = vsel %vm1477_vm3, %v5926_v10, %v5931_v47  ;;  %v6112_v14 = vld [vmem:[%s12181_s8] sm:$0xf] }
 0x740   :  { %6997 = vmatprep.subr.bf16.mxu1 %v8031_v17  ;;  %7120 = vmatprep.subr.bf16.mxu0 %v8034_v46  ;;  %v6117_v17 = vrot.slane %v6112_v14, %v11048_v29  ;;  %v6125_v46 = vrot.slane %v6112_v14, %v11066_v16 }
 0x743   :  { %6998 = vmatpush1.bf16.msra.mxu1 %v8029_v45  ;;  %7121 = vmatpush1.bf16.msra.mxu0 %v8032_v27  ;;  %v6121_v45 = vrot.slane %v6112_v14, %v11063_v7  ;;  %v6129_v27 = vrot.slane %v6112_v14, %v11069_v23  ;;  %v12290_v23 = vld [vmem:[#allocation6_spill] sm:$0xff] }
 0x744   :  { %6999 = vmatprep.subr.bf16.mxu1 %v8037_v42  ;;  %7122 = vmatprep.subr.bf16.mxu0 %v8040_v31 }
 0x747   :  { %7000 = vmatpush1.bf16.msra.mxu1 %v8035_v20  ;;  %7123 = vmatpush1.bf16.msra.mxu0 %v8038_v4 }
 0x748   :  { %7001 = vmatprep.subr.bf16.mxu1 %v8043_v8  ;;  %7124 = vmatprep.subr.bf16.mxu0 %v8046_v18 }
 0x74b   :  { %7002 = vmatpush1.bf16.msra.mxu1 %v8041_v32  ;;  %7125 = vmatpush1.bf16.msra.mxu0 %v8044_v15 }
 0x74c   :  { %7003 = vmatprep.subr.bf16.mxu1 %v8049_v35  ;;  %7126 = vmatprep.subr.bf16.mxu0 %v8052_v57 }
 0x74f   :  { %7004 = vmatpush1.bf16.msra.mxu1 %v8047_v55  ;;  %7127 = vmatpush1.bf16.msra.mxu0 %v8050_v58 }
 0x750   :  { %7005 = vmatprep.subr.bf16.mxu1 %v8055_v54  ;;  %7128 = vmatprep.subr.bf16.mxu0 %v8058_v48 }
 0x753   :  { %7006 = vmatpush1.bf16.msra.mxu1 %v8053_v49  ;;  %7129 = vmatpush1.bf16.msra.mxu0 %v8056_v28 }
 0x754   :  { %7016 = vmatprep.subr.bf16.mxu1 %v8061_v12  ;;  %7139 = vmatprep.subr.bf16.mxu0 %v8064_v41 }
 0x756   :  { %7008 = vmatmul.mubr.bf16.vlgmr.msra.gmra.mrb[32].mxu1 %v5942_v3  ;;  %7131 = vmatmul.mubr.bf16.vlgmr.msra.gmra.mrb[32].mxu0 %v5942_v3 }
 0x757   :  { %7017 = vmatpush1.bf16.msra.mxu1 %v8059_v5  ;;  %7140 = vmatpush1.bf16.msra.mxu0 %v8062_v11 }
 0x758   :  { %7018 = vmatprep.subr.bf16.mxu1 %v8067_v51  ;;  %7141 = vmatprep.subr.bf16.mxu0 %v8070_v59 }
 0x759   :  { %7048 = vmatprep.mubr.bf16.mxu1 %v8204_v26  ;;  %7171 = vmatprep.mubr.bf16.mxu0 %v8204_v26  ;;  %v8082_v26 = vld [vmem:[%s12180_s7 + $0x46c] ss:$16 sps:$4 sm:$0xff]   ;;  %s8205_s7 = smov [#allocation2]  }
 0x75a   :  { %s7213_s8 = sshll.u32 %s8205_s7, 4  ;;  %s7214_s8 = int_to_ptr.vmem [resolvable:$true] %s7213_s8 }
 0x75b   :  { %7019 = vmatpush1.bf16.msra.mxu1 %v8065_v40  ;;  %7142 = vmatpush1.bf16.msra.mxu0 %v8068_v36  ;;  %s8174_s27 = scalar_lea.vmem %s7214_s8, 128  ;;  %p8179_p1 = scmp.lt.s32.totalorder %s7214_s8, %s7214_s8 }
 0x75c   :  { %7020 = vmatprep.subr.bf16.mxu1 %v8073_v39  ;;  %7143 = vmatprep.subr.bf16.mxu0 %v8076_v43  ;;  %p8175_p0 = scmp.ne.s32.totalorder %s7214_s8, %s8174_s27  ;;  %p8180_p2 = scmp.lt.s32.totalorder %s8174_s27, %s8174_s27 }
 0x75e   :  { %p8181_p3 = por %p8180_p2, %p8179_p1 }
 0x75f   :  { %7021 = vmatpush1.bf16.msra.mxu1 %v8071_v53  ;;  %7144 = vmatpush1.bf16.msra.mxu0 %v8074_v56 }
 0x760   :  { %7022 = vmatprep.subr.bf16.mxu1 %v8079_v60  ;;  %7145 = vmatprep.subr.bf16.mxu0 %v8082_v26  ;;  %p8182_p4 = pnand %p8181_p3, %p8175_p0 }
 0x763   :  { %7023 = vmatpush1.bf16.msra.mxu1 %v8077_v52  ;;  %7146 = vmatpush1.bf16.msra.mxu0 %v8080_v33 }
 0x764   :  { %7024 = vmatprep.subr.bf16.mxu1 %v8085_v37  ;;  %7147 = vmatprep.subr.bf16.mxu0 %v8088_v1 }
 0x767   :  { %7025 = vmatpush1.bf16.msra.mxu1 %v8083_v62  ;;  %7148 = vmatpush1.bf16.msra.mxu0 %v8086_v0 }
 0x768   :  { %7026 = vmatprep.subr.bf16.mxu1 %v8091_v25  ;;  %7149 = vmatprep.subr.bf16.mxu0 %v8094_v38 }
 0x76b   :  { %7027 = vmatpush1.bf16.msra.mxu1 %v8089_v44  ;;  %7150 = vmatpush1.bf16.msra.mxu0 %v8092_v34 }
 0x76c   :  { %7028 = vmatprep.subr.bf16.mxu1 %v8097_v2  ;;  %7151 = vmatprep.subr.bf16.mxu0 %v8100_v21 }
 0x76f   :  { %7029 = vmatpush1.bf16.msra.mxu1 %v8095_v24  ;;  %7152 = vmatpush1.bf16.msra.mxu0 %v8098_v61 }
 0x770   :  { %7030 = vmatprep.subr.bf16.mxu1 %v8103_v13  ;;  %7153 = vmatprep.subr.bf16.mxu0 %v8106_v6 }
 0x773   :  { %7031 = vmatpush1.bf16.msra.mxu1 %v8101_v19  ;;  %7154 = vmatpush1.bf16.msra.mxu0 %v8104_v22 }
 0x776   :  { %7049 = vmatmul.mubr.bf16.vlgmr.msra.gmra.mrb[32].mxu1 %v5950_v30  ;;  %7172 = vmatmul.mubr.bf16.vlgmr.msra.gmra.mrb[32].mxu0 %v5950_v30 }
 0x849   :  { %v7050_v42 = vpop.f32.mrb[32].mxu1  ;;  %v7173_v63 = vpop.f32.mrb[32].mxu0 }
 0x84a   :  { %v7699_v31 = vadd.f32 %v7050_v42, %v6117_v17  ;;  %v7701_v20 = vadd.f32 %v7173_v63, %v6125_v46  ;;  %v7052_v4 = vpop.f32.mrb[33].mxu1  ;;  %v7175_v8 = vpop.f32.mrb[33].mxu0 }
 0x84b   :  { %v7700_v18 = vadd.f32 %v7052_v4, %v6121_v45  ;;  %v7702_v32 = vadd.f32 %v7175_v8, %v6129_v27  ;;  %v7054_v15 = vpop.f32.mrb[34].mxu1  ;;  %v7177_v35 = vpop.f32.mrb[34].mxu0 }
 0x84c   :  { %v7180_v57 = vmax.f32 %v7699_v31, 0.0  ;;  %v7182_v55 = vmax.f32 %v7701_v20, 0.0  ;;  %v7055_v58 = vpop.f32.mrb[35].mxu1  ;;  %v7178_v29 = vpop.f32.mrb[35].mxu0 }
 0x84d   :  { %v7181_v54 = vmax.f32 %v7700_v18, 0.0  ;;  %v7183_v16 = vmax.f32 %v7702_v32, 0.0 }
 0x84f   :  { %v7188_v48 = vcombine.low %v7180_v57, %v7181_v54  ;;  %v7189_v7 = vcombine.low %v7182_v55, %v7183_v16 }
 0x851   :  { %v7196_v49 = vrot.slane %v7188_v48, %v12290_v23  ;;  %v7203_v28 = vrot.slane %v7189_v7, %v12290_v23 }
 0x853   :  { %v7204_v12 = vcombine.low %v7196_v49, %v7203_v28 }
 0x855   :  { %7206 = vst [vmem:[#allocation2] sm:$0xff] %v7204_v12 }
 0x856   :  { %8185 = shalt.err (!%p8182_p4)
}
 0x857   :  { %s8186_s5 = scalar_lea.hbm %s12182_s9, 128 }
 0x858   :  { %p8187_p5 = scmp.ne.s32.totalorder %s12182_s9, %s8186_s5  ;;  %p8190_p6 = scmp.lt.u32.totalorder %s8186_s5, %s12182_s9 }
 0x85a   :  { %p8192_p7 = pnand %p8190_p6, %p8187_p5 }
 0x85c   :  { %8195 = shalt.err (!%p8192_p7)
}
 0x85d   :  { %7216 = dma.vmem_to_hbm [thread:$0]  %s7214_s8, 128, %s12182_s9, [#allocation3]  }
 0x85e   :  { %8196 = dma.done.wait [#allocation3], 128  }
 0x85f   :  { %8197 = vsyncadd [#allocation3], 4294967168 }
 0x860   :  { %7220 = vsyncpa [#allocation3], 1 }

</bundles_post_ra>
